<compile_context>
chip_gen: v7x
topology: tpu7x:2x2x1
jax: 0.10.0
libtpu: 0.0.40
codegen_flags: <defaults>
</compile_context>

<pallas_src>
import functools

import jax
import jax.numpy as jnp
from jax.experimental import pallas as pl
from jax.experimental.pallas import tpu as pltpu


# ----------------------------------------------------------------------------
# Pallas kernels
# ----------------------------------------------------------------------------
def _zr_gate_kernel(ah_ref, ax_ref, wh_ref, wx_ref, b_ref, h_ref,
                    z_ref, rh_ref, *, C):
    # [z | r] = sigmoid(Ah @ Wh + Ax @ Wx + b);  outputs z (f32) and r*h (bf16)
    y = jnp.dot(ah_ref[...], wh_ref[...], preferred_element_type=jnp.float32)
    y = y + jnp.dot(ax_ref[...], wx_ref[...], preferred_element_type=jnp.float32)
    g = jax.nn.sigmoid(y + b_ref[...])
    z = g[:, :C]
    r = g[:, C:]
    z_ref[...] = z.astype(z_ref.dtype)
    rh_ref[...] = (r * h_ref[...]).astype(rh_ref.dtype)


def _q_update_kernel(ah_ref, ax_ref, wh_ref, wx_ref, b_ref, z_ref, h_ref, o_ref):
    # q = tanh(Arh @ Wh + Ax @ Wx + b);  out = (1 - z) * h + z * q
    y = jnp.dot(ah_ref[...], wh_ref[...], preferred_element_type=jnp.float32)
    y = y + jnp.dot(ax_ref[...], wx_ref[...], preferred_element_type=jnp.float32)
    q = jnp.tanh(y + b_ref[...])
    z = z_ref[...]
    o_ref[...] = ((1.0 - z) * h_ref[...] + z * q).astype(o_ref.dtype)


def _conv_mm_kernel(a_ref, w_ref, b_ref, o_ref):
    # plain conv-as-matmul + bias (activation handled downstream by GN kernel)
    y = jnp.dot(a_ref[...], w_ref[...], preferred_element_type=jnp.float32)
    o_ref[...] = (y + b_ref[...]).astype(o_ref.dtype)


def _gn_pool_kernel(x_ref, g_ref, b_ref, a_ref, at_ref, sel_ref, o_ref,
                    *, n_per_group, eps, relu):
    # GroupNorm (per-sample, per-group) [+ ReLU] + 2x2 max-pool, all fused.
    # Group reductions and the pooling gather are done with small matmuls
    # (MXU-friendly, no in-kernel reshapes / strided accesses).
    x = x_ref[0].astype(jnp.float32)                 # (HW, C)
    A = a_ref[...]                                   # (C, G)
    At = at_ref[...]                                 # (G, C)
    s1 = jnp.sum(x, axis=0, keepdims=True)           # (1, C)
    s2 = jnp.sum(x * x, axis=0, keepdims=True)       # (1, C)
    gsum = jnp.dot(s1, A, preferred_element_type=jnp.float32)   # (1, G)
    gsq = jnp.dot(s2, A, preferred_element_type=jnp.float32)    # (1, G)
    gmean = gsum / n_per_group
    gvar = jnp.maximum(gsq / n_per_group - gmean * gmean, 0.0)  # clamp >= 0
    mean_c = jnp.dot(gmean, At, preferred_element_type=jnp.float32)  # (1, C)
    var_c = jnp.dot(gvar, At, preferred_element_type=jnp.float32)    # (1, C)
    inv = jax.lax.rsqrt(var_c + eps)
    y = (x - mean_c) * inv * g_ref[...] + b_ref[...]
    if relu:
        y = jnp.maximum(y, 0.0)
    # 2x2 max-pool: each sel_ref[t] is a 0/1 selection matrix (HW/4, HW) that
    # gathers one of the 4 pooling taps exactly (1.0 * value), then max.
    p0 = jnp.dot(sel_ref[0], y, preferred_element_type=jnp.float32)
    p1 = jnp.dot(sel_ref[1], y, preferred_element_type=jnp.float32)
    p2 = jnp.dot(sel_ref[2], y, preferred_element_type=jnp.float32)
    p3 = jnp.dot(sel_ref[3], y, preferred_element_type=jnp.float32)
    o_ref[0] = jnp.maximum(jnp.maximum(p0, p1), jnp.maximum(p2, p3)).astype(o_ref.dtype)


# ----------------------------------------------------------------------------
# Pallas wrappers
# ----------------------------------------------------------------------------
def _pick_tm(M):
    # Prefer a tile that leaves grid >= 2 (keeps both v7x TensorCores busy).
    for tm in (256, 128, 64, 32, 16, 8):
        if M % tm == 0 and M // tm >= 2:
            return tm
    for tm in (256, 128, 64, 32, 16, 8):
        if M % tm == 0:
            return tm
    return M


def zr_gate(ah, ax, wh, wx, b, hflat):
    M, Kh = ah.shape
    Kx = ax.shape[1]
    C = hflat.shape[1]
    tm = _pick_tm(M)
    z, rh = pl.pallas_call(
        functools.partial(_zr_gate_kernel, C=C),
        out_shape=(jax.ShapeDtypeStruct((M, C), jnp.float32),
                   jax.ShapeDtypeStruct((M, C), jnp.bfloat16)),
        grid=(M // tm,),
        in_specs=[
            pl.BlockSpec((tm, Kh), lambda i: (i, 0)),
            pl.BlockSpec((tm, Kx), lambda i: (i, 0)),
            pl.BlockSpec((Kh, 2 * C), lambda i: (0, 0)),
            pl.BlockSpec((Kx, 2 * C), lambda i: (0, 0)),
            pl.BlockSpec((1, 2 * C), lambda i: (0, 0)),
            pl.BlockSpec((tm, C), lambda i: (i, 0)),
        ],
        out_specs=[
            pl.BlockSpec((tm, C), lambda i: (i, 0)),
            pl.BlockSpec((tm, C), lambda i: (i, 0)),
        ],
        compiler_params=pltpu.CompilerParams(dimension_semantics=("parallel",)),
    )(ah, ax, wh, wx, b, hflat)
    return z, rh


def q_update(ah, ax, wh, wx, b, z, hflat):
    M, Kh = ah.shape
    Kx = ax.shape[1]
    C = hflat.shape[1]
    tm = _pick_tm(M)
    return pl.pallas_call(
        _q_update_kernel,
        out_shape=jax.ShapeDtypeStruct((M, C), jnp.float32),
        grid=(M // tm,),
        in_specs=[
            pl.BlockSpec((tm, Kh), lambda i: (i, 0)),
            pl.BlockSpec((tm, Kx), lambda i: (i, 0)),
            pl.BlockSpec((Kh, C), lambda i: (0, 0)),
            pl.BlockSpec((Kx, C), lambda i: (0, 0)),
            pl.BlockSpec((1, C), lambda i: (0, 0)),
            pl.BlockSpec((tm, C), lambda i: (i, 0)),
            pl.BlockSpec((tm, C), lambda i: (i, 0)),
        ],
        out_specs=pl.BlockSpec((tm, C), lambda i: (i, 0)),
        compiler_params=pltpu.CompilerParams(dimension_semantics=("parallel",)),
    )(ah, ax, wh, wx, b, z, hflat)


def conv_mm(a, w, b):
    M, K = a.shape
    N = w.shape[1]
    tm = _pick_tm(M)
    return pl.pallas_call(
        _conv_mm_kernel,
        out_shape=jax.ShapeDtypeStruct((M, N), jnp.float32),
        grid=(M // tm,),
        in_specs=[
            pl.BlockSpec((tm, K), lambda i: (i, 0)),
            pl.BlockSpec((K, N), lambda i: (0, 0)),
            pl.BlockSpec((1, N), lambda i: (0, 0)),
        ],
        out_specs=pl.BlockSpec((tm, N), lambda i: (i, 0)),
        compiler_params=pltpu.CompilerParams(dimension_semantics=("parallel",)),
    )(a, w, b)


def _pool_select_mats(H, W):
    # 4 exact 0/1 selection matrices (HW/4, HW), one per 2x2 pooling tap.
    Ho, Wo = H // 2, W // 2
    pi = jnp.arange(Ho * Wo) // Wo
    pj = jnp.arange(Ho * Wo) % Wo
    cols = jnp.arange(H * W)[None, :]
    mats = []
    for di in range(2):
        for dj in range(2):
            src = (2 * pi + di) * W + (2 * pj + dj)
            mats.append((src[:, None] == cols).astype(jnp.float32))
    return jnp.stack(mats, axis=0)                   # (4, HW/4, HW)


def groupnorm_pool(x, gamma, beta, num_groups, relu, eps=1e-5,
                   out_dtype=jnp.bfloat16):
    # x: [B, H, W, C] f32 -> GN [+ReLU] + 2x2 maxpool -> [B, H/2, W/2, C]
    B, H, W, C = x.shape
    assert H % 2 == 0 and W % 2 == 0
    G = num_groups
    HW, HWp = H * W, (H // 2) * (W // 2)
    xf = x.reshape(B, HW, C)
    assign = (jnp.arange(C)[:, None] // (C // G) == jnp.arange(G)[None, :]).astype(
        jnp.float32)                                 # (C, G)
    assign_t = assign.T                              # (G, C)
    sel = _pool_select_mats(H, W)                    # (4, HW/4, HW)
    kernel = functools.partial(_gn_pool_kernel, n_per_group=float(HW * (C // G)),
                               eps=eps, relu=relu)
    out = pl.pallas_call(
        kernel,
        out_shape=jax.ShapeDtypeStruct((B, HWp, C), out_dtype),
        grid=(B,),
        in_specs=[
            pl.BlockSpec((1, HW, C), lambda b: (b, 0, 0)),
            pl.BlockSpec((1, C), lambda b: (0, 0)),
            pl.BlockSpec((1, C), lambda b: (0, 0)),
            pl.BlockSpec((C, G), lambda b: (0, 0)),
            pl.BlockSpec((G, C), lambda b: (0, 0)),
            pl.BlockSpec((4, HWp, HW), lambda b: (0, 0, 0)),
        ],
        out_specs=pl.BlockSpec((1, HWp, C), lambda b: (b, 0, 0)),
        compiler_params=pltpu.CompilerParams(dimension_semantics=("parallel",)),
    )(xf, gamma, beta, assign, assign_t, sel)
    return out.reshape(B, H // 2, W // 2, C)


# ----------------------------------------------------------------------------
# im2col glue (plain JAX, bf16) + weight layout converters
# ----------------------------------------------------------------------------
def im2col_1x5(x):
    B, H, W, C = x.shape
    xp = jnp.pad(x, ((0, 0), (0, 0), (2, 2), (0, 0)))
    cols = [xp[:, :, k:k + W, :] for k in range(5)]
    return jnp.concatenate(cols, axis=-1).reshape(B * H * W, 5 * C)


def im2col_5x1(x):
    B, H, W, C = x.shape
    xp = jnp.pad(x, ((0, 0), (2, 2), (0, 0), (0, 0)))
    cols = [xp[:, k:k + H, :, :] for k in range(5)]
    return jnp.concatenate(cols, axis=-1).reshape(B * H * W, 5 * C)


def im2col_3x3(x):
    B, H, W, C = x.shape
    xp = jnp.pad(x, ((0, 0), (1, 1), (1, 1), (0, 0)))
    cols = [xp[:, kh:kh + H, kw:kw + W, :] for kh in range(3) for kw in range(3)]
    return jnp.concatenate(cols, axis=-1).reshape(B * H * W, 9 * C)


def conv_w_split_1xk(w, ch):   # torch (O, Cin, 1, Kw) -> (Kw*ch, O), (Kw*(Cin-ch), O)
    O, Cin, _, Kw = w.shape
    wh = jnp.transpose(w[:, :ch, 0, :], (2, 1, 0)).reshape(Kw * ch, O)
    wx = jnp.transpose(w[:, ch:, 0, :], (2, 1, 0)).reshape(Kw * (Cin - ch), O)
    return wh, wx


def conv_w_split_kx1(w, ch):   # torch (O, Cin, Kh, 1) -> (Kh*ch, O), (Kh*(Cin-ch), O)
    O, Cin, Kh, _ = w.shape
    wh = jnp.transpose(w[:, :ch, :, 0], (2, 1, 0)).reshape(Kh * ch, O)
    wx = jnp.transpose(w[:, ch:, :, 0], (2, 1, 0)).reshape(Kh * (Cin - ch), O)
    return wh, wx


def conv_w_to_mat(w):          # torch (O, Cin, Kh, Kw) -> (Kh*Kw*Cin, O)
    O, Cin, Kh, Kw = w.shape
    return jnp.transpose(w, (2, 3, 1, 0)).reshape(Kh * Kw * Cin, O)


# ----------------------------------------------------------------------------
# Parameter init (deterministic, synthetic; torch Conv2d weight layout)
# ----------------------------------------------------------------------------
def init_params(key, hidden_dim=128, input_dim=128):
    Ch = hidden_dim
    Cin = hidden_dim + input_dim
    keys = iter(jax.random.split(key, 64))

    def rnd(shape, scale=0.02):
        return jax.random.normal(next(keys), shape, jnp.float32) * scale

    p = {}
    for tag, (kh, kw), split in (("1", (1, 5), conv_w_split_1xk),
                                 ("2", (5, 1), conv_w_split_kx1)):
        wz, wr, wq = (rnd((Ch, Cin, kh, kw)) for _ in range(3))
        bz, br, bq = (rnd((1, Ch), 0.01) for _ in range(3))
        wz_h, wz_x = split(wz, Ch)
        wr_h, wr_x = split(wr, Ch)
        wq_h, wq_x = split(wq, Ch)
        p[f"wzr_h{tag}"] = jnp.concatenate([wz_h, wr_h], axis=1).astype(jnp.bfloat16)
        p[f"wzr_x{tag}"] = jnp.concatenate([wz_x, wr_x], axis=1).astype(jnp.bfloat16)
        p[f"bzr{tag}"] = jnp.concatenate([bz, br], axis=1)
        p[f"wq_h{tag}"] = wq_h.astype(jnp.bfloat16)
        p[f"wq_x{tag}"] = wq_x.astype(jnp.bfloat16)
        p[f"bq{tag}"] = bq
    # neck: 3x [conv3x3 -> GroupNorm -> (ReLU only on block 0) -> MaxPool2]
    for i in range(3):
        p[f"neck_w{i}"] = conv_w_to_mat(rnd((Ch, Ch, 3, 3))).astype(jnp.bfloat16)
        p[f"neck_b{i}"] = rnd((1, Ch), 0.01)
        p[f"neck_g{i}"] = jnp.ones((1, Ch), jnp.float32)
        p[f"neck_beta{i}"] = jnp.zeros((1, Ch), jnp.float32)
    # head1: conv3x3 Ch -> 2 (plain JAX; tiny)
    p["h1_w"] = conv_w_to_mat(rnd((2, Ch, 3, 3)))
    p["h1_b"] = rnd((1, 2), 0.01)
    # head2: conv3x3 Ch->Ch, GroupNorm, MaxPool2, conv3x3 Ch->2
    p["h2_w0"] = conv_w_to_mat(rnd((Ch, Ch, 3, 3))).astype(jnp.bfloat16)
    p["h2_b0"] = rnd((1, Ch), 0.01)
    p["h2_g"] = jnp.ones((1, Ch), jnp.float32)
    p["h2_beta"] = jnp.zeros((1, Ch), jnp.float32)
    p["h2_w1"] = conv_w_to_mat(rnd((2, Ch, 3, 3)))
    p["h2_b1"] = rnd((1, 2), 0.01)
    return p


# ----------------------------------------------------------------------------
# Forward pass (SepConvGRU2.forward): returns (h, delta_64, delta_32)
# ----------------------------------------------------------------------------
def sepconvgru2_forward(params, h_nchw, x_nchw):
    h = jnp.transpose(h_nchw, (0, 2, 3, 1)).astype(jnp.float32)   # NHWC
    x = jnp.transpose(x_nchw, (0, 2, 3, 1)).astype(jnp.float32)   # NHWC
    B, H, W, Ch = h.shape
    M = B * H * W
    x_bf = x.astype(jnp.bfloat16)

    def gru_half(h, im2col, tag):
        hflat = h.reshape(M, Ch)
        Ax = im2col(x_bf)                          # x-part im2col: shared by z|r and q
        Ah = im2col(h.astype(jnp.bfloat16))
        z, rh = zr_gate(Ah, Ax, params[f"wzr_h{tag}"], params[f"wzr_x{tag}"],
                        params[f"bzr{tag}"], hflat)
        Arh = im2col(rh.reshape(B, H, W, Ch))      # rh already bf16
        hnew = q_update(Arh, Ax, params[f"wq_h{tag}"], params[f"wq_x{tag}"],
                        params[f"bq{tag}"], z, hflat)
        return hnew.reshape(B, H, W, Ch)

    h = gru_half(h, im2col_1x5, "1")               # horizontal (1,5) GRU
    h = gru_half(h, im2col_5x1, "2")               # vertical   (5,1) GRU

    # neck: conv3x3 -> GN(+ReLU only in block 0) -> maxpool2, three times
    G = Ch // 8
    n = h.astype(jnp.bfloat16)
    for i in range(3):
        Bn, Hn, Wn, _ = n.shape
        A = im2col_3x3(n)
        y = conv_mm(A, params[f"neck_w{i}"], params[f"neck_b{i}"]).reshape(Bn, Hn, Wn, Ch)
        n = groupnorm_pool(y, params[f"neck_g{i}"], params[f"neck_beta{i}"],
                           num_groups=G, relu=(i == 0))
    Bn, Hn, Wn, _ = n.shape                        # (B, H/8, W/8, Ch) bf16

    # head1: conv3x3 Ch -> 2, flatten(1) in NCHW (c, h, w) order  (plain JAX)
    A1 = im2col_3x3(n).astype(jnp.float32)
    d64 = (jnp.dot(A1, params["h1_w"]) + params["h1_b"]).reshape(Bn, Hn, Wn, 2)
    delta_64 = jnp.transpose(d64, (0, 3, 1, 2)).reshape(Bn, -1)

    # head2: conv3x3 Ch->Ch, GN (no ReLU), maxpool2, conv3x3 Ch->2
    A2 = im2col_3x3(n)
    y2 = conv_mm(A2, params["h2_w0"], params["h2_b0"]).reshape(Bn, Hn, Wn, Ch)
    n2 = groupnorm_pool(y2, params["h2_g"], params["h2_beta"], num_groups=G, relu=False)
    B2, H2, W2, _ = n2.shape
    A3 = im2col_3x3(n2).astype(jnp.float32)
    d32 = (jnp.dot(A3, params["h2_w1"]) + params["h2_b1"]).reshape(B2, H2, W2, 2)
    delta_32 = jnp.transpose(d32, (0, 3, 1, 2))    # NCHW (B, 2, H/16, W/16)

    h_out = jnp.transpose(h, (0, 3, 1, 2))         # back to NCHW
    return h_out, delta_64, delta_32


# ----------------------------------------------------------------------------
if __name__ == "__main__":
    B, H, W = 2, 16, 16
    hidden_dim, input_dim = 128, 128               # small but lane-dense config

    key = jax.random.PRNGKey(0)
    k_p, k_h, k_x = jax.random.split(key, 3)
    params = init_params(k_p, hidden_dim, input_dim)

    h0 = jax.random.normal(k_h, (B, hidden_dim, H, W), jnp.float32)
    x0 = jax.random.normal(k_x, (B, input_dim, H, W), jnp.float32)

    fwd = jax.jit(sepconvgru2_forward)
    h_out, delta_64, delta_32 = fwd(params, h0, x0)
    h_out, delta_64, delta_32 = jax.block_until_ready((h_out, delta_64, delta_32))

    assert h_out.shape == (B, hidden_dim, H, W), h_out.shape
    assert delta_64.shape == (B, 2 * (H // 8) * (W // 8)), delta_64.shape
    assert delta_32.shape == (B, 2, H // 16, W // 16), delta_32.shape
    assert bool(jnp.all(jnp.isfinite(h_out)))
    assert bool(jnp.all(jnp.isfinite(delta_64)))
    assert bool(jnp.all(jnp.isfinite(delta_32)))
    print("KERNEL_OK")
</pallas_src>

<mosaic_0001>
module attributes {stable_mosaic.version = 11 : i64} {
  func.func @_zr_gate_kernel(%arg0: i32, %arg1: memref<256x640xbf16, #tpu.memory_space<vmem>>, %arg2: memref<256x640xbf16, #tpu.memory_space<vmem>>, %arg3: memref<640x256xbf16, #tpu.memory_space<vmem>>, %arg4: memref<640x256xbf16, #tpu.memory_space<vmem>>, %arg5: memref<1x256xf32, #tpu.memory_space<vmem>>, %arg6: memref<256x128xf32, #tpu.memory_space<vmem>>, %arg7: memref<256x128xf32, #tpu.memory_space<vmem>>, %arg8: memref<256x128xbf16, #tpu.memory_space<vmem>>) attributes {dimension_semantics = [#tpu.dimension_semantics<parallel>], iteration_bounds = array<i64: 2>, scalar_prefetch = 0 : i64, scratch_operands = 0 : i64, tpu.core_type = #tpu.core_type<tc>, window_params = [{transform_indices = @transform_0, window_bounds = array<i64: 256, 640>}, {transform_indices = @transform_1, window_bounds = array<i64: 256, 640>}, {pipeline_mode = #tpu.pipeline_mode<synchronous>, transform_indices = @transform_2, window_bounds = array<i64: 640, 256>}, {pipeline_mode = #tpu.pipeline_mode<synchronous>, transform_indices = @transform_3, window_bounds = array<i64: 640, 256>}, {pipeline_mode = #tpu.pipeline_mode<synchronous>, transform_indices = @transform_4, window_bounds = array<i64: 1, 256>}, {transform_indices = @transform_5, window_bounds = array<i64: 256, 128>}, {transform_indices = @transform_6, window_bounds = array<i64: 256, 128>}, {transform_indices = @transform_7, window_bounds = array<i64: 256, 128>}]} {
    %c0 = arith.constant 0 : index
    %c0_0 = arith.constant 0 : index
    %0 = vector.load %arg1[%c0, %c0_0] : memref<256x640xbf16, #tpu.memory_space<vmem>>, vector<256x640xbf16>
    %c0_1 = arith.constant 0 : index
    %c0_2 = arith.constant 0 : index
    %1 = vector.load %arg3[%c0_1, %c0_2] : memref<640x256xbf16, #tpu.memory_space<vmem>>, vector<640x256xbf16>
    %cst = arith.constant dense<0.000000e+00> : vector<256x256xf32>
    %2 = tpu.matmul %0, %1, %cst {dimension_numbers = #tpu.dot_dimension_numbers<[1], [0], [0], [1], [0, 0, 1, 1], [], []>} : vector<256x640xbf16>, vector<640x256xbf16>, vector<256x256xf32> -> vector<256x256xf32>
    %c0_3 = arith.constant 0 : index
    %c0_4 = arith.constant 0 : index
    %3 = vector.load %arg2[%c0_3, %c0_4] : memref<256x640xbf16, #tpu.memory_space<vmem>>, vector<256x640xbf16>
    %c0_5 = arith.constant 0 : index
    %c0_6 = arith.constant 0 : index
    %4 = vector.load %arg4[%c0_5, %c0_6] : memref<640x256xbf16, #tpu.memory_space<vmem>>, vector<640x256xbf16>
    %cst_7 = arith.constant dense<0.000000e+00> : vector<256x256xf32>
    %5 = tpu.matmul %3, %4, %cst_7 {dimension_numbers = #tpu.dot_dimension_numbers<[1], [0], [0], [1], [0, 0, 1, 1], [], []>} : vector<256x640xbf16>, vector<640x256xbf16>, vector<256x256xf32> -> vector<256x256xf32>
    %6 = arith.addf %2, %5 : vector<256x256xf32>
    %c0_8 = arith.constant 0 : index
    %c0_9 = arith.constant 0 : index
    %7 = vector.load %arg5[%c0_8, %c0_9] : memref<1x256xf32, #tpu.memory_space<vmem>>, vector<1x256xf32>
    %8 = vector.broadcast %7 : vector<1x256xf32> to vector<256x256xf32>
    %9 = arith.addf %6, %8 : vector<256x256xf32>
    %10 = arith.negf %9 : vector<256x256xf32>
    %11 = math.exp %10 : vector<256x256xf32>
    %cst_10 = arith.constant 1.000000e+00 : f32
    %12 = vector.broadcast %cst_10 : f32 to vector<256x256xf32>
    %13 = arith.addf %12, %11 : vector<256x256xf32>
    %14 = arith.divf %12, %13 : vector<256x256xf32>
    %15 = vector.extract_strided_slice %14 {offsets = [0, 0], sizes = [256, 128], strides = [1, 1]} : vector<256x256xf32> to vector<256x128xf32>
    %16 = vector.extract_strided_slice %14 {offsets = [0, 128], sizes = [256, 128], strides = [1, 1]} : vector<256x256xf32> to vector<256x128xf32>
    %c0_11 = arith.constant 0 : index
    %c0_12 = arith.constant 0 : index
    %17 = vector.load %arg7[%c0_11, %c0_12] : memref<256x128xf32, #tpu.memory_space<vmem>>, vector<256x128xf32>
    tpu.vector_store %arg7[%c0_11, %c0_12], %15 {strides = array<i32>} : memref<256x128xf32, #tpu.memory_space<vmem>>, vector<256x128xf32>,
    %c0_13 = arith.constant 0 : index
    %c0_14 = arith.constant 0 : index
    %18 = vector.load %arg6[%c0_13, %c0_14] : memref<256x128xf32, #tpu.memory_space<vmem>>, vector<256x128xf32>
    %19 = arith.mulf %16, %18 : vector<256x128xf32>
    %20 = arith.truncf %19 : vector<256x128xf32> to vector<256x128xbf16>
    %c0_15 = arith.constant 0 : index
    %c0_16 = arith.constant 0 : index
    %21 = vector.load %arg8[%c0_15, %c0_16] : memref<256x128xbf16, #tpu.memory_space<vmem>>, vector<256x128xbf16>
    tpu.vector_store %arg8[%c0_15, %c0_16], %20 {strides = array<i32>} : memref<256x128xbf16, #tpu.memory_space<vmem>>, vector<256x128xbf16>,
    return
  }
  func.func @transform_0(%arg0: i32) -> (i32, i32) {
    %c0_i32 = arith.constant 0 : i32
    %c0_i32_0 = arith.constant 0 : i32
    return %arg0, %c0_i32 : i32, i32
  }
  func.func @transform_1(%arg0: i32) -> (i32, i32) {
    %c0_i32 = arith.constant 0 : i32
    %c0_i32_0 = arith.constant 0 : i32
    return %arg0, %c0_i32 : i32, i32
  }
  func.func @transform_2(%arg0: i32) -> (i32, i32) {
    %c0_i32 = arith.constant 0 : i32
    %c0_i32_0 = arith.constant 0 : i32
    %c0_i32_1 = arith.constant 0 : i32
    return %c0_i32, %c0_i32_0 : i32, i32
  }
  func.func @transform_3(%arg0: i32) -> (i32, i32) {
    %c0_i32 = arith.constant 0 : i32
    %c0_i32_0 = arith.constant 0 : i32
    %c0_i32_1 = arith.constant 0 : i32
    return %c0_i32, %c0_i32_0 : i32, i32
  }
  func.func @transform_4(%arg0: i32) -> (i32, i32) {
    %c0_i32 = arith.constant 0 : i32
    %c0_i32_0 = arith.constant 0 : i32
    %c0_i32_1 = arith.constant 0 : i32
    return %c0_i32, %c0_i32_0 : i32, i32
  }
  func.func @transform_5(%arg0: i32) -> (i32, i32) {
    %c0_i32 = arith.constant 0 : i32
    %c0_i32_0 = arith.constant 0 : i32
    return %arg0, %c0_i32 : i32, i32
  }
  func.func @transform_6(%arg0: i32) -> (i32, i32) {
    %c0_i32 = arith.constant 0 : i32
    %c0_i32_0 = arith.constant 0 : i32
    return %arg0, %c0_i32 : i32, i32
  }
  func.func @transform_7(%arg0: i32) -> (i32, i32) {
    %c0_i32 = arith.constant 0 : i32
    %c0_i32_0 = arith.constant 0 : i32
    return %arg0, %c0_i32 : i32, i32
  }
}

module attributes {stable_mosaic.version = 11 : i64} {
  func.func @_q_update_kernel(%arg0: i32, %arg1: memref<256x640xbf16, #tpu.memory_space<vmem>>, %arg2: memref<256x640xbf16, #tpu.memory_space<vmem>>, %arg3: memref<640x128xbf16, #tpu.memory_space<vmem>>, %arg4: memref<640x128xbf16, #tpu.memory_space<vmem>>, %arg5: memref<1x128xf32, #tpu.memory_space<vmem>>, %arg6: memref<256x128xf32, #tpu.memory_space<vmem>>, %arg7: memref<256x128xf32, #tpu.memory_space<vmem>>, %arg8: memref<256x128xf32, #tpu.memory_space<vmem>>) attributes {dimension_semantics = [#tpu.dimension_semantics<parallel>], iteration_bounds = array<i64: 2>, scalar_prefetch = 0 : i64, scratch_operands = 0 : i64, tpu.core_type = #tpu.core_type<tc>, window_params = [{transform_indices = @transform_0, window_bounds = array<i64: 256, 640>}, {transform_indices = @transform_1, window_bounds = array<i64: 256, 640>}, {pipeline_mode = #tpu.pipeline_mode<synchronous>, transform_indices = @transform_2, window_bounds = array<i64: 640, 128>}, {pipeline_mode = #tpu.pipeline_mode<synchronous>, transform_indices = @transform_3, window_bounds = array<i64: 640, 128>}, {pipeline_mode = #tpu.pipeline_mode<synchronous>, transform_indices = @transform_4, window_bounds = array<i64: 1, 128>}, {transform_indices = @transform_5, window_bounds = array<i64: 256, 128>}, {transform_indices = @transform_6, window_bounds = array<i64: 256, 128>}, {transform_indices = @transform_7, window_bounds = array<i64: 256, 128>}]} {
    %c0 = arith.constant 0 : index
    %c0_0 = arith.constant 0 : index
    %0 = vector.load %arg1[%c0, %c0_0] : memref<256x640xbf16, #tpu.memory_space<vmem>>, vector<256x640xbf16>
    %c0_1 = arith.constant 0 : index
    %c0_2 = arith.constant 0 : index
    %1 = vector.load %arg3[%c0_1, %c0_2] : memref<640x128xbf16, #tpu.memory_space<vmem>>, vector<640x128xbf16>
    %cst = arith.constant dense<0.000000e+00> : vector<256x128xf32>
    %2 = tpu.matmul %0, %1, %cst {dimension_numbers = #tpu.dot_dimension_numbers<[1], [0], [0], [1], [0, 0, 1, 1], [], []>} : vector<256x640xbf16>, vector<640x128xbf16>, vector<256x128xf32> -> vector<256x128xf32>
    %c0_3 = arith.constant 0 : index
    %c0_4 = arith.constant 0 : index
    %3 = vector.load %arg2[%c0_3, %c0_4] : memref<256x640xbf16, #tpu.memory_space<vmem>>, vector<256x640xbf16>
    %c0_5 = arith.constant 0 : index
    %c0_6 = arith.constant 0 : index
    %4 = vector.load %arg4[%c0_5, %c0_6] : memref<640x128xbf16, #tpu.memory_space<vmem>>, vector<640x128xbf16>
    %cst_7 = arith.constant dense<0.000000e+00> : vector<256x128xf32>
    %5 = tpu.matmul %3, %4, %cst_7 {dimension_numbers = #tpu.dot_dimension_numbers<[1], [0], [0], [1], [0, 0, 1, 1], [], []>} : vector<256x640xbf16>, vector<640x128xbf16>, vector<256x128xf32> -> vector<256x128xf32>
    %6 = arith.addf %2, %5 : vector<256x128xf32>
    %c0_8 = arith.constant 0 : index
    %c0_9 = arith.constant 0 : index
    %7 = vector.load %arg5[%c0_8, %c0_9] : memref<1x128xf32, #tpu.memory_space<vmem>>, vector<1x128xf32>
    %8 = vector.broadcast %7 : vector<1x128xf32> to vector<256x128xf32>
    %9 = arith.addf %6, %8 : vector<256x128xf32>
    %10 = math.tanh %9 : vector<256x128xf32>
    %c0_10 = arith.constant 0 : index
    %c0_11 = arith.constant 0 : index
    %11 = vector.load %arg6[%c0_10, %c0_11] : memref<256x128xf32, #tpu.memory_space<vmem>>, vector<256x128xf32>
    %cst_12 = arith.constant 1.000000e+00 : f32
    %12 = vector.broadcast %cst_12 : f32 to vector<256x128xf32>
    %13 = arith.subf %12, %11 : vector<256x128xf32>
    %c0_13 = arith.constant 0 : index
    %c0_14 = arith.constant 0 : index
    %14 = vector.load %arg7[%c0_13, %c0_14] : memref<256x128xf32, #tpu.memory_space<vmem>>, vector<256x128xf32>
    %15 = arith.mulf %13, %14 : vector<256x128xf32>
    %16 = arith.mulf %11, %10 : vector<256x128xf32>
    %17 = arith.addf %15, %16 : vector<256x128xf32>
    %c0_15 = arith.constant 0 : index
    %c0_16 = arith.constant 0 : index
    %18 = vector.load %arg8[%c0_15, %c0_16] : memref<256x128xf32, #tpu.memory_space<vmem>>, vector<256x128xf32>
    tpu.vector_store %arg8[%c0_15, %c0_16], %17 {strides = array<i32>} : memref<256x128xf32, #tpu.memory_space<vmem>>, vector<256x128xf32>,
    return
  }
  func.func @transform_0(%arg0: i32) -> (i32, i32) {
    %c0_i32 = arith.constant 0 : i32
    %c0_i32_0 = arith.constant 0 : i32
    return %arg0, %c0_i32 : i32, i32
  }
  func.func @transform_1(%arg0: i32) -> (i32, i32) {
    %c0_i32 = arith.constant 0 : i32
    %c0_i32_0 = arith.constant 0 : i32
    return %arg0, %c0_i32 : i32, i32
  }
  func.func @transform_2(%arg0: i32) -> (i32, i32) {
    %c0_i32 = arith.constant 0 : i32
    %c0_i32_0 = arith.constant 0 : i32
    %c0_i32_1 = arith.constant 0 : i32
    return %c0_i32, %c0_i32_0 : i32, i32
  }
  func.func @transform_3(%arg0: i32) -> (i32, i32) {
    %c0_i32 = arith.constant 0 : i32
    %c0_i32_0 = arith.constant 0 : i32
    %c0_i32_1 = arith.constant 0 : i32
    return %c0_i32, %c0_i32_0 : i32, i32
  }
  func.func @transform_4(%arg0: i32) -> (i32, i32) {
    %c0_i32 = arith.constant 0 : i32
    %c0_i32_0 = arith.constant 0 : i32
    %c0_i32_1 = arith.constant 0 : i32
    return %c0_i32, %c0_i32_0 : i32, i32
  }
  func.func @transform_5(%arg0: i32) -> (i32, i32) {
    %c0_i32 = arith.constant 0 : i32
    %c0_i32_0 = arith.constant 0 : i32
    return %arg0, %c0_i32 : i32, i32
  }
  func.func @transform_6(%arg0: i32) -> (i32, i32) {
    %c0_i32 = arith.constant 0 : i32
    %c0_i32_0 = arith.constant 0 : i32
    return %arg0, %c0_i32 : i32, i32
  }
  func.func @transform_7(%arg0: i32) -> (i32, i32) {
    %c0_i32 = arith.constant 0 : i32
    %c0_i32_0 = arith.constant 0 : i32
    return %arg0, %c0_i32 : i32, i32
  }
}

module attributes {stable_mosaic.version = 11 : i64} {
  func.func @_conv_mm_kernel(%arg0: i32, %arg1: memref<256x1152xbf16, #tpu.memory_space<vmem>>, %arg2: memref<1152x128xbf16, #tpu.memory_space<vmem>>, %arg3: memref<1x128xf32, #tpu.memory_space<vmem>>, %arg4: memref<256x128xf32, #tpu.memory_space<vmem>>) attributes {dimension_semantics = [#tpu.dimension_semantics<parallel>], iteration_bounds = array<i64: 2>, scalar_prefetch = 0 : i64, scratch_operands = 0 : i64, tpu.core_type = #tpu.core_type<tc>, window_params = [{transform_indices = @transform_0, window_bounds = array<i64: 256, 1152>}, {pipeline_mode = #tpu.pipeline_mode<synchronous>, transform_indices = @transform_1, window_bounds = array<i64: 1152, 128>}, {pipeline_mode = #tpu.pipeline_mode<synchronous>, transform_indices = @transform_2, window_bounds = array<i64: 1, 128>}, {transform_indices = @transform_3, window_bounds = array<i64: 256, 128>}]} {
    %c0 = arith.constant 0 : index
    %c0_0 = arith.constant 0 : index
    %0 = vector.load %arg1[%c0, %c0_0] : memref<256x1152xbf16, #tpu.memory_space<vmem>>, vector<256x1152xbf16>
    %c0_1 = arith.constant 0 : index
    %c0_2 = arith.constant 0 : index
    %1 = vector.load %arg2[%c0_1, %c0_2] : memref<1152x128xbf16, #tpu.memory_space<vmem>>, vector<1152x128xbf16>
    %cst = arith.constant dense<0.000000e+00> : vector<256x128xf32>
    %2 = tpu.matmul %0, %1, %cst {dimension_numbers = #tpu.dot_dimension_numbers<[1], [0], [0], [1], [0, 0, 1, 1], [], []>} : vector<256x1152xbf16>, vector<1152x128xbf16>, vector<256x128xf32> -> vector<256x128xf32>
    %c0_3 = arith.constant 0 : index
    %c0_4 = arith.constant 0 : index
    %3 = vector.load %arg3[%c0_3, %c0_4] : memref<1x128xf32, #tpu.memory_space<vmem>>, vector<1x128xf32>
    %4 = vector.broadcast %3 : vector<1x128xf32> to vector<256x128xf32>
    %5 = arith.addf %2, %4 : vector<256x128xf32>
    %c0_5 = arith.constant 0 : index
    %c0_6 = arith.constant 0 : index
    %6 = vector.load %arg4[%c0_5, %c0_6] : memref<256x128xf32, #tpu.memory_space<vmem>>, vector<256x128xf32>
    tpu.vector_store %arg4[%c0_5, %c0_6], %5 {strides = array<i32>} : memref<256x128xf32, #tpu.memory_space<vmem>>, vector<256x128xf32>,
    return
  }
  func.func @transform_0(%arg0: i32) -> (i32, i32) {
    %c0_i32 = arith.constant 0 : i32
    %c0_i32_0 = arith.constant 0 : i32
    return %arg0, %c0_i32 : i32, i32
  }
  func.func @transform_1(%arg0: i32) -> (i32, i32) {
    %c0_i32 = arith.constant 0 : i32
    %c0_i32_0 = arith.constant 0 : i32
    %c0_i32_1 = arith.constant 0 : i32
    return %c0_i32, %c0_i32_0 : i32, i32
  }
  func.func @transform_2(%arg0: i32) -> (i32, i32) {
    %c0_i32 = arith.constant 0 : i32
    %c0_i32_0 = arith.constant 0 : i32
    %c0_i32_1 = arith.constant 0 : i32
    return %c0_i32, %c0_i32_0 : i32, i32
  }
  func.func @transform_3(%arg0: i32) -> (i32, i32) {
    %c0_i32 = arith.constant 0 : i32
    %c0_i32_0 = arith.constant 0 : i32
    return %arg0, %c0_i32 : i32, i32
  }
}

module attributes {stable_mosaic.version = 11 : i64} {
  func.func @_gn_pool_kernel(%arg0: i32, %arg1: memref<1x256x128xf32, #tpu.memory_space<vmem>>, %arg2: memref<1x128xf32, #tpu.memory_space<vmem>>, %arg3: memref<1x128xf32, #tpu.memory_space<vmem>>, %arg4: memref<128x16xf32, #tpu.memory_space<vmem>>, %arg5: memref<16x128xf32, #tpu.memory_space<vmem>>, %arg6: memref<4x64x256xf32, #tpu.memory_space<vmem>>, %arg7: memref<1x64x128xbf16, #tpu.memory_space<vmem>>) attributes {dimension_semantics = [#tpu.dimension_semantics<parallel>], iteration_bounds = array<i64: 2>, scalar_prefetch = 0 : i64, scratch_operands = 0 : i64, tpu.core_type = #tpu.core_type<tc>, window_params = [{transform_indices = @transform_0, window_bounds = array<i64: 1, 256, 128>}, {pipeline_mode = #tpu.pipeline_mode<synchronous>, transform_indices = @transform_1, window_bounds = array<i64: 1, 128>}, {pipeline_mode = #tpu.pipeline_mode<synchronous>, transform_indices = @transform_2, window_bounds = array<i64: 1, 128>}, {pipeline_mode = #tpu.pipeline_mode<synchronous>, transform_indices = @transform_3, window_bounds = array<i64: 128, 16>}, {pipeline_mode = #tpu.pipeline_mode<synchronous>, transform_indices = @transform_4, window_bounds = array<i64: 16, 128>}, {pipeline_mode = #tpu.pipeline_mode<synchronous>, transform_indices = @transform_5, window_bounds = array<i64: 4, 64, 256>}, {transform_indices = @transform_6, window_bounds = array<i64: 1, 64, 128>}]} {
    %c0 = arith.constant 0 : index
    %c0_0 = arith.constant 0 : index
    %c0_1 = arith.constant 0 : index
    %0 = vector.load %arg1[%c0, %c0_0, %c0_1] : memref<1x256x128xf32, #tpu.memory_space<vmem>>, vector<1x256x128xf32>
    %1 = vector.shape_cast %0 : vector<1x256x128xf32> to vector<256x128xf32>
    %c0_2 = arith.constant 0 : index
    %c0_3 = arith.constant 0 : index
    %2 = vector.load %arg4[%c0_2, %c0_3] : memref<128x16xf32, #tpu.memory_space<vmem>>, vector<128x16xf32>
    %c0_4 = arith.constant 0 : index
    %c0_5 = arith.constant 0 : index
    %3 = vector.load %arg5[%c0_4, %c0_5] : memref<16x128xf32, #tpu.memory_space<vmem>>, vector<16x128xf32>
    %cst = arith.constant dense<0.000000e+00> : vector<128xf32>
    %4 = vector.multi_reduction <add>, %1, %cst [0] : vector<256x128xf32> to vector<128xf32>
    %5 = vector.shape_cast %4 : vector<128xf32> to vector<1x128xf32>
    %6 = arith.mulf %1, %1 : vector<256x128xf32>
    %cst_6 = arith.constant dense<0.000000e+00> : vector<128xf32>
    %7 = vector.multi_reduction <add>, %6, %cst_6 [0] : vector<256x128xf32> to vector<128xf32>
    %8 = vector.shape_cast %7 : vector<128xf32> to vector<1x128xf32>
    %cst_7 = arith.constant dense<0.000000e+00> : vector<1x16xf32>
    %9 = tpu.matmul %5, %2, %cst_7 {dimension_numbers = #tpu.dot_dimension_numbers<[1], [0], [0], [1], [0, 0, 1, 1], [], []>} : vector<1x128xf32>, vector<128x16xf32>, vector<1x16xf32> -> vector<1x16xf32>
    %cst_8 = arith.constant dense<0.000000e+00> : vector<1x16xf32>
    %10 = tpu.matmul %8, %2, %cst_8 {dimension_numbers = #tpu.dot_dimension_numbers<[1], [0], [0], [1], [0, 0, 1, 1], [], []>} : vector<1x128xf32>, vector<128x16xf32>, vector<1x16xf32> -> vector<1x16xf32>
    %cst_9 = arith.constant 2.048000e+03 : f32
    %11 = vector.broadcast %cst_9 : f32 to vector<1x16xf32>
    %12 = arith.divf %9, %11 : vector<1x16xf32>
    %cst_10 = arith.constant 2.048000e+03 : f32
    %13 = vector.broadcast %cst_10 : f32 to vector<1x16xf32>
    %14 = arith.divf %10, %13 : vector<1x16xf32>
    %15 = arith.mulf %12, %12 : vector<1x16xf32>
    %16 = arith.subf %14, %15 : vector<1x16xf32>
    %cst_11 = arith.constant 0.000000e+00 : f32
    %17 = vector.broadcast %cst_11 : f32 to vector<1x16xf32>
    %18 = arith.maximumf %16, %17 : vector<1x16xf32>
    %cst_12 = arith.constant dense<0.000000e+00> : vector<1x128xf32>
    %19 = tpu.matmul %12, %3, %cst_12 {dimension_numbers = #tpu.dot_dimension_numbers<[1], [0], [0], [1], [0, 0, 1, 1], [], []>} : vector<1x16xf32>, vector<16x128xf32>, vector<1x128xf32> -> vector<1x128xf32>
    %cst_13 = arith.constant dense<0.000000e+00> : vector<1x128xf32>
    %20 = tpu.matmul %18, %3, %cst_13 {dimension_numbers = #tpu.dot_dimension_numbers<[1], [0], [0], [1], [0, 0, 1, 1], [], []>} : vector<1x16xf32>, vector<16x128xf32>, vector<1x128xf32> -> vector<1x128xf32>
    %cst_14 = arith.constant 9.99999974E-6 : f32
    %21 = vector.broadcast %cst_14 : f32 to vector<1x128xf32>
    %22 = arith.addf %20, %21 : vector<1x128xf32>
    %23 = math.rsqrt %22 : vector<1x128xf32>
    %24 = vector.broadcast %19 : vector<1x128xf32> to vector<256x128xf32>
    %25 = arith.subf %1, %24 : vector<256x128xf32>
    %26 = vector.broadcast %23 : vector<1x128xf32> to vector<256x128xf32>
    %27 = arith.mulf %25, %26 : vector<256x128xf32>
    %c0_15 = arith.constant 0 : index
    %c0_16 = arith.constant 0 : index
    %28 = vector.load %arg2[%c0_15, %c0_16] : memref<1x128xf32, #tpu.memory_space<vmem>>, vector<1x128xf32>
    %29 = vector.broadcast %28 : vector<1x128xf32> to vector<256x128xf32>
    %30 = arith.mulf %27, %29 : vector<256x128xf32>
    %c0_17 = arith.constant 0 : index
    %c0_18 = arith.constant 0 : index
    %31 = vector.load %arg3[%c0_17, %c0_18] : memref<1x128xf32, #tpu.memory_space<vmem>>, vector<1x128xf32>
    %32 = vector.broadcast %31 : vector<1x128xf32> to vector<256x128xf32>
    %33 = arith.addf %30, %32 : vector<256x128xf32>
    %cst_19 = arith.constant 0.000000e+00 : f32
    %34 = vector.broadcast %cst_19 : f32 to vector<256x128xf32>
    %35 = arith.maximumf %33, %34 : vector<256x128xf32>
    %c0_20 = arith.constant 0 : index
    %c0_21 = arith.constant 0 : index
    %c0_22 = arith.constant 0 : index
    %36 = vector.load %arg6[%c0_20, %c0_21, %c0_22] : memref<4x64x256xf32, #tpu.memory_space<vmem>>, vector<1x64x256xf32>
    %37 = vector.shape_cast %36 : vector<1x64x256xf32> to vector<64x256xf32>
    %cst_23 = arith.constant dense<0.000000e+00> : vector<64x128xf32>
    %38 = tpu.matmul %37, %35, %cst_23 {dimension_numbers = #tpu.dot_dimension_numbers<[1], [0], [0], [1], [0, 0, 1, 1], [], []>} : vector<64x256xf32>, vector<256x128xf32>, vector<64x128xf32> -> vector<64x128xf32>
    %c1 = arith.constant 1 : index
    %c0_24 = arith.constant 0 : index
    %c0_25 = arith.constant 0 : index
    %39 = vector.load %arg6[%c1, %c0_24, %c0_25] : memref<4x64x256xf32, #tpu.memory_space<vmem>>, vector<1x64x256xf32>
    %40 = vector.shape_cast %39 : vector<1x64x256xf32> to vector<64x256xf32>
    %cst_26 = arith.constant dense<0.000000e+00> : vector<64x128xf32>
    %41 = tpu.matmul %40, %35, %cst_26 {dimension_numbers = #tpu.dot_dimension_numbers<[1], [0], [0], [1], [0, 0, 1, 1], [], []>} : vector<64x256xf32>, vector<256x128xf32>, vector<64x128xf32> -> vector<64x128xf32>
    %c2 = arith.constant 2 : index
    %c0_27 = arith.constant 0 : index
    %c0_28 = arith.constant 0 : index
    %42 = vector.load %arg6[%c2, %c0_27, %c0_28] : memref<4x64x256xf32, #tpu.memory_space<vmem>>, vector<1x64x256xf32>
    %43 = vector.shape_cast %42 : vector<1x64x256xf32> to vector<64x256xf32>
    %cst_29 = arith.constant dense<0.000000e+00> : vector<64x128xf32>
    %44 = tpu.matmul %43, %35, %cst_29 {dimension_numbers = #tpu.dot_dimension_numbers<[1], [0], [0], [1], [0, 0, 1, 1], [], []>} : vector<64x256xf32>, vector<256x128xf32>, vector<64x128xf32> -> vector<64x128xf32>
    %c3 = arith.constant 3 : index
    %c0_30 = arith.constant 0 : index
    %c0_31 = arith.constant 0 : index
    %45 = vector.load %arg6[%c3, %c0_30, %c0_31] : memref<4x64x256xf32, #tpu.memory_space<vmem>>, vector<1x64x256xf32>
    %46 = vector.shape_cast %45 : vector<1x64x256xf32> to vector<64x256xf32>
    %cst_32 = arith.constant dense<0.000000e+00> : vector<64x128xf32>
    %47 = tpu.matmul %46, %35, %cst_32 {dimension_numbers = #tpu.dot_dimension_numbers<[1], [0], [0], [1], [0, 0, 1, 1], [], []>} : vector<64x256xf32>, vector<256x128xf32>, vector<64x128xf32> -> vector<64x128xf32>
    %48 = arith.maximumf %38, %41 : vector<64x128xf32>
    %49 = arith.maximumf %44, %47 : vector<64x128xf32>
    %50 = arith.maximumf %48, %49 : vector<64x128xf32>
    %51 = arith.truncf %50 : vector<64x128xf32> to vector<64x128xbf16>
    %c0_33 = arith.constant 0 : index
    %c0_34 = arith.constant 0 : index
    %c0_35 = arith.constant 0 : index
    %52 = vector.load %arg7[%c0_33, %c0_34, %c0_35] : memref<1x64x128xbf16, #tpu.memory_space<vmem>>, vector<1x64x128xbf16>
    %53 = vector.shape_cast %52 : vector<1x64x128xbf16> to vector<64x128xbf16>
    %54 = vector.shape_cast %51 : vector<64x128xbf16> to vector<1x64x128xbf16>
    tpu.vector_store %arg7[%c0_33, %c0_34, %c0_35], %54 {strides = array<i32>} : memref<1x64x128xbf16, #tpu.memory_space<vmem>>, vector<1x64x128xbf16>,
    return
  }
  func.func @transform_0(%arg0: i32) -> (i32, i32, i32) {
    %c0_i32 = arith.constant 0 : i32
    %c0_i32_0 = arith.constant 0 : i32
    %c0_i32_1 = arith.constant 0 : i32
    return %arg0, %c0_i32, %c0_i32_0 : i32, i32, i32
  }
  func.func @transform_1(%arg0: i32) -> (i32, i32) {
    %c0_i32 = arith.constant 0 : i32
    %c0_i32_0 = arith.constant 0 : i32
    %c0_i32_1 = arith.constant 0 : i32
    return %c0_i32, %c0_i32_0 : i32, i32
  }
  func.func @transform_2(%arg0: i32) -> (i32, i32) {
    %c0_i32 = arith.constant 0 : i32
    %c0_i32_0 = arith.constant 0 : i32
    %c0_i32_1 = arith.constant 0 : i32
    return %c0_i32, %c0_i32_0 : i32, i32
  }
  func.func @transform_3(%arg0: i32) -> (i32, i32) {
    %c0_i32 = arith.constant 0 : i32
    %c0_i32_0 = arith.constant 0 : i32
    %c0_i32_1 = arith.constant 0 : i32
    return %c0_i32, %c0_i32_0 : i32, i32
  }
  func.func @transform_4(%arg0: i32) -> (i32, i32) {
    %c0_i32 = arith.constant 0 : i32
    %c0_i32_0 = arith.constant 0 : i32
    %c0_i32_1 = arith.constant 0 : i32
    return %c0_i32, %c0_i32_0 : i32, i32
  }
  func.func @transform_5(%arg0: i32) -> (i32, i32, i32) {
    %c0_i32 = arith.constant 0 : i32
    %c0_i32_0 = arith.constant 0 : i32
    %c0_i32_1 = arith.constant 0 : i32
    %c0_i32_2 = arith.constant 0 : i32
    return %c0_i32, %c0_i32_0, %c0_i32_1 : i32, i32, i32
  }
  func.func @transform_6(%arg0: i32) -> (i32, i32, i32) {
    %c0_i32 = arith.constant 0 : i32
    %c0_i32_0 = arith.constant 0 : i32
    %c0_i32_1 = arith.constant 0 : i32
    return %arg0, %c0_i32, %c0_i32_0 : i32, i32, i32
  }
}

module attributes {stable_mosaic.version = 11 : i64} {
  func.func @_gn_pool_kernel(%arg0: i32, %arg1: memref<1x64x128xf32, #tpu.memory_space<vmem>>, %arg2: memref<1x128xf32, #tpu.memory_space<vmem>>, %arg3: memref<1x128xf32, #tpu.memory_space<vmem>>, %arg4: memref<128x16xf32, #tpu.memory_space<vmem>>, %arg5: memref<16x128xf32, #tpu.memory_space<vmem>>, %arg6: memref<4x16x64xf32, #tpu.memory_space<vmem>>, %arg7: memref<1x16x128xbf16, #tpu.memory_space<vmem>>) attributes {dimension_semantics = [#tpu.dimension_semantics<parallel>], iteration_bounds = array<i64: 2>, scalar_prefetch = 0 : i64, scratch_operands = 0 : i64, tpu.core_type = #tpu.core_type<tc>, window_params = [{transform_indices = @transform_0, window_bounds = array<i64: 1, 64, 128>}, {pipeline_mode = #tpu.pipeline_mode<synchronous>, transform_indices = @transform_1, window_bounds = array<i64: 1, 128>}, {pipeline_mode = #tpu.pipeline_mode<synchronous>, transform_indices = @transform_2, window_bounds = array<i64: 1, 128>}, {pipeline_mode = #tpu.pipeline_mode<synchronous>, transform_indices = @transform_3, window_bounds = array<i64: 128, 16>}, {pipeline_mode = #tpu.pipeline_mode<synchronous>, transform_indices = @transform_4, window_bounds = array<i64: 16, 128>}, {pipeline_mode = #tpu.pipeline_mode<synchronous>, transform_indices = @transform_5, window_bounds = array<i64: 4, 16, 64>}, {transform_indices = @transform_6, window_bounds = array<i64: 1, 16, 128>}]} {
    %c0 = arith.constant 0 : index
    %c0_0 = arith.constant 0 : index
    %c0_1 = arith.constant 0 : index
    %0 = vector.load %arg1[%c0, %c0_0, %c0_1] : memref<1x64x128xf32, #tpu.memory_space<vmem>>, vector<1x64x128xf32>
    %1 = vector.shape_cast %0 : vector<1x64x128xf32> to vector<64x128xf32>
    %c0_2 = arith.constant 0 : index
    %c0_3 = arith.constant 0 : index
    %2 = vector.load %arg4[%c0_2, %c0_3] : memref<128x16xf32, #tpu.memory_space<vmem>>, vector<128x16xf32>
    %c0_4 = arith.constant 0 : index
    %c0_5 = arith.constant 0 : index
    %3 = vector.load %arg5[%c0_4, %c0_5] : memref<16x128xf32, #tpu.memory_space<vmem>>, vector<16x128xf32>
    %cst = arith.constant dense<0.000000e+00> : vector<128xf32>
    %4 = vector.multi_reduction <add>, %1, %cst [0] : vector<64x128xf32> to vector<128xf32>
    %5 = vector.shape_cast %4 : vector<128xf32> to vector<1x128xf32>
    %6 = arith.mulf %1, %1 : vector<64x128xf32>
    %cst_6 = arith.constant dense<0.000000e+00> : vector<128xf32>
    %7 = vector.multi_reduction <add>, %6, %cst_6 [0] : vector<64x128xf32> to vector<128xf32>
    %8 = vector.shape_cast %7 : vector<128xf32> to vector<1x128xf32>
    %cst_7 = arith.constant dense<0.000000e+00> : vector<1x16xf32>
    %9 = tpu.matmul %5, %2, %cst_7 {dimension_numbers = #tpu.dot_dimension_numbers<[1], [0], [0], [1], [0, 0, 1, 1], [], []>} : vector<1x128xf32>, vector<128x16xf32>, vector<1x16xf32> -> vector<1x16xf32>
    %cst_8 = arith.constant dense<0.000000e+00> : vector<1x16xf32>
    %10 = tpu.matmul %8, %2, %cst_8 {dimension_numbers = #tpu.dot_dimension_numbers<[1], [0], [0], [1], [0, 0, 1, 1], [], []>} : vector<1x128xf32>, vector<128x16xf32>, vector<1x16xf32> -> vector<1x16xf32>
    %cst_9 = arith.constant 5.120000e+02 : f32
    %11 = vector.broadcast %cst_9 : f32 to vector<1x16xf32>
    %12 = arith.divf %9, %11 : vector<1x16xf32>
    %cst_10 = arith.constant 5.120000e+02 : f32
    %13 = vector.broadcast %cst_10 : f32 to vector<1x16xf32>
    %14 = arith.divf %10, %13 : vector<1x16xf32>
    %15 = arith.mulf %12, %12 : vector<1x16xf32>
    %16 = arith.subf %14, %15 : vector<1x16xf32>
    %cst_11 = arith.constant 0.000000e+00 : f32
    %17 = vector.broadcast %cst_11 : f32 to vector<1x16xf32>
    %18 = arith.maximumf %16, %17 : vector<1x16xf32>
    %cst_12 = arith.constant dense<0.000000e+00> : vector<1x128xf32>
    %19 = tpu.matmul %12, %3, %cst_12 {dimension_numbers = #tpu.dot_dimension_numbers<[1], [0], [0], [1], [0, 0, 1, 1], [], []>} : vector<1x16xf32>, vector<16x128xf32>, vector<1x128xf32> -> vector<1x128xf32>
    %cst_13 = arith.constant dense<0.000000e+00> : vector<1x128xf32>
    %20 = tpu.matmul %18, %3, %cst_13 {dimension_numbers = #tpu.dot_dimension_numbers<[1], [0], [0], [1], [0, 0, 1, 1], [], []>} : vector<1x16xf32>, vector<16x128xf32>, vector<1x128xf32> -> vector<1x128xf32>
    %cst_14 = arith.constant 9.99999974E-6 : f32
    %21 = vector.broadcast %cst_14 : f32 to vector<1x128xf32>
    %22 = arith.addf %20, %21 : vector<1x128xf32>
    %23 = math.rsqrt %22 : vector<1x128xf32>
    %24 = vector.broadcast %19 : vector<1x128xf32> to vector<64x128xf32>
    %25 = arith.subf %1, %24 : vector<64x128xf32>
    %26 = vector.broadcast %23 : vector<1x128xf32> to vector<64x128xf32>
    %27 = arith.mulf %25, %26 : vector<64x128xf32>
    %c0_15 = arith.constant 0 : index
    %c0_16 = arith.constant 0 : index
    %28 = vector.load %arg2[%c0_15, %c0_16] : memref<1x128xf32, #tpu.memory_space<vmem>>, vector<1x128xf32>
    %29 = vector.broadcast %28 : vector<1x128xf32> to vector<64x128xf32>
    %30 = arith.mulf %27, %29 : vector<64x128xf32>
    %c0_17 = arith.constant 0 : index
    %c0_18 = arith.constant 0 : index
    %31 = vector.load %arg3[%c0_17, %c0_18] : memref<1x128xf32, #tpu.memory_space<vmem>>, vector<1x128xf32>
    %32 = vector.broadcast %31 : vector<1x128xf32> to vector<64x128xf32>
    %33 = arith.addf %30, %32 : vector<64x128xf32>
    %c0_19 = arith.constant 0 : index
    %c0_20 = arith.constant 0 : index
    %c0_21 = arith.constant 0 : index
    %34 = vector.load %arg6[%c0_19, %c0_20, %c0_21] : memref<4x16x64xf32, #tpu.memory_space<vmem>>, vector<1x16x64xf32>
    %35 = vector.shape_cast %34 : vector<1x16x64xf32> to vector<16x64xf32>
    %cst_22 = arith.constant dense<0.000000e+00> : vector<16x128xf32>
    %36 = tpu.matmul %35, %33, %cst_22 {dimension_numbers = #tpu.dot_dimension_numbers<[1], [0], [0], [1], [0, 0, 1, 1], [], []>} : vector<16x64xf32>, vector<64x128xf32>, vector<16x128xf32> -> vector<16x128xf32>
    %c1 = arith.constant 1 : index
    %c0_23 = arith.constant 0 : index
    %c0_24 = arith.constant 0 : index
    %37 = vector.load %arg6[%c1, %c0_23, %c0_24] : memref<4x16x64xf32, #tpu.memory_space<vmem>>, vector<1x16x64xf32>
    %38 = vector.shape_cast %37 : vector<1x16x64xf32> to vector<16x64xf32>
    %cst_25 = arith.constant dense<0.000000e+00> : vector<16x128xf32>
    %39 = tpu.matmul %38, %33, %cst_25 {dimension_numbers = #tpu.dot_dimension_numbers<[1], [0], [0], [1], [0, 0, 1, 1], [], []>} : vector<16x64xf32>, vector<64x128xf32>, vector<16x128xf32> -> vector<16x128xf32>
    %c2 = arith.constant 2 : index
    %c0_26 = arith.constant 0 : index
    %c0_27 = arith.constant 0 : index
    %40 = vector.load %arg6[%c2, %c0_26, %c0_27] : memref<4x16x64xf32, #tpu.memory_space<vmem>>, vector<1x16x64xf32>
    %41 = vector.shape_cast %40 : vector<1x16x64xf32> to vector<16x64xf32>
    %cst_28 = arith.constant dense<0.000000e+00> : vector<16x128xf32>
    %42 = tpu.matmul %41, %33, %cst_28 {dimension_numbers = #tpu.dot_dimension_numbers<[1], [0], [0], [1], [0, 0, 1, 1], [], []>} : vector<16x64xf32>, vector<64x128xf32>, vector<16x128xf32> -> vector<16x128xf32>
    %c3 = arith.constant 3 : index
    %c0_29 = arith.constant 0 : index
    %c0_30 = arith.constant 0 : index
    %43 = vector.load %arg6[%c3, %c0_29, %c0_30] : memref<4x16x64xf32, #tpu.memory_space<vmem>>, vector<1x16x64xf32>
    %44 = vector.shape_cast %43 : vector<1x16x64xf32> to vector<16x64xf32>
    %cst_31 = arith.constant dense<0.000000e+00> : vector<16x128xf32>
    %45 = tpu.matmul %44, %33, %cst_31 {dimension_numbers = #tpu.dot_dimension_numbers<[1], [0], [0], [1], [0, 0, 1, 1], [], []>} : vector<16x64xf32>, vector<64x128xf32>, vector<16x128xf32> -> vector<16x128xf32>
    %46 = arith.maximumf %36, %39 : vector<16x128xf32>
    %47 = arith.maximumf %42, %45 : vector<16x128xf32>
    %48 = arith.maximumf %46, %47 : vector<16x128xf32>
    %49 = arith.truncf %48 : vector<16x128xf32> to vector<16x128xbf16>
    %c0_32 = arith.constant 0 : index
    %c0_33 = arith.constant 0 : index
    %c0_34 = arith.constant 0 : index
    %50 = vector.load %arg7[%c0_32, %c0_33, %c0_34] : memref<1x16x128xbf16, #tpu.memory_space<vmem>>, vector<1x16x128xbf16>
    %51 = vector.shape_cast %50 : vector<1x16x128xbf16> to vector<16x128xbf16>
    %52 = vector.shape_cast %49 : vector<16x128xbf16> to vector<1x16x128xbf16>
    tpu.vector_store %arg7[%c0_32, %c0_33, %c0_34], %52 {strides = array<i32>} : memref<1x16x128xbf16, #tpu.memory_space<vmem>>, vector<1x16x128xbf16>,
    return
  }
  func.func @transform_0(%arg0: i32) -> (i32, i32, i32) {
    %c0_i32 = arith.constant 0 : i32
    %c0_i32_0 = arith.constant 0 : i32
    %c0_i32_1 = arith.constant 0 : i32
    return %arg0, %c0_i32, %c0_i32_0 : i32, i32, i32
  }
  func.func @transform_1(%arg0: i32) -> (i32, i32) {
    %c0_i32 = arith.constant 0 : i32
    %c0_i32_0 = arith.constant 0 : i32
    %c0_i32_1 = arith.constant 0 : i32
    return %c0_i32, %c0_i32_0 : i32, i32
  }
  func.func @transform_2(%arg0: i32) -> (i32, i32) {
    %c0_i32 = arith.constant 0 : i32
    %c0_i32_0 = arith.constant 0 : i32
    %c0_i32_1 = arith.constant 0 : i32
    return %c0_i32, %c0_i32_0 : i32, i32
  }
  func.func @transform_3(%arg0: i32) -> (i32, i32) {
    %c0_i32 = arith.constant 0 : i32
    %c0_i32_0 = arith.constant 0 : i32
    %c0_i32_1 = arith.constant 0 : i32
    return %c0_i32, %c0_i32_0 : i32, i32
  }
  func.func @transform_4(%arg0: i32) -> (i32, i32) {
    %c0_i32 = arith.constant 0 : i32
    %c0_i32_0 = arith.constant 0 : i32
    %c0_i32_1 = arith.constant 0 : i32
    return %c0_i32, %c0_i32_0 : i32, i32
  }
  func.func @transform_5(%arg0: i32) -> (i32, i32, i32) {
    %c0_i32 = arith.constant 0 : i32
    %c0_i32_0 = arith.constant 0 : i32
    %c0_i32_1 = arith.constant 0 : i32
    %c0_i32_2 = arith.constant 0 : i32
    return %c0_i32, %c0_i32_0, %c0_i32_1 : i32, i32, i32
  }
  func.func @transform_6(%arg0: i32) -> (i32, i32, i32) {
    %c0_i32 = arith.constant 0 : i32
    %c0_i32_0 = arith.constant 0 : i32
    %c0_i32_1 = arith.constant 0 : i32
    return %arg0, %c0_i32, %c0_i32_0 : i32, i32, i32
  }
}

module attributes {stable_mosaic.version = 11 : i64} {
  func.func @_conv_mm_kernel(%arg0: i32, %arg1: memref<64x1152xbf16, #tpu.memory_space<vmem>>, %arg2: memref<1152x128xbf16, #tpu.memory_space<vmem>>, %arg3: memref<1x128xf32, #tpu.memory_space<vmem>>, %arg4: memref<64x128xf32, #tpu.memory_space<vmem>>) attributes {dimension_semantics = [#tpu.dimension_semantics<parallel>], iteration_bounds = array<i64: 2>, scalar_prefetch = 0 : i64, scratch_operands = 0 : i64, tpu.core_type = #tpu.core_type<tc>, window_params = [{transform_indices = @transform_0, window_bounds = array<i64: 64, 1152>}, {pipeline_mode = #tpu.pipeline_mode<synchronous>, transform_indices = @transform_1, window_bounds = array<i64: 1152, 128>}, {pipeline_mode = #tpu.pipeline_mode<synchronous>, transform_indices = @transform_2, window_bounds = array<i64: 1, 128>}, {transform_indices = @transform_3, window_bounds = array<i64: 64, 128>}]} {
    %c0 = arith.constant 0 : index
    %c0_0 = arith.constant 0 : index
    %0 = vector.load %arg1[%c0, %c0_0] : memref<64x1152xbf16, #tpu.memory_space<vmem>>, vector<64x1152xbf16>
    %c0_1 = arith.constant 0 : index
    %c0_2 = arith.constant 0 : index
    %1 = vector.load %arg2[%c0_1, %c0_2] : memref<1152x128xbf16, #tpu.memory_space<vmem>>, vector<1152x128xbf16>
    %cst = arith.constant dense<0.000000e+00> : vector<64x128xf32>
    %2 = tpu.matmul %0, %1, %cst {dimension_numbers = #tpu.dot_dimension_numbers<[1], [0], [0], [1], [0, 0, 1, 1], [], []>} : vector<64x1152xbf16>, vector<1152x128xbf16>, vector<64x128xf32> -> vector<64x128xf32>
    %c0_3 = arith.constant 0 : index
    %c0_4 = arith.constant 0 : index
    %3 = vector.load %arg3[%c0_3, %c0_4] : memref<1x128xf32, #tpu.memory_space<vmem>>, vector<1x128xf32>
    %4 = vector.broadcast %3 : vector<1x128xf32> to vector<64x128xf32>
    %5 = arith.addf %2, %4 : vector<64x128xf32>
    %c0_5 = arith.constant 0 : index
    %c0_6 = arith.constant 0 : index
    %6 = vector.load %arg4[%c0_5, %c0_6] : memref<64x128xf32, #tpu.memory_space<vmem>>, vector<64x128xf32>
    tpu.vector_store %arg4[%c0_5, %c0_6], %5 {strides = array<i32>} : memref<64x128xf32, #tpu.memory_space<vmem>>, vector<64x128xf32>,
    return
  }
  func.func @transform_0(%arg0: i32) -> (i32, i32) {
    %c0_i32 = arith.constant 0 : i32
    %c0_i32_0 = arith.constant 0 : i32
    return %arg0, %c0_i32 : i32, i32
  }
  func.func @transform_1(%arg0: i32) -> (i32, i32) {
    %c0_i32 = arith.constant 0 : i32
    %c0_i32_0 = arith.constant 0 : i32
    %c0_i32_1 = arith.constant 0 : i32
    return %c0_i32, %c0_i32_0 : i32, i32
  }
  func.func @transform_2(%arg0: i32) -> (i32, i32) {
    %c0_i32 = arith.constant 0 : i32
    %c0_i32_0 = arith.constant 0 : i32
    %c0_i32_1 = arith.constant 0 : i32
    return %c0_i32, %c0_i32_0 : i32, i32
  }
  func.func @transform_3(%arg0: i32) -> (i32, i32) {
    %c0_i32 = arith.constant 0 : i32
    %c0_i32_0 = arith.constant 0 : i32
    return %arg0, %c0_i32 : i32, i32
  }
}

module attributes {stable_mosaic.version = 11 : i64} {
  func.func @_conv_mm_kernel(%arg0: i32, %arg1: memref<16x1152xbf16, #tpu.memory_space<vmem>>, %arg2: memref<1152x128xbf16, #tpu.memory_space<vmem>>, %arg3: memref<1x128xf32, #tpu.memory_space<vmem>>, %arg4: memref<16x128xf32, #tpu.memory_space<vmem>>) attributes {dimension_semantics = [#tpu.dimension_semantics<parallel>], iteration_bounds = array<i64: 2>, scalar_prefetch = 0 : i64, scratch_operands = 0 : i64, tpu.core_type = #tpu.core_type<tc>, window_params = [{transform_indices = @transform_0, window_bounds = array<i64: 16, 1152>}, {pipeline_mode = #tpu.pipeline_mode<synchronous>, transform_indices = @transform_1, window_bounds = array<i64: 1152, 128>}, {pipeline_mode = #tpu.pipeline_mode<synchronous>, transform_indices = @transform_2, window_bounds = array<i64: 1, 128>}, {transform_indices = @transform_3, window_bounds = array<i64: 16, 128>}]} {
    %c0 = arith.constant 0 : index
    %c0_0 = arith.constant 0 : index
    %0 = vector.load %arg1[%c0, %c0_0] : memref<16x1152xbf16, #tpu.memory_space<vmem>>, vector<16x1152xbf16>
    %c0_1 = arith.constant 0 : index
    %c0_2 = arith.constant 0 : index
    %1 = vector.load %arg2[%c0_1, %c0_2] : memref<1152x128xbf16, #tpu.memory_space<vmem>>, vector<1152x128xbf16>
    %cst = arith.constant dense<0.000000e+00> : vector<16x128xf32>
    %2 = tpu.matmul %0, %1, %cst {dimension_numbers = #tpu.dot_dimension_numbers<[1], [0], [0], [1], [0, 0, 1, 1], [], []>} : vector<16x1152xbf16>, vector<1152x128xbf16>, vector<16x128xf32> -> vector<16x128xf32>
    %c0_3 = arith.constant 0 : index
    %c0_4 = arith.constant 0 : index
    %3 = vector.load %arg3[%c0_3, %c0_4] : memref<1x128xf32, #tpu.memory_space<vmem>>, vector<1x128xf32>
    %4 = vector.broadcast %3 : vector<1x128xf32> to vector<16x128xf32>
    %5 = arith.addf %2, %4 : vector<16x128xf32>
    %c0_5 = arith.constant 0 : index
    %c0_6 = arith.constant 0 : index
    %6 = vector.load %arg4[%c0_5, %c0_6] : memref<16x128xf32, #tpu.memory_space<vmem>>, vector<16x128xf32>
    tpu.vector_store %arg4[%c0_5, %c0_6], %5 {strides = array<i32>} : memref<16x128xf32, #tpu.memory_space<vmem>>, vector<16x128xf32>,
    return
  }
  func.func @transform_0(%arg0: i32) -> (i32, i32) {
    %c0_i32 = arith.constant 0 : i32
    %c0_i32_0 = arith.constant 0 : i32
    return %arg0, %c0_i32 : i32, i32
  }
  func.func @transform_1(%arg0: i32) -> (i32, i32) {
    %c0_i32 = arith.constant 0 : i32
    %c0_i32_0 = arith.constant 0 : i32
    %c0_i32_1 = arith.constant 0 : i32
    return %c0_i32, %c0_i32_0 : i32, i32
  }
  func.func @transform_2(%arg0: i32) -> (i32, i32) {
    %c0_i32 = arith.constant 0 : i32
    %c0_i32_0 = arith.constant 0 : i32
    %c0_i32_1 = arith.constant 0 : i32
    return %c0_i32, %c0_i32_0 : i32, i32
  }
  func.func @transform_3(%arg0: i32) -> (i32, i32) {
    %c0_i32 = arith.constant 0 : i32
    %c0_i32_0 = arith.constant 0 : i32
    return %arg0, %c0_i32 : i32, i32
  }
}

module attributes {stable_mosaic.version = 11 : i64} {
  func.func @_gn_pool_kernel(%arg0: i32, %arg1: memref<1x16x128xf32, #tpu.memory_space<vmem>>, %arg2: memref<1x128xf32, #tpu.memory_space<vmem>>, %arg3: memref<1x128xf32, #tpu.memory_space<vmem>>, %arg4: memref<128x16xf32, #tpu.memory_space<vmem>>, %arg5: memref<16x128xf32, #tpu.memory_space<vmem>>, %arg6: memref<4x4x16xf32, #tpu.memory_space<vmem>>, %arg7: memref<1x4x128xbf16, #tpu.memory_space<vmem>>) attributes {dimension_semantics = [#tpu.dimension_semantics<parallel>], iteration_bounds = array<i64: 2>, scalar_prefetch = 0 : i64, scratch_operands = 0 : i64, tpu.core_type = #tpu.core_type<tc>, window_params = [{transform_indices = @transform_0, window_bounds = array<i64: 1, 16, 128>}, {pipeline_mode = #tpu.pipeline_mode<synchronous>, transform_indices = @transform_1, window_bounds = array<i64: 1, 128>}, {pipeline_mode = #tpu.pipeline_mode<synchronous>, transform_indices = @transform_2, window_bounds = array<i64: 1, 128>}, {pipeline_mode = #tpu.pipeline_mode<synchronous>, transform_indices = @transform_3, window_bounds = array<i64: 128, 16>}, {pipeline_mode = #tpu.pipeline_mode<synchronous>, transform_indices = @transform_4, window_bounds = array<i64: 16, 128>}, {pipeline_mode = #tpu.pipeline_mode<synchronous>, transform_indices = @transform_5, window_bounds = array<i64: 4, 4, 16>}, {transform_indices = @transform_6, window_bounds = array<i64: 1, 4, 128>}]} {
    %c0 = arith.constant 0 : index
    %c0_0 = arith.constant 0 : index
    %c0_1 = arith.constant 0 : index
    %0 = vector.load %arg1[%c0, %c0_0, %c0_1] : memref<1x16x128xf32, #tpu.memory_space<vmem>>, vector<1x16x128xf32>
    %1 = vector.shape_cast %0 : vector<1x16x128xf32> to vector<16x128xf32>
    %c0_2 = arith.constant 0 : index
    %c0_3 = arith.constant 0 : index
    %2 = vector.load %arg4[%c0_2, %c0_3] : memref<128x16xf32, #tpu.memory_space<vmem>>, vector<128x16xf32>
    %c0_4 = arith.constant 0 : index
    %c0_5 = arith.constant 0 : index
    %3 = vector.load %arg5[%c0_4, %c0_5] : memref<16x128xf32, #tpu.memory_space<vmem>>, vector<16x128xf32>
    %cst = arith.constant dense<0.000000e+00> : vector<128xf32>
    %4 = vector.multi_reduction <add>, %1, %cst [0] : vector<16x128xf32> to vector<128xf32>
    %5 = vector.shape_cast %4 : vector<128xf32> to vector<1x128xf32>
    %6 = arith.mulf %1, %1 : vector<16x128xf32>
    %cst_6 = arith.constant dense<0.000000e+00> : vector<128xf32>
    %7 = vector.multi_reduction <add>, %6, %cst_6 [0] : vector<16x128xf32> to vector<128xf32>
    %8 = vector.shape_cast %7 : vector<128xf32> to vector<1x128xf32>
    %cst_7 = arith.constant dense<0.000000e+00> : vector<1x16xf32>
    %9 = tpu.matmul %5, %2, %cst_7 {dimension_numbers = #tpu.dot_dimension_numbers<[1], [0], [0], [1], [0, 0, 1, 1], [], []>} : vector<1x128xf32>, vector<128x16xf32>, vector<1x16xf32> -> vector<1x16xf32>
    %cst_8 = arith.constant dense<0.000000e+00> : vector<1x16xf32>
    %10 = tpu.matmul %8, %2, %cst_8 {dimension_numbers = #tpu.dot_dimension_numbers<[1], [0], [0], [1], [0, 0, 1, 1], [], []>} : vector<1x128xf32>, vector<128x16xf32>, vector<1x16xf32> -> vector<1x16xf32>
    %cst_9 = arith.constant 1.280000e+02 : f32
    %11 = vector.broadcast %cst_9 : f32 to vector<1x16xf32>
    %12 = arith.divf %9, %11 : vector<1x16xf32>
    %cst_10 = arith.constant 1.280000e+02 : f32
    %13 = vector.broadcast %cst_10 : f32 to vector<1x16xf32>
    %14 = arith.divf %10, %13 : vector<1x16xf32>
    %15 = arith.mulf %12, %12 : vector<1x16xf32>
    %16 = arith.subf %14, %15 : vector<1x16xf32>
    %cst_11 = arith.constant 0.000000e+00 : f32
    %17 = vector.broadcast %cst_11 : f32 to vector<1x16xf32>
    %18 = arith.maximumf %16, %17 : vector<1x16xf32>
    %cst_12 = arith.constant dense<0.000000e+00> : vector<1x128xf32>
    %19 = tpu.matmul %12, %3, %cst_12 {dimension_numbers = #tpu.dot_dimension_numbers<[1], [0], [0], [1], [0, 0, 1, 1], [], []>} : vector<1x16xf32>, vector<16x128xf32>, vector<1x128xf32> -> vector<1x128xf32>
    %cst_13 = arith.constant dense<0.000000e+00> : vector<1x128xf32>
    %20 = tpu.matmul %18, %3, %cst_13 {dimension_numbers = #tpu.dot_dimension_numbers<[1], [0], [0], [1], [0, 0, 1, 1], [], []>} : vector<1x16xf32>, vector<16x128xf32>, vector<1x128xf32> -> vector<1x128xf32>
    %cst_14 = arith.constant 9.99999974E-6 : f32
    %21 = vector.broadcast %cst_14 : f32 to vector<1x128xf32>
    %22 = arith.addf %20, %21 : vector<1x128xf32>
    %23 = math.rsqrt %22 : vector<1x128xf32>
    %24 = vector.broadcast %19 : vector<1x128xf32> to vector<16x128xf32>
    %25 = arith.subf %1, %24 : vector<16x128xf32>
    %26 = vector.broadcast %23 : vector<1x128xf32> to vector<16x128xf32>
    %27 = arith.mulf %25, %26 : vector<16x128xf32>
    %c0_15 = arith.constant 0 : index
    %c0_16 = arith.constant 0 : index
    %28 = vector.load %arg2[%c0_15, %c0_16] : memref<1x128xf32, #tpu.memory_space<vmem>>, vector<1x128xf32>
    %29 = vector.broadcast %28 : vector<1x128xf32> to vector<16x128xf32>
    %30 = arith.mulf %27, %29 : vector<16x128xf32>
    %c0_17 = arith.constant 0 : index
    %c0_18 = arith.constant 0 : index
    %31 = vector.load %arg3[%c0_17, %c0_18] : memref<1x128xf32, #tpu.memory_space<vmem>>, vector<1x128xf32>
    %32 = vector.broadcast %31 : vector<1x128xf32> to vector<16x128xf32>
    %33 = arith.addf %30, %32 : vector<16x128xf32>
    %c0_19 = arith.constant 0 : index
    %c0_20 = arith.constant 0 : index
    %c0_21 = arith.constant 0 : index
    %34 = vector.load %arg6[%c0_19, %c0_20, %c0_21] : memref<4x4x16xf32, #tpu.memory_space<vmem>>, vector<1x4x16xf32>
    %35 = vector.shape_cast %34 : vector<1x4x16xf32> to vector<4x16xf32>
    %cst_22 = arith.constant dense<0.000000e+00> : vector<4x128xf32>
    %36 = tpu.matmul %35, %33, %cst_22 {dimension_numbers = #tpu.dot_dimension_numbers<[1], [0], [0], [1], [0, 0, 1, 1], [], []>} : vector<4x16xf32>, vector<16x128xf32>, vector<4x128xf32> -> vector<4x128xf32>
    %c1 = arith.constant 1 : index
    %c0_23 = arith.constant 0 : index
    %c0_24 = arith.constant 0 : index
    %37 = vector.load %arg6[%c1, %c0_23, %c0_24] : memref<4x4x16xf32, #tpu.memory_space<vmem>>, vector<1x4x16xf32>
    %38 = vector.shape_cast %37 : vector<1x4x16xf32> to vector<4x16xf32>
    %cst_25 = arith.constant dense<0.000000e+00> : vector<4x128xf32>
    %39 = tpu.matmul %38, %33, %cst_25 {dimension_numbers = #tpu.dot_dimension_numbers<[1], [0], [0], [1], [0, 0, 1, 1], [], []>} : vector<4x16xf32>, vector<16x128xf32>, vector<4x128xf32> -> vector<4x128xf32>
    %c2 = arith.constant 2 : index
    %c0_26 = arith.constant 0 : index
    %c0_27 = arith.constant 0 : index
    %40 = vector.load %arg6[%c2, %c0_26, %c0_27] : memref<4x4x16xf32, #tpu.memory_space<vmem>>, vector<1x4x16xf32>
    %41 = vector.shape_cast %40 : vector<1x4x16xf32> to vector<4x16xf32>
    %cst_28 = arith.constant dense<0.000000e+00> : vector<4x128xf32>
    %42 = tpu.matmul %41, %33, %cst_28 {dimension_numbers = #tpu.dot_dimension_numbers<[1], [0], [0], [1], [0, 0, 1, 1], [], []>} : vector<4x16xf32>, vector<16x128xf32>, vector<4x128xf32> -> vector<4x128xf32>
    %c3 = arith.constant 3 : index
    %c0_29 = arith.constant 0 : index
    %c0_30 = arith.constant 0 : index
    %43 = vector.load %arg6[%c3, %c0_29, %c0_30] : memref<4x4x16xf32, #tpu.memory_space<vmem>>, vector<1x4x16xf32>
    %44 = vector.shape_cast %43 : vector<1x4x16xf32> to vector<4x16xf32>
    %cst_31 = arith.constant dense<0.000000e+00> : vector<4x128xf32>
    %45 = tpu.matmul %44, %33, %cst_31 {dimension_numbers = #tpu.dot_dimension_numbers<[1], [0], [0], [1], [0, 0, 1, 1], [], []>} : vector<4x16xf32>, vector<16x128xf32>, vector<4x128xf32> -> vector<4x128xf32>
    %46 = arith.maximumf %36, %39 : vector<4x128xf32>
    %47 = arith.maximumf %42, %45 : vector<4x128xf32>
    %48 = arith.maximumf %46, %47 : vector<4x128xf32>
    %49 = arith.truncf %48 : vector<4x128xf32> to vector<4x128xbf16>
    %c0_32 = arith.constant 0 : index
    %c0_33 = arith.constant 0 : index
    %c0_34 = arith.constant 0 : index
    %50 = vector.load %arg7[%c0_32, %c0_33, %c0_34] : memref<1x4x128xbf16, #tpu.memory_space<vmem>>, vector<1x4x128xbf16>
    %51 = vector.shape_cast %50 : vector<1x4x128xbf16> to vector<4x128xbf16>
    %52 = vector.shape_cast %49 : vector<4x128xbf16> to vector<1x4x128xbf16>
    tpu.vector_store %arg7[%c0_32, %c0_33, %c0_34], %52 {strides = array<i32>} : memref<1x4x128xbf16, #tpu.memory_space<vmem>>, vector<1x4x128xbf16>,
    return
  }
  func.func @transform_0(%arg0: i32) -> (i32, i32, i32) {
    %c0_i32 = arith.constant 0 : i32
    %c0_i32_0 = arith.constant 0 : i32
    %c0_i32_1 = arith.constant 0 : i32
    return %arg0, %c0_i32, %c0_i32_0 : i32, i32, i32
  }
  func.func @transform_1(%arg0: i32) -> (i32, i32) {
    %c0_i32 = arith.constant 0 : i32
    %c0_i32_0 = arith.constant 0 : i32
    %c0_i32_1 = arith.constant 0 : i32
    return %c0_i32, %c0_i32_0 : i32, i32
  }
  func.func @transform_2(%arg0: i32) -> (i32, i32) {
    %c0_i32 = arith.constant 0 : i32
    %c0_i32_0 = arith.constant 0 : i32
    %c0_i32_1 = arith.constant 0 : i32
    return %c0_i32, %c0_i32_0 : i32, i32
  }
  func.func @transform_3(%arg0: i32) -> (i32, i32) {
    %c0_i32 = arith.constant 0 : i32
    %c0_i32_0 = arith.constant 0 : i32
    %c0_i32_1 = arith.constant 0 : i32
    return %c0_i32, %c0_i32_0 : i32, i32
  }
  func.func @transform_4(%arg0: i32) -> (i32, i32) {
    %c0_i32 = arith.constant 0 : i32
    %c0_i32_0 = arith.constant 0 : i32
    %c0_i32_1 = arith.constant 0 : i32
    return %c0_i32, %c0_i32_0 : i32, i32
  }
  func.func @transform_5(%arg0: i32) -> (i32, i32, i32) {
    %c0_i32 = arith.constant 0 : i32
    %c0_i32_0 = arith.constant 0 : i32
    %c0_i32_1 = arith.constant 0 : i32
    %c0_i32_2 = arith.constant 0 : i32
    return %c0_i32, %c0_i32_0, %c0_i32_1 : i32, i32, i32
  }
  func.func @transform_6(%arg0: i32) -> (i32, i32, i32) {
    %c0_i32 = arith.constant 0 : i32
    %c0_i32_0 = arith.constant 0 : i32
    %c0_i32_1 = arith.constant 0 : i32
    return %arg0, %c0_i32, %c0_i32_0 : i32, i32, i32
  }
}

module attributes {stable_mosaic.version = 11 : i64} {
  func.func @_conv_mm_kernel(%arg0: i32, %arg1: memref<8x1152xbf16, #tpu.memory_space<vmem>>, %arg2: memref<1152x128xbf16, #tpu.memory_space<vmem>>, %arg3: memref<1x128xf32, #tpu.memory_space<vmem>>, %arg4: memref<8x128xf32, #tpu.memory_space<vmem>>) attributes {dimension_semantics = [#tpu.dimension_semantics<parallel>], iteration_bounds = array<i64: 1>, scalar_prefetch = 0 : i64, scratch_operands = 0 : i64, tpu.core_type = #tpu.core_type<tc>, window_params = [{transform_indices = @transform_0, window_bounds = array<i64: 8, 1152>}, {pipeline_mode = #tpu.pipeline_mode<synchronous>, transform_indices = @transform_1, window_bounds = array<i64: 1152, 128>}, {pipeline_mode = #tpu.pipeline_mode<synchronous>, transform_indices = @transform_2, window_bounds = array<i64: 1, 128>}, {transform_indices = @transform_3, window_bounds = array<i64: 8, 128>}]} {
    %c0 = arith.constant 0 : index
    %c0_0 = arith.constant 0 : index
    %0 = vector.load %arg1[%c0, %c0_0] : memref<8x1152xbf16, #tpu.memory_space<vmem>>, vector<8x1152xbf16>
    %c0_1 = arith.constant 0 : index
    %c0_2 = arith.constant 0 : index
    %1 = vector.load %arg2[%c0_1, %c0_2] : memref<1152x128xbf16, #tpu.memory_space<vmem>>, vector<1152x128xbf16>
    %cst = arith.constant dense<0.000000e+00> : vector<8x128xf32>
    %2 = tpu.matmul %0, %1, %cst {dimension_numbers = #tpu.dot_dimension_numbers<[1], [0], [0], [1], [0, 0, 1, 1], [], []>} : vector<8x1152xbf16>, vector<1152x128xbf16>, vector<8x128xf32> -> vector<8x128xf32>
    %c0_3 = arith.constant 0 : index
    %c0_4 = arith.constant 0 : index
    %3 = vector.load %arg3[%c0_3, %c0_4] : memref<1x128xf32, #tpu.memory_space<vmem>>, vector<1x128xf32>
    %4 = vector.broadcast %3 : vector<1x128xf32> to vector<8x128xf32>
    %5 = arith.addf %2, %4 : vector<8x128xf32>
    %c0_5 = arith.constant 0 : index
    %c0_6 = arith.constant 0 : index
    %6 = vector.load %arg4[%c0_5, %c0_6] : memref<8x128xf32, #tpu.memory_space<vmem>>, vector<8x128xf32>
    tpu.vector_store %arg4[%c0_5, %c0_6], %5 {strides = array<i32>} : memref<8x128xf32, #tpu.memory_space<vmem>>, vector<8x128xf32>,
    return
  }
  func.func @transform_0(%arg0: i32) -> (i32, i32) {
    %c0_i32 = arith.constant 0 : i32
    %c0_i32_0 = arith.constant 0 : i32
    return %arg0, %c0_i32 : i32, i32
  }
  func.func @transform_1(%arg0: i32) -> (i32, i32) {
    %c0_i32 = arith.constant 0 : i32
    %c0_i32_0 = arith.constant 0 : i32
    %c0_i32_1 = arith.constant 0 : i32
    return %c0_i32, %c0_i32_0 : i32, i32
  }
  func.func @transform_2(%arg0: i32) -> (i32, i32) {
    %c0_i32 = arith.constant 0 : i32
    %c0_i32_0 = arith.constant 0 : i32
    %c0_i32_1 = arith.constant 0 : i32
    return %c0_i32, %c0_i32_0 : i32, i32
  }
  func.func @transform_3(%arg0: i32) -> (i32, i32) {
    %c0_i32 = arith.constant 0 : i32
    %c0_i32_0 = arith.constant 0 : i32
    return %arg0, %c0_i32 : i32, i32
  }
}

module attributes {stable_mosaic.version = 11 : i64} {
  func.func @_gn_pool_kernel(%arg0: i32, %arg1: memref<1x4x128xf32, #tpu.memory_space<vmem>>, %arg2: memref<1x128xf32, #tpu.memory_space<vmem>>, %arg3: memref<1x128xf32, #tpu.memory_space<vmem>>, %arg4: memref<128x16xf32, #tpu.memory_space<vmem>>, %arg5: memref<16x128xf32, #tpu.memory_space<vmem>>, %arg6: memref<4x1x4xf32, #tpu.memory_space<vmem>>, %arg7: memref<1x1x128xbf16, #tpu.memory_space<vmem>>) attributes {dimension_semantics = [#tpu.dimension_semantics<parallel>], iteration_bounds = array<i64: 2>, scalar_prefetch = 0 : i64, scratch_operands = 0 : i64, tpu.core_type = #tpu.core_type<tc>, window_params = [{transform_indices = @transform_0, window_bounds = array<i64: 1, 4, 128>}, {pipeline_mode = #tpu.pipeline_mode<synchronous>, transform_indices = @transform_1, window_bounds = array<i64: 1, 128>}, {pipeline_mode = #tpu.pipeline_mode<synchronous>, transform_indices = @transform_2, window_bounds = array<i64: 1, 128>}, {pipeline_mode = #tpu.pipeline_mode<synchronous>, transform_indices = @transform_3, window_bounds = array<i64: 128, 16>}, {pipeline_mode = #tpu.pipeline_mode<synchronous>, transform_indices = @transform_4, window_bounds = array<i64: 16, 128>}, {pipeline_mode = #tpu.pipeline_mode<synchronous>, transform_indices = @transform_5, window_bounds = array<i64: 4, 1, 4>}, {transform_indices = @transform_6, window_bounds = array<i64: 1, 1, 128>}]} {
    %c0 = arith.constant 0 : index
    %c0_0 = arith.constant 0 : index
    %c0_1 = arith.constant 0 : index
    %0 = vector.load %arg1[%c0, %c0_0, %c0_1] : memref<1x4x128xf32, #tpu.memory_space<vmem>>, vector<1x4x128xf32>
    %1 = vector.shape_cast %0 : vector<1x4x128xf32> to vector<4x128xf32>
    %c0_2 = arith.constant 0 : index
    %c0_3 = arith.constant 0 : index
    %2 = vector.load %arg4[%c0_2, %c0_3] : memref<128x16xf32, #tpu.memory_space<vmem>>, vector<128x16xf32>
    %c0_4 = arith.constant 0 : index
    %c0_5 = arith.constant 0 : index
    %3 = vector.load %arg5[%c0_4, %c0_5] : memref<16x128xf32, #tpu.memory_space<vmem>>, vector<16x128xf32>
    %cst = arith.constant dense<0.000000e+00> : vector<128xf32>
    %4 = vector.multi_reduction <add>, %1, %cst [0] : vector<4x128xf32> to vector<128xf32>
    %5 = vector.shape_cast %4 : vector<128xf32> to vector<1x128xf32>
    %6 = arith.mulf %1, %1 : vector<4x128xf32>
    %cst_6 = arith.constant dense<0.000000e+00> : vector<128xf32>
    %7 = vector.multi_reduction <add>, %6, %cst_6 [0] : vector<4x128xf32> to vector<128xf32>
    %8 = vector.shape_cast %7 : vector<128xf32> to vector<1x128xf32>
    %cst_7 = arith.constant dense<0.000000e+00> : vector<1x16xf32>
    %9 = tpu.matmul %5, %2, %cst_7 {dimension_numbers = #tpu.dot_dimension_numbers<[1], [0], [0], [1], [0, 0, 1, 1], [], []>} : vector<1x128xf32>, vector<128x16xf32>, vector<1x16xf32> -> vector<1x16xf32>
    %cst_8 = arith.constant dense<0.000000e+00> : vector<1x16xf32>
    %10 = tpu.matmul %8, %2, %cst_8 {dimension_numbers = #tpu.dot_dimension_numbers<[1], [0], [0], [1], [0, 0, 1, 1], [], []>} : vector<1x128xf32>, vector<128x16xf32>, vector<1x16xf32> -> vector<1x16xf32>
    %cst_9 = arith.constant 3.200000e+01 : f32
    %11 = vector.broadcast %cst_9 : f32 to vector<1x16xf32>
    %12 = arith.divf %9, %11 : vector<1x16xf32>
    %cst_10 = arith.constant 3.200000e+01 : f32
    %13 = vector.broadcast %cst_10 : f32 to vector<1x16xf32>
    %14 = arith.divf %10, %13 : vector<1x16xf32>
    %15 = arith.mulf %12, %12 : vector<1x16xf32>
    %16 = arith.subf %14, %15 : vector<1x16xf32>
    %cst_11 = arith.constant 0.000000e+00 : f32
    %17 = vector.broadcast %cst_11 : f32 to vector<1x16xf32>
    %18 = arith.maximumf %16, %17 : vector<1x16xf32>
    %cst_12 = arith.constant dense<0.000000e+00> : vector<1x128xf32>
    %19 = tpu.matmul %12, %3, %cst_12 {dimension_numbers = #tpu.dot_dimension_numbers<[1], [0], [0], [1], [0, 0, 1, 1], [], []>} : vector<1x16xf32>, vector<16x128xf32>, vector<1x128xf32> -> vector<1x128xf32>
    %cst_13 = arith.constant dense<0.000000e+00> : vector<1x128xf32>
    %20 = tpu.matmul %18, %3, %cst_13 {dimension_numbers = #tpu.dot_dimension_numbers<[1], [0], [0], [1], [0, 0, 1, 1], [], []>} : vector<1x16xf32>, vector<16x128xf32>, vector<1x128xf32> -> vector<1x128xf32>
    %cst_14 = arith.constant 9.99999974E-6 : f32
    %21 = vector.broadcast %cst_14 : f32 to vector<1x128xf32>
    %22 = arith.addf %20, %21 : vector<1x128xf32>
    %23 = math.rsqrt %22 : vector<1x128xf32>
    %24 = vector.broadcast %19 : vector<1x128xf32> to vector<4x128xf32>
    %25 = arith.subf %1, %24 : vector<4x128xf32>
    %26 = vector.broadcast %23 : vector<1x128xf32> to vector<4x128xf32>
    %27 = arith.mulf %25, %26 : vector<4x128xf32>
    %c0_15 = arith.constant 0 : index
    %c0_16 = arith.constant 0 : index
    %28 = vector.load %arg2[%c0_15, %c0_16] : memref<1x128xf32, #tpu.memory_space<vmem>>, vector<1x128xf32>
    %29 = vector.broadcast %28 : vector<1x128xf32> to vector<4x128xf32>
    %30 = arith.mulf %27, %29 : vector<4x128xf32>
    %c0_17 = arith.constant 0 : index
    %c0_18 = arith.constant 0 : index
    %31 = vector.load %arg3[%c0_17, %c0_18] : memref<1x128xf32, #tpu.memory_space<vmem>>, vector<1x128xf32>
    %32 = vector.broadcast %31 : vector<1x128xf32> to vector<4x128xf32>
    %33 = arith.addf %30, %32 : vector<4x128xf32>
    %c0_19 = arith.constant 0 : index
    %c0_20 = arith.constant 0 : index
    %c0_21 = arith.constant 0 : index
    %34 = vector.load %arg6[%c0_19, %c0_20, %c0_21] : memref<4x1x4xf32, #tpu.memory_space<vmem>>, vector<1x1x4xf32>
    %35 = vector.shape_cast %34 : vector<1x1x4xf32> to vector<1x4xf32>
    %cst_22 = arith.constant dense<0.000000e+00> : vector<1x128xf32>
    %36 = tpu.matmul %35, %33, %cst_22 {dimension_numbers = #tpu.dot_dimension_numbers<[1], [0], [0], [1], [0, 0, 1, 1], [], []>} : vector<1x4xf32>, vector<4x128xf32>, vector<1x128xf32> -> vector<1x128xf32>
    %c1 = arith.constant 1 : index
    %c0_23 = arith.constant 0 : index
    %c0_24 = arith.constant 0 : index
    %37 = vector.load %arg6[%c1, %c0_23, %c0_24] : memref<4x1x4xf32, #tpu.memory_space<vmem>>, vector<1x1x4xf32>
    %38 = vector.shape_cast %37 : vector<1x1x4xf32> to vector<1x4xf32>
    %cst_25 = arith.constant dense<0.000000e+00> : vector<1x128xf32>
    %39 = tpu.matmul %38, %33, %cst_25 {dimension_numbers = #tpu.dot_dimension_numbers<[1], [0], [0], [1], [0, 0, 1, 1], [], []>} : vector<1x4xf32>, vector<4x128xf32>, vector<1x128xf32> -> vector<1x128xf32>
    %c2 = arith.constant 2 : index
    %c0_26 = arith.constant 0 : index
    %c0_27 = arith.constant 0 : index
    %40 = vector.load %arg6[%c2, %c0_26, %c0_27] : memref<4x1x4xf32, #tpu.memory_space<vmem>>, vector<1x1x4xf32>
    %41 = vector.shape_cast %40 : vector<1x1x4xf32> to vector<1x4xf32>
    %cst_28 = arith.constant dense<0.000000e+00> : vector<1x128xf32>
    %42 = tpu.matmul %41, %33, %cst_28 {dimension_numbers = #tpu.dot_dimension_numbers<[1], [0], [0], [1], [0, 0, 1, 1], [], []>} : vector<1x4xf32>, vector<4x128xf32>, vector<1x128xf32> -> vector<1x128xf32>
    %c3 = arith.constant 3 : index
    %c0_29 = arith.constant 0 : index
    %c0_30 = arith.constant 0 : index
    %43 = vector.load %arg6[%c3, %c0_29, %c0_30] : memref<4x1x4xf32, #tpu.memory_space<vmem>>, vector<1x1x4xf32>
    %44 = vector.shape_cast %43 : vector<1x1x4xf32> to vector<1x4xf32>
    %cst_31 = arith.constant dense<0.000000e+00> : vector<1x128xf32>
    %45 = tpu.matmul %44, %33, %cst_31 {dimension_numbers = #tpu.dot_dimension_numbers<[1], [0], [0], [1], [0, 0, 1, 1], [], []>} : vector<1x4xf32>, vector<4x128xf32>, vector<1x128xf32> -> vector<1x128xf32>
    %46 = arith.maximumf %36, %39 : vector<1x128xf32>
    %47 = arith.maximumf %42, %45 : vector<1x128xf32>
    %48 = arith.maximumf %46, %47 : vector<1x128xf32>
    %49 = arith.truncf %48 : vector<1x128xf32> to vector<1x128xbf16>
    %c0_32 = arith.constant 0 : index
    %c0_33 = arith.constant 0 : index
    %c0_34 = arith.constant 0 : index
    %50 = vector.load %arg7[%c0_32, %c0_33, %c0_34] : memref<1x1x128xbf16, #tpu.memory_space<vmem>>, vector<1x1x128xbf16>
    %51 = vector.shape_cast %50 : vector<1x1x128xbf16> to vector<1x128xbf16>
    %52 = vector.shape_cast %49 : vector<1x128xbf16> to vector<1x1x128xbf16>
    tpu.vector_store %arg7[%c0_32, %c0_33, %c0_34], %52 {strides = array<i32>} : memref<1x1x128xbf16, #tpu.memory_space<vmem>>, vector<1x1x128xbf16>,
    return
  }
  func.func @transform_0(%arg0: i32) -> (i32, i32, i32) {
    %c0_i32 = arith.constant 0 : i32
    %c0_i32_0 = arith.constant 0 : i32
    %c0_i32_1 = arith.constant 0 : i32
    return %arg0, %c0_i32, %c0_i32_0 : i32, i32, i32
  }
  func.func @transform_1(%arg0: i32) -> (i32, i32) {
    %c0_i32 = arith.constant 0 : i32
    %c0_i32_0 = arith.constant 0 : i32
    %c0_i32_1 = arith.constant 0 : i32
    return %c0_i32, %c0_i32_0 : i32, i32
  }
  func.func @transform_2(%arg0: i32) -> (i32, i32) {
    %c0_i32 = arith.constant 0 : i32
    %c0_i32_0 = arith.constant 0 : i32
    %c0_i32_1 = arith.constant 0 : i32
    return %c0_i32, %c0_i32_0 : i32, i32
  }
  func.func @transform_3(%arg0: i32) -> (i32, i32) {
    %c0_i32 = arith.constant 0 : i32
    %c0_i32_0 = arith.constant 0 : i32
    %c0_i32_1 = arith.constant 0 : i32
    return %c0_i32, %c0_i32_0 : i32, i32
  }
  func.func @transform_4(%arg0: i32) -> (i32, i32) {
    %c0_i32 = arith.constant 0 : i32
    %c0_i32_0 = arith.constant 0 : i32
    %c0_i32_1 = arith.constant 0 : i32
    return %c0_i32, %c0_i32_0 : i32, i32
  }
  func.func @transform_5(%arg0: i32) -> (i32, i32, i32) {
    %c0_i32 = arith.constant 0 : i32
    %c0_i32_0 = arith.constant 0 : i32
    %c0_i32_1 = arith.constant 0 : i32
    %c0_i32_2 = arith.constant 0 : i32
    return %c0_i32, %c0_i32_0, %c0_i32_1 : i32, i32, i32
  }
  func.func @transform_6(%arg0: i32) -> (i32, i32, i32) {
    %c0_i32 = arith.constant 0 : i32
    %c0_i32_0 = arith.constant 0 : i32
    %c0_i32_1 = arith.constant 0 : i32
    return %arg0, %c0_i32, %c0_i32_0 : i32, i32, i32
  }
}

</mosaic_0001>

<bundles_post_ra>
// kernel: sepconvgru2_forward.12
= control target key start
LH: loop header
LB: loop body
LE: loop exit
PB: predicated region body
PF: predicated region fallthrough
CT: control target
= control target key end

     0   :  { %s5994_s24 = smov 0   ;;  %s7235_s0 = inlined_call_operand.vmem [shape: bf16[512,640], index: 0, kind: input, shape index: {}]   ;;  %s7236_s1 = inlined_call_operand.vmem [shape: bf16[512,640], index: 1, kind: input, shape index: {}]   ;;  %s7237_s2 = inlined_call_operand.vmem [shape: bf16[640,256], index: 2, kind: input, shape index: {}]   ;;  %s7238_s3 = inlined_call_operand.vmem [shape: bf16[640,256], index: 3, kind: input, shape index: {}]   ;;  %s7239_s4 = inlined_call_operand.vmem [shape: f32[1,256], index: 4, kind: input, shape index: {}]   ;;  %s7240_s5 = inlined_call_operand.vmem [shape: f32[512,128], index: 5, kind: input, shape index: {}]   ;;  %s7241_s6 = inlined_call_operand.vmem [shape: f32[512,128], index: 6, kind: output, shape index: {0}]   ;;  %s7242_s7 = inlined_call_operand.vmem [shape: bf16[512,128], index: 7, kind: output, shape index: {1}]  }
   0x1 LB: > { %s4319_s25 = sadd.s32 4294967295, %s5951_s24   ;;  %p4323_p0 = scmp.ge.s32.totalorder %s5951_s24, 1  ;;  %s5951_s24 = sphi %s5994_s24, %s18_s24  }
   0x2   : > { %p265_p1 = scmp.lt.s32.totalorder %s5951_s24, 3 }
   0x4   : > { %p266_p2 = pnand %p4323_p0, %p265_p1 }
   0x6   : > { %269 = sbr.rel (%p266_p2) target bundleno = 713 (0x2c9), region = 44 }
   0xd   : > { %v5225_v0 = vld [vmem:[%s7238_s3 + $0x4] ss:$8 sps:$4 sm:$0xff]   ;;  %v5953_v2 = vmov 0   ;;  %v5229_v3 = vld [vmem:[%s7238_s3] ss:$8 sps:$4 sm:$0xff]   ;;  %s4324_s21 = sshll.u32 %s4319_s25, 5 }
   0xe   : > { %v5227_v1 = vld [vmem:[%s7238_s3 + $0x204] ss:$8 sps:$4 sm:$0xff]   ;;  %1933 = vmatprep.mubr.bf16.mxu0 %v5953_v2  ;;  %1515 = vmatprep.subr.bf16.mxu1 %v5225_v0  ;;  %v5230_v4 = vld [vmem:[%s7238_s3 + $0x200] ss:$8 sps:$4 sm:$0xff]   ;;  %v5231_v5 = vld [vmem:[%s7238_s3 + $0x14] ss:$8 sps:$4 sm:$0xff]  }
   0xf   : > { %1901 = vmatprep.subr.bf16.mxu0 %v5227_v1  ;;  %1516 = vmatpush1.bf16.msra.mxu1 %v5229_v3  ;;  %v5233_v6 = vld [vmem:[%s7238_s3 + $0x214] ss:$8 sps:$4 sm:$0xff]   ;;  %v5235_v7 = vld [vmem:[%s7238_s3 + $0x10] ss:$8 sps:$4 sm:$0xff]   ;;  %v5237_v9 = vld [vmem:[%s7238_s3 + $0x24] ss:$8 sps:$4 sm:$0xff]  }
  0x10   : > { %1902 = vmatpush1.bf16.msra.mxu0 %v5230_v4  ;;  %1517 = vmatprep.subr.bf16.mxu1 %v5231_v5  ;;  %v5236_v8 = vld [vmem:[%s7238_s3 + $0x210] ss:$8 sps:$4 sm:$0xff]   ;;  %v5239_v10 = vld [vmem:[%s7238_s3 + $0x224] ss:$8 sps:$4 sm:$0xff]   ;;  %v5241_v11 = vld [vmem:[%s7238_s3 + $0x20] ss:$8 sps:$4 sm:$0xff]  }
  0x11   : > { %1903 = vmatprep.subr.bf16.mxu0 %v5233_v6  ;;  %v5242_v12 = vld [vmem:[%s7238_s3 + $0x220] ss:$8 sps:$4 sm:$0xff]   ;;  %v5243_v13 = vld [vmem:[%s7238_s3 + $0x34] ss:$8 sps:$4 sm:$0xff]   ;;  %p315_p3 = scmp.lt.s32.totalorder %s4324_s21, 63 }
  0x12   : > { %v5245_v14 = vld [vmem:[%s7238_s3 + $0x234] ss:$8 sps:$4 sm:$0xff]   ;;  %v5247_v15 = vld [vmem:[%s7238_s3 + $0x30] ss:$8 sps:$4 sm:$0xff]   ;;  %v5249_v17 = vld [vmem:[%s7238_s3 + $0x44] ss:$8 sps:$4 sm:$0xff]  }
  0x13   : > { %1518 = vmatpush1.bf16.msra.mxu1 %v5235_v7  ;;  %v5248_v16 = vld [vmem:[%s7238_s3 + $0x230] ss:$8 sps:$4 sm:$0xff]   ;;  %v5251_v18 = vld [vmem:[%s7238_s3 + $0x244] ss:$8 sps:$4 sm:$0xff]   ;;  %s7282_s21 = smov (!%p315_p3, %s4324_s21), 63 }
  0x14   : > { %1904 = vmatpush1.bf16.msra.mxu0 %v5236_v8  ;;  %1519 = vmatprep.subr.bf16.mxu1 %v5237_v9  ;;  %v5253_v19 = vld [vmem:[%s7238_s3 + $0x40] ss:$8 sps:$4 sm:$0xff]   ;;  %v5255_v21 = vld [vmem:[%s7238_s3 + $0x54] ss:$8 sps:$4 sm:$0xff]   ;;  %s5215_s29 = smul.u32 20, %s7282_s21  ;;  %s4329_s22 = sshll.u32 %s7282_s21, 3 }
  0x15   : > { %1905 = vmatprep.subr.bf16.mxu0 %v5239_v10  ;;  %v5254_v20 = vld [vmem:[%s7238_s3 + $0x240] ss:$8 sps:$4 sm:$0xff]   ;;  %v5257_v22 = vld [vmem:[%s7238_s3 + $0x254] ss:$8 sps:$4 sm:$0xff]   ;;  %v5259_v23 = vld [vmem:[%s7238_s3 + $0x50] ss:$8 sps:$4 sm:$0xff]   ;;  %s6934_s27 = scalar_lea.vmem %s7240_s5, %s4329_s22  ;;  %s6944_s8 = scalar_lea.vmem %s7241_s6, %s4329_s22 }
  0x16   : > { %v5260_v24 = vld [vmem:[%s7238_s3 + $0x250] ss:$8 sps:$4 sm:$0xff]   ;;  %v5261_v25 = vld [vmem:[%s7238_s3 + $0x64] ss:$8 sps:$4 sm:$0xff]   ;;  %s6089_s16 = scalar_lea.vmem %s7236_s1, %s5215_s29  ;;  %v5265_v27 = vld [vmem:[%s7238_s3 + $0x60] ss:$8 sps:$4 sm:$0xff]   ;;  %s6347_s14 = scalar_lea.vmem %s7235_s0, %s5215_s29 }
  0x17   : > { %1520 = vmatpush1.bf16.msra.mxu1 %v5241_v11  ;;  %v5263_v26 = vld [vmem:[%s7238_s3 + $0x264] ss:$8 sps:$4 sm:$0xff]   ;;  %v5266_v28 = vld [vmem:[%s7238_s3 + $0x260] ss:$8 sps:$4 sm:$0xff]   ;;  %v5267_v29 = vld [vmem:[%s7238_s3 + $0x74] ss:$8 sps:$4 sm:$0xff]  }
  0x18   : > { %1906 = vmatpush1.bf16.msra.mxu0 %v5242_v12  ;;  %1521 = vmatprep.subr.bf16.mxu1 %v5243_v13  ;;  %v5269_v30 = vld [vmem:[%s7238_s3 + $0x274] ss:$8 sps:$4 sm:$0xff]   ;;  %v5271_v31 = vld [vmem:[%s7238_s3 + $0x70] ss:$8 sps:$4 sm:$0xff]   ;;  %v5273_v33 = vld [vmem:[%s7238_s3 + $0x84] ss:$8 sps:$4 sm:$0xff]  }
  0x19   : > { %1907 = vmatprep.subr.bf16.mxu0 %v5245_v14  ;;  %v5272_v32 = vld [vmem:[%s7238_s3 + $0x270] ss:$8 sps:$4 sm:$0xff]   ;;  %v5278_v34 = vld [vmem:[%s7237_s2 + $0x4] ss:$8 sps:$4 sm:$0xff]   ;;  %v5276_v36 = vld [vmem:[%s7237_s2] ss:$8 sps:$4 sm:$0xff]  }
  0x1a   : > { %v5275_v35 = vld [vmem:[%s6089_s16 + $0x10] ss:$20 sps:$4 sm:$0xff]   ;;  %v5279_v37 = vld [vmem:[%s7238_s3 + $0x80] ss:$8 sps:$4 sm:$0xff]   ;;  %v5280_v38 = vld [vmem:[%s7238_s3 + $0x94] ss:$8 sps:$4 sm:$0xff]  }
  0x1b   : > { %1522 = vmatpush1.bf16.msra.mxu1 %v5247_v15  ;;  %v5282_v39 = vld [vmem:[%s7238_s3 + $0x90] ss:$8 sps:$4 sm:$0xff]   ;;  %v5288_v40 = vld [vmem:[%s7237_s2 + $0x14] ss:$8 sps:$4 sm:$0xff]   ;;  %v5283_v41 = vld [vmem:[%s7238_s3 + $0xa4] ss:$8 sps:$4 sm:$0xff]  }
  0x1c   : > { %1908 = vmatpush1.bf16.msra.mxu0 %v5248_v16  ;;  %1523 = vmatprep.subr.bf16.mxu1 %v5249_v17  ;;  %v5286_v42 = vld [vmem:[%s7237_s2 + $0x10] ss:$8 sps:$4 sm:$0xff]   ;;  %v5298_v43 = vld [vmem:[%s7237_s2 + $0x24] ss:$8 sps:$4 sm:$0xff]   ;;  %v5289_v45 = vld [vmem:[%s7238_s3 + $0xa0] ss:$8 sps:$4 sm:$0xff]  }
  0x1d   : > { %1909 = vmatprep.subr.bf16.mxu0 %v5251_v18  ;;  %v5285_v44 = vld [vmem:[%s6089_s16 + $0x38] ss:$20 sps:$4 sm:$0xff]   ;;  %v5290_v46 = vld [vmem:[%s7238_s3 + $0xb4] ss:$8 sps:$4 sm:$0xff]   ;;  %v5296_v47 = vld [vmem:[%s7237_s2 + $0x20] ss:$8 sps:$4 sm:$0xff]  }
  0x1e   : > { %v5308_v48 = vld [vmem:[%s7237_s2 + $0x34] ss:$8 sps:$4 sm:$0xff]   ;;  %v5315_v49 = vld [vmem:[%s6089_s16 + $0x4] ss:$20 sps:$4 sm:$0xff]   ;;  %v5299_v55 = vld [vmem:[%s7238_s3 + $0xc0] ss:$8 sps:$4 sm:$0xff]  }
  0x1f   : > { %1524 = vmatpush1.bf16.msra.mxu1 %v5253_v19  ;;  %v5292_v50 = vld [vmem:[%s7238_s3 + $0xb0] ss:$8 sps:$4 sm:$0xff]   ;;  %v5293_v51 = vld [vmem:[%s7238_s3 + $0xc4] ss:$8 sps:$4 sm:$0xff]   ;;  %1547 = vmatprep.mubr.bf16.mxu1 %v5315_v49  ;;  %v5295_v54 = vld [vmem:[%s6089_s16 + $0x60] ss:$20 sps:$4 sm:$0xff]  }
  0x20   : > { %1910 = vmatpush1.bf16.msra.mxu0 %v5254_v20  ;;  %1525 = vmatprep.subr.bf16.mxu1 %v5255_v21  ;;  %v5306_v52 = vld [vmem:[%s7237_s2 + $0x30] ss:$8 sps:$4 sm:$0xff]   ;;  %v5322_v53 = vld [vmem:[%s7237_s2 + $0x44] ss:$8 sps:$4 sm:$0xff]   ;;  %v5300_v56 = vld [vmem:[%s7238_s3 + $0xd4] ss:$8 sps:$4 sm:$0xff]  }
  0x21   : > { %1911 = vmatprep.subr.bf16.mxu0 %v5257_v22  ;;  %v5320_v57 = vld [vmem:[%s7237_s2 + $0x40] ss:$8 sps:$4 sm:$0xff]   ;;  %v5332_v58 = vld [vmem:[%s7237_s2 + $0x54] ss:$8 sps:$4 sm:$0xff]   ;;  %v5302_v59 = vld [vmem:[%s7238_s3 + $0xd0] ss:$8 sps:$4 sm:$0xff]  }
  0x22   : > { %v5303_v60 = vld [vmem:[%s7238_s3 + $0xe4] ss:$8 sps:$4 sm:$0xff]   ;;  %v5330_v61 = vld [vmem:[%s7237_s2 + $0x50] ss:$8 sps:$4 sm:$0xff]   ;;  %v5305_v62 = vld [vmem:[%s6089_s16 + $0x88] ss:$20 sps:$4 sm:$0xff]  }
  0x23   : > { %1526 = vmatpush1.bf16.msra.mxu1 %v5259_v23  ;;  %v5309_v63 = vld [vmem:[%s7238_s3 + $0xe0] ss:$8 sps:$4 sm:$0xff]   ;;  %v5342_v0 = vld [vmem:[%s7237_s2 + $0x64] ss:$8 sps:$4 sm:$0xff]   ;;  %v5310_v1 = vld [vmem:[%s7238_s3 + $0xf4] ss:$8 sps:$4 sm:$0xff]  }
  0x24   : > { %1912 = vmatpush1.bf16.msra.mxu0 %v5260_v24  ;;  %1527 = vmatprep.subr.bf16.mxu1 %v5261_v25  ;;  %v5340_v3 = vld [vmem:[%s7237_s2 + $0x60] ss:$8 sps:$4 sm:$0xff]   ;;  %v5312_v4 = vld [vmem:[%s7238_s3 + $0xf0] ss:$8 sps:$4 sm:$0xff]   ;;  %v5318_v5 = vld [vmem:[%s7238_s3 + $0x104] ss:$8 sps:$4 sm:$0xff]  }
  0x25   : > { %1913 = vmatprep.subr.bf16.mxu0 %v5263_v26  ;;  %v5350_v6 = vld [vmem:[%s7237_s2 + $0x70] ss:$8 sps:$4 sm:$0xff]   ;;  %v5352_v7 = vld [vmem:[%s7237_s2 + $0x74] ss:$8 sps:$4 sm:$0xff]   ;;  %v5316_v9 = vld [vmem:[%s7238_s3 + $0x100] ss:$8 sps:$4 sm:$0xff]  }
  0x26   : > { %v5313_v8 = vld [vmem:[%s6089_s16] ss:$20 sps:$4 sm:$0xff]   ;;  %v5319_v10 = vld [vmem:[%s6089_s16 + $0xb0] ss:$20 sps:$4 sm:$0xff]   ;;  %v5325_v16 = vld [vmem:[%s6089_s16 + $0x28] ss:$20 sps:$4 sm:$0xff]  }
  0x27   : > { %1528 = vmatpush1.bf16.msra.mxu1 %v5265_v27  ;;  %v5323_v11 = vld [vmem:[%s6089_s16 + $0x2c] ss:$20 sps:$4 sm:$0xff]   ;;  %v5328_v12 = vld [vmem:[%s7238_s3 + $0x114] ss:$8 sps:$4 sm:$0xff]   ;;  %v5326_v15 = vld [vmem:[%s7238_s3 + $0x110] ss:$8 sps:$4 sm:$0xff]  }
  0x28   : > { %1914 = vmatpush1.bf16.msra.mxu0 %v5266_v28  ;;  %1529 = vmatprep.subr.bf16.mxu1 %v5267_v29  ;;  %v5362_v13 = vld [vmem:[%s7237_s2 + $0x84] ss:$8 sps:$4 sm:$0xff]   ;;  %v5360_v14 = vld [vmem:[%s7237_s2 + $0x80] ss:$8 sps:$4 sm:$0xff]   ;;  %v5372_v19 = vld [vmem:[%s7237_s2 + $0x94] ss:$8 sps:$4 sm:$0xff]  }
  0x29   : > { %1915 = vmatprep.subr.bf16.mxu0 %v5269_v30  ;;  %v5338_v17 = vld [vmem:[%s7238_s3 + $0x124] ss:$8 sps:$4 sm:$0xff]   ;;  %v5333_v20 = vld [vmem:[%s6089_s16 + $0x54] ss:$20 sps:$4 sm:$0xff]   ;;  %v5370_v22 = vld [vmem:[%s7237_s2 + $0x90] ss:$8 sps:$4 sm:$0xff]  }
  0x2a   : > { %v5329_v18 = vld [vmem:[%s6089_s16 + $0xd8] ss:$20 sps:$4 sm:$0xff]   ;;  %v5336_v21 = vld [vmem:[%s7238_s3 + $0x120] ss:$8 sps:$4 sm:$0xff]   ;;  %v5348_v23 = vld [vmem:[%s7238_s3 + $0x134] ss:$8 sps:$4 sm:$0xff]  }
  0x2b   : > { %1530 = vmatpush1.bf16.msra.mxu1 %v5271_v31  ;;  %v5382_v24 = vld [vmem:[%s7237_s2 + $0xa4] ss:$8 sps:$4 sm:$0xff]   ;;  %v5346_v26 = vld [vmem:[%s7238_s3 + $0x130] ss:$8 sps:$4 sm:$0xff]   ;;  %v5380_v27 = vld [vmem:[%s7237_s2 + $0xa0] ss:$8 sps:$4 sm:$0xff]  }
  0x2c   : > { %1916 = vmatpush1.bf16.msra.mxu0 %v5272_v32  ;;  %1531 = vmatprep.subr.bf16.mxu1 %v5273_v33  ;;  %v5335_v25 = vld [vmem:[%s6089_s16 + $0x50] ss:$20 sps:$4 sm:$0xff]   ;;  %v5339_v28 = vld [vmem:[%s6089_s16 + $0x100] ss:$20 sps:$4 sm:$0xff]   ;;  %s4333_s25 = sshll.u32 %s7282_s21, 2 }
  0x2d   : > { %2910 = vmatprep.subr.bf16.mxu0 %v5278_v34  ;;  %v5358_v29 = vld [vmem:[%s7238_s3 + $0x144] ss:$8 sps:$4 sm:$0xff]   ;;  %v5343_v30 = vld [vmem:[%s6089_s16 + $0x7c] ss:$20 sps:$4 sm:$0xff]   ;;  %v5356_v31 = vld [vmem:[%s7238_s3 + $0x140] ss:$8 sps:$4 sm:$0xff]   ;;  %s6969_s10 = scalar_lea.vmem %s7242_s7, %s4333_s25 }
  0x2e   : > { %v5392_v32 = vld [vmem:[%s7237_s2 + $0xb4] ss:$8 sps:$4 sm:$0xff]   ;;  %v5390_v34 = vld [vmem:[%s7237_s2 + $0xb0] ss:$8 sps:$4 sm:$0xff]   ;;  %v5398_v49 = vld [vmem:[%s7238_s3 + $0x184] ss:$8 sps:$4 sm:$0xff]  }
  0x2f   : > { %1934 = vmatmul.mubr.bf16.vlgmr.msra.gmra.mrb[0].mxu0 %v5275_v35  ;;  %1532 = vmatpush1.bf16.msra.mxu1 %v5279_v37  ;;  %v5368_v33 = vld [vmem:[%s7238_s3 + $0x154] ss:$8 sps:$4 sm:$0xff]   ;;  %v5366_v35 = vld [vmem:[%s7238_s3 + $0x150] ss:$8 sps:$4 sm:$0xff]   ;;  %v5400_v37 = vld [vmem:[%s7237_s2 + $0xc0] ss:$8 sps:$4 sm:$0xff]  }
  0x30   : > { %2911 = vmatpush1.bf16.msra.mxu0 %v5276_v36  ;;  %1533 = vmatprep.subr.bf16.mxu1 %v5280_v38  ;;  %v5378_v36 = vld [vmem:[%s7238_s3 + $0x164] ss:$8 sps:$4 sm:$0xff]  }
  0x31   : > { %1943 = vmatprep.mubr.bf16.mxu0 %v5953_v2  ;;  %2912 = vmatprep.subr.bf16.mxu0 %v5288_v40  ;;  %v5402_v38 = vld [vmem:[%s7237_s2 + $0xc4] ss:$8 sps:$4 sm:$0xff]   ;;  %v5349_v40 = vld [vmem:[%s6089_s16 + $0x128] ss:$20 sps:$4 sm:$0xff]  }
  0x33   : > { %1534 = vmatpush1.bf16.msra.mxu1 %v5282_v39  ;;  %v5345_v39 = vld [vmem:[%s6089_s16 + $0x78] ss:$20 sps:$4 sm:$0xff]  }
  0x34   : > { %2913 = vmatpush1.bf16.msra.mxu0 %v5286_v42  ;;  %1535 = vmatprep.subr.bf16.mxu1 %v5283_v41  ;;  %v5353_v41 = vld [vmem:[%s6089_s16 + $0xa4] ss:$20 sps:$4 sm:$0xff]   ;;  %v5376_v42 = vld [vmem:[%s7238_s3 + $0x160] ss:$8 sps:$4 sm:$0xff]  }
  0x35   : > { %2914 = vmatprep.subr.bf16.mxu0 %v5298_v43  ;;  %v5388_v43 = vld [vmem:[%s7238_s3 + $0x174] ss:$8 sps:$4 sm:$0xff]  }
  0x37   : > { %1944 = vmatmul.mubr.bf16.gmra.mrb[4].mxu0 %v5285_v44  ;;  %1536 = vmatpush1.bf16.msra.mxu1 %v5289_v45  ;;  %v5410_v44 = vld [vmem:[%s7237_s2 + $0xd0] ss:$8 sps:$4 sm:$0xff]   ;;  %v5412_v45 = vld [vmem:[%s7237_s2 + $0xd4] ss:$8 sps:$4 sm:$0xff]  }
  0x38   : > { %1953 = vmatprep.mubr.bf16.mxu0 %v5953_v2  ;;  %1537 = vmatprep.subr.bf16.mxu1 %v5290_v46  ;;  %v5355_v46 = vld [vmem:[%s6089_s16 + $0xa0] ss:$20 sps:$4 sm:$0xff]  }
  0x39   : > { %2915 = vmatpush1.bf16.msra.mxu0 %v5296_v47  ;;  %v5359_v47 = vld [vmem:[%s6089_s16 + $0x150] ss:$20 sps:$4 sm:$0xff]  }
  0x3a   : > { %2916 = vmatprep.subr.bf16.mxu0 %v5308_v48  ;;  %v5386_v48 = vld [vmem:[%s7238_s3 + $0x170] ss:$8 sps:$4 sm:$0xff]  }
  0x3b   : > { %1538 = vmatpush1.bf16.msra.mxu1 %v5292_v50  ;;  %v5363_v50 = vld [vmem:[%s6089_s16 + $0xcc] ss:$20 sps:$4 sm:$0xff]  }
  0x3c   : > { %1539 = vmatprep.subr.bf16.mxu1 %v5293_v51  ;;  %v5422_v51 = vld [vmem:[%s7237_s2 + $0xe4] ss:$8 sps:$4 sm:$0xff]  }
  0x3d   : > { %2917 = vmatpush1.bf16.msra.mxu0 %v5306_v52  ;;  %v5396_v52 = vld [vmem:[%s7238_s3 + $0x180] ss:$8 sps:$4 sm:$0xff]  }
  0x3e   : > { %2918 = vmatprep.subr.bf16.mxu0 %v5322_v53  ;;  %v5420_v53 = vld [vmem:[%s7237_s2 + $0xe0] ss:$8 sps:$4 sm:$0xff]  }
  0x3f   : > { %1954 = vmatmul.mubr.bf16.gmra.mrb[8].mxu0 %v5295_v54  ;;  %1540 = vmatpush1.bf16.msra.mxu1 %v5299_v55  ;;  %v5408_v54 = vld [vmem:[%s7238_s3 + $0x194] ss:$8 sps:$4 sm:$0xff]   ;;  %v5406_v55 = vld [vmem:[%s7238_s3 + $0x190] ss:$8 sps:$4 sm:$0xff]  }
  0x40   : > { %1963 = vmatprep.mubr.bf16.mxu0 %v5953_v2  ;;  %1541 = vmatprep.subr.bf16.mxu1 %v5300_v56  ;;  %v5430_v56 = vld [vmem:[%s7237_s2 + $0xf0] ss:$8 sps:$4 sm:$0xff]  }
  0x41   : > { %2919 = vmatpush1.bf16.msra.mxu0 %v5320_v57  ;;  %v5432_v57 = vld [vmem:[%s7237_s2 + $0xf4] ss:$8 sps:$4 sm:$0xff]  }
  0x42   : > { %2920 = vmatprep.subr.bf16.mxu0 %v5332_v58  ;;  %v5418_v58 = vld [vmem:[%s7238_s3 + $0x1a4] ss:$8 sps:$4 sm:$0xff]  }
  0x43   : > { %1542 = vmatpush1.bf16.msra.mxu1 %v5302_v59  ;;  %v5365_v59 = vld [vmem:[%s6089_s16 + $0xc8] ss:$20 sps:$4 sm:$0xff]  }
  0x44   : > { %1543 = vmatprep.subr.bf16.mxu1 %v5303_v60  ;;  %v5369_v60 = vld [vmem:[%s6089_s16 + $0x178] ss:$20 sps:$4 sm:$0xff]  }
  0x45   : > { %2921 = vmatpush1.bf16.msra.mxu0 %v5330_v61  ;;  %v5373_v61 = vld [vmem:[%s6089_s16 + $0xf4] ss:$20 sps:$4 sm:$0xff]  }
  0x46   : > { %2922 = vmatprep.subr.bf16.mxu0 %v5342_v0  ;;  %v5444_v0 = vld [vmem:[%s7237_s2 + $0x104] ss:$8 sps:$4 sm:$0xff]  }
  0x47   : > { %1964 = vmatmul.mubr.bf16.gmra.mrb[12].mxu0 %v5305_v62  ;;  %1544 = vmatpush1.bf16.msra.mxu1 %v5309_v63  ;;  %v5416_v62 = vld [vmem:[%s7238_s3 + $0x1a0] ss:$8 sps:$4 sm:$0xff]   ;;  %v5428_v63 = vld [vmem:[%s7238_s3 + $0x1b4] ss:$8 sps:$4 sm:$0xff]  }
  0x48   : > { %1973 = vmatprep.mubr.bf16.mxu0 %v5953_v2  ;;  %1545 = vmatprep.subr.bf16.mxu1 %v5310_v1  ;;  %v5426_v1 = vld [vmem:[%s7238_s3 + $0x1b0] ss:$8 sps:$4 sm:$0xff]  }
  0x49   : > { %2923 = vmatpush1.bf16.msra.mxu0 %v5340_v3  ;;  %v5441_v3 = vld [vmem:[%s7238_s3 + $0x1c4] ss:$8 sps:$4 sm:$0xff]  }
  0x4a   : > { %2924 = vmatprep.subr.bf16.mxu0 %v5352_v7  ;;  %v5439_v7 = vld [vmem:[%s7238_s3 + $0x1c0] ss:$8 sps:$4 sm:$0xff]  }
  0x4b   : > { %1546 = vmatpush1.bf16.msra.mxu1 %v5312_v4  ;;  %v5375_v4 = vld [vmem:[%s6089_s16 + $0xf0] ss:$20 sps:$4 sm:$0xff]  }
  0x4c   : > { %1708 = vmatprep.subr.bf16.mxu1 %v5318_v5  ;;  %v5379_v5 = vld [vmem:[%s6089_s16 + $0x1a0] ss:$20 sps:$4 sm:$0xff]  }
  0x4d   : > { %2925 = vmatpush1.bf16.msra.mxu0 %v5350_v6  ;;  %v5383_v6 = vld [vmem:[%s6089_s16 + $0x11c] ss:$20 sps:$4 sm:$0xff]  }
  0x4e   : > { %1548 = vmatmul.mubr.bf16.vlgmr.msra.gmra.mrb[0].mxu1 %v5313_v8  ;;  %2926 = vmatprep.subr.bf16.mxu0 %v5362_v13  ;;  %v5452_v8 = vld [vmem:[%s7238_s3 + $0x1d4] ss:$8 sps:$4 sm:$0xff]   ;;  %v5393_v13 = vld [vmem:[%s6089_s16 + $0x144] ss:$20 sps:$4 sm:$0xff]  }
  0x4f   : > { %1974 = vmatmul.mubr.bf16.gmra.mrb[16].mxu0 %v5319_v10  ;;  %1709 = vmatpush1.bf16.msra.mxu1 %v5316_v9  ;;  %v5450_v9 = vld [vmem:[%s7238_s3 + $0x1d0] ss:$8 sps:$4 sm:$0xff]   ;;  %v5464_v10 = vld [vmem:[%s7238_s3 + $0x1e4] ss:$8 sps:$4 sm:$0xff]  }
  0x50   : > { %1557 = vmatprep.mubr.bf16.mxu1 %v5323_v11  ;;  %1983 = vmatprep.mubr.bf16.mxu0 %v5953_v2  ;;  %v5385_v11 = vld [vmem:[%s6089_s16 + $0x118] ss:$20 sps:$4 sm:$0xff]  }
  0x51   : > { %1710 = vmatprep.subr.bf16.mxu1 %v5328_v12  ;;  %2927 = vmatpush1.bf16.msra.mxu0 %v5360_v14  ;;  %v5389_v12 = vld [vmem:[%s6089_s16 + $0x1c8] ss:$20 sps:$4 sm:$0xff]  }
  0x52   : > { %2928 = vmatprep.subr.bf16.mxu0 %v5372_v19  ;;  %v5462_v14 = vld [vmem:[%s7238_s3 + $0x1e0] ss:$8 sps:$4 sm:$0xff]   ;;  %v6405_v19 = vld [vmem:[%s7237_s2 + $0x204] ss:$8 sps:$4 sm:$0xff]  }
  0x53   : > { %1711 = vmatpush1.bf16.msra.mxu1 %v5326_v15  ;;  %v5476_v15 = vld [vmem:[%s7238_s3 + $0x1f4] ss:$8 sps:$4 sm:$0xff]  }
  0x54   : > { %1712 = vmatprep.subr.bf16.mxu1 %v5338_v17  ;;  %v5395_v17 = vld [vmem:[%s6089_s16 + $0x140] ss:$20 sps:$4 sm:$0xff]  }
  0x55   : > { %2929 = vmatpush1.bf16.msra.mxu0 %v5370_v22  ;;  %v5409_v22 = vld [vmem:[%s6089_s16 + $0x218] ss:$20 sps:$4 sm:$0xff]  }
  0x56   : > { %1558 = vmatmul.mubr.bf16.gmra.mrb[4].mxu1 %v5325_v16  ;;  %2930 = vmatprep.subr.bf16.mxu0 %v5382_v24  ;;  %v5474_v16 = vld [vmem:[%s7238_s3 + $0x1f0] ss:$8 sps:$4 sm:$0xff]  }
  0x57   : > { %1984 = vmatmul.mubr.bf16.gmra.mrb[20].mxu0 %v5329_v18  ;;  %1567 = vmatprep.mubr.bf16.mxu1 %v5333_v20  ;;  %v5399_v18 = vld [vmem:[%s6089_s16 + $0x1f0] ss:$20 sps:$4 sm:$0xff]   ;;  %v5403_v20 = vld [vmem:[%s6089_s16 + $0x16c] ss:$20 sps:$4 sm:$0xff]  }
  0x58   : > { %1993 = vmatprep.mubr.bf16.mxu0 %v5953_v2  ;;  %1713 = vmatpush1.bf16.msra.mxu1 %v5336_v21  ;;  %v5405_v21 = vld [vmem:[%s6089_s16 + $0x168] ss:$20 sps:$4 sm:$0xff]   ;;  %v5415_v24 = vld [vmem:[%s6089_s16 + $0x190] ss:$20 sps:$4 sm:$0xff]  }
  0x59   : > { %1714 = vmatprep.subr.bf16.mxu1 %v5348_v23  ;;  %2931 = vmatpush1.bf16.msra.mxu0 %v5380_v27  ;;  %v5413_v23 = vld [vmem:[%s6089_s16 + $0x194] ss:$20 sps:$4 sm:$0xff]   ;;  %v5425_v27 = vld [vmem:[%s6089_s16 + $0x1b8] ss:$20 sps:$4 sm:$0xff]  }
  0x5a   : > { %2932 = vmatprep.subr.bf16.mxu0 %v5392_v32  ;;  %v5438_v32 = vld [vmem:[%s6089_s16 + $0x1e0] ss:$20 sps:$4 sm:$0xff]  }
  0x5c   : > { %1715 = vmatpush1.bf16.msra.mxu1 %v5346_v26  ;;  %v5423_v26 = vld [vmem:[%s6089_s16 + $0x1bc] ss:$20 sps:$4 sm:$0xff]  }
  0x5d   : > { %1716 = vmatprep.subr.bf16.mxu1 %v5358_v29  ;;  %2933 = vmatpush1.bf16.msra.mxu0 %v5390_v34  ;;  %v5433_v29 = vld [vmem:[%s6089_s16 + $0x1e4] ss:$20 sps:$4 sm:$0xff]   ;;  %v5445_v34 = vld [vmem:[%s6089_s16 + $0x20c] ss:$20 sps:$4 sm:$0xff]  }
  0x5e   : > { %1568 = vmatmul.mubr.bf16.gmra.mrb[8].mxu1 %v5335_v25  ;;  %2934 = vmatprep.subr.bf16.mxu0 %v5402_v38  ;;  %v5419_v25 = vld [vmem:[%s6089_s16 + $0x240] ss:$20 sps:$4 sm:$0xff]   ;;  %v5468_v38 = vld [vmem:[%s7237_s2 + $0x124] ss:$8 sps:$4 sm:$0xff]  }
  0x5f   : > { %1994 = vmatmul.mubr.bf16.gmra.mrb[24].mxu0 %v5339_v28  ;;  %1577 = vmatprep.mubr.bf16.mxu1 %v5343_v30  ;;  %v5429_v28 = vld [vmem:[%s6089_s16 + $0x268] ss:$20 sps:$4 sm:$0xff]   ;;  %v5437_v30 = vld [vmem:[%s6347_s14 + $0x4] ss:$20 sps:$4 sm:$0xff]  }
  0x60   : > { %2003 = vmatprep.mubr.bf16.mxu0 %v5953_v2  ;;  %1717 = vmatpush1.bf16.msra.mxu1 %v5356_v31  ;;  %v5435_v31 = vld [vmem:[%s6347_s14] ss:$20 sps:$4 sm:$0xff]  }
  0x61   : > { %1718 = vmatprep.subr.bf16.mxu1 %v5368_v33  ;;  %2935 = vmatpush1.bf16.msra.mxu0 %v5400_v37  ;;  %v5442_v33 = vld [vmem:[%s7237_s2 + $0x100] ss:$8 sps:$4 sm:$0xff]   ;;  %v5454_v37 = vld [vmem:[%s7237_s2 + $0x110] ss:$8 sps:$4 sm:$0xff]  }
  0x62   : > { %2936 = vmatprep.subr.bf16.mxu0 %v5412_v45  ;;  %v5478_v45 = vld [vmem:[%s7237_s2 + $0x130] ss:$8 sps:$4 sm:$0xff]  }
  0x64   : > { %1719 = vmatpush1.bf16.msra.mxu1 %v5366_v35  ;;  %v5447_v35 = vld [vmem:[%s6347_s14 + $0x2c] ss:$20 sps:$4 sm:$0xff]  }
  0x65   : > { %1720 = vmatprep.subr.bf16.mxu1 %v5378_v36  ;;  %2937 = vmatpush1.bf16.msra.mxu0 %v5410_v44  ;;  %v5456_v36 = vld [vmem:[%s7237_s2 + $0x114] ss:$8 sps:$4 sm:$0xff]  }
  0x66   : > { %1578 = vmatmul.mubr.bf16.gmra.mrb[12].mxu1 %v5345_v39  ;;  %2938 = vmatprep.subr.bf16.mxu0 %v5422_v51  ;;  %v5449_v39 = vld [vmem:[%s6089_s16 + $0x208] ss:$20 sps:$4 sm:$0xff]  }
  0x67   : > { %2004 = vmatmul.mubr.bf16.gmra.mrb[28].mxu0 %v5349_v40  ;;  %1587 = vmatprep.mubr.bf16.mxu1 %v5353_v41  ;;  %v5453_v40 = vld [vmem:[%s6347_s14 + $0x28] ss:$20 sps:$4 sm:$0xff]  }
  0x68   : > { %2013 = vmatprep.mubr.bf16.mxu0 %v5953_v2  ;;  %1721 = vmatpush1.bf16.msra.mxu1 %v5376_v42  ;;  %v5457_v41 = vld [vmem:[%s6089_s16 + $0x234] ss:$20 sps:$4 sm:$0xff]  }
  0x69   : > { %1722 = vmatprep.subr.bf16.mxu1 %v5388_v43  ;;  %2939 = vmatpush1.bf16.msra.mxu0 %v5420_v53  ;;  %v5459_v42 = vld [vmem:[%s6347_s14 + $0x54] ss:$20 sps:$4 sm:$0xff]   ;;  %v5499_v53 = vld [vmem:[%s7237_s2 + $0x150] ss:$8 sps:$4 sm:$0xff]  }
  0x6a   : > { %2940 = vmatprep.subr.bf16.mxu0 %v5432_v57  ;;  %v5466_v43 = vld [vmem:[%s7237_s2 + $0x120] ss:$8 sps:$4 sm:$0xff]   ;;  %v5480_v44 = vld [vmem:[%s7237_s2 + $0x134] ss:$8 sps:$4 sm:$0xff]  }
  0x6b   : > { %v5487_v51 = vld [vmem:[%s7237_s2 + $0x140] ss:$8 sps:$4 sm:$0xff]  }
  0x6c   : > { %1723 = vmatpush1.bf16.msra.mxu1 %v5386_v48  ;;  %v5465_v48 = vld [vmem:[%s6347_s14 + $0x50] ss:$20 sps:$4 sm:$0xff]   ;;  %v5483_v57 = vld [vmem:[%s6089_s16 + $0xc] ss:$20 sps:$4 sm:$0xff]  }
  0x6d   : > { %1724 = vmatprep.subr.bf16.mxu1 %v5398_v49  ;;  %2941 = vmatpush1.bf16.msra.mxu0 %v5430_v56  ;;  %v5469_v49 = vld [vmem:[%s6089_s16 + $0x25c] ss:$20 sps:$4 sm:$0xff]   ;;  %v5477_v56 = vld [vmem:[%s6347_s14 + $0x78] ss:$20 sps:$4 sm:$0xff]  }
  0x6e   : > { %1588 = vmatmul.mubr.bf16.gmra.mrb[16].mxu1 %v5355_v46  ;;  %3103 = vmatprep.subr.bf16.mxu0 %v5444_v0  ;;  %v5461_v46 = vld [vmem:[%s6089_s16 + $0x230] ss:$20 sps:$4 sm:$0xff]   ;;  %v5486_v0 = vld [vmem:[%s6347_s14 + $0xa0] ss:$20 sps:$4 sm:$0xff]  }
  0x6f   : > { %2014 = vmatmul.mubr.bf16.gmra.mrb[32].mxu0 %v5359_v47  ;;  %1597 = vmatprep.mubr.bf16.mxu1 %v5363_v50  ;;  %v5489_v47 = vld [vmem:[%s7237_s2 + $0x144] ss:$8 sps:$4 sm:$0xff]   ;;  %v5471_v50 = vld [vmem:[%s6347_s14 + $0x7c] ss:$20 sps:$4 sm:$0xff]  }
  0x70   : > { %2023 = vmatprep.mubr.bf16.mxu0 %v5953_v2  ;;  %1725 = vmatpush1.bf16.msra.mxu1 %v5396_v52  ;;  %v5501_v52 = vld [vmem:[%s7237_s2 + $0x154] ss:$8 sps:$4 sm:$0xff]  }
  0x71   : > { %1726 = vmatprep.subr.bf16.mxu1 %v5408_v54  ;;  %v5473_v54 = vld [vmem:[%s6089_s16 + $0x258] ss:$20 sps:$4 sm:$0xff]  }
  0x74   : > { %1727 = vmatpush1.bf16.msra.mxu1 %v5406_v55  ;;  %v5510_v55 = vld [vmem:[%s7237_s2 + $0x164] ss:$8 sps:$4 sm:$0xff]  }
  0x75   : > { %1728 = vmatprep.subr.bf16.mxu1 %v5418_v58  ;;  %v5484_v58 = vld [vmem:[%s6347_s14 + $0xa4] ss:$20 sps:$4 sm:$0xff]  }
  0x76   : > { %1598 = vmatmul.mubr.bf16.gmra.mrb[20].mxu1 %v5365_v59  ;;  %v5508_v59 = vld [vmem:[%s7237_s2 + $0x160] ss:$8 sps:$4 sm:$0xff]  }
  0x77   : > { %2024 = vmatmul.mubr.bf16.gmra.mrb[36].mxu0 %v5369_v60  ;;  %1607 = vmatprep.mubr.bf16.mxu1 %v5373_v61  ;;  %v5522_v60 = vld [vmem:[%s7237_s2 + $0x174] ss:$8 sps:$4 sm:$0xff]  }
  0x78   : > { %2033 = vmatprep.mubr.bf16.mxu0 %v5953_v2  ;;  %1729 = vmatpush1.bf16.msra.mxu1 %v5416_v62  ;;  %v5481_v61 = vld [vmem:[%s6089_s16 + $0x8] ss:$20 sps:$4 sm:$0xff]   ;;  %v5520_v62 = vld [vmem:[%s7237_s2 + $0x170] ss:$8 sps:$4 sm:$0xff]  }
  0x79   : > { %1730 = vmatprep.subr.bf16.mxu1 %v5428_v63  ;;  %v5531_v63 = vld [vmem:[%s7237_s2 + $0x184] ss:$8 sps:$4 sm:$0xff]  }
  0x7c   : > { %1731 = vmatpush1.bf16.msra.mxu1 %v5426_v1  ;;  %v6491_v1 = vld [vmem:[%s7237_s2 + $0x200] ss:$8 sps:$4 sm:$0xff]  }
  0x7d   : > { %1732 = vmatprep.subr.bf16.mxu1 %v5441_v3  ;;  %v5493_v3 = vld [vmem:[%s6089_s16 + $0x34] ss:$20 sps:$4 sm:$0xff]  }
  0x7e   : > { %1608 = vmatmul.mubr.bf16.gmra.mrb[24].mxu1 %v5375_v4  ;;  %v5495_v4 = vld [vmem:[%s6347_s14 + $0xcc] ss:$20 sps:$4 sm:$0xff]  }
  0x7f   : > { %2034 = vmatmul.mubr.bf16.gmra.mrb[40].mxu0 %v5379_v5  ;;  %1617 = vmatprep.mubr.bf16.mxu1 %v5383_v6  ;;  %v6498_v5 = vld [vmem:[%s7237_s2 + $0x214] ss:$8 sps:$4 sm:$0xff]   ;;  %v6503_v6 = vld [vmem:[%s7237_s2 + $0x210] ss:$8 sps:$4 sm:$0xff]  }
  0x80   : > { %2043 = vmatprep.mubr.bf16.mxu0 %v5953_v2  ;;  %1733 = vmatpush1.bf16.msra.mxu1 %v5439_v7  ;;  %v5529_v7 = vld [vmem:[%s7237_s2 + $0x180] ss:$8 sps:$4 sm:$0xff]  }
  0x81   : > { %1734 = vmatprep.subr.bf16.mxu1 %v5452_v8  ;;  %v6511_v8 = vld [vmem:[%s7237_s2 + $0x224] ss:$8 sps:$4 sm:$0xff]  }
  0x84   : > { %1735 = vmatpush1.bf16.msra.mxu1 %v5450_v9  ;;  %v5543_v9 = vld [vmem:[%s7237_s2 + $0x194] ss:$8 sps:$4 sm:$0xff]  }
  0x85   : > { %1736 = vmatprep.subr.bf16.mxu1 %v5464_v10  ;;  %v5541_v10 = vld [vmem:[%s7237_s2 + $0x190] ss:$8 sps:$4 sm:$0xff]  }
  0x86   : > { %1618 = vmatmul.mubr.bf16.gmra.mrb[28].mxu1 %v5385_v11  ;;  %v5497_v11 = vld [vmem:[%s6089_s16 + $0x30] ss:$20 sps:$4 sm:$0xff]  }
  0x87   : > { %2044 = vmatmul.mubr.bf16.gmra.mrb[44].mxu0 %v5389_v12  ;;  %1627 = vmatprep.mubr.bf16.mxu1 %v5393_v13  ;;  %v5498_v12 = vld [vmem:[%s6347_s14 + $0xc8] ss:$20 sps:$4 sm:$0xff]  }
  0x88   : > { %2053 = vmatprep.mubr.bf16.mxu0 %v5953_v2  ;;  %1737 = vmatpush1.bf16.msra.mxu1 %v5462_v14  ;;  %v5502_v13 = vld [vmem:[%s6089_s16 + $0x5c] ss:$20 sps:$4 sm:$0xff]   ;;  %v5504_v14 = vld [vmem:[%s6347_s14 + $0xf4] ss:$20 sps:$4 sm:$0xff]  }
  0x89   : > { %1738 = vmatprep.subr.bf16.mxu1 %v5476_v15  ;;  %v6528_v15 = vld [vmem:[%s7237_s2 + $0x220] ss:$8 sps:$4 sm:$0xff]  }
  0x8c   : > { %1739 = vmatpush1.bf16.msra.mxu1 %v5474_v16  ;;  %v5552_v16 = vld [vmem:[%s7237_s2 + $0x1a4] ss:$8 sps:$4 sm:$0xff]  }
  0x8d   : > { %4879 = vmatprep.subr.bf16.mxu1 %v6405_v19 }
  0x8e   : > { %1628 = vmatmul.mubr.bf16.gmra.mrb[32].mxu1 %v5395_v17  ;;  %v5550_v17 = vld [vmem:[%s7237_s2 + $0x1a0] ss:$8 sps:$4 sm:$0xff]  }
  0x8f   : > { %2054 = vmatmul.mubr.bf16.gmra.mrb[48].mxu0 %v5399_v18  ;;  %1637 = vmatprep.mubr.bf16.mxu1 %v5403_v20  ;;  %v6541_v18 = vld [vmem:[%s7237_s2 + $0x234] ss:$8 sps:$4 sm:$0xff]   ;;  %v6546_v20 = vld [vmem:[%s7237_s2 + $0x230] ss:$8 sps:$4 sm:$0xff]  }
  0x90   : > { %2063 = vmatprep.mubr.bf16.mxu0 %v5953_v2 }
  0x96   : > { %1638 = vmatmul.mubr.bf16.gmra.mrb[36].mxu1 %v5405_v21  ;;  %v5564_v21 = vld [vmem:[%s7237_s2 + $0x1b4] ss:$8 sps:$4 sm:$0xff]  }
  0x97   : > { %2064 = vmatmul.mubr.bf16.gmra.mrb[52].mxu0 %v5409_v22  ;;  %1647 = vmatprep.mubr.bf16.mxu1 %v5413_v23  ;;  %v5562_v22 = vld [vmem:[%s7237_s2 + $0x1b0] ss:$8 sps:$4 sm:$0xff]   ;;  %v6557_v23 = vld [vmem:[%s7237_s2 + $0x244] ss:$8 sps:$4 sm:$0xff]  }
  0x98   : > { %2073 = vmatprep.mubr.bf16.mxu0 %v5953_v2 }
  0x9e   : > { %1648 = vmatmul.mubr.bf16.gmra.mrb[40].mxu1 %v5415_v24  ;;  %v5506_v24 = vld [vmem:[%s6089_s16 + $0x58] ss:$20 sps:$4 sm:$0xff]  }
  0x9f   : > { %2074 = vmatmul.mubr.bf16.gmra.mrb[56].mxu0 %v5419_v25  ;;  %1657 = vmatprep.mubr.bf16.mxu1 %v5423_v26  ;;  %v5507_v25 = vld [vmem:[%s6347_s14 + $0xf0] ss:$20 sps:$4 sm:$0xff]  }
  0xa0   : > { %2083 = vmatprep.mubr.bf16.mxu0 %v5953_v2  ;;  %v5514_v26 = vld [vmem:[%s6089_s16 + $0x84] ss:$20 sps:$4 sm:$0xff]  }
  0xa6   : > { %1658 = vmatmul.mubr.bf16.gmra.mrb[44].mxu1 %v5425_v27  ;;  %v5516_v27 = vld [vmem:[%s6347_s14 + $0x11c] ss:$20 sps:$4 sm:$0xff]  }
  0xa7   : > { %2084 = vmatmul.mubr.bf16.gmra.mrb[60].mxu0 %v5429_v28  ;;  %1667 = vmatprep.mubr.bf16.mxu1 %v5433_v29  ;;  %v5573_v28 = vld [vmem:[%s7237_s2 + $0x1c4] ss:$8 sps:$4 sm:$0xff]   ;;  %v6571_v29 = vld [vmem:[%s7237_s2 + $0x240] ss:$8 sps:$4 sm:$0xff]  }
  0xa8   : > { %2942 = vmatprep.mubr.bf16.mxu0 %v5437_v30  ;;  %v5571_v30 = vld [vmem:[%s7237_s2 + $0x1c0] ss:$8 sps:$4 sm:$0xff]  }
  0xae   : > { %1668 = vmatmul.mubr.bf16.gmra.mrb[48].mxu1 %v5438_v32  ;;  %v5585_v32 = vld [vmem:[%s7237_s2 + $0x1d4] ss:$8 sps:$4 sm:$0xff]  }
  0xaf   : > { %2943 = vmatmul.mubr.bf16.vlgmr.msra.gmra.mrb[0].mxu0 %v5435_v31  ;;  %1677 = vmatprep.mubr.bf16.mxu1 %v5445_v34  ;;  %v6580_v31 = vld [vmem:[%s7237_s2 + $0x254] ss:$8 sps:$4 sm:$0xff]   ;;  %v5583_v34 = vld [vmem:[%s7237_s2 + $0x1d0] ss:$8 sps:$4 sm:$0xff]  }
  0xb0   : > { %3104 = vmatpush1.bf16.msra.mxu0 %v5442_v33  ;;  %2952 = vmatprep.mubr.bf16.mxu0 %v5447_v35  ;;  %v6589_v33 = vld [vmem:[%s7237_s2 + $0x250] ss:$8 sps:$4 sm:$0xff]   ;;  %v6599_v35 = vld [vmem:[%s7237_s2 + $0x264] ss:$8 sps:$4 sm:$0xff]  }
  0xb1   : > { %3105 = vmatprep.subr.bf16.mxu0 %v5456_v36  ;;  %v5518_v36 = vld [vmem:[%s6089_s16 + $0x80] ss:$20 sps:$4 sm:$0xff]  }
  0xb4   : > { %3106 = vmatpush1.bf16.msra.mxu0 %v5454_v37  ;;  %v5519_v37 = vld [vmem:[%s6347_s14 + $0x118] ss:$20 sps:$4 sm:$0xff]  }
  0xb5   : > { %3107 = vmatprep.subr.bf16.mxu0 %v5468_v38  ;;  %v5523_v38 = vld [vmem:[%s6089_s16 + $0xac] ss:$20 sps:$4 sm:$0xff]  }
  0xb6   : > { %1678 = vmatmul.mubr.bf16.gmra.mrb[52].mxu1 %v5449_v39  ;;  %v5525_v39 = vld [vmem:[%s6347_s14 + $0x144] ss:$20 sps:$4 sm:$0xff]  }
  0xb7   : > { %2953 = vmatmul.mubr.bf16.gmra.mrb[4].mxu0 %v5453_v40  ;;  %1687 = vmatprep.mubr.bf16.mxu1 %v5457_v41  ;;  %v5594_v40 = vld [vmem:[%s7237_s2 + $0x1e4] ss:$8 sps:$4 sm:$0xff]   ;;  %v6612_v41 = vld [vmem:[%s7237_s2 + $0x260] ss:$8 sps:$4 sm:$0xff]  }
  0xb8   : > { %2962 = vmatprep.mubr.bf16.mxu0 %v5459_v42  ;;  %3108 = vmatpush1.bf16.msra.mxu0 %v5466_v43  ;;  %v5592_v42 = vld [vmem:[%s7237_s2 + $0x1e0] ss:$8 sps:$4 sm:$0xff]   ;;  %v6621_v43 = vld [vmem:[%s7237_s2 + $0x274] ss:$8 sps:$4 sm:$0xff]  }
  0xb9   : > { %3109 = vmatprep.subr.bf16.mxu0 %v5480_v44  ;;  %v5606_v44 = vld [vmem:[%s7237_s2 + $0x1f4] ss:$8 sps:$4 sm:$0xff]  }
  0xbc   : > { %3110 = vmatpush1.bf16.msra.mxu0 %v5478_v45  ;;  %v6630_v45 = vld [vmem:[%s7237_s2 + $0x270] ss:$8 sps:$4 sm:$0xff]  }
  0xbd   : > { %3111 = vmatprep.subr.bf16.mxu0 %v5489_v47  ;;  %v5527_v47 = vld [vmem:[%s6089_s16 + $0xa8] ss:$20 sps:$4 sm:$0xff]  }
  0xbe   : > { %1688 = vmatmul.mubr.bf16.gmra.mrb[56].mxu1 %v5461_v46  ;;  %v5604_v46 = vld [vmem:[%s7237_s2 + $0x1f0] ss:$8 sps:$4 sm:$0xff]  }
  0xbf   : > { %2963 = vmatmul.mubr.bf16.gmra.mrb[8].mxu0 %v5465_v48  ;;  %1697 = vmatprep.mubr.bf16.mxu1 %v5469_v49  ;;  %v5528_v48 = vld [vmem:[%s6347_s14 + $0x140] ss:$20 sps:$4 sm:$0xff]  }
  0xc0   : > { %2972 = vmatprep.mubr.bf16.mxu0 %v5471_v50  ;;  %3112 = vmatpush1.bf16.msra.mxu0 %v5487_v51  ;;  %v5535_v49 = vld [vmem:[%s6089_s16 + $0xd4] ss:$20 sps:$4 sm:$0xff]   ;;  %v5537_v50 = vld [vmem:[%s6347_s14 + $0x16c] ss:$20 sps:$4 sm:$0xff]   ;;  %v5539_v51 = vld [vmem:[%s6089_s16 + $0xd0] ss:$20 sps:$4 sm:$0xff]  }
  0xc1   : > { %3113 = vmatprep.subr.bf16.mxu0 %v5501_v52  ;;  %v5540_v52 = vld [vmem:[%s6347_s14 + $0x168] ss:$20 sps:$4 sm:$0xff]  }
  0xc4   : > { %3114 = vmatpush1.bf16.msra.mxu0 %v5499_v53  ;;  %v5544_v53 = vld [vmem:[%s6089_s16 + $0xfc] ss:$20 sps:$4 sm:$0xff]  }
  0xc5   : > { %3115 = vmatprep.subr.bf16.mxu0 %v5510_v55  ;;  %v5548_v55 = vld [vmem:[%s6089_s16 + $0xf8] ss:$20 sps:$4 sm:$0xff]  }
  0xc6   : > { %1698 = vmatmul.mubr.bf16.gmra.mrb[60].mxu1 %v5473_v54  ;;  %v5546_v54 = vld [vmem:[%s6347_s14 + $0x194] ss:$20 sps:$4 sm:$0xff]  }
  0xc7   : > { %2973 = vmatmul.mubr.bf16.gmra.mrb[12].mxu0 %v5477_v56  ;;  %1740 = vmatprep.mubr.bf16.mxu1 %v5483_v57  ;;  %v5549_v56 = vld [vmem:[%s6347_s14 + $0x190] ss:$20 sps:$4 sm:$0xff]  }
  0xc8   : > { %2982 = vmatprep.mubr.bf16.mxu0 %v5484_v58  ;;  %3116 = vmatpush1.bf16.msra.mxu0 %v5508_v59  ;;  %v5556_v57 = vld [vmem:[%s6089_s16 + $0x124] ss:$20 sps:$4 sm:$0xff]   ;;  %v5558_v58 = vld [vmem:[%s6347_s14 + $0x1bc] ss:$20 sps:$4 sm:$0xff]  }
  0xc9   : > { %3117 = vmatprep.subr.bf16.mxu0 %v5522_v60  ;;  %v5561_v59 = vld [vmem:[%s6347_s14 + $0x1b8] ss:$20 sps:$4 sm:$0xff]  }
  0xca   : > { %v5565_v60 = vld [vmem:[%s6089_s16 + $0x14c] ss:$20 sps:$4 sm:$0xff]  }
  0xcc   : > { %3118 = vmatpush1.bf16.msra.mxu0 %v5520_v62  ;;  %v5569_v62 = vld [vmem:[%s6089_s16 + $0x148] ss:$20 sps:$4 sm:$0xff]  }
  0xcd   : > { %3119 = vmatprep.subr.bf16.mxu0 %v5531_v63  ;;  %v5570_v63 = vld [vmem:[%s6347_s14 + $0x1e0] ss:$20 sps:$4 sm:$0xff]  }
  0xce   : > { %1741 = vmatmul.mubr.bf16.vlgmr.msra.gmra.mrb[0].mxu1 %v5481_v61  ;;  %v5567_v61 = vld [vmem:[%s6347_s14 + $0x1e4] ss:$20 sps:$4 sm:$0xff]  }
  0xcf   : > { %2983 = vmatmul.mubr.bf16.gmra.mrb[16].mxu0 %v5486_v0  ;;  %4887 = vmatpush1.bf16.msra.mxu1 %v6491_v1  ;;  %v5577_v0 = vld [vmem:[%s6089_s16 + $0x174] ss:$20 sps:$4 sm:$0xff]  }
  0xd0   : > { %1750 = vmatprep.mubr.bf16.mxu1 %v5493_v3  ;;  %2992 = vmatprep.mubr.bf16.mxu0 %v5495_v4  ;;  %v5579_v3 = vld [vmem:[%s6347_s14 + $0x20c] ss:$20 sps:$4 sm:$0xff]   ;;  %v5581_v4 = vld [vmem:[%s6089_s16 + $0x170] ss:$20 sps:$4 sm:$0xff]  }
  0xd1   : > { %4880 = vmatprep.subr.bf16.mxu1 %v6498_v5  ;;  %3120 = vmatpush1.bf16.msra.mxu0 %v5529_v7  ;;  %v5582_v7 = vld [vmem:[%s6347_s14 + $0x208] ss:$20 sps:$4 sm:$0xff]  }
  0xd2   : > { %3121 = vmatprep.subr.bf16.mxu0 %v5543_v9  ;;  %v5586_v9 = vld [vmem:[%s6089_s16 + $0x19c] ss:$20 sps:$4 sm:$0xff]  }
  0xd3   : > { %4888 = vmatpush1.bf16.msra.mxu1 %v6503_v6 }
  0xd4   : > { %4881 = vmatprep.subr.bf16.mxu1 %v6511_v8 }
  0xd5   : > { %3122 = vmatpush1.bf16.msra.mxu0 %v5541_v10  ;;  %v5588_v10 = vld [vmem:[%s6347_s14 + $0x234] ss:$20 sps:$4 sm:$0xff]  }
  0xd6   : > { %1751 = vmatmul.mubr.bf16.gmra.mrb[4].mxu1 %v5497_v11  ;;  %3123 = vmatprep.subr.bf16.mxu0 %v5552_v16  ;;  %v5590_v11 = vld [vmem:[%s6089_s16 + $0x198] ss:$20 sps:$4 sm:$0xff]   ;;  %v5602_v16 = vld [vmem:[%s6089_s16 + $0x1c0] ss:$20 sps:$4 sm:$0xff]  }
  0xd7   : > { %2993 = vmatmul.mubr.bf16.gmra.mrb[20].mxu0 %v5498_v12  ;;  %1760 = vmatprep.mubr.bf16.mxu1 %v5502_v13  ;;  %v5591_v12 = vld [vmem:[%s6347_s14 + $0x230] ss:$20 sps:$4 sm:$0xff]  }
  0xd8   : > { %3002 = vmatprep.mubr.bf16.mxu0 %v5504_v14  ;;  %4889 = vmatpush1.bf16.msra.mxu1 %v6528_v15  ;;  %v5598_v13 = vld [vmem:[%s6089_s16 + $0x1c4] ss:$20 sps:$4 sm:$0xff]   ;;  %v5600_v14 = vld [vmem:[%s6347_s14 + $0x25c] ss:$20 sps:$4 sm:$0xff]  }
  0xd9   : > { %4882 = vmatprep.subr.bf16.mxu1 %v6541_v18  ;;  %3124 = vmatpush1.bf16.msra.mxu0 %v5550_v17  ;;  %v5603_v17 = vld [vmem:[%s6347_s14 + $0x258] ss:$20 sps:$4 sm:$0xff]  }
  0xda   : > { %3125 = vmatprep.subr.bf16.mxu0 %v5564_v21  ;;  %v5607_v21 = vld [vmem:[%s6089_s16 + $0x1ec] ss:$20 sps:$4 sm:$0xff]  }
  0xdc   : > { %4890 = vmatpush1.bf16.msra.mxu1 %v6546_v20 }
  0xdd   : > { %3126 = vmatpush1.bf16.msra.mxu0 %v5562_v22  ;;  %4883 = vmatprep.subr.bf16.mxu1 %v6557_v23  ;;  %v5611_v22 = vld [vmem:[%s6347_s14 + $0xc] ss:$20 sps:$4 sm:$0xff]  }
  0xde   : > { %1761 = vmatmul.mubr.bf16.gmra.mrb[8].mxu1 %v5506_v24  ;;  %3127 = vmatprep.subr.bf16.mxu0 %v5573_v28  ;;  %v5609_v24 = vld [vmem:[%s6347_s14 + $0x8] ss:$20 sps:$4 sm:$0xff]   ;;  %v5620_v28 = vld [vmem:[%s6089_s16 + $0x210] ss:$20 sps:$4 sm:$0xff]  }
  0xdf   : > { %3003 = vmatmul.mubr.bf16.gmra.mrb[24].mxu0 %v5507_v25  ;;  %1770 = vmatprep.mubr.bf16.mxu1 %v5514_v26  ;;  %v5612_v25 = vld [vmem:[%s6089_s16 + $0x1e8] ss:$20 sps:$4 sm:$0xff]  }
  0xe0   : > { %3012 = vmatprep.mubr.bf16.mxu0 %v5516_v27  ;;  %4891 = vmatpush1.bf16.msra.mxu1 %v6571_v29  ;;  %v5616_v26 = vld [vmem:[%s6089_s16 + $0x214] ss:$20 sps:$4 sm:$0xff]  }
  0xe1   : > { %3128 = vmatpush1.bf16.msra.mxu0 %v5571_v30  ;;  %4884 = vmatprep.subr.bf16.mxu1 %v6580_v31  ;;  %v5618_v27 = vld [vmem:[%s6347_s14 + $0x34] ss:$20 sps:$4 sm:$0xff]   ;;  %v5621_v30 = vld [vmem:[%s6347_s14 + $0x30] ss:$20 sps:$4 sm:$0xff]  }
  0xe2   : > { %3129 = vmatprep.subr.bf16.mxu0 %v5585_v32  ;;  %v5622_v32 = vld [vmem:[%s6089_s16 + $0x23c] ss:$20 sps:$4 sm:$0xff]  }
  0xe4   : > { %4892 = vmatpush1.bf16.msra.mxu1 %v6589_v33 }
  0xe5   : > { %3130 = vmatpush1.bf16.msra.mxu0 %v5583_v34  ;;  %4885 = vmatprep.subr.bf16.mxu1 %v6599_v35  ;;  %v5624_v34 = vld [vmem:[%s6347_s14 + $0x5c] ss:$20 sps:$4 sm:$0xff]  }
  0xe6   : > { %1771 = vmatmul.mubr.bf16.gmra.mrb[12].mxu1 %v5518_v36  ;;  %3131 = vmatprep.subr.bf16.mxu0 %v5594_v40  ;;  %v5631_v36 = vld [vmem:[%s6089_s16 + $0x264] ss:$20 sps:$4 sm:$0xff]   ;;  %v5651_v40 = vld [vmem:[%s6347_s14 + $0x120] ss:$20 sps:$4 sm:$0xff]  }
  0xe7   : > { %3013 = vmatmul.mubr.bf16.gmra.mrb[28].mxu0 %v5519_v37  ;;  %1780 = vmatprep.mubr.bf16.mxu1 %v5523_v38  ;;  %v5633_v37 = vld [vmem:[%s6347_s14 + $0x84] ss:$20 sps:$4 sm:$0xff]  }
  0xe8   : > { %3022 = vmatprep.mubr.bf16.mxu0 %v5525_v39  ;;  %4893 = vmatpush1.bf16.msra.mxu1 %v6612_v41  ;;  %v5648_v38 = vld [vmem:[%s6347_s14 + $0xb0] ss:$20 sps:$4 sm:$0xff]  }
  0xe9   : > { %3132 = vmatpush1.bf16.msra.mxu0 %v5592_v42  ;;  %4886 = vmatprep.subr.bf16.mxu1 %v6621_v43  ;;  %v5649_v39 = vld [vmem:[%s6347_s14 + $0x124] ss:$20 sps:$4 sm:$0xff]   ;;  %v5653_v42 = vld [vmem:[%s6347_s14 + $0x14c] ss:$20 sps:$4 sm:$0xff]  }
  0xea   : > { %3133 = vmatprep.subr.bf16.mxu0 %v5606_v44  ;;  %v5656_v44 = vld [vmem:[%s6347_s14 + $0x100] ss:$20 sps:$4 sm:$0xff]  }
  0xec   : > { %4894 = vmatpush1.bf16.msra.mxu1 %v6630_v45 }
  0xed   : > { %3134 = vmatpush1.bf16.msra.mxu0 %v5604_v46  ;;  %v5659_v46 = vld [vmem:[%s6347_s14 + $0x170] ss:$20 sps:$4 sm:$0xff]  }
  0xee   : > { %1781 = vmatmul.mubr.bf16.gmra.mrb[16].mxu1 %v5527_v47  ;;  %3296 = vmatprep.subr.bf16.mxu0 %v6405_v19  ;;  %v5560_v19 = vld [vmem:[%s6089_s16 + $0x120] ss:$20 sps:$4 sm:$0xff]   ;;  %v5660_v47 = vld [vmem:[%s6347_s14 + $0x128] ss:$20 sps:$4 sm:$0xff]  }
  0xef   : > { %3023 = vmatmul.mubr.bf16.gmra.mrb[32].mxu0 %v5528_v48  ;;  %1790 = vmatprep.mubr.bf16.mxu1 %v5535_v49  ;;  %v5661_v48 = vld [vmem:[%s6347_s14 + $0x19c] ss:$20 sps:$4 sm:$0xff]   ;;  %v5663_v49 = vld [vmem:[%s6347_s14 + $0x198] ss:$20 sps:$4 sm:$0xff]  }
  0xf0   : > { %3032 = vmatprep.mubr.bf16.mxu0 %v5537_v50  ;;  %v5664_v50 = vld [vmem:[%s6347_s14 + $0x150] ss:$20 sps:$4 sm:$0xff]  }
  0xf6   : > { %1791 = vmatmul.mubr.bf16.gmra.mrb[20].mxu1 %v5539_v51  ;;  %v5665_v51 = vld [vmem:[%s6347_s14 + $0x1c4] ss:$20 sps:$4 sm:$0xff]  }
  0xf7   : > { %3033 = vmatmul.mubr.bf16.gmra.mrb[36].mxu0 %v5540_v52  ;;  %1800 = vmatprep.mubr.bf16.mxu1 %v5544_v53  ;;  %v5667_v52 = vld [vmem:[%s6347_s14 + $0x1c0] ss:$20 sps:$4 sm:$0xff]   ;;  %v5668_v53 = vld [vmem:[%s6347_s14 + $0x178] ss:$20 sps:$4 sm:$0xff]  }
  0xf8   : > { %3042 = vmatprep.mubr.bf16.mxu0 %v5546_v54  ;;  %v5669_v54 = vld [vmem:[%s6347_s14 + $0x1ec] ss:$20 sps:$4 sm:$0xff]  }
  0xfe   : > { %1801 = vmatmul.mubr.bf16.gmra.mrb[24].mxu1 %v5548_v55  ;;  %v5671_v55 = vld [vmem:[%s6347_s14 + $0x1e8] ss:$20 sps:$4 sm:$0xff]  }
  0xff   : > { %3043 = vmatmul.mubr.bf16.gmra.mrb[40].mxu0 %v5549_v56  ;;  %1810 = vmatprep.mubr.bf16.mxu1 %v5556_v57  ;;  %v5672_v56 = vld [vmem:[%s6347_s14 + $0x1a0] ss:$20 sps:$4 sm:$0xff]  }
 0x100   : > { %3052 = vmatprep.mubr.bf16.mxu0 %v5558_v58  ;;  %v5673_v57 = vld [vmem:[%s6347_s14 + $0x214] ss:$20 sps:$4 sm:$0xff]   ;;  %v5675_v58 = vld [vmem:[%s6347_s14 + $0x210] ss:$20 sps:$4 sm:$0xff]  }
 0x106   : > { %1811 = vmatmul.mubr.bf16.gmra.mrb[28].mxu1 %v5560_v19  ;;  %v5676_v19 = vld [vmem:[%s6347_s14 + $0x1c8] ss:$20 sps:$4 sm:$0xff]  }
 0x107   : > { %3053 = vmatmul.mubr.bf16.gmra.mrb[44].mxu0 %v5561_v59  ;;  %1820 = vmatprep.mubr.bf16.mxu1 %v5565_v60  ;;  %v5677_v59 = vld [vmem:[%s6347_s14 + $0x23c] ss:$20 sps:$4 sm:$0xff]   ;;  %v5679_v60 = vld [vmem:[%s6347_s14 + $0x238] ss:$20 sps:$4 sm:$0xff]  }
 0x108   : > { %3062 = vmatprep.mubr.bf16.mxu0 %v5567_v61  ;;  %v5680_v61 = vld [vmem:[%s6347_s14 + $0x1f0] ss:$20 sps:$4 sm:$0xff]  }
 0x10e   : > { %1821 = vmatmul.mubr.bf16.gmra.mrb[32].mxu1 %v5569_v62  ;;  %v5681_v62 = vld [vmem:[%s6347_s14 + $0x264] ss:$20 sps:$4 sm:$0xff]  }
 0x10f   : > { %3063 = vmatmul.mubr.bf16.gmra.mrb[48].mxu0 %v5570_v63  ;;  %1830 = vmatprep.mubr.bf16.mxu1 %v5577_v0 }
 0x110   : > { %3072 = vmatprep.mubr.bf16.mxu0 %v5579_v3  ;;  %v5683_v3 = vld [vmem:[%s6347_s14 + $0x260] ss:$20 sps:$4 sm:$0xff]  }
 0x116   : > { %1831 = vmatmul.mubr.bf16.gmra.mrb[36].mxu1 %v5581_v4  ;;  %v5684_v4 = vld [vmem:[%s6347_s14 + $0x218] ss:$20 sps:$4 sm:$0xff]  }
 0x117   : > { %3073 = vmatmul.mubr.bf16.gmra.mrb[52].mxu0 %v5582_v7  ;;  %1840 = vmatprep.mubr.bf16.mxu1 %v5586_v9 }
 0x118   : > { %3082 = vmatprep.mubr.bf16.mxu0 %v5588_v10 }
 0x11e   : > { %1841 = vmatmul.mubr.bf16.gmra.mrb[40].mxu1 %v5590_v11 }
 0x11f   : > { %3083 = vmatmul.mubr.bf16.gmra.mrb[56].mxu0 %v5591_v12  ;;  %1850 = vmatprep.mubr.bf16.mxu1 %v5598_v13  ;;  %v5685_v12 = vld [vmem:[%s6347_s14 + $0x10] ss:$20 sps:$4 sm:$0xff]   ;;  %v5686_v13 = vld [vmem:[%s6347_s14 + $0x240] ss:$20 sps:$4 sm:$0xff]  }
 0x120   : > { %3092 = vmatprep.mubr.bf16.mxu0 %v5600_v14 }
 0x126   : > { %1851 = vmatmul.mubr.bf16.gmra.mrb[44].mxu1 %v5602_v16 }
 0x127   : > { %3093 = vmatmul.mubr.bf16.gmra.mrb[60].mxu0 %v5603_v17  ;;  %1860 = vmatprep.mubr.bf16.mxu1 %v5607_v21 }
 0x128   : > { %3135 = vmatprep.mubr.bf16.mxu0 %v5611_v22  ;;  %v5687_v22 = vld [vmem:[%s6347_s14 + $0x38] ss:$20 sps:$4 sm:$0xff]  }
 0x12e   : > { %1861 = vmatmul.mubr.bf16.gmra.mrb[48].mxu1 %v5612_v25 }
 0x12f   : > { %3136 = vmatmul.mubr.bf16.vlgmr.msra.gmra.mrb[0].mxu0 %v5609_v24  ;;  %1870 = vmatprep.mubr.bf16.mxu1 %v5616_v26  ;;  %v5688_v24 = vld [vmem:[%s6347_s14 + $0x268] ss:$20 sps:$4 sm:$0xff]  }
 0x130   : > { %3297 = vmatpush1.bf16.msra.mxu0 %v6491_v1  ;;  %3145 = vmatprep.mubr.bf16.mxu0 %v5618_v27  ;;  %v5626_v1 = vld [vmem:[%s6089_s16 + $0x238] ss:$20 sps:$4 sm:$0xff]  }
 0x131   : > { %3298 = vmatprep.subr.bf16.mxu0 %v6498_v5  ;;  %v5627_v5 = vld [vmem:[%s6347_s14 + $0x58] ss:$20 sps:$4 sm:$0xff]  }
 0x134   : > { %3299 = vmatpush1.bf16.msra.mxu0 %v6503_v6  ;;  %v5635_v6 = vld [vmem:[%s6089_s16 + $0x260] ss:$20 sps:$4 sm:$0xff]  }
 0x135   : > { %3300 = vmatprep.subr.bf16.mxu0 %v6511_v8  ;;  %v5636_v8 = vld [vmem:[%s6347_s14 + $0x80] ss:$20 sps:$4 sm:$0xff]  }
 0x136   : > { %1871 = vmatmul.mubr.bf16.gmra.mrb[52].mxu1 %v5620_v28 }
 0x137   : > { %3146 = vmatmul.mubr.bf16.gmra.mrb[4].mxu0 %v5621_v30  ;;  %1880 = vmatprep.mubr.bf16.mxu1 %v5622_v32 }
 0x138   : > { %3155 = vmatprep.mubr.bf16.mxu0 %v5624_v34  ;;  %3301 = vmatpush1.bf16.msra.mxu0 %v6528_v15  ;;  %v5637_v15 = vld [vmem:[%s6347_s14 + $0xac] ss:$20 sps:$4 sm:$0xff]  }
 0x139   : > { %3302 = vmatprep.subr.bf16.mxu0 %v6541_v18  ;;  %v5639_v18 = vld [vmem:[%s6347_s14 + $0xa8] ss:$20 sps:$4 sm:$0xff]  }
 0x13c   : > { %3303 = vmatpush1.bf16.msra.mxu0 %v6546_v20  ;;  %v5640_v20 = vld [vmem:[%s6347_s14 + $0x60] ss:$20 sps:$4 sm:$0xff]  }
 0x13d   : > { %3304 = vmatprep.subr.bf16.mxu0 %v6557_v23  ;;  %v5641_v23 = vld [vmem:[%s6347_s14 + $0xd4] ss:$20 sps:$4 sm:$0xff]  }
 0x13e   : > { %1881 = vmatmul.mubr.bf16.gmra.mrb[56].mxu1 %v5626_v1 }
 0x13f   : > { %3156 = vmatmul.mubr.bf16.gmra.mrb[8].mxu0 %v5627_v5  ;;  %1890 = vmatprep.mubr.bf16.mxu1 %v5631_v36 }
 0x140   : > { %3165 = vmatprep.mubr.bf16.mxu0 %v5633_v37  ;;  %3305 = vmatpush1.bf16.msra.mxu0 %v6571_v29  ;;  %v5643_v29 = vld [vmem:[%s6347_s14 + $0xd0] ss:$20 sps:$4 sm:$0xff]  }
 0x141   : > { %3306 = vmatprep.subr.bf16.mxu0 %v6580_v31  ;;  %v5644_v31 = vld [vmem:[%s6347_s14 + $0x88] ss:$20 sps:$4 sm:$0xff]  }
 0x144   : > { %3307 = vmatpush1.bf16.msra.mxu0 %v6589_v33  ;;  %v5645_v33 = vld [vmem:[%s6347_s14 + $0xfc] ss:$20 sps:$4 sm:$0xff]  }
 0x145   : > { %3308 = vmatprep.subr.bf16.mxu0 %v6599_v35  ;;  %v5647_v35 = vld [vmem:[%s6347_s14 + $0xf8] ss:$20 sps:$4 sm:$0xff]  }
 0x146   : > { %1891 = vmatmul.mubr.bf16.gmra.mrb[60].mxu1 %v5635_v6 }
 0x147   : > { %3166 = vmatmul.mubr.bf16.gmra.mrb[12].mxu0 %v5636_v8  ;;  %3348 = vmatprep.mubr.bf16.mxu1 %v5953_v2 }
 0x148   : > { %3175 = vmatprep.mubr.bf16.mxu0 %v5637_v15  ;;  %3309 = vmatpush1.bf16.msra.mxu0 %v6612_v41  ;;  %v5652_v41 = vld [vmem:[%s6347_s14 + $0xd8] ss:$20 sps:$4 sm:$0xff]  }
 0x149   : > { %3310 = vmatprep.subr.bf16.mxu0 %v6621_v43  ;;  %v5655_v43 = vld [vmem:[%s6347_s14 + $0x148] ss:$20 sps:$4 sm:$0xff]  }
 0x14c   : > { %3311 = vmatpush1.bf16.msra.mxu0 %v6630_v45  ;;  %v5657_v45 = vld [vmem:[%s6347_s14 + $0x174] ss:$20 sps:$4 sm:$0xff]  }
 0x14e   : > { %3349 = vmatmul.mubr.bf16.vlgmr.msra.gmra.mrb[64].mxu1 %v5640_v20 }
 0x14f   : > { %3176 = vmatmul.mubr.bf16.gmra.mrb[16].mxu0 %v5639_v18  ;;  %3358 = vmatprep.mubr.bf16.mxu1 %v5953_v2 }
 0x150   : > { %3185 = vmatprep.mubr.bf16.mxu0 %v5641_v23 }
 0x156   : > { %3359 = vmatmul.mubr.bf16.gmra.mrb[68].mxu1 %v5644_v31 }
 0x157   : > { %3186 = vmatmul.mubr.bf16.gmra.mrb[20].mxu0 %v5643_v29  ;;  %3368 = vmatprep.mubr.bf16.mxu1 %v5953_v2 }
 0x158   : > { %3195 = vmatprep.mubr.bf16.mxu0 %v5645_v33 }
 0x15e   : > { %3369 = vmatmul.mubr.bf16.gmra.mrb[72].mxu1 %v5648_v38 }
 0x15f   : > { %3196 = vmatmul.mubr.bf16.gmra.mrb[24].mxu0 %v5647_v35  ;;  %3378 = vmatprep.mubr.bf16.mxu1 %v5953_v2 }
 0x160   : > { %3205 = vmatprep.mubr.bf16.mxu0 %v5649_v39 }
 0x166   : > { %3379 = vmatmul.mubr.bf16.gmra.mrb[76].mxu1 %v5652_v41 }
 0x167   : > { %3206 = vmatmul.mubr.bf16.gmra.mrb[28].mxu0 %v5651_v40  ;;  %3388 = vmatprep.mubr.bf16.mxu1 %v5953_v2 }
 0x168   : > { %3215 = vmatprep.mubr.bf16.mxu0 %v5653_v42 }
 0x16e   : > { %3389 = vmatmul.mubr.bf16.gmra.mrb[80].mxu1 %v5656_v44 }
 0x16f   : > { %3216 = vmatmul.mubr.bf16.gmra.mrb[32].mxu0 %v5655_v43  ;;  %3398 = vmatprep.mubr.bf16.mxu1 %v5953_v2 }
 0x170   : > { %3225 = vmatprep.mubr.bf16.mxu0 %v5657_v45 }
 0x176   : > { %3399 = vmatmul.mubr.bf16.gmra.mrb[84].mxu1 %v5660_v47 }
 0x177   : > { %3226 = vmatmul.mubr.bf16.gmra.mrb[36].mxu0 %v5659_v46  ;;  %3408 = vmatprep.mubr.bf16.mxu1 %v5953_v2 }
 0x178   : > { %3235 = vmatprep.mubr.bf16.mxu0 %v5661_v48 }
 0x17e   : > { %3409 = vmatmul.mubr.bf16.gmra.mrb[88].mxu1 %v5664_v50 }
 0x17f   : > { %3236 = vmatmul.mubr.bf16.gmra.mrb[40].mxu0 %v5663_v49  ;;  %3418 = vmatprep.mubr.bf16.mxu1 %v5953_v2 }
 0x180   : > { %3245 = vmatprep.mubr.bf16.mxu0 %v5665_v51 }
 0x186   : > { %3419 = vmatmul.mubr.bf16.gmra.mrb[92].mxu1 %v5668_v53 }
 0x187   : > { %3246 = vmatmul.mubr.bf16.gmra.mrb[44].mxu0 %v5667_v52  ;;  %3428 = vmatprep.mubr.bf16.mxu1 %v5953_v2 }
 0x188   : > { %3255 = vmatprep.mubr.bf16.mxu0 %v5669_v54 }
 0x18e   : > { %3429 = vmatmul.mubr.bf16.gmra.mrb[96].mxu1 %v5672_v56 }
 0x18f   : > { %3256 = vmatmul.mubr.bf16.gmra.mrb[48].mxu0 %v5671_v55  ;;  %3438 = vmatprep.mubr.bf16.mxu1 %v5953_v2 }
 0x190   : > { %3265 = vmatprep.mubr.bf16.mxu0 %v5673_v57 }
 0x196   : > { %3439 = vmatmul.mubr.bf16.gmra.mrb[100].mxu1 %v5676_v19 }
 0x197   : > { %3266 = vmatmul.mubr.bf16.gmra.mrb[52].mxu0 %v5675_v58  ;;  %3448 = vmatprep.mubr.bf16.mxu1 %v5953_v2 }
 0x198   : > { %3275 = vmatprep.mubr.bf16.mxu0 %v5677_v59 }
 0x19e   : > { %3449 = vmatmul.mubr.bf16.gmra.mrb[104].mxu1 %v5680_v61 }
 0x19f   : > { %3276 = vmatmul.mubr.bf16.gmra.mrb[56].mxu0 %v5679_v60  ;;  %3458 = vmatprep.mubr.bf16.mxu1 %v5953_v2 }
 0x1a0   : > { %3285 = vmatprep.mubr.bf16.mxu0 %v5681_v62 }
 0x1a1   : > { %v6745_v63 = vpop.f32.mrb[0].mxu1 }
 0x1a2   : > { %7243 = vst [vmem:[#allocation2_spill] sm:$0xff] %v6745_v63  ;;  %v6747_v0 = vpop.f32.mrb[1].mxu1 }
 0x1a3   : > { %7244 = vst [vmem:[#allocation3_spill] sm:$0xff] %v6747_v0  ;;  %v6751_v7 = vpop.f32.mrb[2].mxu1 }
 0x1a4   : > { %7245 = vst [vmem:[#allocation4_spill] sm:$0xff] %v6751_v7  ;;  %v6753_v9 = vpop.f32.mrb[3].mxu1 }
 0x1a5   : > { %7246 = vst [vmem:[#allocation5_spill] sm:$0xff] %v6753_v9 }
 0x1a6   : > { %3459 = vmatmul.mubr.bf16.gmra.mrb[108].mxu1 %v5684_v4 }
 0x1a7   : > { %3286 = vmatmul.mubr.bf16.gmra.mrb[60].mxu0 %v5683_v3  ;;  %3468 = vmatprep.mubr.bf16.mxu1 %v5953_v2 }
 0x1a8   : > { %3328 = vmatprep.mubr.bf16.mxu0 %v5953_v2 }
 0x1a9   : > { %v6757_v10 = vpop.f32.mrb[4].mxu1 }
 0x1aa   : > { %7247 = vst [vmem:[#allocation6_spill] sm:$0xff] %v6757_v10  ;;  %v6759_v11 = vpop.f32.mrb[5].mxu1  ;;  %v3491_v10 = vlaneseq }
 0x1ab   : > { %7248 = vst [vmem:[#allocation7_spill] sm:$0xff] %v6759_v11  ;;  %v6763_v14 = vpop.f32.mrb[6].mxu1 }
 0x1ac   : > { %7249 = vst [vmem:[#allocation8_spill] sm:$0xff] %v6763_v14  ;;  %v6765_v16 = vpop.f32.mrb[7].mxu1  ;;  %v3492_v7 = vshrl.u32 %v3491_v10, 7  ;;  %v3489_v10 = vld [vmem:[%s7239_s4] sm:$0x3] }
 0x1ad   : > { %7250 = vst [vmem:[#allocation9_spill] sm:$0xff] %v6765_v16 }
 0x1ae   : > { %3469 = vmatmul.mubr.bf16.gmra.mrb[112].mxu1 %v5686_v13 }
 0x1af   : > { %3329 = vmatmul.mubr.bf16.vlgmr.msra.gmra.mrb[0].mxu0 %v5685_v12  ;;  %3478 = vmatprep.mubr.bf16.mxu1 %v5953_v2 }
 0x1b0   : > { %3338 = vmatprep.mubr.bf16.mxu0 %v5953_v2 }
 0x1b1   : > { %v1762_v17 = vpop.f32.mrb[8].mxu1 }
 0x1b2   : > { %v1764_v21 = vpop.f32.mrb[9].mxu1 }
 0x1b3   : > { %v1766_v25 = vpop.f32.mrb[10].mxu1 }
 0x1b4   : > { %v1768_v26 = vpop.f32.mrb[11].mxu1 }
 0x1b6   : > { %3479 = vmatmul.mubr.bf16.gmra.mrb[116].mxu1 %v5688_v24 }
 0x1b7   : > { %3339 = vmatmul.mubr.bf16.gmra.mrb[4].mxu0 %v5687_v22 }
 0x1b9   : > { %v1772_v27 = vpop.f32.mrb[12].mxu1 }
 0x1ba   : > { %v1774_v28 = vpop.f32.mrb[13].mxu1 }
 0x1bb   : > { %v6771_v30 = vpop.f32.mrb[14].mxu1 }
 0x1bc   : > { %v6773_v32 = vpop.f32.mrb[15].mxu1 }
 0x1c1   : > { %v6775_v34 = vpop.f32.mrb[16].mxu1 }
 0x1c2   : > { %v6777_v1 = vpop.f32.mrb[17].mxu1 }
 0x1c3   : > { %v6779_v5 = vpop.f32.mrb[18].mxu1 }
 0x1c4   : > { %v6781_v2 = vpop.f32.mrb[19].mxu1 }
 0x1c9   : > { %v6783_v36 = vpop.f32.mrb[20].mxu1 }
 0x1ca   : > { %v6785_v37 = vpop.f32.mrb[21].mxu1 }
 0x1cb   : > { %v6787_v6 = vpop.f32.mrb[22].mxu1 }
 0x1cc   : > { %v6789_v8 = vpop.f32.mrb[23].mxu1 }
 0x1d1   : > { %v6791_v15 = vpop.f32.mrb[24].mxu1 }
 0x1d2   : > { %v6793_v18 = vpop.f32.mrb[25].mxu1 }
 0x1d3   : > { %v6795_v20 = vpop.f32.mrb[26].mxu1 }
 0x1d4   : > { %v6797_v23 = vpop.f32.mrb[27].mxu1 }
 0x1d9   : > { %v6799_v29 = vpop.f32.mrb[28].mxu1 }
 0x1da   : > { %v6801_v31 = vpop.f32.mrb[29].mxu1 }
 0x1db   : > { %v6803_v33 = vpop.f32.mrb[30].mxu1 }
 0x1dc   : > { %v6805_v35 = vpop.f32.mrb[31].mxu1 }
 0x1e1   : > { %v6807_v38 = vpop.f32.mrb[32].mxu1 }
 0x1e2   : > { %v6809_v39 = vpop.f32.mrb[33].mxu1 }
 0x1e3   : > { %v6811_v40 = vpop.f32.mrb[34].mxu1 }
 0x1e4   : > { %v6813_v41 = vpop.f32.mrb[35].mxu1 }
 0x1e9   : > { %v6815_v42 = vpop.f32.mrb[36].mxu1 }
 0x1ea   : > { %v6817_v43 = vpop.f32.mrb[37].mxu1 }
 0x1eb   : > { %v6819_v44 = vpop.f32.mrb[38].mxu1 }
 0x1ec   : > { %v6821_v45 = vpop.f32.mrb[39].mxu1 }
 0x1f1   : > { %v6823_v46 = vpop.f32.mrb[40].mxu1 }
 0x1f2   : > { %v6825_v47 = vpop.f32.mrb[41].mxu1 }
 0x1f3   : > { %v6827_v48 = vpop.f32.mrb[42].mxu1 }
 0x1f4   : > { %v6829_v49 = vpop.f32.mrb[43].mxu1 }
 0x1f9   : > { %v6831_v50 = vpop.f32.mrb[44].mxu1 }
 0x1fa   : > { %v6833_v51 = vpop.f32.mrb[45].mxu1 }
 0x1fb   : > { %v6835_v52 = vpop.f32.mrb[46].mxu1 }
 0x1fc   : > { %v6837_v53 = vpop.f32.mrb[47].mxu1 }
 0x201   : > { %v6839_v54 = vpop.f32.mrb[48].mxu1 }
 0x202   : > { %v6841_v55 = vpop.f32.mrb[49].mxu1 }
 0x203   : > { %v6843_v56 = vpop.f32.mrb[50].mxu1 }
 0x204   : > { %v6845_v57 = vpop.f32.mrb[51].mxu1 }
 0x209   : > { %v6847_v58 = vpop.f32.mrb[52].mxu1 }
 0x20a   : > { %v6849_v19 = vpop.f32.mrb[53].mxu1 }
 0x20b   : > { %7251 = vst [vmem:[#allocation10_spill] sm:$0xff] %v6849_v19  ;;  %v6851_v59 = vpop.f32.mrb[54].mxu1 }
 0x20c   : > { %7252 = vst [vmem:[#allocation11_spill] sm:$0xff] %v6851_v59  ;;  %v6853_v60 = vpop.f32.mrb[55].mxu1 }
 0x20d   : > { %7253 = vst [vmem:[#allocation12_spill] sm:$0xff] %v6853_v60 }
 0x211   : > { %v6855_v61 = vpop.f32.mrb[56].mxu1 }
 0x212   : > { %7254 = vst [vmem:[#allocation13_spill] sm:$0xff] %v6855_v61  ;;  %v3157_v62 = vpop.f32.mrb[8].mxu0  ;;  %v6857_v4 = vpop.f32.mrb[57].mxu1 }
 0x213   : > { %v4903_v3 = vadd.f32 %v3157_v62, %v1762_v17  ;;  %7255 = vst [vmem:[#allocation14_spill] sm:$0xff] %v6857_v4  ;;  %v3159_v12 = vpop.f32.mrb[9].mxu0  ;;  %v6859_v22 = vpop.f32.mrb[58].mxu1 }
 0x214   : > { %v4905_v13 = vadd.f32 %v3159_v12, %v1764_v21  ;;  %7256 = vst [vmem:[#allocation15_spill] sm:$0xff] %v6859_v22  ;;  %v3161_v24 = vpop.f32.mrb[10].mxu0  ;;  %v6861_v14 = vpop.f32.mrb[59].mxu1 }
 0x215   : > { %v4907_v16 = vadd.f32 %v3161_v24, %v1766_v25  ;;  %7257 = vst [vmem:[#allocation16_spill] sm:$0xff] %v6861_v14  ;;  %v3163_v11 = vpop.f32.mrb[11].mxu0  ;;  %v3493_v14 = vsub.s32 0, %v3492_v7 }
 0x216   : > { %v4909_v9 = vadd.f32 %v3163_v11, %v1768_v26 }
 0x217   : > { %v6876_v26 = vrot.slane %v3489_v10, %v3493_v14 }
 0x219   : > { %v6863_v0 = vpop.f32.mrb[60].mxu1 }
 0x21a   : > { %7258 = vst [vmem:[#allocation17_spill] sm:$0xff] %v6863_v0  ;;  %v3167_v63 = vpop.f32.mrb[12].mxu0  ;;  %v6865_v60 = vpop.f32.mrb[61].mxu1 }
 0x21b   : > { %v4911_v61 = vadd.f32 %v3167_v63, %v1772_v27  ;;  %7259 = vst [vmem:[#allocation18_spill] sm:$0xff] %v6865_v60  ;;  %v3169_v17 = vpop.f32.mrb[13].mxu0  ;;  %v6867_v4 = vpop.f32.mrb[62].mxu1  ;;  %v3497_v63 = vsub.s32 1, %v3492_v7 }
 0x21c   : > { %v4913_v62 = vadd.f32 %v3169_v17, %v1774_v28  ;;  %7260 = vst [vmem:[#allocation19_spill] sm:$0xff] %v6867_v4  ;;  %v3171_v21 = vpop.f32.mrb[14].mxu0  ;;  %v6870_v25 = vpop.f32.mrb[63].mxu1 }
 0x21d   : > { %v4915_v12 = vadd.f32 %v3171_v21, %v6771_v30  ;;  %7261 = vst [vmem:[#allocation20_spill] sm:$0xff] %v6870_v25  ;;  %v3173_v24 = vpop.f32.mrb[15].mxu0  ;;  %v6878_v17 = vrot.slane %v3489_v10, %v3497_v63 }
 0x21e   : > { %v4917_v11 = vadd.f32 %v3173_v24, %v6773_v32 }
 0x221   : > { %v3350_v28 = vpop.f32.mrb[64].mxu1 }
 0x222   : > { %v3177_v27 = vpop.f32.mrb[16].mxu0  ;;  %v4904_v30 = vadd.f32 %v4903_v3, %v3350_v28  ;;  %v3352_v25 = vpop.f32.mrb[65].mxu1 }
 0x223   : > { %v4919_v4 = vadd.f32 %v3177_v27, %v6775_v34  ;;  %v3179_v21 = vpop.f32.mrb[17].mxu0  ;;  %v4906_v0 = vadd.f32 %v4905_v13, %v3352_v25  ;;  %v3354_v24 = vpop.f32.mrb[66].mxu1 }
 0x224   : > { %v4921_v60 = vadd.f32 %v3179_v21, %v6777_v1  ;;  %v3181_v32 = vpop.f32.mrb[18].mxu0  ;;  %v3509_v22 = vadd.f32 %v4904_v30, %v6876_v26  ;;  %v4908_v14 = vadd.f32 %v4907_v16, %v3354_v24  ;;  %v3356_v19 = vpop.f32.mrb[67].mxu1 }
 0x225   : > { %v4923_v7 = vadd.f32 %v3181_v32, %v6779_v5  ;;  %v3183_v59 = vpop.f32.mrb[19].mxu0  ;;  %v3510_v10 = vadd.f32 %v4906_v0, %v6878_v17  ;;  %v4910_v34 = vadd.f32 %v4909_v9, %v3356_v19 }
 0x226   : > { %v6886_v63 = vadd.f32 %v3183_v59, %v6781_v2  ;;  %v4662_v3 = vmul.f32 -1.442695, %v3509_v22  ;;  %v3511_v27 = vadd.f32 %v4908_v14, %v6876_v26 }
 0x227   : > { %v4663_v1 = vmul.f32 -1.442695, %v3510_v10  ;;  %v3512_v13 = vadd.f32 %v4910_v34, %v6878_v17 }
 0x228   : > { %5689 = vpow2.f32 %v4662_v3  ;;  %v4664_v25 = vmul.f32 -1.442695, %v3511_v27 }
 0x229   : > { %5691 = vpow2.f32 %v4663_v1  ;;  %v4665_v28 = vmul.f32 -1.442695, %v3512_v13  ;;  %v3360_v16 = vpop.f32.mrb[68].mxu1 }
 0x22a   : > { %v3187_v5 = vpop.f32.mrb[20].mxu0  ;;  %5693 = vpow2.f32 %v4664_v25  ;;  %v4912_v0 = vadd.f32 %v4911_v61, %v3360_v16  ;;  %v3362_v59 = vpop.f32.mrb[69].mxu1 }
 0x22b   : > { %v6891_v30 = vadd.f32 %v3187_v5, %v6783_v36  ;;  %v3189_v2 = vpop.f32.mrb[21].mxu0  ;;  %5695 = vpow2.f32 %v4665_v28  ;;  %v4914_v19 = vadd.f32 %v4913_v62, %v3362_v59  ;;  %v3364_v21 = vpop.f32.mrb[70].mxu1 }
 0x22c   : > { %v6894_v9 = vadd.f32 %v3189_v2, %v6785_v37  ;;  %v3191_v22 = vpop.f32.mrb[22].mxu0  ;;  %v3513_v32 = vadd.f32 %v4912_v0, %v6876_v26  ;;  %v4916_v14 = vadd.f32 %v4915_v12, %v3364_v21  ;;  %v3366_v34 = vpop.f32.mrb[71].mxu1 }
 0x22d   : > { %v6898_v24 = vadd.f32 %v3191_v22, %v6787_v6  ;;  %v3193_v10 = vpop.f32.mrb[23].mxu0  ;;  %v3514_v36 = vadd.f32 %v4914_v19, %v6878_v17  ;;  %v4918_v3 = vadd.f32 %v4917_v11, %v3366_v34 }
 0x22e   : > { %v6902_v61 = vadd.f32 %v3193_v10, %v6789_v8  ;;  %v4666_v27 = vmul.f32 -1.442695, %v3513_v32  ;;  %v3515_v37 = vadd.f32 %v4916_v14, %v6876_v26 }
 0x22f   : > { %v4667_v62 = vmul.f32 -1.442695, %v3514_v36  ;;  %v3516_v1 = vadd.f32 %v4918_v3, %v6878_v17 }
 0x230   : > { %5697 = vpow2.f32 %v4666_v27  ;;  %v4668_v13 = vmul.f32 -1.442695, %v3515_v37 }
 0x231   : > { %5699 = vpow2.f32 %v4667_v62  ;;  %v4669_v6 = vmul.f32 -1.442695, %v3516_v1  ;;  %v3370_v12 = vpop.f32.mrb[72].mxu1 }
 0x232   : > { %v3197_v25 = vpop.f32.mrb[24].mxu0  ;;  %v5690_v28 = vpop.eup %5689  ;;  %5701 = vpow2.f32 %v4668_v13  ;;  %v4920_v8 = vadd.f32 %v4919_v4, %v3370_v12 }
 0x233   : > { %v6907_v5 = vadd.f32 %v3197_v25, %v6791_v15  ;;  %v3199_v16 = vpop.f32.mrb[25].mxu0  ;;  %v3372_v11 = vpop.f32.mrb[73].mxu1  ;;  %v3765_v2 = vadd.f32 1.0, %v5690_v28  ;;  %5703 = vpow2.f32 %v4669_v6 }
 0x234   : > { %v5692_v0 = vpop.eup %5691  ;;  %v6910_v59 = vadd.f32 %v3199_v16, %v6793_v18  ;;  %v4922_v19 = vadd.f32 %v4921_v60, %v3372_v11  ;;  %v3201_v22 = vpop.f32.mrb[26].mxu0  ;;  %v3517_v10 = vadd.f32 %v4920_v8, %v6876_v26 }
 0x235   : > { %v3374_v21 = vpop.f32.mrb[74].mxu1  ;;  %v5694_v32 = vpop.eup %5693  ;;  %v3766_v14 = vadd.f32 1.0, %v5692_v0  ;;  %v6914_v34 = vadd.f32 %v3201_v22, %v6795_v20  ;;  %5705 = vrcp.f32 %v3765_v2 }
 0x236   : > { %v4924_v15 = vadd.f32 %v4923_v7, %v3374_v21  ;;  %v3203_v4 = vpop.f32.mrb[27].mxu0  ;;  %v3376_v36 = vpop.f32.mrb[75].mxu1  ;;  %v3767_v27 = vadd.f32 1.0, %v5694_v32  ;;  %v3518_v18 = vadd.f32 %v4922_v19, %v6878_v17  ;;  %v4670_v62 = vmul.f32 -1.442695, %v3517_v10 }
 0x237   : > { %v5696_v3 = vpop.eup %5695  ;;  %v6918_v60 = vadd.f32 %v3203_v4, %v6797_v23  ;;  %5707 = vrcp.f32 %v3766_v14  ;;  %v4926_v7 = vadd.f32 %v6886_v63, %v3376_v36 }
 0x238   : > { %v3768_v37 = vadd.f32 1.0, %v5696_v3  ;;  %v3519_v1 = vadd.f32 %v4924_v15, %v6876_v26  ;;  %5709 = vrcp.f32 %v3767_v27  ;;  %v4671_v20 = vmul.f32 -1.442695, %v3518_v18 }
 0x239   : > { %v3520_v6 = vadd.f32 %v4926_v7, %v6878_v17  ;;  %v3380_v12 = vpop.f32.mrb[76].mxu1 }
 0x23a   : > { %5711 = vrcp.f32 %v3768_v37  ;;  %v4672_v13 = vmul.f32 -1.442695, %v3519_v1  ;;  %v3207_v25 = vpop.f32.mrb[28].mxu0  ;;  %v5698_v28 = vpop.eup %5697  ;;  %v4928_v8 = vadd.f32 %v6891_v30, %v3380_v12 }
 0x23b   : > { %5713 = vpow2.f32 %v4670_v62  ;;  %v6925_v23 = vadd.f32 %v3207_v25, %v6799_v29  ;;  %v3209_v16 = vpop.f32.mrb[29].mxu0  ;;  %v3382_v11 = vpop.f32.mrb[77].mxu1  ;;  %v3769_v2 = vadd.f32 1.0, %v5698_v28  ;;  %v4673_v63 = vmul.f32 -1.442695, %v3520_v6  ;;  %v3985_v62 = vld [vmem:[%s6934_s27 + $0x20] sm:$0xff] }
 0x23c   : > { %5715 = vpow2.f32 %v4671_v20  ;;  %v5700_v0 = vpop.eup %5699  ;;  %v6929_v19 = vadd.f32 %v3209_v16, %v6801_v31  ;;  %v3211_v22 = vpop.f32.mrb[30].mxu0  ;;  %v3521_v30 = vadd.f32 %v4928_v8, %v6876_v26  ;;  %v4930_v14 = vadd.f32 %v6894_v9, %v3382_v11 }
 0x23d   : > { %5717 = vpow2.f32 %v4672_v13  ;;  %v3384_v21 = vpop.f32.mrb[78].mxu1  ;;  %v5702_v32 = vpop.eup %5701  ;;  %v3770_v29 = vadd.f32 1.0, %v5700_v0  ;;  %v6939_v10 = vadd.f32 %v3211_v22, %v6803_v33 }
 0x23e   : > { %v3213_v15 = vpop.f32.mrb[31].mxu0  ;;  %v3386_v31 = vpop.f32.mrb[79].mxu1  ;;  %5719 = vrcp.f32 %v3769_v2  ;;  %v3771_v36 = vadd.f32 1.0, %v5702_v32  ;;  %v4932_v3 = vadd.f32 %v6898_v24, %v3384_v21  ;;  %v4674_v9 = vmul.f32 -1.442695, %v3521_v30  ;;  %v3986_v24 = vld [vmem:[%s6934_s27 + $0x28] sm:$0xff] }
 0x23f   : > { %v5704_v4 = vpop.eup %5703  ;;  %v6948_v27 = vadd.f32 %v3213_v15, %v6805_v35  ;;  %5721 = vrcp.f32 %v3770_v29  ;;  %v3522_v18 = vadd.f32 %v4930_v14, %v6878_v17  ;;  %v4934_v20 = vadd.f32 %v6902_v61, %v3386_v31 }
 0x240   : > { %v3772_v33 = vadd.f32 1.0, %v5704_v4  ;;  %v5706_v37 = vpop.eup %5705  ;;  %5723 = vrcp.f32 %v3771_v36  ;;  %v3523_v1 = vadd.f32 %v4932_v3, %v6876_v26 }
 0x241   : > { %v5708_v7 = vpop.eup %5707  ;;  %3953 = vst [vmem:[%s6944_s8 + $0x20] sm:$0xff] %v5706_v37  ;;  %v4675_v35 = vmul.f32 -1.442695, %v3522_v18  ;;  %v3524_v25 = vadd.f32 %v4934_v20, %v6878_v17  ;;  %v3390_v28 = vpop.f32.mrb[80].mxu1 }
 0x242   : > { %5725 = vrcp.f32 %v3772_v33  ;;  %v5710_v13 = vpop.eup %5709  ;;  %v4676_v6 = vmul.f32 -1.442695, %v3523_v1  ;;  %v3217_v12 = vpop.f32.mrb[32].mxu0  ;;  %v4017_v16 = vmul.f32 %v5708_v7, %v3985_v62  ;;  %v4936_v61 = vadd.f32 %v6907_v5, %v3390_v28 }
 0x243   : > { %5727 = vpow2.f32 %v4673_v63  ;;  %3954 = vst [vmem:[%s6944_s8 + $0x28] sm:$0xff] %v5710_v13  ;;  %v6960_v11 = vadd.f32 %v3217_v12, %v6807_v38  ;;  %v3219_v0 = vpop.f32.mrb[33].mxu0  ;;  %v3392_v2 = vpop.f32.mrb[81].mxu1  ;;  %v4677_v63 = vmul.f32 -1.442695, %v3524_v25 }
 0x244   : > { %v5712_v8 = vpop.eup %5711  ;;  %5729 = vpow2.f32 %v4674_v9  ;;  %v6964_v32 = vadd.f32 %v3219_v0, %v6809_v39  ;;  %v3221_v29 = vpop.f32.mrb[34].mxu0  ;;  %v3525_v5 = vadd.f32 %v4936_v61, %v6876_v26  ;;  %v4938_v15 = vadd.f32 %v6910_v59, %v3392_v2 }
 0x245   : > { %v5714_v22 = vpop.eup %5713  ;;  %v4018_v21 = vmul.f32 %v5712_v8, %v3986_v24  ;;  %5731 = vpow2.f32 %v4675_v35  ;;  %v3394_v30 = vpop.f32.mrb[82].mxu1  ;;  %v6974_v33 = vadd.f32 %v3221_v29, %v6811_v40  ;;  %v3987_v40 = vld [vmem:[%s6934_s27 + $0x30] sm:$0xff]  ;;  %v3988_v24 = vld [vmem:[%s6934_s27 + $0x38] sm:$0xff] }
 0x246   : > { %v5716_v14 = vpop.eup %5715  ;;  %v3773_v38 = vadd.f32 1.0, %v5714_v22  ;;  %5733 = vpow2.f32 %v4676_v6  ;;  %v3223_v31 = vpop.f32.mrb[35].mxu0  ;;  %v4678_v18 = vmul.f32 -1.442695, %v3525_v5  ;;  %v3526_v37 = vadd.f32 %v4938_v15, %v6878_v17 }
 0x247   : > { %v3396_v4 = vpop.f32.mrb[83].mxu1  ;;  %v5718_v36 = vpop.eup %5717  ;;  %v4797_v39 = vpack.c.bf16 %v4018_v21, %v4017_v16  ;;  %v3774_v3 = vadd.f32 1.0, %v5716_v14  ;;  %5735 = vpow2.f32 %v4677_v63  ;;  %v4940_v59 = vadd.f32 %v6914_v34, %v3394_v30 }
 0x248   : > { %5737 = vrcp.f32 %v3773_v38  ;;  %v3775_v9 = vadd.f32 1.0, %v5718_v36  ;;  %v5720_v62 = vpop.eup %5719  ;;  %v6980_v1 = vadd.f32 %v3223_v31, %v6813_v41  ;;  %v4942_v20 = vadd.f32 %v6918_v60, %v3396_v4 }
 0x249   : > { %4865 = vst [vmem:[%s6969_s10 + $0x10] sm:$0xff] %v4797_v39   ;;  %5739 = vrcp.f32 %v3774_v3  ;;  %v5722_v7 = vpop.eup %5721  ;;  %3955 = vst [vmem:[%s6944_s8 + $0x30] sm:$0xff] %v5720_v62  ;;  %v4679_v35 = vmul.f32 -1.442695, %v3526_v37  ;;  %v3527_v6 = vadd.f32 %v4940_v59, %v6876_v26  ;;  %v3400_v12 = vpop.f32.mrb[84].mxu1 }
 0x24a   : > { %5741 = vrcp.f32 %v3775_v9  ;;  %v5724_v13 = vpop.eup %5723  ;;  %v3227_v25 = vpop.f32.mrb[36].mxu0  ;;  %v3528_v41 = vadd.f32 %v4942_v20, %v6878_v17  ;;  %v4944_v60 = vadd.f32 %v6925_v23, %v3400_v12  ;;  %v4019_v0 = vmul.f32 %v5722_v7, %v3987_v40 }
 0x24b   : > { %5743 = vpow2.f32 %v4678_v18  ;;  %3956 = vst [vmem:[%s6944_s8 + $0x38] sm:$0xff] %v5724_v13  ;;  %v6990_v34 = vadd.f32 %v3227_v25, %v6815_v42  ;;  %v3229_v8 = vpop.f32.mrb[37].mxu0  ;;  %v3402_v16 = vpop.f32.mrb[85].mxu1  ;;  %v4680_v22 = vmul.f32 -1.442695, %v3527_v6 }
 0x24c   : > { %v5726_v28 = vpop.eup %5725  ;;  %5745 = vpow2.f32 %v4679_v35  ;;  %v6994_v21 = vadd.f32 %v3229_v8, %v6817_v43  ;;  %v3231_v63 = vpop.f32.mrb[38].mxu0  ;;  %v3529_v38 = vadd.f32 %v4944_v60, %v6876_v26  ;;  %v4946_v42 = vadd.f32 %v6929_v19, %v3402_v16 }
 0x24d   : > { %v5728_v61 = vpop.eup %5727  ;;  %v4020_v2 = vmul.f32 %v5726_v28, %v3988_v24  ;;  %v3404_v29 = vpop.f32.mrb[86].mxu1  ;;  %v6999_v23 = vadd.f32 %v3231_v63, %v6819_v44  ;;  %5747 = vpow2.f32 %v4680_v22  ;;  %v4681_v9 = vmul.f32 -1.442695, %v3528_v41 }
 0x24e   : > { %v5730_v30 = vpop.eup %5729  ;;  %v3776_v14 = vadd.f32 1.0, %v5728_v61  ;;  %v3233_v5 = vpop.f32.mrb[39].mxu0  ;;  %v4948_v43 = vadd.f32 %v6939_v10, %v3404_v29  ;;  %v3530_v18 = vadd.f32 %v4946_v42, %v6878_v17  ;;  %v4682_v10 = vmul.f32 -1.442695, %v3529_v38  ;;  %v3989_v38 = vld [vmem:[%s6934_s27 + $0x40] sm:$0xff] }
 0x24f   : > { %v3406_v15 = vpop.f32.mrb[87].mxu1  ;;  %v5732_v31 = vpop.eup %5731  ;;  %v4802_v4 = vpack.c.bf16 %v4020_v2, %v4019_v0  ;;  %v3777_v36 = vadd.f32 1.0, %v5730_v30  ;;  %v7006_v62 = vadd.f32 %v3233_v5, %v6821_v45 }
 0x250   : > { %v5734_v39 = vpop.eup %5733  ;;  %5749 = vrcp.f32 %v3776_v14  ;;  %v3778_v3 = vadd.f32 1.0, %v5732_v31  ;;  %v3531_v19 = vadd.f32 %v4948_v43, %v6876_v26  ;;  %v4950_v7 = vadd.f32 %v6948_v27, %v3406_v15  ;;  %v3991_v43 = vld [vmem:[%s6934_s27 + $0x50] sm:$0xff] }
 0x251   : > { %v5736_v37 = vpop.eup %5735  ;;  %4866 = vst [vmem:[%s6969_s10 + $0x18] sm:$0xff] %v4802_v4   ;;  %5751 = vrcp.f32 %v3777_v36  ;;  %v3779_v44 = vadd.f32 1.0, %v5734_v39  ;;  %v4683_v24 = vmul.f32 -1.442695, %v3530_v18  ;;  %v3410_v13 = vpop.f32.mrb[88].mxu1 }
 0x252   : > { %v5738_v59 = vpop.eup %5737  ;;  %5753 = vrcp.f32 %v3778_v3  ;;  %v3780_v20 = vadd.f32 1.0, %v5736_v37  ;;  %v3237_v35 = vpop.f32.mrb[40].mxu0  ;;  %v4684_v25 = vmul.f32 -1.442695, %v3531_v19  ;;  %v3532_v12 = vadd.f32 %v4950_v7, %v6878_v17 }
 0x253   : > { %v5740_v40 = vpop.eup %5739  ;;  %3957 = vst [vmem:[%s6944_s8 + $0x40] sm:$0xff] %v5738_v59  ;;  %5755 = vrcp.f32 %v3779_v44  ;;  %v7012_v45 = vadd.f32 %v3237_v35, %v6823_v46  ;;  %v3239_v28 = vpop.f32.mrb[41].mxu0  ;;  %v4952_v27 = vadd.f32 %v6960_v11, %v3410_v13 }
 0x254   : > { %v5742_v6 = vpop.eup %5741  ;;  %5757 = vrcp.f32 %v3780_v20  ;;  %v3412_v41 = vpop.f32.mrb[89].mxu1  ;;  %v7017_v8 = vadd.f32 %v3239_v28, %v6825_v47  ;;  %v4685_v46 = vmul.f32 -1.442695, %v3532_v12  ;;  %v4021_v18 = vmul.f32 %v5740_v40, %v3989_v38 }
 0x255   : > { %v5744_v60 = vpop.eup %5743  ;;  %3958 = vst [vmem:[%s6944_s8 + $0x48] sm:$0xff] %v5742_v6  ;;  %5759 = vpow2.f32 %v4681_v9  ;;  %v4954_v16 = vadd.f32 %v6964_v32, %v3412_v41  ;;  %v3241_v61 = vpop.f32.mrb[42].mxu0  ;;  %v3533_v47 = vadd.f32 %v4952_v27, %v6876_v26  ;;  %v3990_v32 = vld [vmem:[%s6934_s27 + $0x48] sm:$0xff] }
 0x256   : > { %v3414_v0 = vpop.f32.mrb[90].mxu1  ;;  %v5746_v2 = vpop.eup %5745  ;;  %v3781_v22 = vadd.f32 1.0, %v5744_v60  ;;  %5761 = vpow2.f32 %v4682_v10  ;;  %v7021_v63 = vadd.f32 %v3241_v61, %v6827_v48 }
 0x257   : > { %v3243_v29 = vpop.f32.mrb[43].mxu0  ;;  %v3416_v30 = vpop.f32.mrb[91].mxu1  ;;  %v3782_v11 = vadd.f32 1.0, %v5746_v2  ;;  %5763 = vpow2.f32 %v4683_v24  ;;  %v3534_v14 = vadd.f32 %v4954_v16, %v6878_v17  ;;  %v4956_v42 = vadd.f32 %v6974_v33, %v3414_v0 }
 0x258   : > { %5765 = vrcp.f32 %v3781_v22  ;;  %v7029_v5 = vadd.f32 %v3243_v29, %v6829_v49  ;;  %v4958_v48 = vadd.f32 %v6980_v1, %v3416_v30  ;;  %v5748_v15 = vpop.eup %5747  ;;  %v4686_v31 = vmul.f32 -1.442695, %v3533_v47  ;;  %v3992_v49 = vld [vmem:[%s6934_s27 + $0x58] sm:$0xff] }
 0x259   : > { %5767 = vrcp.f32 %v3782_v11  ;;  %v4687_v4 = vmul.f32 -1.442695, %v3534_v14  ;;  %v3783_v39 = vadd.f32 1.0, %v5748_v15  ;;  %v3535_v3 = vadd.f32 %v4956_v42, %v6876_v26  ;;  %v3420_v1 = vpop.f32.mrb[92].mxu1 }
 0x25a   : > { %v5750_v36 = vpop.eup %5749  ;;  %5769 = vpow2.f32 %v4684_v25  ;;  %v3536_v9 = vadd.f32 %v4958_v48, %v6878_v17  ;;  %v3247_v44 = vpop.f32.mrb[44].mxu0  ;;  %v4960_v6 = vadd.f32 %v6990_v34, %v3420_v1 }
 0x25b   : > { %v5752_v33 = vpop.eup %5751  ;;  %v4022_v37 = vmul.f32 %v5750_v36, %v3990_v32  ;;  %5771 = vpow2.f32 %v4685_v46  ;;  %v4688_v59 = vmul.f32 -1.442695, %v3535_v3  ;;  %v7038_v10 = vadd.f32 %v3247_v44, %v6831_v50  ;;  %v3249_v7 = vpop.f32.mrb[45].mxu0 }
 0x25c   : > { %v5754_v19 = vpop.eup %5753  ;;  %3959 = vst [vmem:[%s6944_s8 + $0x50] sm:$0xff] %v5752_v33  ;;  %5773 = vrcp.f32 %v3783_v39  ;;  %v4689_v20 = vmul.f32 -1.442695, %v3536_v9  ;;  %v3422_v24 = vpop.f32.mrb[93].mxu1  ;;  %v7043_v41 = vadd.f32 %v3249_v7, %v6833_v51  ;;  %v3537_v34 = vadd.f32 %v4960_v6, %v6876_v26 }
 0x25d   : > { %v5756_v35 = vpop.eup %5755  ;;  %v4807_v13 = vpack.c.bf16 %v4022_v37, %v4021_v18  ;;  %v4023_v40 = vmul.f32 %v5754_v19, %v3991_v43  ;;  %5775 = vpow2.f32 %v4686_v31  ;;  %v3251_v25 = vpop.f32.mrb[46].mxu0  ;;  %v4962_v50 = vadd.f32 %v6994_v21, %v3422_v24 }
 0x25e   : > { %v3424_v12 = vpop.f32.mrb[94].mxu1  ;;  %v5758_v28 = vpop.eup %5757  ;;  %3960 = vst [vmem:[%s6944_s8 + $0x58] sm:$0xff] %v5756_v35  ;;  %5777 = vpow2.f32 %v4687_v4  ;;  %v7047_v60 = vadd.f32 %v3251_v25, %v6835_v52  ;;  %v4690_v11 = vmul.f32 -1.442695, %v3537_v34  ;;  %v3993_v35 = vld [vmem:[%s6934_s27 + $0x60] sm:$0xff] }
 0x25f   : > { %v3253_v27 = vpop.f32.mrb[47].mxu0  ;;  %v3426_v16 = vpop.f32.mrb[95].mxu1  ;;  %4867 = vst [vmem:[%s6969_s10 + $0x20] sm:$0xff] %v4807_v13   ;;  %v4024_v0 = vmul.f32 %v5758_v28, %v3992_v49  ;;  %5779 = vpow2.f32 %v4688_v59  ;;  %v4964_v2 = vadd.f32 %v6999_v23, %v3424_v12  ;;  %v3538_v51 = vadd.f32 %v4962_v50, %v6878_v17 }
 0x260   : > { %v5760_v61 = vpop.eup %5759  ;;  %5781 = vpow2.f32 %v4689_v20  ;;  %v7054_v52 = vadd.f32 %v3253_v27, %v6837_v53  ;;  %v4966_v32 = vadd.f32 %v7006_v62, %v3426_v16 }
 0x261   : > { %v5762_v22 = vpop.eup %5761  ;;  %v3784_v46 = vadd.f32 1.0, %v5760_v61  ;;  %v4812_v29 = vpack.c.bf16 %v4024_v0, %v4023_v40  ;;  %v3539_v47 = vadd.f32 %v4964_v2, %v6876_v26  ;;  %v4691_v23 = vmul.f32 -1.442695, %v3538_v51  ;;  %v3430_v15 = vpop.f32.mrb[96].mxu1 }
 0x262   : > { %v5764_v21 = vpop.eup %5763  ;;  %v3785_v30 = vadd.f32 1.0, %v5762_v22  ;;  %v3257_v48 = vpop.f32.mrb[48].mxu0  ;;  %v3540_v4 = vadd.f32 %v4966_v32, %v6878_v17  ;;  %v4968_v62 = vadd.f32 %v7012_v45, %v3430_v15 }
 0x263   : > { %v5766_v14 = vpop.eup %5765  ;;  %5783 = vrcp.f32 %v3784_v46  ;;  %v3786_v38 = vadd.f32 1.0, %v5764_v21  ;;  %4868 = vst [vmem:[%s6969_s10 + $0x28] sm:$0xff] %v4812_v29   ;;  %v4692_v31 = vmul.f32 -1.442695, %v3539_v47  ;;  %v7062_v36 = vadd.f32 %v3257_v48, %v6839_v54  ;;  %v3259_v43 = vpop.f32.mrb[49].mxu0  ;;  %v7262_v47 = vld [vmem:[#allocation10_spill] sm:$0xff] }
 0x264   : > { %v5768_v42 = vpop.eup %5767  ;;  %3961 = vst [vmem:[%s6944_s8 + $0x60] sm:$0xff] %v5766_v14  ;;  %5785 = vrcp.f32 %v3785_v30  ;;  %v3432_v39 = vpop.f32.mrb[97].mxu1  ;;  %v7066_v33 = vadd.f32 %v3259_v43, %v6841_v55  ;;  %v4693_v1 = vmul.f32 -1.442695, %v3540_v4  ;;  %v3541_v45 = vadd.f32 %v4968_v62, %v6876_v26 }
 0x265   : > { %v5770_v53 = vpop.eup %5769  ;;  %5787 = vrcp.f32 %v3786_v38  ;;  %v3261_v18 = vpop.f32.mrb[50].mxu0  ;;  %v4970_v54 = vadd.f32 %v7017_v8, %v3432_v39  ;;  %v4025_v61 = vmul.f32 %v5768_v42, %v3993_v35  ;;  %v3995_v39 = vld [vmem:[%s6934_s27 + $0x70] sm:$0xff] }
 0x266   : > { %v5772_v3 = vpop.eup %5771  ;;  %v3787_v9 = vadd.f32 1.0, %v5770_v53  ;;  %5789 = vpow2.f32 %v4690_v11  ;;  %v3434_v37 = vpop.f32.mrb[98].mxu1  ;;  %v7072_v55 = vadd.f32 %v3261_v18, %v6843_v56  ;;  %v4694_v12 = vmul.f32 -1.442695, %v3541_v45  ;;  %v3994_v56 = vld [vmem:[%s6934_s27 + $0x68] sm:$0xff] }
 0x267   : > { %v5774_v49 = vpop.eup %5773  ;;  %v3788_v44 = vadd.f32 1.0, %v5772_v3  ;;  %5791 = vpow2.f32 %v4691_v23  ;;  %v3263_v19 = vpop.f32.mrb[51].mxu0  ;;  %v4972_v7 = vadd.f32 %v7021_v63, %v3434_v37  ;;  %v3542_v40 = vadd.f32 %v4970_v54, %v6878_v17  ;;  %v3996_v3 = vld [vmem:[%s6934_s27 + $0x78] sm:$0xff] }
 0x268   : > { %v3436_v59 = vpop.f32.mrb[99].mxu1  ;;  %v5776_v20 = vpop.eup %5775  ;;  %3962 = vst [vmem:[%s6944_s8 + $0x68] sm:$0xff] %v5774_v49  ;;  %5793 = vrcp.f32 %v3787_v9  ;;  %v7078_v8 = vadd.f32 %v3263_v19, %v6845_v57 }
 0x269   : > { %v5778_v24 = vpop.eup %5777  ;;  %5795 = vrcp.f32 %v3788_v44  ;;  %v3789_v13 = vadd.f32 1.0, %v5776_v20  ;;  %v3543_v28 = vadd.f32 %v4972_v7, %v6876_v26  ;;  %v4695_v63 = vmul.f32 -1.442695, %v3542_v40  ;;  %v3440_v57 = vpop.f32.mrb[100].mxu1 }
 0x26a   : > { %v5780_v6 = vpop.eup %5779  ;;  %v3790_v25 = vadd.f32 1.0, %v5778_v24  ;;  %5797 = vpow2.f32 %v4692_v31  ;;  %v4974_v16 = vadd.f32 %v7029_v5, %v3436_v59  ;;  %v3267_v2 = vpop.f32.mrb[52].mxu0  ;;  %v4976_v21 = vadd.f32 %v7038_v10, %v3440_v57  ;;  %v7263_v10 = vld [vmem:[#allocation11_spill] sm:$0xff] }
 0x26b   : > { %v5782_v50 = vpop.eup %5781  ;;  %5799 = vrcp.f32 %v3789_v13  ;;  %v3791_v27 = vadd.f32 1.0, %v5780_v6  ;;  %v4696_v34 = vmul.f32 -1.442695, %v3543_v28  ;;  %v7085_v51 = vadd.f32 %v3267_v2, %v6847_v58  ;;  %v3269_v29 = vpop.f32.mrb[53].mxu0 }
 0x26c   : > { %5801 = vrcp.f32 %v3790_v25  ;;  %v3792_v0 = vadd.f32 1.0, %v5782_v50  ;;  %v3544_v46 = vadd.f32 %v4974_v16, %v6878_v17  ;;  %v3442_v30 = vpop.f32.mrb[101].mxu1  ;;  %v7089_v14 = vadd.f32 %v3269_v29, %v7262_v47  ;;  %v3271_v23 = vpop.f32.mrb[54].mxu0  ;;  %v7265_v16 = vld [vmem:[#allocation13_spill] sm:$0xff] }
 0x26d   : > { %v5784_v22 = vpop.eup %5783  ;;  %5803 = vrcp.f32 %v3791_v27  ;;  %v4978_v38 = vadd.f32 %v7043_v41, %v3442_v30  ;;  %v3444_v32 = vpop.f32.mrb[102].mxu1  ;;  %v3545_v58 = vadd.f32 %v4976_v21, %v6876_v26  ;;  %v7095_v48 = vadd.f32 %v3271_v23, %v7263_v10  ;;  %v7266_v21 = vld [vmem:[#allocation14_spill] sm:$0xff]  ;;  %v7268_v10 = vld [vmem:[#allocation16_spill] sm:$0xff] }
 0x26e   : > { %v5786_v11 = vpop.eup %5785  ;;  %v4026_v5 = vmul.f32 %v5784_v22, %v3994_v56  ;;  %5805 = vrcp.f32 %v3792_v0  ;;  %v3273_v15 = vpop.f32.mrb[55].mxu0  ;;  %v4697_v62 = vmul.f32 -1.442695, %v3544_v46  ;;  %v4980_v18 = vadd.f32 %v7047_v60, %v3444_v32  ;;  %v3997_v60 = vld [vmem:[%s6934_s27 + $0x80] sm:$0xff] }
 0x26f   : > { %v5788_v42 = vpop.eup %5787  ;;  %3963 = vst [vmem:[%s6944_s8 + $0x70] sm:$0xff] %v5786_v11  ;;  %5807 = vpow2.f32 %v4693_v1  ;;  %v3446_v53 = vpop.f32.mrb[103].mxu1  ;;  %v3546_v41 = vadd.f32 %v4978_v38, %v6878_v17  ;;  %v4698_v44 = vmul.f32 -1.442695, %v3545_v58  ;;  %v7264_v1 = vld [vmem:[#allocation12_spill] sm:$0xff] }
 0x270   : > { %v5790_v31 = vpop.eup %5789  ;;  %v4817_v4 = vpack.c.bf16 %v4026_v5, %v4025_v61  ;;  %5809 = vpow2.f32 %v4694_v12  ;;  %v7103_v54 = vadd.f32 %v3273_v15, %v7264_v1  ;;  %v3547_v59 = vadd.f32 %v4980_v18, %v6876_v26 }
 0x271   : > { %v5792_v43 = vpop.eup %5791  ;;  %v3793_v9 = vadd.f32 1.0, %v5790_v31  ;;  %5811 = vpow2.f32 %v4695_v63  ;;  %v4982_v20 = vadd.f32 %v7054_v52, %v3446_v53  ;;  %v4027_v7 = vmul.f32 %v5788_v42, %v3995_v39  ;;  %v3450_v40 = vpop.f32.mrb[104].mxu1  ;;  %v3998_v63 = vld [vmem:[%s6934_s27 + $0x88] sm:$0xff] }
 0x272   : > { %v5794_v37 = vpop.eup %5793  ;;  %4869 = vst [vmem:[%s6969_s10 + $0x30] sm:$0xff] %v4817_v4   ;;  %v3794_v49 = vadd.f32 1.0, %v5792_v43  ;;  %5813 = vpow2.f32 %v4696_v34  ;;  %v4699_v35 = vmul.f32 -1.442695, %v3546_v41  ;;  %v3277_v13 = vpop.f32.mrb[56].mxu0  ;;  %v4984_v0 = vadd.f32 %v7062_v36, %v3450_v40  ;;  %v7267_v36 = vld [vmem:[#allocation15_spill] sm:$0xff] }
 0x273   : > { %v5796_v19 = vpop.eup %5795  ;;  %3964 = vst [vmem:[%s6944_s8 + $0x78] sm:$0xff] %v5794_v37  ;;  %5815 = vrcp.f32 %v3793_v9  ;;  %v4700_v12 = vmul.f32 -1.442695, %v3547_v59  ;;  %v3548_v28 = vadd.f32 %v4982_v20, %v6878_v17  ;;  %v3279_v50 = vpop.f32.mrb[57].mxu0  ;;  %v7113_v61 = vadd.f32 %v3277_v13, %v7265_v16 }
 0x274   : > { %v5798_v45 = vpop.eup %5797  ;;  %v4028_v24 = vmul.f32 %v5796_v19, %v3996_v3  ;;  %5817 = vrcp.f32 %v3794_v49  ;;  %v3452_v56 = vpop.f32.mrb[105].mxu1  ;;  %v7117_v29 = vadd.f32 %v3279_v50, %v7266_v21  ;;  %v3549_v47 = vadd.f32 %v4984_v0, %v6876_v26 }
 0x275   : > { %v5800_v6 = vpop.eup %5799  ;;  %v3795_v25 = vadd.f32 1.0, %v5798_v45  ;;  %5819 = vpow2.f32 %v4697_v62  ;;  %v3281_v34 = vpop.f32.mrb[58].mxu0  ;;  %v4701_v46 = vmul.f32 -1.442695, %v3548_v28  ;;  %v4986_v38 = vadd.f32 %v7066_v33, %v3452_v56  ;;  %v7269_v45 = vld [vmem:[#allocation17_spill] sm:$0xff] }
 0x276   : > { %v5802_v27 = vpop.eup %5801  ;;  %v4822_v52 = vpack.c.bf16 %v4028_v24, %v4027_v7  ;;  %3965 = vst [vmem:[%s6944_s8 + $0x80] sm:$0xff] %v5800_v6  ;;  %5821 = vpow2.f32 %v4698_v44  ;;  %v3454_v2 = vpop.f32.mrb[106].mxu1  ;;  %v7124_v23 = vadd.f32 %v3281_v34, %v7267_v36  ;;  %v4702_v62 = vmul.f32 -1.442695, %v3549_v47  ;;  %v7270_v24 = vld [vmem:[#allocation18_spill] sm:$0xff]  ;;  %v3999_v6 = vld [vmem:[%s6934_s27 + $0x90] sm:$0xff] }
 0x277   : > { %v5804_v57 = vpop.eup %5803  ;;  %v4029_v22 = vmul.f32 %v5802_v27, %v3997_v60  ;;  %5823 = vrcp.f32 %v3795_v25  ;;  %v3283_v30 = vpop.f32.mrb[59].mxu0  ;;  %v4988_v58 = vadd.f32 %v7072_v55, %v3454_v2  ;;  %v3550_v4 = vadd.f32 %v4986_v38, %v6878_v17 }
 0x278   : > { %v3456_v11 = vpop.f32.mrb[107].mxu1  ;;  %v5806_v5 = vpop.eup %5805  ;;  %4870 = vst [vmem:[%s6969_s10 + $0x38] sm:$0xff] %v4822_v52   ;;  %3966 = vst [vmem:[%s6944_s8 + $0x88] sm:$0xff] %v5804_v57  ;;  %5825 = vpow2.f32 %v4699_v35  ;;  %v7128_v15 = vadd.f32 %v3283_v30, %v7268_v10 }
 0x279   : > { %v5808_v32 = vpop.eup %5807  ;;  %v4030_v42 = vmul.f32 %v5806_v5, %v3998_v63  ;;  %5827 = vpow2.f32 %v4700_v12  ;;  %v3551_v39 = vadd.f32 %v4988_v58, %v6876_v26  ;;  %v4990_v3 = vadd.f32 %v7078_v8, %v3456_v11  ;;  %v3460_v37 = vpop.f32.mrb[108].mxu1  ;;  %v7271_v63 = vld [vmem:[#allocation19_spill] sm:$0xff] }
 0x27a   : > { %v5810_v53 = vpop.eup %5809  ;;  %v3796_v31 = vadd.f32 1.0, %v5808_v32  ;;  %5829 = vpow2.f32 %v4701_v46  ;;  %v3287_v18 = vpop.f32.mrb[60].mxu0  ;;  %v4703_v1 = vmul.f32 -1.442695, %v3550_v4  ;;  %v4992_v8 = vadd.f32 %v7085_v51, %v3460_v37  ;;  %v7272_v46 = vld [vmem:[#allocation20_spill] sm:$0xff]  ;;  %v4000_v32 = vld [vmem:[%s6934_s27 + $0x98] sm:$0xff] }
 0x27b   : > { %v5812_v41 = vpop.eup %5811  ;;  %v4827_v43 = vpack.c.bf16 %v4030_v42, %v4029_v22  ;;  %v3797_v33 = vadd.f32 1.0, %v5810_v53  ;;  %v3289_v19 = vpop.f32.mrb[61].mxu0  ;;  %v7136_v7 = vadd.f32 %v3287_v18, %v7269_v45  ;;  %v4704_v25 = vmul.f32 -1.442695, %v3551_v39 }
 0x27c   : > { %v5814_v9 = vpop.eup %5813  ;;  %5831 = vrcp.f32 %v3796_v31  ;;  %v3798_v55 = vadd.f32 1.0, %v5812_v41  ;;  %v3462_v59 = vpop.f32.mrb[109].mxu1  ;;  %v7140_v60 = vadd.f32 %v3289_v19, %v7270_v24  ;;  %v3552_v12 = vadd.f32 %v4990_v3, %v6878_v17  ;;  %v7273_v41 = vld [vmem:[#allocation2_spill] sm:$0xff]  ;;  %v7275_v24 = vld [vmem:[#allocation4_spill] sm:$0xff] }
 0x27d   : > { %v5816_v49 = vpop.eup %5815  ;;  %4871 = vst [vmem:[%s6969_s10 + $0x40] sm:$0xff] %v4827_v43   ;;  %5833 = vrcp.f32 %v3797_v33  ;;  %v3799_v44 = vadd.f32 1.0, %v5814_v9  ;;  %v3291_v35 = vpop.f32.mrb[62].mxu0  ;;  %v4994_v28 = vadd.f32 %v7089_v14, %v3462_v59  ;;  %v3553_v51 = vadd.f32 %v4992_v8, %v6876_v26 }
 0x27e   : > { %v5818_v20 = vpop.eup %5817  ;;  %3967 = vst [vmem:[%s6944_s8 + $0x90] sm:$0xff] %v5816_v49  ;;  %5835 = vrcp.f32 %v3798_v55  ;;  %v3464_v13 = vpop.f32.mrb[110].mxu1  ;;  %v7147_v16 = vadd.f32 %v3291_v35, %v7271_v63  ;;  %v4705_v47 = vmul.f32 -1.442695, %v3552_v12  ;;  %v7274_v55 = vld [vmem:[#allocation3_spill] sm:$0xff] }
 0x27f   : > { %v5820_v40 = vpop.eup %5819  ;;  %5837 = vrcp.f32 %v3799_v44  ;;  %v3293_v50 = vpop.f32.mrb[63].mxu0  ;;  %v3554_v2 = vadd.f32 %v4994_v28, %v6878_v17  ;;  %v4996_v57 = vadd.f32 %v7095_v48, %v3464_v13  ;;  %v4031_v14 = vmul.f32 %v5818_v20, %v3999_v6  ;;  %v4002_v12 = vld [vmem:[%s6934_s27 + $0xa8] sm:$0xff] }
 0x280   : > { %v3466_v56 = vpop.f32.mrb[111].mxu1  ;;  %v5822_v27 = vpop.eup %5821  ;;  %v3800_v52 = vadd.f32 1.0, %v5820_v40  ;;  %5839 = vpow2.f32 %v4702_v62  ;;  %v7153_v21 = vadd.f32 %v3293_v50, %v7272_v46  ;;  %v4706_v48 = vmul.f32 -1.442695, %v3553_v51 }
 0x281   : > { %v5824_v0 = vpop.eup %5823  ;;  %v3801_v34 = vadd.f32 1.0, %v5822_v27  ;;  %5841 = vpow2.f32 %v4703_v1  ;;  %v4998_v30 = vadd.f32 %v7103_v54, %v3466_v56  ;;  %v3555_v38 = vadd.f32 %v4996_v57, %v6876_v26  ;;  %v3470_v53 = vpop.f32.mrb[112].mxu1 }
 0x282   : > { %v5826_v22 = vpop.eup %5825  ;;  %3968 = vst [vmem:[%s6944_s8 + $0x98] sm:$0xff] %v5824_v0  ;;  %5843 = vrcp.f32 %v3800_v52  ;;  %v3330_v10 = vpop.f32.mrb[0].mxu0  ;;  %v4707_v4 = vmul.f32 -1.442695, %v3554_v2  ;;  %v5000_v9 = vadd.f32 %v7113_v61, %v3470_v53  ;;  %v7276_v2 = vld [vmem:[#allocation5_spill] sm:$0xff] }
 0x283   : > { %v5828_v11 = vpop.eup %5827  ;;  %5845 = vrcp.f32 %v3801_v34  ;;  %v3802_v5 = vadd.f32 1.0, %v5826_v22  ;;  %v3556_v58 = vadd.f32 %v4998_v30, %v6878_v17  ;;  %v4895_v54 = vadd.f32 %v3330_v10, %v7273_v41  ;;  %v3332_v43 = vpop.f32.mrb[1].mxu0 }
 0x284   : > { %v5830_v36 = vpop.eup %5829  ;;  %v3803_v42 = vadd.f32 1.0, %v5828_v11  ;;  %5847 = vpow2.f32 %v4704_v25  ;;  %v3472_v33 = vpop.f32.mrb[113].mxu1  ;;  %v4708_v3 = vmul.f32 -1.442695, %v3555_v38  ;;  %v4896_v62 = vadd.f32 %v3332_v43, %v7274_v55  ;;  %v4001_v25 = vld [vmem:[%s6934_s27 + $0xa0] sm:$0xff] }
 0x285   : > { %5849 = vrcp.f32 %v3802_v5  ;;  %v3804_v31 = vadd.f32 1.0, %v5830_v36  ;;  %v3334_v18 = vpop.f32.mrb[2].mxu0  ;;  %v3474_v37 = vpop.f32.mrb[114].mxu1  ;;  %v3501_v1 = vadd.f32 %v4895_v54, %v6876_v26  ;;  %v5002_v19 = vadd.f32 %v7117_v29, %v3472_v33 }
 0x286   : > { %v5832_v39 = vpop.eup %5831  ;;  %5851 = vrcp.f32 %v3803_v42  ;;  %v3336_v59 = vpop.f32.mrb[3].mxu0  ;;  %v4709_v61 = vmul.f32 -1.442695, %v3556_v58  ;;  %v3557_v8 = vadd.f32 %v5000_v9, %v6876_v26  ;;  %v4897_v35 = vadd.f32 %v3334_v18, %v7275_v24  ;;  %v7277_v42 = vld [vmem:[#allocation6_spill] sm:$0xff] }
 0x287   : > { %v5834_v49 = vpop.eup %5833  ;;  %v4032_v44 = vmul.f32 %v5832_v39, %v4000_v32  ;;  %5853 = vrcp.f32 %v3804_v31  ;;  %v3476_v20 = vpop.f32.mrb[115].mxu1  ;;  %v4654_v29 = vmul.f32 -1.442695, %v3501_v1  ;;  %v3502_v50 = vadd.f32 %v4896_v62, %v6878_v17  ;;  %v7278_v62 = vld [vmem:[#allocation7_spill] sm:$0xff] }
 0x288   : > { %v5836_v45 = vpop.eup %5835  ;;  %3969 = vst [vmem:[%s6944_s8 + $0xa0] sm:$0xff] %v5834_v49  ;;  %5855 = vpow2.f32 %v4705_v47  ;;  %v4710_v28 = vmul.f32 -1.442695, %v3557_v8  ;;  %v3558_v52 = vadd.f32 %v5002_v19, %v6878_v17  ;;  %v5004_v51 = vadd.f32 %v7124_v23, %v3474_v37  ;;  %v4003_v23 = vld [vmem:[%s6934_s27 + $0xb0] sm:$0xff] }
 0x289   : > { %v5838_v13 = vpop.eup %5837  ;;  %v4832_v40 = vpack.c.bf16 %v4032_v44, %v4031_v14  ;;  %5857 = vpow2.f32 %v4706_v48  ;;  %v3503_v34 = vadd.f32 %v4897_v35, %v6876_v26  ;;  %v4898_v57 = vadd.f32 %v3336_v59, %v7276_v2  ;;  %v3480_v14 = vpop.f32.mrb[116].mxu1 }
 0x28a   : > { %v5840_v6 = vpop.eup %5839  ;;  %3970 = vst [vmem:[%s6944_s8 + $0xa8] sm:$0xff] %v5838_v13  ;;  %5859 = vpow2.f32 %v4707_v4  ;;  %v3340_v22 = vpop.f32.mrb[4].mxu0  ;;  %v4033_v30 = vmul.f32 %v5836_v45, %v4001_v25  ;;  %v4655_v36 = vmul.f32 -1.442695, %v3502_v50  ;;  %v5006_v32 = vadd.f32 %v7128_v15, %v3476_v20  ;;  %v4004_v4 = vld [vmem:[%s6934_s27 + $0xb8] sm:$0xff] }
 0x28b   : > { %v5842_v56 = vpop.eup %5841  ;;  %4872 = vst [vmem:[%s6969_s10 + $0x48] sm:$0xff] %v4832_v40   ;;  %v3805_v27 = vadd.f32 1.0, %v5840_v6  ;;  %5861 = vpow2.f32 %v4708_v3  ;;  %v3342_v5 = vpop.f32.mrb[5].mxu0  ;;  %v4899_v48 = vadd.f32 %v3340_v22, %v7277_v42  ;;  %v4711_v54 = vmul.f32 -1.442695, %v3558_v52  ;;  %v7279_v6 = vld [vmem:[#allocation8_spill] sm:$0xff] }
 0x28c   : > { %v5844_v63 = vpop.eup %5843  ;;  %v3806_v0 = vadd.f32 1.0, %v5842_v56  ;;  %5863 = vpow2.f32 %v4709_v61  ;;  %v3482_v47 = vpop.f32.mrb[117].mxu1  ;;  %v4656_v3 = vmul.f32 -1.442695, %v3503_v34  ;;  %v3559_v15 = vadd.f32 %v5004_v51, %v6876_v26 }
 0x28d   : > { %v5846_v46 = vpop.eup %5845  ;;  %v4034_v11 = vmul.f32 %v5844_v63, %v4002_v12  ;;  %5865 = vrcp.f32 %v3805_v27  ;;  %v3344_v58 = vpop.f32.mrb[6].mxu0  ;;  %v5008_v55 = vadd.f32 %v7136_v7, %v3480_v14  ;;  %v4900_v18 = vadd.f32 %v3342_v5, %v7278_v62  ;;  %v7280_v27 = vld [vmem:[#allocation9_spill] sm:$0xff]  ;;  %v4006_v5 = vld [vmem:[%s6934_s27 + $0xc8] sm:$0xff] }
 0x28e   : > { %v5848_v38 = vpop.eup %5847  ;;  %3971 = vst [vmem:[%s6944_s8 + $0xb0] sm:$0xff] %v5846_v46  ;;  %5867 = vrcp.f32 %v3806_v0  ;;  %v3484_v10 = vpop.f32.mrb[118].mxu1  ;;  %v5010_v1 = vadd.f32 %v7140_v60, %v3482_v47  ;;  %v3504_v20 = vadd.f32 %v4898_v57, %v6878_v17  ;;  %v4712_v35 = vmul.f32 -1.442695, %v3559_v15 }
 0x28f   : > { %v5850_v53 = vpop.eup %5849  ;;  %v4837_v31 = vpack.c.bf16 %v4034_v11, %v4033_v30  ;;  %v3807_v41 = vadd.f32 1.0, %v5848_v38  ;;  %5869 = vpow2.f32 %v4654_v29  ;;  %v3346_v43 = vpop.f32.mrb[7].mxu0  ;;  %v3560_v60 = vadd.f32 %v5006_v32, %v6878_v17  ;;  %v4005_v11 = vld [vmem:[%s6934_s27 + $0xc0] sm:$0xff] }
 0x290   : > { %v3486_v33 = vpop.f32.mrb[119].mxu1  ;;  %v5852_v39 = vpop.eup %5851  ;;  %5871 = vpow2.f32 %v4710_v28  ;;  %v4035_v49 = vmul.f32 %v5850_v53, %v4003_v23  ;;  %v4901_v25 = vadd.f32 %v3344_v58, %v7279_v6  ;;  %v4657_v28 = vmul.f32 -1.442695, %v3504_v20 }
 0x291   : > { %v5854_v9 = vpop.eup %5853  ;;  %4873 = vst [vmem:[%s6969_s10 + $0x50] sm:$0xff] %v4837_v31   ;;  %3972 = vst [vmem:[%s6944_s8 + $0xb8] sm:$0xff] %v5852_v39  ;;  %5873 = vrcp.f32 %v3807_v41  ;;  %v5012_v50 = vadd.f32 %v7147_v16, %v3484_v10  ;;  %v4902_v52 = vadd.f32 %v3346_v43, %v7280_v27  ;;  %v5014_v51 = vadd.f32 %v7153_v21, %v3486_v33  ;;  %v4007_v43 = vld [vmem:[%s6934_s27 + $0xd0] sm:$0xff]  ;;  %v4008_v33 = vld [vmem:[%s6934_s27 + $0xd8] sm:$0xff] }
 0x292   : > { %v5856_v37 = vpop.eup %5855  ;;  %v4036_v44 = vmul.f32 %v5854_v9, %v4004_v4  ;;  %5875 = vpow2.f32 %v4655_v36  ;;  %v4713_v2 = vmul.f32 -1.442695, %v3560_v60  ;;  %v3505_v57 = vadd.f32 %v4899_v48, %v6876_v26  ;;  %v3981_v27 = vld [vmem:[%s6934_s27] sm:$0xff] }
 0x293   : > { %v5858_v19 = vpop.eup %5857  ;;  %v3808_v59 = vadd.f32 1.0, %v5856_v37  ;;  %5877 = vpow2.f32 %v4711_v54  ;;  %v3561_v14 = vadd.f32 %v5008_v55, %v6876_v26  ;;  %v3506_v21 = vadd.f32 %v4900_v18, %v6878_v17 }
 0x294   : > { %v5860_v45 = vpop.eup %5859  ;;  %v4842_v61 = vpack.c.bf16 %v4036_v44, %v4035_v49  ;;  %v3809_v8 = vadd.f32 1.0, %v5858_v19  ;;  %5879 = vpow2.f32 %v4656_v3  ;;  %v3562_v38 = vadd.f32 %v5010_v1, %v6878_v17 }
 0x295   : > { %v5862_v24 = vpop.eup %5861  ;;  %5881 = vrcp.f32 %v3808_v59  ;;  %v3810_v7 = vadd.f32 1.0, %v5860_v45  ;;  %v4658_v32 = vmul.f32 -1.442695, %v3505_v57  ;;  %v3507_v42 = vadd.f32 %v4901_v25, %v6876_v26 }
 0x296   : > { %v5864_v13 = vpop.eup %5863  ;;  %4874 = vst [vmem:[%s6969_s10 + $0x58] sm:$0xff] %v4842_v61   ;;  %5883 = vrcp.f32 %v3809_v8  ;;  %v3811_v40 = vadd.f32 1.0, %v5862_v24  ;;  %v4714_v10 = vmul.f32 -1.442695, %v3561_v14  ;;  %v4659_v41 = vmul.f32 -1.442695, %v3506_v21 }
 0x297   : > { %v5866_v12 = vpop.eup %5865  ;;  %5885 = vrcp.f32 %v3810_v7  ;;  %v3812_v29 = vadd.f32 1.0, %v5864_v13  ;;  %v4715_v39 = vmul.f32 -1.442695, %v3562_v38  ;;  %v3563_v3 = vadd.f32 %v5012_v50, %v6876_v26 }
 0x298   : > { %v5868_v56 = vpop.eup %5867  ;;  %3973 = vst [vmem:[%s6944_s8 + $0xc0] sm:$0xff] %v5866_v12  ;;  %5887 = vrcp.f32 %v3811_v40  ;;  %v4660_v55 = vmul.f32 -1.442695, %v3507_v42  ;;  %v3508_v62 = vadd.f32 %v4902_v52, %v6878_v17  ;;  %v3564_v1 = vadd.f32 %v5014_v51, %v6878_v17  ;;  %v3982_v52 = vld [vmem:[%s6934_s27 + $0x8] sm:$0xff] }
 0x299   : > { %v5870_v63 = vpop.eup %5869  ;;  %5889 = vrcp.f32 %v3812_v29  ;;  %v4037_v31 = vmul.f32 %v5868_v56, %v4005_v11  ;;  %v4716_v59 = vmul.f32 -1.442695, %v3563_v3 }
 0x29a   : > { %v5872_v0 = vpop.eup %5871  ;;  %v3757_v34 = vadd.f32 1.0, %v5870_v63  ;;  %5891 = vpow2.f32 %v4712_v35  ;;  %v4661_v8 = vmul.f32 -1.442695, %v3508_v62  ;;  %v4717_v35 = vmul.f32 -1.442695, %v3564_v1 }
 0x29b   : > { %v5874_v22 = vpop.eup %5873  ;;  %v3813_v16 = vadd.f32 1.0, %v5872_v0  ;;  %5893 = vpow2.f32 %v4657_v28 }
 0x29c   : > { %v5876_v46 = vpop.eup %5875  ;;  %3974 = vst [vmem:[%s6944_s8 + $0xc8] sm:$0xff] %v5874_v22  ;;  %5895 = vrcp.f32 %v3757_v34 }
 0x29d   : > { %v5878_v30 = vpop.eup %5877  ;;  %5897 = vrcp.f32 %v3813_v16  ;;  %v3758_v47 = vadd.f32 1.0, %v5876_v46  ;;  %v4009_v16 = vld [vmem:[%s6934_s27 + $0xe0] sm:$0xff]  ;;  %v4010_v46 = vld [vmem:[%s6934_s27 + $0xe8] sm:$0xff] }
 0x29e   : > { %v5880_v23 = vpop.eup %5879  ;;  %v3814_v36 = vadd.f32 1.0, %v5878_v30  ;;  %5899 = vpow2.f32 %v4713_v2 }
 0x29f   : > { %v5882_v48 = vpop.eup %5881  ;;  %5901 = vrcp.f32 %v3758_v47  ;;  %v3759_v58 = vadd.f32 1.0, %v5880_v23 }
 0x2a0   : > { %v5884_v53 = vpop.eup %5883  ;;  %v4038_v4 = vmul.f32 %v5882_v48, %v4006_v5  ;;  %5903 = vrcp.f32 %v3814_v36 }
 0x2a1   : > { %v5886_v54 = vpop.eup %5885  ;;  %3975 = vst [vmem:[%s6944_s8 + $0xd0] sm:$0xff] %v5884_v53  ;;  %5905 = vrcp.f32 %v3759_v58 }
 0x2a2   : > { %v5888_v9 = vpop.eup %5887  ;;  %v4847_v15 = vpack.c.bf16 %v4038_v4, %v4037_v31  ;;  %5907 = vpow2.f32 %v4658_v32  ;;  %v4039_v49 = vmul.f32 %v5886_v54, %v4007_v43  ;;  %v3983_v4 = vld [vmem:[%s6934_s27 + $0x10] sm:$0xff] }
 0x2a3   : > { %v5890_v18 = vpop.eup %5889  ;;  %3976 = vst [vmem:[%s6944_s8 + $0xd8] sm:$0xff] %v5888_v9  ;;  %5909 = vpow2.f32 %v4714_v10 }
 0x2a4   : > { %v5892_v37 = vpop.eup %5891  ;;  %4875 = vst [vmem:[%s6969_s10 + $0x60] sm:$0xff] %v4847_v15   ;;  %v4040_v44 = vmul.f32 %v5890_v18, %v4008_v33  ;;  %5911 = vpow2.f32 %v4659_v41  ;;  %v3984_v41 = vld [vmem:[%s6934_s27 + $0x18] sm:$0xff]  ;;  %v4011_v33 = vld [vmem:[%s6934_s27 + $0xf0] sm:$0xff] }
 0x2a5   : > { %v5894_v26 = vpop.eup %5893  ;;  %v3815_v19 = vadd.f32 1.0, %v5892_v37  ;;  %5913 = vpow2.f32 %v4715_v39  ;;  %v4012_v39 = vld [vmem:[%s6934_s27 + $0xf8] sm:$0xff] }
 0x2a6   : > { %v5896_v20 = vpop.eup %5895  ;;  %v4852_v45 = vpack.c.bf16 %v4040_v44, %v4039_v49  ;;  %v3760_v61 = vadd.f32 1.0, %v5894_v26  ;;  %5915 = vpow2.f32 %v4660_v55 }
 0x2a7   : > { %v5898_v24 = vpop.eup %5897  ;;  %3949 = vst [vmem:[%s6944_s8] sm:$0xff] %v5896_v20  ;;  %5917 = vrcp.f32 %v3815_v19 }
 0x2a8   : > { %v5900_v7 = vpop.eup %5899  ;;  %4876 = vst [vmem:[%s6969_s10 + $0x68] sm:$0xff] %v4852_v45   ;;  %3977 = vst [vmem:[%s6944_s8 + $0xe0] sm:$0xff] %v5898_v24  ;;  %5919 = vrcp.f32 %v3760_v61 }
 0x2a9   : > { %v5902_v13 = vpop.eup %5901  ;;  %v3816_v17 = vadd.f32 1.0, %v5900_v7  ;;  %5921 = vpow2.f32 %v4716_v59 }
 0x2aa   : > { %v5904_v40 = vpop.eup %5903  ;;  %5923 = vpow2.f32 %v4661_v8  ;;  %v4013_v22 = vmul.f32 %v5902_v13, %v3981_v27 }
 0x2ab   : > { %v5906_v60 = vpop.eup %5905  ;;  %5925 = vrcp.f32 %v3816_v17  ;;  %v4041_v23 = vmul.f32 %v5904_v40, %v4009_v16 }
 0x2ac   : > { %v5908_v6 = vpop.eup %5907  ;;  %3950 = vst [vmem:[%s6944_s8 + $0x8] sm:$0xff] %v5906_v60  ;;  %5927 = vpow2.f32 %v4717_v35 }
 0x2ad   : > { %v5910_v25 = vpop.eup %5909  ;;  %v3761_v12 = vadd.f32 1.0, %v5908_v6 }
 0x2ae   : > { %v5912_v29 = vpop.eup %5911  ;;  %v3817_v28 = vadd.f32 1.0, %v5910_v25 }
 0x2af   : > { %v5914_v50 = vpop.eup %5913  ;;  %5929 = vrcp.f32 %v3761_v12  ;;  %v3762_v51 = vadd.f32 1.0, %v5912_v29 }
 0x2b0   : > { %v5916_v56 = vpop.eup %5915  ;;  %5931 = vrcp.f32 %v3817_v28  ;;  %v3818_v0 = vadd.f32 1.0, %v5914_v50 }
 0x2b1   : > { %v5918_v63 = vpop.eup %5917  ;;  %v3763_v34 = vadd.f32 1.0, %v5916_v56 }
 0x2b2   : > { %v5920_v2 = vpop.eup %5919  ;;  %3978 = vst [vmem:[%s6944_s8 + $0xe8] sm:$0xff] %v5918_v63 }
 0x2b3   : > { %v5922_v57 = vpop.eup %5921  ;;  %v4014_v14 = vmul.f32 %v5920_v2, %v3982_v52  ;;  %5933 = vrcp.f32 %v3763_v34 }
 0x2b4   : > { %v5924_v21 = vpop.eup %5923  ;;  %5935 = vrcp.f32 %v3762_v51  ;;  %v3819_v30 = vadd.f32 1.0, %v5922_v57 }
 0x2b5   : > { %v5926_v11 = vpop.eup %5925  ;;  %v4787_v5 = vpack.c.bf16 %v4014_v14, %v4013_v22  ;;  %5937 = vrcp.f32 %v3818_v0  ;;  %v3764_v47 = vadd.f32 1.0, %v5924_v21 }
 0x2b6   : > { %v5928_v38 = vpop.eup %5927  ;;  %v4042_v36 = vmul.f32 %v5926_v11, %v4010_v46  ;;  %5939 = vrcp.f32 %v3819_v30 }
 0x2b7   : > { %4788 = vst [vmem:[%s6969_s10] sm:$0xff] %v4787_v5   ;;  %5941 = vrcp.f32 %v3764_v47  ;;  %v3820_v32 = vadd.f32 1.0, %v5928_v38 }
 0x2b8   : > { %v4857_v42 = vpack.c.bf16 %v4042_v36, %v4041_v23 }
 0x2b9   : > { %v5930_v48 = vpop.eup %5929  ;;  %5943 = vrcp.f32 %v3820_v32 }
 0x2ba   : > { %v5932_v58 = vpop.eup %5931  ;;  %4877 = vst [vmem:[%s6969_s10 + $0x70] sm:$0xff] %v4857_v42   ;;  %3951 = vst [vmem:[%s6944_s8 + $0x10] sm:$0xff] %v5930_v48 }
 0x2bb   : > { %3979 = vst [vmem:[%s6944_s8 + $0xf0] sm:$0xff] %v5932_v58 }
 0x2bd   : > { %v5934_v10 = vpop.eup %5933 }
 0x2be   : > { %v5936_v53 = vpop.eup %5935  ;;  %3952 = vst [vmem:[%s6944_s8 + $0x18] sm:$0xff] %v5934_v10 }
 0x2bf   : > { %v5938_v31 = vpop.eup %5937  ;;  %v4015_v3 = vmul.f32 %v5936_v53, %v3983_v4 }
 0x2c0   : > { %v5940_v54 = vpop.eup %5939  ;;  %v4043_v55 = vmul.f32 %v5938_v31, %v4011_v33 }
 0x2c1   : > { %v5942_v43 = vpop.eup %5941  ;;  %3980 = vst [vmem:[%s6944_s8 + $0xf8] sm:$0xff] %v5940_v54 }
 0x2c2   : > { %v4016_v9 = vmul.f32 %v5942_v43, %v3984_v41 }
 0x2c3   : > { %v5944_v15 = vpop.eup %5943 }
 0x2c4   : > { %v4792_v62 = vpack.c.bf16 %v4016_v9, %v4015_v3  ;;  %v4044_v18 = vmul.f32 %v5944_v15, %v4012_v39 }
 0x2c6   : > { %4864 = vst [vmem:[%s6969_s10 + $0x8] sm:$0xff] %v4792_v62   ;;  %v4862_v37 = vpack.c.bf16 %v4044_v18, %v4043_v55 }
 0x2c8   : > { %4878 = vst [vmem:[%s6969_s10 + $0x78] sm:$0xff] %v4862_v37  }
 0x2c9 PF: > { %s18_s24 = sadd.s32 1, %s5951_s24  }
 0x2ca   : > { %p15_p4 = scmp.ge.s32.totalorder %s18_s24, 4  }
 0x2cc   :  { %17 = sbr.rel (!%p15_p4) target bundleno = 1 (0x1), region = 92 }

// kernel: sepconvgru2_forward.13
= control target key start
LH: loop header
LB: loop body
LE: loop exit
PB: predicated region body
PF: predicated region fallthrough
CT: control target
= control target key end

     0   :  { %s4791_s24 = smov 0   ;;  %s5877_s0 = inlined_call_operand.vmem [shape: bf16[512,640], index: 0, kind: input, shape index: {}]   ;;  %s5878_s1 = inlined_call_operand.vmem [shape: bf16[512,640], index: 1, kind: input, shape index: {}]   ;;  %s5879_s2 = inlined_call_operand.vmem [shape: bf16[640,128], index: 2, kind: input, shape index: {}]   ;;  %s5880_s3 = inlined_call_operand.vmem [shape: bf16[640,128], index: 3, kind: input, shape index: {}]   ;;  %s5881_s4 = inlined_call_operand.vmem [shape: f32[1,128], index: 4, kind: input, shape index: {}]   ;;  %s5882_s5 = inlined_call_operand.vmem [shape: f32[512,128], index: 5, kind: input, shape index: {}]   ;;  %s5883_s6 = inlined_call_operand.vmem [shape: f32[512,128], index: 6, kind: input, shape index: {}]   ;;  %s5884_s7 = inlined_call_operand.vmem [shape: f32[512,128], index: 7, kind: output, shape index: {}]  }
   0x1 LB: > { %s3372_s25 = sadd.s32 4294967295, %s4749_s24   ;;  %p3376_p0 = scmp.ge.s32.totalorder %s4749_s24, 1  ;;  %s4749_s24 = sphi %s4791_s24, %s17_s24  }
   0x2   : > { %p273_p1 = scmp.lt.s32.totalorder %s4749_s24, 3 }
   0x4   : > { %p274_p2 = pnand %p3376_p0, %p273_p1 }
   0x6   : > { %277 = sbr.rel (%p274_p2) target bundleno = 601 (0x259), region = 48 }
   0xd   : > { %v4375_v0 = vld [vmem:[%s5880_s3 + $0x40] sm:$0xff]   ;;  %s3377_s28 = sshll.u32 %s3372_s25, 5  ;;  %v4377_v2 = vld [vmem:[%s5880_s3 + $0x48] sm:$0xff]   ;;  %v4379_v4 = vld [vmem:[%s5880_s3 + $0x50] sm:$0xff]  }
   0xe   : > { %v4376_v1 = vld [vmem:[%s5880_s3] sm:$0xff]   ;;  %3630 = vmatprep.subr.bf16.mxu0 %v4375_v0  ;;  %4222 = vmatprep.subr.bf16.mxu1 %v4375_v0  ;;  %p323_p3 = scmp.lt.s32.totalorder %s3377_s28, 63  ;;  %v4378_v3 = vld [vmem:[%s5880_s3 + $0x8] sm:$0xff]   ;;  %v4380_v5 = vld [vmem:[%s5880_s3 + $0x10] sm:$0xff]  }
   0xf   : > { %3631 = vmatpush3.bf16.msra.mxu0 %v4376_v1  ;;  %4230 = vmatpush3.bf16.msra.mxu1 %v4376_v1  ;;  %v4381_v6 = vld [vmem:[%s5880_s3 + $0x58] sm:$0xff]   ;;  %v4383_v8 = vld [vmem:[%s5880_s3 + $0x60] sm:$0xff]   ;;  %v4385_v10 = vld [vmem:[%s5880_s3 + $0x68] sm:$0xff]  }
  0x10   : > { %3632 = vmatprep.subr.bf16.mxu0 %v4377_v2  ;;  %4223 = vmatprep.subr.bf16.mxu1 %v4377_v2  ;;  %s5910_s28 = smov (!%p323_p3, %s3377_s28), 63  ;;  %v4382_v7 = vld [vmem:[%s5880_s3 + $0x18] sm:$0xff]   ;;  %v4384_v9 = vld [vmem:[%s5880_s3 + $0x20] sm:$0xff]   ;;  %v4386_v13 = vld [vmem:[%s5880_s3 + $0x28] sm:$0xff]  }
  0x11   : > { %s4366_s18 = smul.u32 20, %s5910_s28  ;;  %v4387_v14 = vld [vmem:[%s5880_s3 + $0x70] sm:$0xff]   ;;  %v4389_v16 = vld [vmem:[%s5880_s3 + $0x78] sm:$0xff]   ;;  %v4397_v18 = vld [vmem:[%s5880_s3 + $0xc0] sm:$0xff]  }
  0x12   : > { %v4388_v15 = vld [vmem:[%s5880_s3 + $0x30] sm:$0xff]   ;;  %v4390_v17 = vld [vmem:[%s5880_s3 + $0x38] sm:$0xff]   ;;  %v4399_v19 = vld [vmem:[%s5880_s3 + $0x100] sm:$0xff]  }
  0x13   : > { %3633 = vmatpush3.bf16.msra.mxu0 %v4378_v3  ;;  %4231 = vmatpush3.bf16.msra.mxu1 %v4378_v3  ;;  %s4834_s26 = scalar_lea.vmem %s5878_s1, %s4366_s18  ;;  %v4398_v22 = vld [vmem:[%s5880_s3 + $0x80] sm:$0xff]   ;;  %v4406_v25 = vld [vmem:[%s5880_s3 + $0xc8] sm:$0xff]   ;;  %v4415_v30 = vld [vmem:[%s5880_s3 + $0xd0] sm:$0xff]   ;;  %s5034_s10 = scalar_lea.vmem %s5877_s0, %s4366_s18 }
  0x14   : > { %3634 = vmatprep.subr.bf16.mxu0 %v4379_v4  ;;  %4224 = vmatprep.subr.bf16.mxu1 %v4379_v4  ;;  %v4393_v11 = vld [vmem:[%s4834_s26 + $0x4] ss:$20 sps:$4 sm:$0xff]   ;;  %v4391_v20 = vld [vmem:[%s4834_s26] ss:$20 sps:$4 sm:$0xff]   ;;  %v4408_v26 = vld [vmem:[%s5880_s3 + $0x108] sm:$0xff]  }
  0x15   : > { %v4396_v12 = vld [vmem:[%s4834_s26 + $0x144] ss:$20 sps:$4 sm:$0xff]   ;;  %1395 = vmatprep.mubr.bf16.mxu0 %v4393_v11  ;;  %v4394_v21 = vld [vmem:[%s4834_s26 + $0x140] ss:$20 sps:$4 sm:$0xff]   ;;  %v4407_v27 = vld [vmem:[%s5880_s3 + $0x88] sm:$0xff]  }
  0x16   : > { %1459 = vmatprep.mubr.bf16.mxu1 %v4396_v12  ;;  %v4400_v23 = vld [vmem:[%s4834_s26 + $0x2c] ss:$20 sps:$4 sm:$0xff]   ;;  %v4404_v28 = vld [vmem:[%s4834_s26 + $0x28] ss:$20 sps:$4 sm:$0xff]   ;;  %v4417_v31 = vld [vmem:[%s5880_s3 + $0x110] sm:$0xff]  }
  0x17   : > { %3635 = vmatpush3.bf16.msra.mxu0 %v4380_v5  ;;  %4232 = vmatpush3.bf16.msra.mxu1 %v4380_v5  ;;  %v4402_v24 = vld [vmem:[%s4834_s26 + $0x16c] ss:$20 sps:$4 sm:$0xff]   ;;  %v4405_v29 = vld [vmem:[%s4834_s26 + $0x168] ss:$20 sps:$4 sm:$0xff]   ;;  %v4416_v34 = vld [vmem:[%s5880_s3 + $0x90] sm:$0xff]  }
  0x18   : > { %3636 = vmatprep.subr.bf16.mxu0 %v4381_v6  ;;  %4225 = vmatprep.subr.bf16.mxu1 %v4381_v6  ;;  %v4409_v32 = vld [vmem:[%s4834_s26 + $0x54] ss:$20 sps:$4 sm:$0xff]   ;;  %v4424_v35 = vld [vmem:[%s5880_s3 + $0xd8] sm:$0xff]   ;;  %v4413_v38 = vld [vmem:[%s4834_s26 + $0x50] ss:$20 sps:$4 sm:$0xff]  }
  0x19   : > { %v4411_v33 = vld [vmem:[%s4834_s26 + $0x194] ss:$20 sps:$4 sm:$0xff]   ;;  %v4426_v36 = vld [vmem:[%s5880_s3 + $0x118] sm:$0xff]   ;;  %v4433_v39 = vld [vmem:[%s5880_s3 + $0xe0] sm:$0xff]  }
  0x1a   : > { %v4425_v37 = vld [vmem:[%s5880_s3 + $0x98] sm:$0xff]   ;;  %v4435_v40 = vld [vmem:[%s5880_s3 + $0x120] sm:$0xff]   ;;  %v4442_v45 = vld [vmem:[%s5880_s3 + $0xe8] sm:$0xff]  }
  0x1b   : > { %3637 = vmatpush3.bf16.msra.mxu0 %v4382_v7  ;;  %4233 = vmatpush3.bf16.msra.mxu1 %v4382_v7  ;;  %v4414_v41 = vld [vmem:[%s4834_s26 + $0x190] ss:$20 sps:$4 sm:$0xff]   ;;  %v4444_v46 = vld [vmem:[%s5880_s3 + $0x128] sm:$0xff]   ;;  %v4460_v55 = vld [vmem:[%s5880_s3 + $0xf8] sm:$0xff]  }
  0x1c   : > { %3638 = vmatprep.subr.bf16.mxu0 %v4383_v8  ;;  %4226 = vmatprep.subr.bf16.mxu1 %v4383_v8  ;;  %v4418_v42 = vld [vmem:[%s4834_s26 + $0x7c] ss:$20 sps:$4 sm:$0xff]   ;;  %v4434_v44 = vld [vmem:[%s5880_s3 + $0xa0] sm:$0xff]   ;;  %v4422_v47 = vld [vmem:[%s4834_s26 + $0x78] ss:$20 sps:$4 sm:$0xff]  }
  0x1d   : > { %v4420_v43 = vld [vmem:[%s4834_s26 + $0x1bc] ss:$20 sps:$4 sm:$0xff]   ;;  %v4423_v48 = vld [vmem:[%s4834_s26 + $0x1b8] ss:$20 sps:$4 sm:$0xff]   ;;  %v4431_v56 = vld [vmem:[%s4834_s26 + $0xa0] ss:$20 sps:$4 sm:$0xff]  }
  0x1e   : > { %v4443_v49 = vld [vmem:[%s5880_s3 + $0xa8] sm:$0xff]   ;;  %v4427_v50 = vld [vmem:[%s4834_s26 + $0xa4] ss:$20 sps:$4 sm:$0xff]   ;;  %v4451_v51 = vld [vmem:[%s5880_s3 + $0xf0] sm:$0xff]  }
  0x1f   : > { %3639 = vmatpush3.bf16.msra.mxu0 %v4384_v9  ;;  %4234 = vmatpush3.bf16.msra.mxu1 %v4384_v9  ;;  %v4429_v52 = vld [vmem:[%s4834_s26 + $0x1e4] ss:$20 sps:$4 sm:$0xff]   ;;  %v4453_v53 = vld [vmem:[%s5880_s3 + $0x130] sm:$0xff]   ;;  %v4436_v60 = vld [vmem:[%s4834_s26 + $0xcc] ss:$20 sps:$4 sm:$0xff]  }
  0x20   : > { %3640 = vmatprep.subr.bf16.mxu0 %v4385_v10  ;;  %4227 = vmatprep.subr.bf16.mxu1 %v4385_v10  ;;  %v4452_v54 = vld [vmem:[%s5880_s3 + $0xb0] sm:$0xff]   ;;  %v4461_v57 = vld [vmem:[%s5880_s3 + $0xb8] sm:$0xff]   ;;  %v4438_v61 = vld [vmem:[%s4834_s26 + $0x20c] ss:$20 sps:$4 sm:$0xff]  }
  0x21   : > { %v4462_v58 = vld [vmem:[%s5880_s3 + $0x138] sm:$0xff]   ;;  %v4432_v59 = vld [vmem:[%s4834_s26 + $0x1e0] ss:$20 sps:$4 sm:$0xff]   ;;  %v4449_v4 = vld [vmem:[%s4834_s26 + $0xf0] ss:$20 sps:$4 sm:$0xff]  }
  0x22   : > { %v4468_v62 = vld [vmem:[%s5879_s2 + $0x40] sm:$0xff]   ;;  %v4440_v0 = vld [vmem:[%s4834_s26 + $0xc8] ss:$20 sps:$4 sm:$0xff]   ;;  %v4458_v8 = vld [vmem:[%s4834_s26 + $0x118] ss:$20 sps:$4 sm:$0xff]  }
  0x23   : > { %3641 = vmatpush3.bf16.msra.mxu0 %v4386_v13  ;;  %4235 = vmatpush3.bf16.msra.mxu1 %v4386_v13  ;;  %v4470_v63 = vld [vmem:[%s5879_s2 + $0xc0] sm:$0xff]   ;;  %v4441_v1 = vld [vmem:[%s4834_s26 + $0x208] ss:$20 sps:$4 sm:$0xff]   ;;  %v4459_v9 = vld [vmem:[%s4834_s26 + $0x258] ss:$20 sps:$4 sm:$0xff]  }
  0x24   : > { %3642 = vmatprep.subr.bf16.mxu0 %v4387_v14  ;;  %4228 = vmatprep.subr.bf16.mxu1 %v4387_v14  ;;  %v4445_v2 = vld [vmem:[%s4834_s26 + $0xf4] ss:$20 sps:$4 sm:$0xff]   ;;  %v4450_v5 = vld [vmem:[%s4834_s26 + $0x230] ss:$20 sps:$4 sm:$0xff]   ;;  %v4465_v10 = vld [vmem:[%s4834_s26 + $0xc] ss:$20 sps:$4 sm:$0xff]  }
  0x25   : > { %v4447_v3 = vld [vmem:[%s4834_s26 + $0x234] ss:$20 sps:$4 sm:$0xff]   ;;  %v4454_v6 = vld [vmem:[%s4834_s26 + $0x11c] ss:$20 sps:$4 sm:$0xff]   ;;  %v4467_v13 = vld [vmem:[%s4834_s26 + $0x38] ss:$20 sps:$4 sm:$0xff]  }
  0x26   : > { %v4456_v7 = vld [vmem:[%s4834_s26 + $0x25c] ss:$20 sps:$4 sm:$0xff]   ;;  %v4469_v14 = vld [vmem:[%s5879_s2] sm:$0xff]  }
  0x27   : > { %3643 = vmatpush3.bf16.msra.mxu0 %v4388_v15  ;;  %4236 = vmatpush3.bf16.msra.mxu1 %v4388_v15  ;;  %v4466_v11 = vld [vmem:[%s4834_s26 + $0x10] ss:$20 sps:$4 sm:$0xff]   ;;  %v4463_v12 = vld [vmem:[%s4834_s26 + $0x8] ss:$20 sps:$4 sm:$0xff]  }
  0x28   : > { %3644 = vmatprep.subr.bf16.mxu0 %v4389_v16  ;;  %4229 = vmatprep.subr.bf16.mxu1 %v4389_v16  ;;  %v4471_v15 = vld [vmem:[%s4834_s26 + $0x34] ss:$20 sps:$4 sm:$0xff]  }
  0x29   : > { %v4473_v16 = vld [vmem:[%s4834_s26 + $0x60] ss:$20 sps:$4 sm:$0xff]  }
  0x2b   : > { %3645 = vmatpush3.bf16.msra.mxu0 %v4390_v17  ;;  %4237 = vmatpush3.bf16.msra.mxu1 %v4390_v17  ;;  %v4474_v17 = vld [vmem:[%s5879_s2 + $0x80] sm:$0xff]  }
  0x2c   : > { %3742 = vmatprep.subr.bf16.mxu1 %v4397_v18  ;;  %4126 = vmatprep.subr.bf16.mxu0 %v4399_v19  ;;  %v4477_v18 = vld [vmem:[%s5879_s2 + $0xc8] sm:$0xff]  }
  0x2e   : > { %1396 = vmatmul.mubr.bf16.vlgmr.msra.gmra.mrb[0].mxu0 %v4391_v20  ;;  %1460 = vmatmul.mubr.bf16.vlgmr.msra.gmra.mrb[0].mxu1 %v4394_v21  ;;  %v4481_v20 = vld [vmem:[%s5879_s2 + $0x88] sm:$0xff]  }
  0x2f   : > { %3743 = vmatpush3.bf16.msra.mxu1 %v4398_v22  ;;  %1403 = vmatprep.mubr.bf16.mxu0 %v4400_v23  ;;  %v4485_v21 = vld [vmem:[%s5879_s2 + $0x8] sm:$0xff]   ;;  %v4475_v22 = vld [vmem:[%s4834_s26 + $0x30] ss:$20 sps:$4 sm:$0xff]  }
  0x30   : > { %1467 = vmatprep.mubr.bf16.mxu1 %v4402_v24  ;;  %4127 = vmatpush3.bf16.msra.mxu0 %v4399_v19  ;;  %v4484_v19 = vld [vmem:[%s5879_s2 + $0x48] sm:$0xff]   ;;  %v4500_v24 = vld [vmem:[%s5879_s2 + $0x50] sm:$0xff]  }
  0x31   : > { %3744 = vmatprep.subr.bf16.mxu1 %v4406_v25  ;;  %4128 = vmatprep.subr.bf16.mxu0 %v4408_v26  ;;  %v4476_v23 = vld [vmem:[%s4834_s26 + $0x88] ss:$20 sps:$4 sm:$0xff]  }
  0x32   : > { %v4478_v25 = vld [vmem:[%s4834_s26 + $0x5c] ss:$20 sps:$4 sm:$0xff]  }
  0x33   : > { %3745 = vmatpush3.bf16.msra.mxu1 %v4407_v27  ;;  %v4486_v27 = vld [vmem:[%s5879_s2 + $0xd0] sm:$0xff]  }
  0x34   : > { %4129 = vmatpush3.bf16.msra.mxu0 %v4408_v26  ;;  %3746 = vmatprep.subr.bf16.mxu1 %v4415_v30  ;;  %v4480_v26 = vld [vmem:[%s4834_s26 + $0xb0] ss:$20 sps:$4 sm:$0xff]  }
  0x35   : > { %4130 = vmatprep.subr.bf16.mxu0 %v4417_v31  ;;  %v4501_v30 = vld [vmem:[%s5879_s2 + $0x10] sm:$0xff]  }
  0x36   : > { %1404 = vmatmul.mubr.bf16.gmra.mrb[4].mxu0 %v4404_v28  ;;  %1468 = vmatmul.mubr.bf16.gmra.mrb[4].mxu1 %v4405_v29  ;;  %v4490_v28 = vld [vmem:[%s5879_s2 + $0x90] sm:$0xff]   ;;  %v4493_v29 = vld [vmem:[%s5879_s2 + $0xd8] sm:$0xff]  }
  0x37   : > { %1411 = vmatprep.mubr.bf16.mxu0 %v4409_v32  ;;  %1475 = vmatprep.mubr.bf16.mxu1 %v4411_v33  ;;  %v4482_v32 = vld [vmem:[%s4834_s26 + $0x58] ss:$20 sps:$4 sm:$0xff]  }
  0x38   : > { %3747 = vmatpush3.bf16.msra.mxu1 %v4416_v34  ;;  %4131 = vmatpush3.bf16.msra.mxu0 %v4417_v31  ;;  %v4516_v31 = vld [vmem:[%s5879_s2 + $0x58] sm:$0xff]  }
  0x39   : > { %3748 = vmatprep.subr.bf16.mxu1 %v4424_v35  ;;  %4132 = vmatprep.subr.bf16.mxu0 %v4426_v36  ;;  %v4483_v33 = vld [vmem:[%s4834_s26 + $0xd8] ss:$20 sps:$4 sm:$0xff]  }
  0x3a   : > { %v4497_v34 = vld [vmem:[%s5879_s2 + $0x98] sm:$0xff]  }
  0x3b   : > { %v4517_v35 = vld [vmem:[%s5879_s2 + $0x18] sm:$0xff]  }
  0x3c   : > { %3749 = vmatpush3.bf16.msra.mxu1 %v4425_v37  ;;  %4133 = vmatpush3.bf16.msra.mxu0 %v4426_v36  ;;  %v4502_v36 = vld [vmem:[%s5879_s2 + $0xe0] sm:$0xff]  }
  0x3d   : > { %3750 = vmatprep.subr.bf16.mxu1 %v4433_v39  ;;  %4134 = vmatprep.subr.bf16.mxu0 %v4435_v40  ;;  %v4487_v37 = vld [vmem:[%s4834_s26 + $0x84] ss:$20 sps:$4 sm:$0xff]  }
  0x3e   : > { %1412 = vmatmul.mubr.bf16.gmra.mrb[8].mxu0 %v4413_v38  ;;  %1476 = vmatmul.mubr.bf16.gmra.mrb[8].mxu1 %v4414_v41  ;;  %v4489_v38 = vld [vmem:[%s4834_s26 + $0x100] ss:$20 sps:$4 sm:$0xff]   ;;  %v4513_v41 = vld [vmem:[%s5879_s2 + $0xa8] sm:$0xff]  }
  0x3f   : > { %1419 = vmatprep.mubr.bf16.mxu0 %v4418_v42  ;;  %1483 = vmatprep.mubr.bf16.mxu1 %v4420_v43  ;;  %v4506_v39 = vld [vmem:[%s5879_s2 + $0xa0] sm:$0xff]  }
  0x40   : > { %3751 = vmatpush3.bf16.msra.mxu1 %v4434_v44  ;;  %4135 = vmatpush3.bf16.msra.mxu0 %v4435_v40  ;;  %v4509_v40 = vld [vmem:[%s5879_s2 + $0xe8] sm:$0xff]   ;;  %v4533_v42 = vld [vmem:[%s5879_s2 + $0x60] sm:$0xff]  }
  0x41   : > { %3752 = vmatprep.subr.bf16.mxu1 %v4442_v45  ;;  %4136 = vmatprep.subr.bf16.mxu0 %v4444_v46  ;;  %v4491_v43 = vld [vmem:[%s4834_s26 + $0x80] ss:$20 sps:$4 sm:$0xff]  }
  0x42   : > { %v4534_v44 = vld [vmem:[%s5879_s2 + $0x20] sm:$0xff]   ;;  %v4518_v45 = vld [vmem:[%s5879_s2 + $0xf0] sm:$0xff]  }
  0x44   : > { %3753 = vmatpush3.bf16.msra.mxu1 %v4443_v49  ;;  %4137 = vmatpush3.bf16.msra.mxu0 %v4444_v46  ;;  %v4492_v46 = vld [vmem:[%s4834_s26 + $0x128] ss:$20 sps:$4 sm:$0xff]   ;;  %v4522_v49 = vld [vmem:[%s5879_s2 + $0xb0] sm:$0xff]  }
  0x45   : > { %3754 = vmatprep.subr.bf16.mxu1 %v4451_v51  ;;  %4138 = vmatprep.subr.bf16.mxu0 %v4453_v53  ;;  %v4526_v51 = vld [vmem:[%s5879_s2 + $0xb8] sm:$0xff]  }
  0x46   : > { %1420 = vmatmul.mubr.bf16.gmra.mrb[12].mxu0 %v4422_v47  ;;  %1484 = vmatmul.mubr.bf16.gmra.mrb[12].mxu1 %v4423_v48  ;;  %v4494_v47 = vld [vmem:[%s4834_s26 + $0xac] ss:$20 sps:$4 sm:$0xff]   ;;  %v4496_v48 = vld [vmem:[%s4834_s26 + $0x150] ss:$20 sps:$4 sm:$0xff]  }
  0x47   : > { %1427 = vmatprep.mubr.bf16.mxu0 %v4427_v50  ;;  %1491 = vmatprep.mubr.bf16.mxu1 %v4429_v52  ;;  %v4525_v50 = vld [vmem:[%s5879_s2 + $0xf8] sm:$0xff]   ;;  %v4547_v52 = vld [vmem:[%s5879_s2 + $0x68] sm:$0xff]  }
  0x48   : > { %3755 = vmatpush3.bf16.msra.mxu1 %v4452_v54  ;;  %4139 = vmatpush3.bf16.msra.mxu0 %v4453_v53  ;;  %v4498_v53 = vld [vmem:[%s4834_s26 + $0xa8] ss:$20 sps:$4 sm:$0xff]   ;;  %v4499_v54 = vld [vmem:[%s4834_s26 + $0x178] ss:$20 sps:$4 sm:$0xff]  }
  0x49   : > { %3756 = vmatprep.subr.bf16.mxu1 %v4460_v55  ;;  %4140 = vmatprep.subr.bf16.mxu0 %v4462_v58  ;;  %v4549_v55 = vld [vmem:[%s5879_s2 + $0x28] sm:$0xff]  }
  0x4c   : > { %3757 = vmatpush3.bf16.msra.mxu1 %v4461_v57  ;;  %4141 = vmatpush3.bf16.msra.mxu0 %v4462_v58  ;;  %v4503_v57 = vld [vmem:[%s4834_s26 + $0xd4] ss:$20 sps:$4 sm:$0xff]  }
  0x4d   : > { %3878 = vmatprep.subr.bf16.mxu1 %v4468_v62  ;;  %3990 = vmatprep.subr.bf16.mxu0 %v4470_v63  ;;  %v4505_v58 = vld [vmem:[%s4834_s26 + $0x1a0] ss:$20 sps:$4 sm:$0xff]   ;;  %v4510_v63 = vld [vmem:[%s4834_s26 + $0xfc] ss:$20 sps:$4 sm:$0xff]  }
  0x4e   : > { %1428 = vmatmul.mubr.bf16.gmra.mrb[16].mxu0 %v4431_v56  ;;  %1492 = vmatmul.mubr.bf16.gmra.mrb[16].mxu1 %v4432_v59  ;;  %v4535_v56 = vld [vmem:[%s5879_s2 + $0x100] sm:$0xff]   ;;  %v4562_v59 = vld [vmem:[%s5879_s2 + $0x70] sm:$0xff]  }
  0x4f   : > { %1435 = vmatprep.mubr.bf16.mxu0 %v4436_v60  ;;  %1499 = vmatprep.mubr.bf16.mxu1 %v4438_v61  ;;  %v4507_v60 = vld [vmem:[%s4834_s26 + $0xd0] ss:$20 sps:$4 sm:$0xff]   ;;  %v4508_v61 = vld [vmem:[%s4834_s26 + $0x1c8] ss:$20 sps:$4 sm:$0xff]  }
  0x50   : > { %v4564_v62 = vld [vmem:[%s5879_s2 + $0x30] sm:$0xff]  }
  0x56   : > { %1436 = vmatmul.mubr.bf16.gmra.mrb[20].mxu0 %v4440_v0  ;;  %1500 = vmatmul.mubr.bf16.gmra.mrb[20].mxu1 %v4441_v1  ;;  %v4512_v0 = vld [vmem:[%s4834_s26 + $0x1f0] ss:$20 sps:$4 sm:$0xff]   ;;  %v4514_v1 = vld [vmem:[%s4834_s26 + $0xf8] ss:$20 sps:$4 sm:$0xff]  }
  0x57   : > { %1443 = vmatprep.mubr.bf16.mxu0 %v4445_v2  ;;  %1507 = vmatprep.mubr.bf16.mxu1 %v4447_v3  ;;  %v4515_v2 = vld [vmem:[%s4834_s26 + $0x218] ss:$20 sps:$4 sm:$0xff]  }
  0x58   : > { %v4577_v3 = vld [vmem:[%s5879_s2 + $0x78] sm:$0xff]  }
  0x5e   : > { %1444 = vmatmul.mubr.bf16.gmra.mrb[24].mxu0 %v4449_v4  ;;  %1508 = vmatmul.mubr.bf16.gmra.mrb[24].mxu1 %v4450_v5  ;;  %v4579_v4 = vld [vmem:[%s5879_s2 + $0x38] sm:$0xff]  }
  0x5f   : > { %1451 = vmatprep.mubr.bf16.mxu0 %v4454_v6  ;;  %1515 = vmatprep.mubr.bf16.mxu1 %v4456_v7  ;;  %v4519_v5 = vld [vmem:[%s4834_s26 + $0x124] ss:$20 sps:$4 sm:$0xff]   ;;  %v4521_v6 = vld [vmem:[%s4834_s26 + $0x240] ss:$20 sps:$4 sm:$0xff]  }
  0x60   : > { %v4523_v7 = vld [vmem:[%s4834_s26 + $0x120] ss:$20 sps:$4 sm:$0xff]  }
  0x66   : > { %1452 = vmatmul.mubr.bf16.gmra.mrb[28].mxu0 %v4458_v8  ;;  %1516 = vmatmul.mubr.bf16.gmra.mrb[28].mxu1 %v4459_v9  ;;  %v4524_v8 = vld [vmem:[%s4834_s26 + $0x268] ss:$20 sps:$4 sm:$0xff]   ;;  %v4527_v9 = vld [vmem:[%s4834_s26 + $0x14c] ss:$20 sps:$4 sm:$0xff]  }
  0x67   : > { %1556 = vmatprep.mubr.bf16.mxu1 %v4465_v10  ;;  %4142 = vmatprep.mubr.bf16.mxu0 %v4466_v11  ;;  %v4531_v10 = vld [vmem:[%s5034_s10 + $0xc] ss:$20 sps:$4 sm:$0xff]   ;;  %v4529_v11 = vld [vmem:[%s5034_s10 + $0x8] ss:$20 sps:$4 sm:$0xff]  }
  0x6e   : > { %1557 = vmatmul.mubr.bf16.vlgmr.msra.gmra.mrb[32].mxu1 %v4463_v12  ;;  %4143 = vmatmul.mubr.bf16.vlgmr.msra.gmra.mrb[32].mxu0 %v4467_v13  ;;  %v4532_v12 = vld [vmem:[%s4834_s26 + $0x148] ss:$20 sps:$4 sm:$0xff]  }
  0x6f   : > { %3879 = vmatpush3.bf16.msra.mxu1 %v4469_v14  ;;  %1564 = vmatprep.mubr.bf16.mxu1 %v4471_v15  ;;  %v4536_v13 = vld [vmem:[%s4834_s26 + $0x174] ss:$20 sps:$4 sm:$0xff]  }
  0x70   : > { %4146 = vmatprep.mubr.bf16.mxu0 %v4473_v16  ;;  %3991 = vmatpush3.bf16.msra.mxu0 %v4474_v17  ;;  %v4538_v14 = vld [vmem:[%s5034_s10 + $0x34] ss:$20 sps:$4 sm:$0xff]   ;;  %v4540_v17 = vld [vmem:[%s4834_s26 + $0x170] ss:$20 sps:$4 sm:$0xff]  }
  0x71   : > { %3992 = vmatprep.subr.bf16.mxu0 %v4477_v18  ;;  %3880 = vmatprep.subr.bf16.mxu1 %v4484_v19  ;;  %v4550_v15 = vld [vmem:[%s5879_s2 + $0x108] sm:$0xff]   ;;  %v4565_v16 = vld [vmem:[%s5879_s2 + $0x110] sm:$0xff]  }
  0x72   : > { %v4541_v18 = vld [vmem:[%s5034_s10 + $0x30] ss:$20 sps:$4 sm:$0xff]  }
  0x73   : > { %3881 = vmatpush3.bf16.msra.mxu1 %v4485_v21  ;;  %v4542_v19 = vld [vmem:[%s4834_s26 + $0x19c] ss:$20 sps:$4 sm:$0xff]  }
  0x74   : > { %3993 = vmatpush3.bf16.msra.mxu0 %v4481_v20  ;;  %3882 = vmatprep.subr.bf16.mxu1 %v4500_v24  ;;  %v4544_v20 = vld [vmem:[%s5034_s10 + $0x5c] ss:$20 sps:$4 sm:$0xff]   ;;  %v4593_v24 = vld [vmem:[%s5879_s2 + $0x120] sm:$0xff]  }
  0x75   : > { %3994 = vmatprep.subr.bf16.mxu0 %v4486_v27  ;;  %v4580_v21 = vld [vmem:[%s5879_s2 + $0x118] sm:$0xff]   ;;  %v4606_v27 = vld [vmem:[%s5879_s2 + $0x128] sm:$0xff]  }
  0x76   : > { %1565 = vmatmul.mubr.bf16.gmra.mrb[36].mxu1 %v4475_v22  ;;  %4147 = vmatmul.mubr.bf16.gmra.mrb[36].mxu0 %v4476_v23  ;;  %v4546_v22 = vld [vmem:[%s4834_s26 + $0x198] ss:$20 sps:$4 sm:$0xff]  }
  0x77   : > { %1572 = vmatprep.mubr.bf16.mxu1 %v4478_v25  ;;  %4150 = vmatprep.mubr.bf16.mxu0 %v4480_v26  ;;  %v4548_v23 = vld [vmem:[%s5034_s10 + $0x58] ss:$20 sps:$4 sm:$0xff]  }
  0x78   : > { %3995 = vmatpush3.bf16.msra.mxu0 %v4490_v28  ;;  %3883 = vmatpush3.bf16.msra.mxu1 %v4501_v30  ;;  %v4551_v25 = vld [vmem:[%s4834_s26 + $0x1c4] ss:$20 sps:$4 sm:$0xff]   ;;  %v4555_v28 = vld [vmem:[%s4834_s26 + $0x1c0] ss:$20 sps:$4 sm:$0xff]  }
  0x79   : > { %3996 = vmatprep.subr.bf16.mxu0 %v4493_v29  ;;  %3884 = vmatprep.subr.bf16.mxu1 %v4516_v31  ;;  %v4553_v26 = vld [vmem:[%s5034_s10 + $0x84] ss:$20 sps:$4 sm:$0xff]   ;;  %v4556_v29 = vld [vmem:[%s5034_s10 + $0x80] ss:$20 sps:$4 sm:$0xff]  }
  0x7a   : > { %v4619_v30 = vld [vmem:[%s5879_s2 + $0x130] sm:$0xff]   ;;  %v4557_v31 = vld [vmem:[%s4834_s26 + $0x1ec] ss:$20 sps:$4 sm:$0xff]  }
  0x7c   : > { %3997 = vmatpush3.bf16.msra.mxu0 %v4497_v34  ;;  %3885 = vmatpush3.bf16.msra.mxu1 %v4517_v35  ;;  %v4561_v34 = vld [vmem:[%s4834_s26 + $0x1e8] ss:$20 sps:$4 sm:$0xff]  }
  0x7d   : > { %3998 = vmatprep.subr.bf16.mxu0 %v4502_v36  ;;  %3886 = vmatprep.subr.bf16.mxu1 %v4533_v42  ;;  %v4563_v35 = vld [vmem:[%s5034_s10 + $0xa8] ss:$20 sps:$4 sm:$0xff]   ;;  %v4576_v42 = vld [vmem:[%s4834_s26 + $0x238] ss:$20 sps:$4 sm:$0xff]  }
  0x7e   : > { %1573 = vmatmul.mubr.bf16.gmra.mrb[40].mxu1 %v4482_v32  ;;  %4151 = vmatmul.mubr.bf16.gmra.mrb[40].mxu0 %v4483_v33  ;;  %v4559_v32 = vld [vmem:[%s5034_s10 + $0xac] ss:$20 sps:$4 sm:$0xff]   ;;  %v4632_v33 = vld [vmem:[%s5879_s2 + $0x138] sm:$0xff]   ;;  %v4566_v36 = vld [vmem:[%s4834_s26 + $0x214] ss:$20 sps:$4 sm:$0xff]  }
  0x7f   : > { %1580 = vmatprep.mubr.bf16.mxu1 %v4487_v37  ;;  %4154 = vmatprep.mubr.bf16.mxu0 %v4489_v38  ;;  %v4568_v37 = vld [vmem:[%s5034_s10 + $0xd4] ss:$20 sps:$4 sm:$0xff]   ;;  %v4570_v38 = vld [vmem:[%s4834_s26 + $0x210] ss:$20 sps:$4 sm:$0xff]  }
  0x80   : > { %3999 = vmatpush3.bf16.msra.mxu0 %v4506_v39  ;;  %3887 = vmatpush3.bf16.msra.mxu1 %v4534_v44  ;;  %v4571_v39 = vld [vmem:[%s5034_s10 + $0xd0] ss:$20 sps:$4 sm:$0xff]  }
  0x81   : > { %4000 = vmatprep.subr.bf16.mxu0 %v4509_v40  ;;  %3888 = vmatprep.subr.bf16.mxu1 %v4547_v52  ;;  %v4572_v40 = vld [vmem:[%s4834_s26 + $0x23c] ss:$20 sps:$4 sm:$0xff]   ;;  %v4581_v44 = vld [vmem:[%s4834_s26 + $0x264] ss:$20 sps:$4 sm:$0xff]   ;;  %v4594_v52 = vld [vmem:[%s5034_s10 + $0x2c] ss:$20 sps:$4 sm:$0xff]  }
  0x84   : > { %4001 = vmatpush3.bf16.msra.mxu0 %v4513_v41  ;;  %3889 = vmatpush3.bf16.msra.mxu1 %v4549_v55  ;;  %v4574_v41 = vld [vmem:[%s5034_s10 + $0xfc] ss:$20 sps:$4 sm:$0xff]  }
  0x85   : > { %4002 = vmatprep.subr.bf16.mxu0 %v4518_v45  ;;  %3890 = vmatprep.subr.bf16.mxu1 %v4562_v59  ;;  %v4583_v45 = vld [vmem:[%s5034_s10 + $0x124] ss:$20 sps:$4 sm:$0xff]  }
  0x86   : > { %1581 = vmatmul.mubr.bf16.gmra.mrb[44].mxu1 %v4491_v43  ;;  %4155 = vmatmul.mubr.bf16.gmra.mrb[44].mxu0 %v4492_v46  ;;  %v4578_v43 = vld [vmem:[%s5034_s10 + $0xf8] ss:$20 sps:$4 sm:$0xff]   ;;  %v4585_v46 = vld [vmem:[%s4834_s26 + $0x260] ss:$20 sps:$4 sm:$0xff]   ;;  %v4599_v55 = vld [vmem:[%s5034_s10 + $0x170] ss:$20 sps:$4 sm:$0xff]  }
  0x87   : > { %1588 = vmatprep.mubr.bf16.mxu1 %v4494_v47  ;;  %4158 = vmatprep.mubr.bf16.mxu0 %v4496_v48  ;;  %v4586_v47 = vld [vmem:[%s5034_s10 + $0x120] ss:$20 sps:$4 sm:$0xff]   ;;  %v4589_v48 = vld [vmem:[%s5034_s10 + $0x4] ss:$20 sps:$4 sm:$0xff]   ;;  %s5495_s26 = sshll.u32 %s5910_s28, 3 }
  0x88   : > { %4003 = vmatpush3.bf16.msra.mxu0 %v4522_v49  ;;  %3891 = vmatpush3.bf16.msra.mxu1 %v4564_v62  ;;  %v4590_v49 = vld [vmem:[%s5034_s10 + $0x14c] ss:$20 sps:$4 sm:$0xff]   ;;  %s5504_s17 = scalar_lea.vmem %s5882_s5, %s5495_s26  ;;  %s5526_s22 = scalar_lea.vmem %s5883_s6, %s5495_s26 }
  0x89   : > { %4004 = vmatprep.subr.bf16.mxu0 %v4525_v50  ;;  %3892 = vmatprep.subr.bf16.mxu1 %v4577_v3  ;;  %v4587_v50 = vld [vmem:[%s5034_s10] ss:$20 sps:$4 sm:$0xff]   ;;  %v4605_v59 = vld [vmem:[%s5034_s10 + $0x198] ss:$20 sps:$4 sm:$0xff]   ;;  %s5625_s27 = scalar_lea.vmem %s5884_s7, %s5495_s26 }
  0x8a   : > { %v4612_v3 = vld [vmem:[%s5034_s10 + $0x1c0] ss:$20 sps:$4 sm:$0xff]  }
  0x8c   : > { %4005 = vmatpush3.bf16.msra.mxu0 %v4526_v51  ;;  %3893 = vmatpush3.bf16.msra.mxu1 %v4579_v4  ;;  %v4592_v51 = vld [vmem:[%s5034_s10 + $0x148] ss:$20 sps:$4 sm:$0xff]  }
  0x8d   : > { %4174 = vmatprep.subr.bf16.mxu0 %v4535_v56 }
  0x8e   : > { %1589 = vmatmul.mubr.bf16.gmra.mrb[48].mxu1 %v4498_v53  ;;  %4159 = vmatmul.mubr.bf16.gmra.mrb[48].mxu0 %v4499_v54  ;;  %v4596_v53 = vld [vmem:[%s5034_s10 + $0x174] ss:$20 sps:$4 sm:$0xff]  }
  0x8f   : > { %1596 = vmatprep.mubr.bf16.mxu1 %v4503_v57  ;;  %4162 = vmatprep.mubr.bf16.mxu0 %v4505_v58  ;;  %v4598_v54 = vld [vmem:[%s5034_s10 + $0x28] ss:$20 sps:$4 sm:$0xff]   ;;  %v4604_v58 = vld [vmem:[%s5034_s10 + $0x50] ss:$20 sps:$4 sm:$0xff]  }
  0x90   : > { %v4602_v57 = vld [vmem:[%s5034_s10 + $0x19c] ss:$20 sps:$4 sm:$0xff]  }
  0x96   : > { %1597 = vmatmul.mubr.bf16.gmra.mrb[52].mxu1 %v4507_v60  ;;  %4163 = vmatmul.mubr.bf16.gmra.mrb[52].mxu0 %v4508_v61  ;;  %v4607_v60 = vld [vmem:[%s5034_s10 + $0x7c] ss:$20 sps:$4 sm:$0xff]   ;;  %v4609_v61 = vld [vmem:[%s5034_s10 + $0x1c4] ss:$20 sps:$4 sm:$0xff]  }
  0x97   : > { %1604 = vmatprep.mubr.bf16.mxu1 %v4510_v63  ;;  %4166 = vmatprep.mubr.bf16.mxu0 %v4512_v0 }
  0x9e   : > { %1605 = vmatmul.mubr.bf16.gmra.mrb[56].mxu1 %v4514_v1  ;;  %4167 = vmatmul.mubr.bf16.gmra.mrb[56].mxu0 %v4515_v2  ;;  %v4611_v2 = vld [vmem:[%s5034_s10 + $0x78] ss:$20 sps:$4 sm:$0xff]  }
  0x9f   : > { %1612 = vmatprep.mubr.bf16.mxu1 %v4519_v5  ;;  %4170 = vmatprep.mubr.bf16.mxu0 %v4521_v6 }
  0xa6   : > { %1613 = vmatmul.mubr.bf16.gmra.mrb[60].mxu1 %v4523_v7  ;;  %4171 = vmatmul.mubr.bf16.gmra.mrb[60].mxu0 %v4524_v8  ;;  %v4613_v8 = vld [vmem:[%s5034_s10 + $0xa4] ss:$20 sps:$4 sm:$0xff]  }
  0xa7   : > { %1620 = vmatprep.mubr.bf16.mxu1 %v4527_v9  ;;  %2695 = vmatprep.mubr.bf16.mxu0 %v4531_v10  ;;  %v4615_v9 = vld [vmem:[%s5034_s10 + $0x1ec] ss:$20 sps:$4 sm:$0xff]  }
  0xae   : > { %1621 = vmatmul.mubr.bf16.gmra.mrb[64].mxu1 %v4532_v12  ;;  %2696 = vmatmul.mubr.bf16.vlgmr.msra.gmra.mrb[64].mxu0 %v4529_v11 }
  0xaf   : > { %1628 = vmatprep.mubr.bf16.mxu1 %v4536_v13  ;;  %2703 = vmatprep.mubr.bf16.mxu0 %v4538_v14 }
  0xb0   : > { %4175 = vmatpush3.bf16.msra.mxu0 %v4535_v56  ;;  %v4600_v56 = vld [vmem:[%s5034_s10 + $0x54] ss:$20 sps:$4 sm:$0xff]  }
  0xb1   : > { %4176 = vmatprep.subr.bf16.mxu0 %v4550_v15 }
  0xb4   : > { %4177 = vmatpush3.bf16.msra.mxu0 %v4550_v15 }
  0xb5   : > { %4178 = vmatprep.subr.bf16.mxu0 %v4565_v16 }
  0xb6   : > { %1629 = vmatmul.mubr.bf16.gmra.mrb[68].mxu1 %v4540_v17  ;;  %2704 = vmatmul.mubr.bf16.gmra.mrb[68].mxu0 %v4541_v18  ;;  %v4617_v18 = vld [vmem:[%s5034_s10 + $0xa0] ss:$20 sps:$4 sm:$0xff]  }
  0xb7   : > { %1636 = vmatprep.mubr.bf16.mxu1 %v4542_v19  ;;  %2711 = vmatprep.mubr.bf16.mxu0 %v4544_v20  ;;  %v4618_v19 = vld [vmem:[%s5034_s10 + $0x1e8] ss:$20 sps:$4 sm:$0xff]  }
  0xb8   : > { %4179 = vmatpush3.bf16.msra.mxu0 %v4565_v16 }
  0xb9   : > { %4180 = vmatprep.subr.bf16.mxu0 %v4580_v21 }
  0xbc   : > { %4181 = vmatpush3.bf16.msra.mxu0 %v4580_v21 }
  0xbd   : > { %4182 = vmatprep.subr.bf16.mxu0 %v4593_v24 }
  0xbe   : > { %1637 = vmatmul.mubr.bf16.gmra.mrb[72].mxu1 %v4546_v22  ;;  %2712 = vmatmul.mubr.bf16.gmra.mrb[72].mxu0 %v4548_v23 }
  0xbf   : > { %1644 = vmatprep.mubr.bf16.mxu1 %v4551_v25  ;;  %2719 = vmatprep.mubr.bf16.mxu0 %v4553_v26  ;;  %v4622_v25 = vld [vmem:[%s5034_s10 + $0x214] ss:$20 sps:$4 sm:$0xff]  }
  0xc0   : > { %4183 = vmatpush3.bf16.msra.mxu0 %v4593_v24  ;;  %v4620_v24 = vld [vmem:[%s5034_s10 + $0xcc] ss:$20 sps:$4 sm:$0xff]  }
  0xc1   : > { %4184 = vmatprep.subr.bf16.mxu0 %v4606_v27 }
  0xc4   : > { %4185 = vmatpush3.bf16.msra.mxu0 %v4606_v27 }
  0xc5   : > { %4186 = vmatprep.subr.bf16.mxu0 %v4619_v30 }
  0xc6   : > { %1645 = vmatmul.mubr.bf16.gmra.mrb[76].mxu1 %v4555_v28  ;;  %2720 = vmatmul.mubr.bf16.gmra.mrb[76].mxu0 %v4556_v29 }
  0xc7   : > { %1652 = vmatprep.mubr.bf16.mxu1 %v4557_v31  ;;  %2727 = vmatprep.mubr.bf16.mxu0 %v4559_v32 }
  0xc8   : > { %4187 = vmatpush3.bf16.msra.mxu0 %v4619_v30 }
  0xc9   : > { %4188 = vmatprep.subr.bf16.mxu0 %v4632_v33 }
  0xcc   : > { %4189 = vmatpush3.bf16.msra.mxu0 %v4632_v33 }
  0xce   : > { %1653 = vmatmul.mubr.bf16.gmra.mrb[80].mxu1 %v4561_v34  ;;  %2728 = vmatmul.mubr.bf16.gmra.mrb[80].mxu0 %v4563_v35  ;;  %v4624_v34 = vld [vmem:[%s5034_s10 + $0xc8] ss:$20 sps:$4 sm:$0xff]   ;;  %v4625_v35 = vld [vmem:[%s5034_s10 + $0x210] ss:$20 sps:$4 sm:$0xff]  }
  0xcf   : > { %1660 = vmatprep.mubr.bf16.mxu1 %v4566_v36  ;;  %2735 = vmatprep.mubr.bf16.mxu0 %v4568_v37 }
  0xd6   : > { %1661 = vmatmul.mubr.bf16.gmra.mrb[84].mxu1 %v4570_v38  ;;  %2736 = vmatmul.mubr.bf16.gmra.mrb[84].mxu0 %v4571_v39 }
  0xd7   : > { %1668 = vmatprep.mubr.bf16.mxu1 %v4572_v40  ;;  %2743 = vmatprep.mubr.bf16.mxu0 %v4574_v41  ;;  %v4626_v40 = vld [vmem:[%s5034_s10 + $0xf4] ss:$20 sps:$4 sm:$0xff]   ;;  %v4628_v41 = vld [vmem:[%s5034_s10 + $0x23c] ss:$20 sps:$4 sm:$0xff]  }
  0xde   : > { %1669 = vmatmul.mubr.bf16.gmra.mrb[88].mxu1 %v4576_v42  ;;  %2744 = vmatmul.mubr.bf16.gmra.mrb[88].mxu0 %v4578_v43 }
  0xdf   : > { %1676 = vmatprep.mubr.bf16.mxu1 %v4581_v44  ;;  %2751 = vmatprep.mubr.bf16.mxu0 %v4583_v45 }
  0xe6   : > { %1677 = vmatmul.mubr.bf16.gmra.mrb[92].mxu1 %v4585_v46  ;;  %2752 = vmatmul.mubr.bf16.gmra.mrb[92].mxu0 %v4586_v47 }
  0xe7   : > { %2534 = vmatprep.mubr.bf16.mxu1 %v4589_v48  ;;  %2759 = vmatprep.mubr.bf16.mxu0 %v4590_v49 }
  0xee   : > { %2535 = vmatmul.mubr.bf16.vlgmr.msra.gmra.mrb[96].mxu1 %v4587_v50  ;;  %2760 = vmatmul.mubr.bf16.gmra.mrb[96].mxu0 %v4592_v51  ;;  %v4630_v50 = vld [vmem:[%s5034_s10 + $0xf0] ss:$20 sps:$4 sm:$0xff]   ;;  %v4631_v51 = vld [vmem:[%s5034_s10 + $0x238] ss:$20 sps:$4 sm:$0xff]  }
  0xef   : > { %2542 = vmatprep.mubr.bf16.mxu1 %v4594_v52  ;;  %2767 = vmatprep.mubr.bf16.mxu0 %v4596_v53 }
  0xf6   : > { %2543 = vmatmul.mubr.bf16.gmra.mrb[100].mxu1 %v4598_v54  ;;  %2768 = vmatmul.mubr.bf16.gmra.mrb[100].mxu0 %v4599_v55 }
  0xf7   : > { %2550 = vmatprep.mubr.bf16.mxu1 %v4600_v56  ;;  %2775 = vmatprep.mubr.bf16.mxu0 %v4602_v57  ;;  %v4633_v56 = vld [vmem:[%s5034_s10 + $0x11c] ss:$20 sps:$4 sm:$0xff]   ;;  %v4635_v57 = vld [vmem:[%s5034_s10 + $0x264] ss:$20 sps:$4 sm:$0xff]  }
  0xfe   : > { %2551 = vmatmul.mubr.bf16.gmra.mrb[104].mxu1 %v4604_v58  ;;  %2776 = vmatmul.mubr.bf16.gmra.mrb[104].mxu0 %v4605_v59 }
  0xff   : > { %2558 = vmatprep.mubr.bf16.mxu1 %v4607_v60  ;;  %2783 = vmatprep.mubr.bf16.mxu0 %v4609_v61 }
 0x101   : > { %v3694_v62 = vpop.f32.mrb[0].mxu1  ;;  %v3646_v63 = vpop.f32.mrb[0].mxu0 }
 0x102   : > { %v3695_v0 = vpop.f32.mrb[1].mxu1  ;;  %v3647_v1 = vpop.f32.mrb[1].mxu0 }
 0x103   : > { %v5168_v4 = vadd.f32 %v3695_v0, %v3694_v62  ;;  %v3697_v5 = vpop.f32.mrb[2].mxu1  ;;  %v5170_v6 = vadd.f32 %v3647_v1, %v3646_v63  ;;  %v3649_v7 = vpop.f32.mrb[2].mxu0 }
 0x104   : > { %v3698_v10 = vpop.f32.mrb[3].mxu1  ;;  %v3650_v11 = vpop.f32.mrb[3].mxu0 }
 0x105   : > { %v5174_v12 = vadd.f32 %v3698_v10, %v3697_v5  ;;  %v5176_v13 = vadd.f32 %v3650_v11, %v3649_v7  ;;  %v4639_v10 = vld [vmem:[%s5034_s10 + $0x144] ss:$20 sps:$4 sm:$0xff]  }
 0x106   : > { %2559 = vmatmul.mubr.bf16.gmra.mrb[108].mxu1 %v4611_v2  ;;  %2784 = vmatmul.mubr.bf16.gmra.mrb[108].mxu0 %v4612_v3  ;;  %v4637_v2 = vld [vmem:[%s5034_s10 + $0x118] ss:$20 sps:$4 sm:$0xff]   ;;  %v4638_v3 = vld [vmem:[%s5034_s10 + $0x260] ss:$20 sps:$4 sm:$0xff]   ;;  %v4641_v11 = vld [vmem:[%s5034_s10 + $0x10] ss:$20 sps:$4 sm:$0xff]  }
 0x107   : > { %2566 = vmatprep.mubr.bf16.mxu1 %v4613_v8  ;;  %2791 = vmatprep.mubr.bf16.mxu0 %v4615_v9 }
 0x109   : > { %v3700_v14 = vpop.f32.mrb[4].mxu1  ;;  %v3652_v15 = vpop.f32.mrb[4].mxu0 }
 0x10a   : > { %v3701_v16 = vpop.f32.mrb[5].mxu1  ;;  %v3653_v17 = vpop.f32.mrb[5].mxu0 }
 0x10b   : > { %v5180_v20 = vadd.f32 %v3701_v16, %v3700_v14  ;;  %v3703_v21 = vpop.f32.mrb[6].mxu1  ;;  %v5182_v22 = vadd.f32 %v3653_v17, %v3652_v15  ;;  %v3655_v23 = vpop.f32.mrb[6].mxu0 }
 0x10c   : > { %v3704_v26 = vpop.f32.mrb[7].mxu1  ;;  %v3656_v27 = vpop.f32.mrb[7].mxu0 }
 0x10d   : > { %v5186_v28 = vadd.f32 %v3704_v26, %v3703_v21  ;;  %v5188_v29 = vadd.f32 %v3656_v27, %v3655_v23 }
 0x10e   : > { %2567 = vmatmul.mubr.bf16.gmra.mrb[112].mxu1 %v4617_v18  ;;  %2792 = vmatmul.mubr.bf16.gmra.mrb[112].mxu0 %v4618_v19 }
 0x10f   : > { %2574 = vmatprep.mubr.bf16.mxu1 %v4620_v24  ;;  %2799 = vmatprep.mubr.bf16.mxu0 %v4622_v25  ;;  %v4642_v24 = vld [vmem:[%s5034_s10 + $0x140] ss:$20 sps:$4 sm:$0xff]   ;;  %v4643_v25 = vld [vmem:[%s5034_s10 + $0x38] ss:$20 sps:$4 sm:$0xff]  }
 0x111   : > { %v3706_v30 = vpop.f32.mrb[8].mxu1  ;;  %v3658_v31 = vpop.f32.mrb[8].mxu0 }
 0x112   : > { %v3707_v32 = vpop.f32.mrb[9].mxu1  ;;  %v3659_v33 = vpop.f32.mrb[9].mxu0 }
 0x113   : > { %v5192_v36 = vadd.f32 %v3707_v32, %v3706_v30  ;;  %v3709_v37 = vpop.f32.mrb[10].mxu1  ;;  %v5194_v38 = vadd.f32 %v3659_v33, %v3658_v31  ;;  %v3661_v39 = vpop.f32.mrb[10].mxu0  ;;  %v4644_v32 = vld [vmem:[%s5034_s10 + $0x16c] ss:$20 sps:$4 sm:$0xff]  }
 0x114   : > { %v3710_v42 = vpop.f32.mrb[11].mxu1  ;;  %v3662_v43 = vpop.f32.mrb[11].mxu0  ;;  %v4646_v33 = vld [vmem:[%s5034_s10 + $0x60] ss:$20 sps:$4 sm:$0xff]  }
 0x115   : > { %v5198_v44 = vadd.f32 %v3710_v42, %v3709_v37  ;;  %v5200_v45 = vadd.f32 %v3662_v43, %v3661_v39 }
 0x116   : > { %2575 = vmatmul.mubr.bf16.gmra.mrb[116].mxu1 %v4624_v34  ;;  %2800 = vmatmul.mubr.bf16.gmra.mrb[116].mxu0 %v4625_v35 }
 0x117   : > { %2582 = vmatprep.mubr.bf16.mxu1 %v4626_v40  ;;  %2807 = vmatprep.mubr.bf16.mxu0 %v4628_v41 }
 0x119   : > { %v3712_v46 = vpop.f32.mrb[12].mxu1  ;;  %v3664_v47 = vpop.f32.mrb[12].mxu0 }
 0x11a   : > { %v3713_v48 = vpop.f32.mrb[13].mxu1  ;;  %v3665_v49 = vpop.f32.mrb[13].mxu0 }
 0x11b   : > { %v5204_v52 = vadd.f32 %v3713_v48, %v3712_v46  ;;  %v3715_v53 = vpop.f32.mrb[14].mxu1  ;;  %v5206_v54 = vadd.f32 %v3665_v49, %v3664_v47  ;;  %v3667_v55 = vpop.f32.mrb[14].mxu0  ;;  %v4647_v46 = vld [vmem:[%s5034_s10 + $0x168] ss:$20 sps:$4 sm:$0xff]  }
 0x11c   : > { %v3716_v58 = vpop.f32.mrb[15].mxu1  ;;  %v3668_v59 = vpop.f32.mrb[15].mxu0  ;;  %v4648_v47 = vld [vmem:[%s5034_s10 + $0x88] ss:$20 sps:$4 sm:$0xff]  }
 0x11d   : > { %v5210_v60 = vadd.f32 %v3716_v58, %v3715_v53  ;;  %v5212_v61 = vadd.f32 %v3668_v59, %v3667_v55  ;;  %v4649_v53 = vld [vmem:[%s5034_s10 + $0x194] ss:$20 sps:$4 sm:$0xff]   ;;  %v4651_v55 = vld [vmem:[%s5034_s10 + $0xb0] ss:$20 sps:$4 sm:$0xff]  }
 0x11e   : > { %2583 = vmatmul.mubr.bf16.gmra.mrb[120].mxu1 %v4630_v50  ;;  %2808 = vmatmul.mubr.bf16.gmra.mrb[120].mxu0 %v4631_v51 }
 0x11f   : > { %2590 = vmatprep.mubr.bf16.mxu1 %v4633_v56  ;;  %2815 = vmatprep.mubr.bf16.mxu0 %v4635_v57 }
 0x121   : > { %v3718_v62 = vpop.f32.mrb[16].mxu1  ;;  %v3670_v63 = vpop.f32.mrb[16].mxu0 }
 0x122   : > { %v3719_v0 = vpop.f32.mrb[17].mxu1  ;;  %v3671_v1 = vpop.f32.mrb[17].mxu0 }
 0x123   : > { %v5216_v5 = vadd.f32 %v3719_v0, %v3718_v62  ;;  %v3721_v7 = vpop.f32.mrb[18].mxu1  ;;  %v5218_v8 = vadd.f32 %v3671_v1, %v3670_v63  ;;  %v3673_v9 = vpop.f32.mrb[18].mxu0 }
 0x124   : > { %v3722_v14 = vpop.f32.mrb[19].mxu1  ;;  %v3674_v15 = vpop.f32.mrb[19].mxu0 }
 0x125   : > { %v5222_v16 = vadd.f32 %v3722_v14, %v3721_v7  ;;  %v5224_v17 = vadd.f32 %v3674_v15, %v3673_v9  ;;  %v4654_v14 = vld [vmem:[%s5034_s10 + $0x1bc] ss:$20 sps:$4 sm:$0xff]   ;;  %v4656_v15 = vld [vmem:[%s5034_s10 + $0x100] ss:$20 sps:$4 sm:$0xff]  }
 0x126   : > { %2591 = vmatmul.mubr.bf16.gmra.mrb[124].mxu1 %v4637_v2  ;;  %2816 = vmatmul.mubr.bf16.gmra.mrb[124].mxu0 %v4638_v3  ;;  %v4652_v2 = vld [vmem:[%s5034_s10 + $0x190] ss:$20 sps:$4 sm:$0xff]   ;;  %v4653_v3 = vld [vmem:[%s5034_s10 + $0xd8] ss:$20 sps:$4 sm:$0xff]  }
 0x127   : > { %2598 = vmatprep.mubr.bf16.mxu1 %v4639_v10  ;;  %4190 = vmatprep.mubr.bf16.mxu0 %v4641_v11 }
 0x129   : > { %v3724_v18 = vpop.f32.mrb[20].mxu1  ;;  %v3676_v19 = vpop.f32.mrb[20].mxu0 }
 0x12a   : > { %v3725_v21 = vpop.f32.mrb[21].mxu1  ;;  %v3677_v23 = vpop.f32.mrb[21].mxu0 }
 0x12b   : > { %v5228_v26 = vadd.f32 %v3725_v21, %v3724_v18  ;;  %v3727_v27 = vpop.f32.mrb[22].mxu1  ;;  %v5230_v30 = vadd.f32 %v3677_v23, %v3676_v19  ;;  %v3679_v31 = vpop.f32.mrb[22].mxu0 }
 0x12c   : > { %v3728_v34 = vpop.f32.mrb[23].mxu1  ;;  %v3680_v35 = vpop.f32.mrb[23].mxu0 }
 0x12d   : > { %v5234_v37 = vadd.f32 %v3728_v34, %v3727_v27  ;;  %v5236_v39 = vadd.f32 %v3680_v35, %v3679_v31  ;;  %v4657_v27 = vld [vmem:[%s5034_s10 + $0x1b8] ss:$20 sps:$4 sm:$0xff]   ;;  %v4658_v31 = vld [vmem:[%s5034_s10 + $0x128] ss:$20 sps:$4 sm:$0xff]   ;;  %v4661_v35 = vld [vmem:[%s5034_s10 + $0x150] ss:$20 sps:$4 sm:$0xff]  }
 0x12e   : > { %2599 = vmatmul.mubr.bf16.gmra.mrb[128].mxu1 %v4642_v24  ;;  %4191 = vmatmul.mubr.bf16.vlgmr.msra.gmra.mrb[32].mxu0 %v4643_v25  ;;  %v4659_v34 = vld [vmem:[%s5034_s10 + $0x1e4] ss:$20 sps:$4 sm:$0xff]  }
 0x12f   : > { %2606 = vmatprep.mubr.bf16.mxu1 %v4644_v32  ;;  %4194 = vmatprep.mubr.bf16.mxu0 %v4646_v33 }
 0x131   : > { %v3730_v40 = vpop.f32.mrb[24].mxu1  ;;  %v3682_v41 = vpop.f32.mrb[24].mxu0 }
 0x132   : > { %v3731_v42 = vpop.f32.mrb[25].mxu1  ;;  %v3683_v43 = vpop.f32.mrb[25].mxu0 }
 0x133   : > { %v5240_v48 = vadd.f32 %v3731_v42, %v3730_v40  ;;  %v3733_v49 = vpop.f32.mrb[26].mxu1  ;;  %v5242_v50 = vadd.f32 %v3683_v43, %v3682_v41  ;;  %v3685_v51 = vpop.f32.mrb[26].mxu0 }
 0x134   : > { %v3734_v56 = vpop.f32.mrb[27].mxu1  ;;  %v3686_v57 = vpop.f32.mrb[27].mxu0 }
 0x135   : > { %v5246_v58 = vadd.f32 %v3734_v56, %v3733_v49  ;;  %v5248_v59 = vadd.f32 %v3686_v57, %v3685_v51  ;;  %v4662_v49 = vld [vmem:[%s5034_s10 + $0x1e0] ss:$20 sps:$4 sm:$0xff]   ;;  %v4663_v51 = vld [vmem:[%s5034_s10 + $0x178] ss:$20 sps:$4 sm:$0xff]  }
 0x136   : > { %2607 = vmatmul.mubr.bf16.gmra.mrb[132].mxu1 %v4647_v46  ;;  %4195 = vmatmul.mubr.bf16.gmra.mrb[36].mxu0 %v4648_v47  ;;  %v4664_v56 = vld [vmem:[%s5034_s10 + $0x20c] ss:$20 sps:$4 sm:$0xff]  }
 0x137   : > { %2614 = vmatprep.mubr.bf16.mxu1 %v4649_v53  ;;  %4198 = vmatprep.mubr.bf16.mxu0 %v4651_v55 }
 0x139   : > { %v3736_v62 = vpop.f32.mrb[28].mxu1  ;;  %v3688_v63 = vpop.f32.mrb[28].mxu0 }
 0x13a   : > { %v3737_v0 = vpop.f32.mrb[29].mxu1  ;;  %v3689_v1 = vpop.f32.mrb[29].mxu0 }
 0x13b   : > { %v5252_v7 = vadd.f32 %v3737_v0, %v3736_v62  ;;  %v3739_v9 = vpop.f32.mrb[30].mxu1  ;;  %v5254_v10 = vadd.f32 %v3689_v1, %v3688_v63  ;;  %v3691_v11 = vpop.f32.mrb[30].mxu0 }
 0x13c   : > { %v3740_v18 = vpop.f32.mrb[31].mxu1  ;;  %v3692_v19 = vpop.f32.mrb[31].mxu0 }
 0x13d   : > { %v5258_v21 = vadd.f32 %v3740_v18, %v3739_v9  ;;  %v5260_v23 = vadd.f32 %v3692_v19, %v3691_v11 }
 0x13e   : > { %2615 = vmatmul.mubr.bf16.gmra.mrb[136].mxu1 %v4652_v2  ;;  %4199 = vmatmul.mubr.bf16.gmra.mrb[40].mxu0 %v4653_v3  ;;  %v4667_v2 = vld [vmem:[%s5034_s10 + $0x208] ss:$20 sps:$4 sm:$0xff]  }
 0x13f   : > { %2622 = vmatprep.mubr.bf16.mxu1 %v4654_v14  ;;  %4202 = vmatprep.mubr.bf16.mxu0 %v4656_v15  ;;  %v4668_v3 = vld [vmem:[%s5034_s10 + $0x1c8] ss:$20 sps:$4 sm:$0xff]  }
 0x140   : > { %v4669_v14 = vld [vmem:[%s5034_s10 + $0x234] ss:$20 sps:$4 sm:$0xff]  }
 0x141   : > { %v3758_v24 = vpop.f32.mrb[32].mxu1 }
 0x142   : > { %v3759_v25 = vpop.f32.mrb[33].mxu1 }
 0x143   : > { %v3760_v32 = vadd.f32 %v3759_v25, %v3758_v24  ;;  %v3761_v33 = vpop.f32.mrb[34].mxu1 }
 0x144   : > { %v3762_v40 = vpop.f32.mrb[35].mxu1 }
 0x145   : > { %v5267_v41 = vadd.f32 %v3760_v32, %v5170_v6  ;;  %v3763_v42 = vadd.f32 %v3762_v40, %v3761_v33  ;;  %v4666_v6 = vld [vmem:[%s5034_s10 + $0x1a0] ss:$20 sps:$4 sm:$0xff]  }
 0x146   : > { %2623 = vmatmul.mubr.bf16.gmra.mrb[140].mxu1 %v4657_v27  ;;  %4203 = vmatmul.mubr.bf16.gmra.mrb[44].mxu0 %v4658_v31  ;;  %v4672_v27 = vld [vmem:[%s5034_s10 + $0x230] ss:$20 sps:$4 sm:$0xff]   ;;  %v4673_v31 = vld [vmem:[%s5034_s10 + $0x218] ss:$20 sps:$4 sm:$0xff]  }
 0x147   : > { %v5270_v43 = vadd.f32 %v3763_v42, %v5176_v13  ;;  %2630 = vmatprep.mubr.bf16.mxu1 %v4659_v34  ;;  %4206 = vmatprep.mubr.bf16.mxu0 %v4661_v35  ;;  %v4674_v34 = vld [vmem:[%s5034_s10 + $0x25c] ss:$20 sps:$4 sm:$0xff]   ;;  %v4676_v35 = vld [vmem:[%s5034_s10 + $0x240] ss:$20 sps:$4 sm:$0xff]  }
 0x149   : > { %v3764_v46 = vpop.f32.mrb[36].mxu1 }
 0x14a   : > { %v3765_v47 = vpop.f32.mrb[37].mxu1 }
 0x14b   : > { %v3766_v53 = vadd.f32 %v3765_v47, %v3764_v46  ;;  %v3767_v55 = vpop.f32.mrb[38].mxu1 }
 0x14c   : > { %v3768_v57 = vpop.f32.mrb[39].mxu1 }
 0x14d   : > { %v5277_v62 = vadd.f32 %v3766_v53, %v5182_v22  ;;  %v3769_v13 = vadd.f32 %v3768_v57, %v3767_v55  ;;  %v4671_v22 = vld [vmem:[%s5034_s10 + $0x1f0] ss:$20 sps:$4 sm:$0xff]  }
 0x14e   : > { %2631 = vmatmul.mubr.bf16.gmra.mrb[144].mxu1 %v4662_v49  ;;  %4207 = vmatmul.mubr.bf16.gmra.mrb[48].mxu0 %v4663_v51  ;;  %v4677_v49 = vld [vmem:[%s5034_s10 + $0x258] ss:$20 sps:$4 sm:$0xff]   ;;  %v4678_v51 = vld [vmem:[%s5034_s10 + $0x268] ss:$20 sps:$4 sm:$0xff]  }
 0x14f   : > { %v5280_v63 = vadd.f32 %v3769_v13, %v5188_v29  ;;  %2638 = vmatprep.mubr.bf16.mxu1 %v4664_v56  ;;  %4210 = vmatprep.mubr.bf16.mxu0 %v4666_v6 }
 0x151   : > { %v3770_v0 = vpop.f32.mrb[40].mxu1 }
 0x152   : > { %v3771_v1 = vpop.f32.mrb[41].mxu1 }
 0x153   : > { %v3772_v9 = vadd.f32 %v3771_v1, %v3770_v0  ;;  %v3773_v11 = vpop.f32.mrb[42].mxu1 }
 0x154   : > { %v3774_v15 = vpop.f32.mrb[43].mxu1 }
 0x155   : > { %v5287_v18 = vadd.f32 %v3772_v9, %v5194_v38  ;;  %v3775_v29 = vadd.f32 %v3774_v15, %v3773_v11 }
 0x156   : > { %2639 = vmatmul.mubr.bf16.gmra.mrb[148].mxu1 %v4667_v2  ;;  %4211 = vmatmul.mubr.bf16.gmra.mrb[52].mxu0 %v4668_v3 }
 0x157   : > { %v5290_v19 = vadd.f32 %v3775_v29, %v5200_v45  ;;  %2646 = vmatprep.mubr.bf16.mxu1 %v4669_v14  ;;  %4214 = vmatprep.mubr.bf16.mxu0 %v4671_v22 }
 0x159   : > { %v3776_v24 = vpop.f32.mrb[44].mxu1 }
 0x15a   : > { %v3777_v25 = vpop.f32.mrb[45].mxu1 }
 0x15b   : > { %v3778_v32 = vadd.f32 %v3777_v25, %v3776_v24  ;;  %v3779_v33 = vpop.f32.mrb[46].mxu1 }
 0x15c   : > { %v3780_v38 = vpop.f32.mrb[47].mxu1 }
 0x15d   : > { %v5297_v40 = vadd.f32 %v3778_v32, %v5206_v54  ;;  %v3781_v42 = vadd.f32 %v3780_v38, %v3779_v33 }
 0x15e   : > { %2647 = vmatmul.mubr.bf16.gmra.mrb[152].mxu1 %v4672_v27  ;;  %4215 = vmatmul.mubr.bf16.gmra.mrb[56].mxu0 %v4673_v31 }
 0x15f   : > { %v5300_v45 = vadd.f32 %v3781_v42, %v5212_v61  ;;  %2654 = vmatprep.mubr.bf16.mxu1 %v4674_v34  ;;  %4218 = vmatprep.mubr.bf16.mxu0 %v4676_v35 }
 0x161   : > { %v3782_v46 = vpop.f32.mrb[48].mxu1 }
 0x162   : > { %v3783_v47 = vpop.f32.mrb[49].mxu1 }
 0x163   : > { %v3784_v53 = vadd.f32 %v3783_v47, %v3782_v46  ;;  %v3785_v55 = vpop.f32.mrb[50].mxu1 }
 0x164   : > { %v3786_v56 = vpop.f32.mrb[51].mxu1 }
 0x165   : > { %v5305_v6 = vadd.f32 %v3784_v53, %v5218_v8  ;;  %v3787_v54 = vadd.f32 %v3786_v56, %v3785_v55 }
 0x166   : > { %2655 = vmatmul.mubr.bf16.gmra.mrb[156].mxu1 %v4677_v49  ;;  %4219 = vmatmul.mubr.bf16.gmra.mrb[60].mxu0 %v4678_v51 }
 0x167   : > { %v5308_v57 = vadd.f32 %v3787_v54, %v5224_v17 }
 0x169   : > { %v3788_v61 = vpop.f32.mrb[52].mxu1 }
 0x16a   : > { %v3789_v13 = vpop.f32.mrb[53].mxu1 }
 0x16b   : > { %v3790_v0 = vadd.f32 %v3789_v13, %v3788_v61  ;;  %v3791_v1 = vpop.f32.mrb[54].mxu1 }
 0x16c   : > { %v3792_v2 = vpop.f32.mrb[55].mxu1 }
 0x16d   : > { %v5311_v3 = vadd.f32 %v3790_v0, %v5230_v30  ;;  %v3793_v9 = vadd.f32 %v3792_v2, %v3791_v1 }
 0x16f   : > { %v5314_v11 = vadd.f32 %v3793_v9, %v5236_v39 }
 0x171   : > { %v3794_v8 = vpop.f32.mrb[56].mxu1 }
 0x172   : > { %v3795_v14 = vpop.f32.mrb[57].mxu1 }
 0x173   : > { %v3796_v22 = vadd.f32 %v3795_v14, %v3794_v8  ;;  %v3797_v15 = vpop.f32.mrb[58].mxu1 }
 0x174   : > { %v3798_v29 = vpop.f32.mrb[59].mxu1 }
 0x175   : > { %v5317_v17 = vadd.f32 %v3796_v22, %v5242_v50  ;;  %v3799_v24 = vadd.f32 %v3798_v29, %v3797_v15 }
 0x177   : > { %v5320_v25 = vadd.f32 %v3799_v24, %v5248_v59 }
 0x179   : > { %v3800_v27 = vpop.f32.mrb[60].mxu1 }
 0x17a   : > { %v3801_v31 = vpop.f32.mrb[61].mxu1 }
 0x17b   : > { %v3802_v30 = vadd.f32 %v3801_v31, %v3800_v27  ;;  %v3803_v32 = vpop.f32.mrb[62].mxu1 }
 0x17c   : > { %v3804_v33 = vpop.f32.mrb[63].mxu1 }
 0x17d   : > { %v5323_v39 = vadd.f32 %v3802_v30, %v5254_v10  ;;  %v3805_v34 = vadd.f32 %v3804_v33, %v3803_v32 }
 0x17f   : > { %v5326_v35 = vadd.f32 %v3805_v34, %v5260_v23 }
 0x181   : > { %v3806_v38 = vpop.f32.mrb[64].mxu1  ;;  %v4006_v42 = vpop.f32.mrb[64].mxu0 }
 0x182   : > { %v3807_v50 = vpop.f32.mrb[65].mxu1  ;;  %v4007_v46 = vpop.f32.mrb[65].mxu0 }
 0x183   : > { %v3808_v47 = vadd.f32 %v3807_v50, %v3806_v38  ;;  %v3809_v49 = vpop.f32.mrb[66].mxu1  ;;  %v5328_v59 = vadd.f32 %v4007_v46, %v4006_v42  ;;  %v4009_v51 = vpop.f32.mrb[66].mxu0 }
 0x184   : > { %v3810_v53 = vpop.f32.mrb[67].mxu1  ;;  %v4010_v55 = vpop.f32.mrb[67].mxu0 }
 0x185   : > { %v5331_v56 = vadd.f32 %v3808_v47, %v5168_v4  ;;  %v3811_v10 = vadd.f32 %v3810_v53, %v3809_v49  ;;  %v5333_v54 = vadd.f32 %v4010_v55, %v4009_v51 }
 0x187   : > { %v5336_v23 = vadd.f32 %v3811_v10, %v5174_v12 }
 0x189   : > { %v3812_v61 = vpop.f32.mrb[68].mxu1  ;;  %v4012_v13 = vpop.f32.mrb[68].mxu0 }
 0x18a   : > { %v3813_v0 = vpop.f32.mrb[69].mxu1  ;;  %v4013_v1 = vpop.f32.mrb[69].mxu0 }
 0x18b   : > { %v3814_v2 = vadd.f32 %v3813_v0, %v3812_v61  ;;  %v3815_v9 = vpop.f32.mrb[70].mxu1  ;;  %v5338_v8 = vadd.f32 %v4013_v1, %v4012_v13  ;;  %v4015_v14 = vpop.f32.mrb[70].mxu0 }
 0x18c   : > { %v3816_v22 = vpop.f32.mrb[71].mxu1  ;;  %v4016_v15 = vpop.f32.mrb[71].mxu0 }
 0x18d   : > { %v5341_v4 = vadd.f32 %v3814_v2, %v5180_v20  ;;  %v3817_v29 = vadd.f32 %v3816_v22, %v3815_v9  ;;  %v5343_v24 = vadd.f32 %v4016_v15, %v4015_v14 }
 0x18f   : > { %v5346_v12 = vadd.f32 %v3817_v29, %v5186_v28 }
 0x191   : > { %v3818_v27 = vpop.f32.mrb[72].mxu1  ;;  %v4018_v31 = vpop.f32.mrb[72].mxu0 }
 0x192   : > { %v3819_v30 = vpop.f32.mrb[73].mxu1  ;;  %v4019_v32 = vpop.f32.mrb[73].mxu0 }
 0x193   : > { %v3820_v33 = vadd.f32 %v3819_v30, %v3818_v27  ;;  %v3821_v34 = vpop.f32.mrb[74].mxu1  ;;  %v5348_v38 = vadd.f32 %v4019_v32, %v4018_v31  ;;  %v4021_v42 = vpop.f32.mrb[74].mxu0 }
 0x194   : > { %v3822_v50 = vpop.f32.mrb[75].mxu1  ;;  %v4022_v46 = vpop.f32.mrb[75].mxu0 }
 0x195   : > { %v5351_v20 = vadd.f32 %v3820_v33, %v5192_v36  ;;  %v3823_v47 = vadd.f32 %v3822_v50, %v3821_v34  ;;  %v5353_v49 = vadd.f32 %v4022_v46, %v4021_v42 }
 0x197   : > { %v5356_v28 = vadd.f32 %v3823_v47, %v5198_v44 }
 0x199   : > { %v3824_v51 = vpop.f32.mrb[76].mxu1  ;;  %v4024_v53 = vpop.f32.mrb[76].mxu0 }
 0x19a   : > { %v3825_v55 = vpop.f32.mrb[77].mxu1  ;;  %v4025_v10 = vpop.f32.mrb[77].mxu0 }
 0x19b   : > { %v3826_v61 = vadd.f32 %v3825_v55, %v3824_v51  ;;  %v3827_v13 = vpop.f32.mrb[78].mxu1  ;;  %v5358_v0 = vadd.f32 %v4025_v10, %v4024_v53  ;;  %v4027_v1 = vpop.f32.mrb[78].mxu0 }
 0x19c   : > { %v3828_v2 = vpop.f32.mrb[79].mxu1  ;;  %v4028_v9 = vpop.f32.mrb[79].mxu0 }
 0x19d   : > { %v5361_v36 = vadd.f32 %v3826_v61, %v5204_v52  ;;  %v3829_v14 = vadd.f32 %v3828_v2, %v3827_v13  ;;  %v5363_v22 = vadd.f32 %v4028_v9, %v4027_v1 }
 0x19f   : > { %v5366_v44 = vadd.f32 %v3829_v14, %v5210_v60 }
 0x1a1   : > { %v3830_v15 = vpop.f32.mrb[80].mxu1  ;;  %v4030_v29 = vpop.f32.mrb[80].mxu0 }
 0x1a2   : > { %v3831_v27 = vpop.f32.mrb[81].mxu1  ;;  %v4031_v31 = vpop.f32.mrb[81].mxu0 }
 0x1a3   : > { %v3832_v30 = vadd.f32 %v3831_v27, %v3830_v15  ;;  %v3833_v32 = vpop.f32.mrb[82].mxu1  ;;  %v5368_v33 = vadd.f32 %v4031_v31, %v4030_v29  ;;  %v4033_v34 = vpop.f32.mrb[82].mxu0 }
 0x1a4   : > { %v3834_v42 = vpop.f32.mrb[83].mxu1  ;;  %v4034_v50 = vpop.f32.mrb[83].mxu0 }
 0x1a5   : > { %v5371_v52 = vadd.f32 %v3832_v30, %v5216_v5  ;;  %v3835_v46 = vadd.f32 %v3834_v42, %v3833_v32  ;;  %v5373_v47 = vadd.f32 %v4034_v50, %v4033_v34 }
 0x1a7   : > { %v5376_v60 = vadd.f32 %v3835_v46, %v5222_v16 }
 0x1a9   : > { %v3836_v51 = vpop.f32.mrb[84].mxu1  ;;  %v4036_v53 = vpop.f32.mrb[84].mxu0 }
 0x1aa   : > { %v3837_v55 = vpop.f32.mrb[85].mxu1  ;;  %v4037_v10 = vpop.f32.mrb[85].mxu0 }
 0x1ab   : > { %v3838_v61 = vadd.f32 %v3837_v55, %v3836_v51  ;;  %v3839_v13 = vpop.f32.mrb[86].mxu1  ;;  %v5378_v1 = vadd.f32 %v4037_v10, %v4036_v53  ;;  %v4039_v2 = vpop.f32.mrb[86].mxu0 }
 0x1ac   : > { %v3840_v9 = vpop.f32.mrb[87].mxu1  ;;  %v4040_v14 = vpop.f32.mrb[87].mxu0 }
 0x1ad   : > { %v5381_v5 = vadd.f32 %v3838_v61, %v5228_v26  ;;  %v3841_v15 = vadd.f32 %v3840_v9, %v3839_v13  ;;  %v5383_v29 = vadd.f32 %v4040_v14, %v4039_v2 }
 0x1af   : > { %5885 = vst [vmem:[#allocation2_spill] sm:$0xff] %v5381_v5  ;;  %v5386_v16 = vadd.f32 %v3841_v15, %v5234_v37  ;;  %v5597_v5 = vld [vmem:[%s5504_s17 + $0x50] sm:$0xff] }
 0x1b1   : > { %5886 = vst [vmem:[#allocation3_spill] sm:$0xff] %v5386_v16  ;;  %v3842_v27 = vpop.f32.mrb[88].mxu1  ;;  %v4042_v31 = vpop.f32.mrb[88].mxu0  ;;  %v3125_v16 = vld [vmem:[%s5526_s22 + $0x28] sm:$0xff] }
 0x1b2   : > { %v3843_v30 = vpop.f32.mrb[89].mxu1  ;;  %v4043_v32 = vpop.f32.mrb[89].mxu0 }
 0x1b3   : > { %v3844_v34 = vadd.f32 %v3843_v30, %v3842_v27  ;;  %v3845_v42 = vpop.f32.mrb[90].mxu1  ;;  %v5388_v50 = vadd.f32 %v4043_v32, %v4042_v31  ;;  %v4045_v46 = vpop.f32.mrb[90].mxu0 }
 0x1b4   : > { %v3846_v51 = vpop.f32.mrb[91].mxu1  ;;  %v4046_v53 = vpop.f32.mrb[91].mxu0 }
 0x1b5   : > { %v5391_v26 = vadd.f32 %v3844_v34, %v5240_v48  ;;  %v3847_v55 = vadd.f32 %v3846_v51, %v3845_v42  ;;  %v5393_v10 = vadd.f32 %v4046_v53, %v4045_v46 }
 0x1b7   : > { %5887 = vst [vmem:[#allocation4_spill] sm:$0xff] %v5391_v26  ;;  %v5396_v37 = vadd.f32 %v3847_v55, %v5246_v58 }
 0x1b9   : > { %5888 = vst [vmem:[#allocation5_spill] sm:$0xff] %v5396_v37  ;;  %v3848_v61 = vpop.f32.mrb[92].mxu1  ;;  %v4048_v13 = vpop.f32.mrb[92].mxu0 }
 0x1ba   : > { %v3849_v2 = vpop.f32.mrb[93].mxu1  ;;  %v4049_v9 = vpop.f32.mrb[93].mxu0 }
 0x1bb   : > { %v3850_v14 = vadd.f32 %v3849_v2, %v3848_v61  ;;  %v3851_v15 = vpop.f32.mrb[94].mxu1  ;;  %v5398_v27 = vadd.f32 %v4049_v9, %v4048_v13  ;;  %v4051_v31 = vpop.f32.mrb[94].mxu0 }
 0x1bc   : > { %v3852_v30 = vpop.f32.mrb[95].mxu1  ;;  %v4052_v32 = vpop.f32.mrb[95].mxu0 }
 0x1bd   : > { %v5401_v48 = vadd.f32 %v3850_v14, %v5252_v7  ;;  %v3853_v34 = vadd.f32 %v3852_v30, %v3851_v15  ;;  %v5403_v42 = vadd.f32 %v4052_v32, %v4051_v31 }
 0x1bf   : > { %5889 = vst [vmem:[#allocation6_spill] sm:$0xff] %v5401_v48  ;;  %v5406_v58 = vadd.f32 %v3853_v34, %v5258_v21 }
 0x1c1   : > { %5890 = vst [vmem:[#allocation7_spill] sm:$0xff] %v5406_v58  ;;  %v3894_v46 = vpop.f32.mrb[96].mxu1  ;;  %v4054_v51 = vpop.f32.mrb[96].mxu0 }
 0x1c2   : > { %v3895_v53 = vpop.f32.mrb[97].mxu1  ;;  %v4055_v55 = vpop.f32.mrb[97].mxu0 }
 0x1c3   : > { %v3896_v61 = vadd.f32 %v3895_v53, %v3894_v46  ;;  %v3897_v2 = vpop.f32.mrb[98].mxu1  ;;  %v5408_v13 = vadd.f32 %v4055_v55, %v4054_v51  ;;  %v4057_v9 = vpop.f32.mrb[98].mxu0 }
 0x1c4   : > { %v3898_v37 = vpop.f32.mrb[99].mxu1  ;;  %v4058_v26 = vpop.f32.mrb[99].mxu0 }
 0x1c5   : > { %v4241_v7 = vadd.f32 %v3896_v61, %v5267_v41  ;;  %v3899_v14 = vadd.f32 %v3898_v37, %v3897_v2  ;;  %v5411_v15 = vadd.f32 %v4058_v26, %v4057_v9 }
 0x1c7   : > { %v4247_v31 = vadd.f32 %v3899_v14, %v5270_v43  ;;  %v5415_v21 = vadd.f32 %v4241_v7, %v5328_v59 }
 0x1c9   : > { %v3900_v30 = vpop.f32.mrb[100].mxu1  ;;  %v4060_v32 = vpop.f32.mrb[100].mxu0  ;;  %v5418_v34 = vadd.f32 %v4247_v31, %v5333_v54 }
 0x1ca   : > { %v3901_v46 = vpop.f32.mrb[101].mxu1  ;;  %v4061_v51 = vpop.f32.mrb[101].mxu0 }
 0x1cb   : > { %v3902_v53 = vadd.f32 %v3901_v46, %v3900_v30  ;;  %v3903_v55 = vpop.f32.mrb[102].mxu1  ;;  %v5420_v58 = vadd.f32 %v4061_v51, %v4060_v32  ;;  %v4063_v41 = vpop.f32.mrb[102].mxu0 }
 0x1cc   : > { %v3904_v37 = vpop.f32.mrb[103].mxu1  ;;  %v4064_v26 = vpop.f32.mrb[103].mxu0 }
 0x1cd   : > { %v4238_v61 = vadd.f32 %v3902_v53, %v5277_v62  ;;  %v3905_v43 = vadd.f32 %v3904_v37, %v3903_v55  ;;  %v5423_v2 = vadd.f32 %v4064_v26, %v4063_v41 }
 0x1cf   : > { %v4244_v59 = vadd.f32 %v3905_v43, %v5280_v63  ;;  %v5427_v9 = vadd.f32 %v4238_v61, %v5338_v8 }
 0x1d1   : > { %v3906_v54 = vpop.f32.mrb[104].mxu1  ;;  %v4066_v7 = vpop.f32.mrb[104].mxu0  ;;  %v5430_v14 = vadd.f32 %v4244_v59, %v5343_v24 }
 0x1d2   : > { %v3907_v31 = vpop.f32.mrb[105].mxu1  ;;  %v4067_v30 = vpop.f32.mrb[105].mxu0 }
 0x1d3   : > { %v3908_v32 = vadd.f32 %v3907_v31, %v3906_v54  ;;  %v3909_v46 = vpop.f32.mrb[106].mxu1  ;;  %v5432_v51 = vadd.f32 %v4067_v30, %v4066_v7  ;;  %v4069_v62 = vpop.f32.mrb[106].mxu0 }
 0x1d4   : > { %v3910_v53 = vpop.f32.mrb[107].mxu1  ;;  %v4070_v55 = vpop.f32.mrb[107].mxu0 }
 0x1d5   : > { %v4253_v41 = vadd.f32 %v3908_v32, %v5287_v18  ;;  %v3911_v63 = vadd.f32 %v3910_v53, %v3909_v46  ;;  %v5435_v37 = vadd.f32 %v4070_v55, %v4069_v62 }
 0x1d7   : > { %v4259_v8 = vadd.f32 %v3911_v63, %v5290_v19  ;;  %v5439_v26 = vadd.f32 %v4253_v41, %v5348_v38 }
 0x1d9   : > { %v3912_v24 = vpop.f32.mrb[108].mxu1  ;;  %v4072_v61 = vpop.f32.mrb[108].mxu0  ;;  %v5442_v43 = vadd.f32 %v4259_v8, %v5353_v49 }
 0x1da   : > { %v3913_v59 = vpop.f32.mrb[109].mxu1  ;;  %v4073_v54 = vpop.f32.mrb[109].mxu0 }
 0x1db   : > { %v3914_v7 = vadd.f32 %v3913_v59, %v3912_v24  ;;  %v3915_v31 = vpop.f32.mrb[110].mxu1  ;;  %v5444_v30 = vadd.f32 %v4073_v54, %v4072_v61  ;;  %v4075_v18 = vpop.f32.mrb[110].mxu0 }
 0x1dc   : > { %v3916_v32 = vpop.f32.mrb[111].mxu1  ;;  %v4076_v46 = vpop.f32.mrb[111].mxu0 }
 0x1dd   : > { %v4250_v62 = vadd.f32 %v3914_v7, %v5297_v40  ;;  %v3917_v19 = vadd.f32 %v3916_v32, %v3915_v31  ;;  %v5447_v53 = vadd.f32 %v4076_v46, %v4075_v18 }
 0x1df   : > { %v4256_v38 = vadd.f32 %v3917_v19, %v5300_v45  ;;  %v5451_v55 = vadd.f32 %v4250_v62, %v5358_v0 }
 0x1e1   : > { %v3918_v49 = vpop.f32.mrb[112].mxu1  ;;  %v4078_v41 = vpop.f32.mrb[112].mxu0  ;;  %v5454_v63 = vadd.f32 %v4256_v38, %v5363_v22 }
 0x1e2   : > { %v3919_v8 = vpop.f32.mrb[113].mxu1  ;;  %v4079_v24 = vpop.f32.mrb[113].mxu0 }
 0x1e3   : > { %v3920_v61 = vadd.f32 %v3919_v8, %v3918_v49  ;;  %v3921_v59 = vpop.f32.mrb[114].mxu1  ;;  %v5456_v54 = vadd.f32 %v4079_v24, %v4078_v41  ;;  %v4081_v40 = vpop.f32.mrb[114].mxu0 }
 0x1e4   : > { %v3922_v7 = vpop.f32.mrb[115].mxu1  ;;  %v4082_v31 = vpop.f32.mrb[115].mxu0 }
 0x1e5   : > { %v4265_v18 = vadd.f32 %v3920_v61, %v5305_v6  ;;  %v3923_v45 = vadd.f32 %v3922_v7, %v3921_v59  ;;  %v5459_v32 = vadd.f32 %v4082_v31, %v4081_v40 }
 0x1e7   : > { %v4271_v0 = vadd.f32 %v3923_v45, %v5308_v57  ;;  %v5463_v46 = vadd.f32 %v4265_v18, %v5368_v33 }
 0x1e9   : > { %v3924_v22 = vpop.f32.mrb[116].mxu1  ;;  %v4084_v62 = vpop.f32.mrb[116].mxu0  ;;  %v5466_v19 = vadd.f32 %v4271_v0, %v5373_v47 }
 0x1ea   : > { %v3925_v38 = vpop.f32.mrb[117].mxu1  ;;  %v4085_v49 = vpop.f32.mrb[117].mxu0 }
 0x1eb   : > { %v3926_v41 = vadd.f32 %v3925_v38, %v3924_v22  ;;  %v3927_v8 = vpop.f32.mrb[118].mxu1  ;;  %v5468_v24 = vadd.f32 %v4085_v49, %v4084_v62  ;;  %v4087_v6 = vpop.f32.mrb[118].mxu0 }
 0x1ec   : > { %v3928_v61 = vpop.f32.mrb[119].mxu1  ;;  %v4088_v59 = vpop.f32.mrb[119].mxu0 }
 0x1ed   : > { %5891 = vst [vmem:[#allocation8_spill] sm:$0xff] %v5468_v24  ;;  %v4262_v40 = vadd.f32 %v3926_v41, %v5311_v3  ;;  %v3929_v57 = vadd.f32 %v3928_v61, %v3927_v8  ;;  %v5471_v7 = vadd.f32 %v4088_v59, %v4087_v6 }
 0x1ef   : > { %5892 = vst [vmem:[#allocation9_spill] sm:$0xff] %v5471_v7  ;;  %v4268_v33 = vadd.f32 %v3929_v57, %v5314_v11  ;;  %v5475_v31 = vadd.f32 %v4262_v40, %v5378_v1 }
 0x1f1   : > { %v3930_v47 = vpop.f32.mrb[120].mxu1  ;;  %v4090_v18 = vpop.f32.mrb[120].mxu0  ;;  %v5478_v45 = vadd.f32 %v4268_v33, %v5383_v29 }
 0x1f2   : > { %v3931_v0 = vpop.f32.mrb[121].mxu1  ;;  %v4091_v22 = vpop.f32.mrb[121].mxu0 }
 0x1f3   : > { %v3932_v62 = vadd.f32 %v3931_v0, %v3930_v47  ;;  %v3933_v38 = vpop.f32.mrb[122].mxu1  ;;  %v5480_v49 = vadd.f32 %v4091_v22, %v4090_v18  ;;  %v4093_v3 = vpop.f32.mrb[122].mxu0 }
 0x1f4   : > { %v3934_v41 = vpop.f32.mrb[123].mxu1  ;;  %v4094_v8 = vpop.f32.mrb[123].mxu0 }
 0x1f5   : > { %5893 = vst [vmem:[#allocation10_spill] sm:$0xff] %v5480_v49  ;;  %v4277_v11 = vadd.f32 %v3932_v62, %v5317_v17  ;;  %v3935_v6 = vadd.f32 %v3934_v41, %v3933_v38  ;;  %v5483_v1 = vadd.f32 %v4094_v8, %v4093_v3 }
 0x1f7   : > { %5894 = vst [vmem:[#allocation11_spill] sm:$0xff] %v5483_v1  ;;  %v4283_v61 = vadd.f32 %v3935_v6, %v5320_v25  ;;  %v5487_v29 = vadd.f32 %v4277_v11, %v5388_v50  ;;  %v5516_v6 = vld [vmem:[%s5504_s17 + $0x10] sm:$0xff] }
 0x1f9   : > { %v3936_v59 = vpop.f32.mrb[124].mxu1  ;;  %v4096_v40 = vpop.f32.mrb[124].mxu0  ;;  %v5490_v57 = vadd.f32 %v4283_v61, %v5393_v10 }
 0x1fa   : > { %v3937_v33 = vpop.f32.mrb[125].mxu1  ;;  %v4097_v47 = vpop.f32.mrb[125].mxu0 }
 0x1fb   : > { %v3938_v18 = vadd.f32 %v3937_v33, %v3936_v59  ;;  %v3939_v0 = vpop.f32.mrb[126].mxu1  ;;  %v5492_v22 = vadd.f32 %v4097_v47, %v4096_v40  ;;  %v4099_v17 = vpop.f32.mrb[126].mxu0  ;;  %v5530_v47 = vld [vmem:[%s5504_s17] sm:$0xff] }
 0x1fc   : > { %v3940_v62 = vpop.f32.mrb[127].mxu1  ;;  %v4100_v25 = vpop.f32.mrb[127].mxu0 }
 0x1fd   : > { %5895 = vst [vmem:[#allocation12_spill] sm:$0xff] %v5492_v22  ;;  %v4274_v50 = vadd.f32 %v3938_v18, %v5323_v39  ;;  %v3941_v38 = vadd.f32 %v3940_v62, %v3939_v0  ;;  %v5498_v3 = vadd.f32 %v4100_v25, %v4099_v17  ;;  %v5513_v39 = vld [vmem:[%s5881_s4] ss:$0 sm:$0xff]  ;;  %v5533_v17 = vld [vmem:[%s5504_s17 + $0x18] sm:$0xff]  ;;  %v3126_v22 = vld [vmem:[%s5526_s22 + $0x30] sm:$0xff] }
 0x1ff   : > { %5896 = vst [vmem:[#allocation13_spill] sm:$0xff] %v5498_v3  ;;  %v4280_v10 = vadd.f32 %v3941_v38, %v5326_v35  ;;  %v5508_v41 = vadd.f32 %v4274_v50, %v5398_v27  ;;  %v3121_v3 = vld [vmem:[%s5526_s22 + $0x8] sm:$0xff] }
 0x201   : > { %v3942_v8 = vpop.f32.mrb[128].mxu1  ;;  %v4192_v11 = vpop.f32.mrb[32].mxu0  ;;  %v5519_v61 = vadd.f32 %v4280_v10, %v5403_v42 }
 0x202   : > { %v4240_v59 = vadd.f32 %v5427_v9, %v4192_v11  ;;  %v3943_v40 = vpop.f32.mrb[129].mxu1  ;;  %v2858_v35 = vpop.f32.mrb[33].mxu0  ;;  %v3090_v9 = vsub.f32 1.0, %v5516_v6  ;;  %v3122_v11 = vld [vmem:[%s5526_s22 + $0x10] sm:$0xff] }
 0x203   : > { %v3944_v27 = vadd.f32 %v3943_v40, %v3942_v8  ;;  %v4243_v33 = vadd.f32 %v5415_v21, %v2858_v35  ;;  %v3945_v18 = vpop.f32.mrb[130].mxu1  ;;  %v4193_v0 = vpop.f32.mrb[34].mxu0  ;;  %v3120_v35 = vld [vmem:[%s5526_s22] sm:$0xff] }
 0x204   : > { %v2994_v42 = vadd.f32 %v4240_v59, %v5513_v39  ;;  %v4246_v62 = vadd.f32 %v5430_v14, %v4193_v0  ;;  %v3946_v25 = vpop.f32.mrb[131].mxu1  ;;  %v2861_v50 = vpop.f32.mrb[35].mxu0  ;;  %v3088_v59 = vsub.f32 1.0, %v5530_v47  ;;  %v3091_v14 = vsub.f32 1.0, %v5533_v17  ;;  %v3123_v0 = vld [vmem:[%s5526_s22 + $0x18] sm:$0xff] }
 0x205   : > { %v4289_v38 = vadd.f32 %v3944_v27, %v5331_v56  ;;  %v2992_v21 = vadd.f32 %v4243_v33, %v5513_v39  ;;  %v3947_v10 = vadd.f32 %v3946_v25, %v3945_v18  ;;  %v4249_v8 = vadd.f32 %v5418_v34, %v2861_v50  ;;  %v5549_v33 = vld [vmem:[%s5504_s17 + $0x8] sm:$0xff]  ;;  %v5552_v18 = vld [vmem:[%s5504_s17 + $0x30] sm:$0xff]  ;;  %v5564_v50 = vld [vmem:[%s5504_s17 + $0x38] sm:$0xff] }
 0x206   : > { %4679 = vtanh.f32 %v2994_v42  ;;  %v2995_v40 = vadd.f32 %v4246_v62, %v5513_v39  ;;  %v5559_v42 = vld [vmem:[%s5504_s17 + $0x20] sm:$0xff]  ;;  %v5561_v62 = vmul.f32 %v3122_v11, %v3090_v9 }
 0x207   : > { %4681 = vtanh.f32 %v2992_v21  ;;  %v4295_v56 = vadd.f32 %v3947_v10, %v5336_v23  ;;  %v2993_v27 = vadd.f32 %v4249_v8, %v5513_v39  ;;  %v5555_v34 = vadd.f32 %v4289_v38, %v5408_v13  ;;  %v5567_v21 = vld [vmem:[%s5504_s17 + $0x28] sm:$0xff] }
 0x208   : > { %4683 = vtanh.f32 %v2995_v40  ;;  %v5572_v13 = vmul.f32 %v3120_v35, %v3088_v59  ;;  %v3089_v38 = vsub.f32 1.0, %v5549_v33  ;;  %v3094_v40 = vsub.f32 1.0, %v5552_v18 }
 0x209   : > { %4685 = vtanh.f32 %v2993_v27  ;;  %v3948_v25 = vpop.f32.mrb[132].mxu1  ;;  %v4196_v23 = vpop.f32.mrb[36].mxu0  ;;  %v5570_v10 = vadd.f32 %v4295_v56, %v5411_v15  ;;  %v5577_v27 = vmul.f32 %v3123_v0, %v3091_v14  ;;  %v3092_v59 = vsub.f32 1.0, %v5559_v42 }
 0x20a   : > { %v4252_v8 = vadd.f32 %v5451_v55, %v4196_v23  ;;  %v3949_v9 = vpop.f32.mrb[133].mxu1  ;;  %v2874_v11 = vpop.f32.mrb[37].mxu0  ;;  %v3095_v14 = vsub.f32 1.0, %v5564_v50  ;;  %v3093_v49 = vsub.f32 1.0, %v5567_v21 }
 0x20b   : > { %v3950_v48 = vadd.f32 %v3949_v9, %v3948_v25  ;;  %v4255_v15 = vadd.f32 %v5439_v26, %v2874_v11  ;;  %v3951_v35 = vpop.f32.mrb[134].mxu1  ;;  %v4197_v56 = vpop.f32.mrb[38].mxu0  ;;  %v3124_v9 = vld [vmem:[%s5526_s22 + $0x20] sm:$0xff]  ;;  %v3127_v11 = vld [vmem:[%s5526_s22 + $0x38] sm:$0xff] }
 0x20c   : > { %v2998_v55 = vadd.f32 %v4252_v8, %v5513_v39  ;;  %v4258_v23 = vadd.f32 %v5454_v63, %v4197_v56  ;;  %v3952_v0 = vpop.f32.mrb[135].mxu1  ;;  %v2877_v1 = vpop.f32.mrb[39].mxu0  ;;  %v3153_v63 = vmul.f32 %v3121_v3, %v3089_v38  ;;  %v5593_v56 = vmul.f32 %v3126_v22, %v3094_v40 }
 0x20d   : > { %v4286_v25 = vadd.f32 %v3950_v48, %v5341_v4  ;;  %v2996_v26 = vadd.f32 %v4255_v15, %v5513_v39  ;;  %v3953_v7 = vadd.f32 %v3952_v0, %v3951_v35  ;;  %v4261_v8 = vadd.f32 %v5442_v43, %v2877_v1  ;;  %v5602_v15 = vld [vmem:[%s5504_s17 + $0x40] sm:$0xff]  ;;  %v5605_v35 = vld [vmem:[%s5504_s17 + $0x58] sm:$0xff] }
 0x20e   : > { %4687 = vtanh.f32 %v2998_v55  ;;  %v2999_v24 = vadd.f32 %v4258_v23, %v5513_v39  ;;  %v5610_v22 = vmul.f32 %v3124_v9, %v3092_v59  ;;  %v5612_v3 = vmul.f32 %v3127_v11, %v3095_v14 }
 0x20f   : > { %4689 = vtanh.f32 %v2996_v26  ;;  %v4292_v4 = vadd.f32 %v3953_v7, %v5346_v12  ;;  %v2997_v48 = vadd.f32 %v4261_v8, %v5513_v39  ;;  %v5608_v43 = vadd.f32 %v4286_v25, %v5420_v58 }
 0x210   : > { %v4680_v1 = vpop.eup %4679  ;;  %4691 = vtanh.f32 %v2999_v24  ;;  %v5614_v38 = vmul.f32 %v3125_v16, %v3093_v49  ;;  %v3098_v23 = vsub.f32 1.0, %v5597_v5  ;;  %v3096_v59 = vsub.f32 1.0, %v5602_v15 }
 0x211   : > { %v4682_v40 = vpop.eup %4681  ;;  %v3186_v12 = vmul.f32 %v4680_v1, %v5516_v6  ;;  %4693 = vtanh.f32 %v2997_v48  ;;  %v3954_v7 = vpop.f32.mrb[136].mxu1  ;;  %v5619_v0 = vadd.f32 %v4292_v4, %v5423_v2  ;;  %v3099_v14 = vsub.f32 1.0, %v5605_v35  ;;  %v3130_v1 = vld [vmem:[%s5526_s22 + $0x50] sm:$0xff] }
 0x212   : > { %v4200_v55 = vpop.f32.mrb[40].mxu0  ;;  %v4684_v58 = vpop.eup %4683  ;;  %v3184_v16 = vmul.f32 %v4682_v40, %v5530_v47 }
 0x213   : > { %v4264_v24 = vadd.f32 %v5475_v31, %v4200_v55  ;;  %v3955_v49 = vpop.f32.mrb[137].mxu1  ;;  %v2890_v6 = vpop.f32.mrb[41].mxu0  ;;  %v3218_v25 = vadd.f32 %v3186_v12, %v5561_v62  ;;  %v3187_v26 = vmul.f32 %v4684_v58, %v5533_v17 }
 0x214   : > { %v4686_v2 = vpop.eup %4685  ;;  %v3956_v9 = vadd.f32 %v3955_v49, %v3954_v7  ;;  %v4267_v47 = vadd.f32 %v5463_v46, %v2890_v6  ;;  %v3957_v11 = vpop.f32.mrb[138].mxu1  ;;  %v3216_v8 = vadd.f32 %v3184_v16, %v5572_v13  ;;  %v3128_v7 = vld [vmem:[%s5526_s22 + $0x40] sm:$0xff]  ;;  %v5652_v49 = vld [vmem:[%s5504_s17 + $0x70] sm:$0xff] }
 0x215   : > { %v4201_v31 = vpop.f32.mrb[42].mxu0  ;;  %v3185_v4 = vmul.f32 %v4686_v2, %v5549_v33  ;;  %v3002_v48 = vadd.f32 %v4264_v24, %v5513_v39  ;;  %v3958_v17 = vpop.f32.mrb[139].mxu1  ;;  %3250 = vst [vmem:[%s5625_s27 + $0x10] sm:$0xff] %v3218_v25  ;;  %v3219_v46 = vadd.f32 %v3187_v26, %v5577_v27  ;;  %v3131_v33 = vld [vmem:[%s5526_s22 + $0x58] sm:$0xff]  ;;  %v5649_v24 = vld [vmem:[%s5504_s17 + $0x48] sm:$0xff]  ;;  %v5659_v6 = vld [vmem:[%s5504_s17 + $0x60] sm:$0xff]  ;;  %v5665_v25 = vmul.f32 %v3128_v7, %v3096_v59 }
 0x216   : > { %v4270_v62 = vadd.f32 %v5478_v45, %v4201_v31  ;;  %v2893_v40 = vpop.f32.mrb[43].mxu0  ;;  %v4301_v12 = vadd.f32 %v3956_v9, %v5351_v20  ;;  %v3000_v13 = vadd.f32 %v4267_v47, %v5513_v39  ;;  %v3959_v55 = vadd.f32 %v3958_v17, %v3957_v11  ;;  %3248 = vst [vmem:[%s5625_s27] sm:$0xff] %v3216_v8 }
 0x217   : > { %v3217_v58 = vadd.f32 %v3185_v4, %v3153_v63  ;;  %4695 = vtanh.f32 %v3002_v48  ;;  %v4273_v16 = vadd.f32 %v5466_v19, %v2893_v40  ;;  %3251 = vst [vmem:[%s5625_s27 + $0x18] sm:$0xff] %v3219_v46  ;;  %v5655_v20 = vmul.f32 %v3130_v1, %v3098_v23 }
 0x218   : > { %v3003_v45 = vadd.f32 %v4270_v62, %v5513_v39  ;;  %4697 = vtanh.f32 %v3000_v13  ;;  %v4307_v27 = vadd.f32 %v3959_v55, %v5356_v28  ;;  %v5662_v2 = vadd.f32 %v4301_v12, %v5432_v51  ;;  %v4688_v63 = vpop.eup %4687  ;;  %v3129_v13 = vld [vmem:[%s5526_s22 + $0x48] sm:$0xff]  ;;  %v3134_v55 = vld [vmem:[%s5526_s22 + $0x70] sm:$0xff] }
 0x219   : > { %3249 = vst [vmem:[%s5625_s27 + $0x8] sm:$0xff] %v3217_v58  ;;  %v5667_v19 = vmul.f32 %v3131_v33, %v3099_v14  ;;  %v3001_v26 = vadd.f32 %v4273_v16, %v5513_v39  ;;  %v4690_v9 = vpop.eup %4689  ;;  %v3190_v23 = vmul.f32 %v4688_v63, %v5552_v18  ;;  %v3097_v47 = vsub.f32 1.0, %v5649_v24  ;;  %v3960_v28 = vpop.f32.mrb[140].mxu1  ;;  %v3132_v16 = vld [vmem:[%s5526_s22 + $0x60] sm:$0xff] }
 0x21a   : > { %4699 = vtanh.f32 %v3003_v45  ;;  %v4204_v11 = vpop.f32.mrb[44].mxu0  ;;  %v3102_v31 = vsub.f32 1.0, %v5652_v49  ;;  %v5674_v51 = vadd.f32 %v4307_v27, %v5435_v37  ;;  %v4692_v8 = vpop.eup %4691  ;;  %v3188_v59 = vmul.f32 %v4690_v9, %v5559_v42  ;;  %v5706_v9 = vld [vmem:[%s5504_s17 + $0x90] sm:$0xff] }
 0x21b   : > { %4701 = vtanh.f32 %v3001_v26  ;;  %v4276_v14 = vadd.f32 %v5508_v41, %v4204_v11  ;;  %v3961_v4 = vpop.f32.mrb[141].mxu1  ;;  %v2906_v48 = vpop.f32.mrb[45].mxu0  ;;  %v3100_v18 = vsub.f32 1.0, %v5659_v6  ;;  %v3222_v62 = vadd.f32 %v3190_v23, %v5593_v56 }
 0x21c   : > { %v4694_v1 = vpop.eup %4693  ;;  %v3191_v17 = vmul.f32 %v4692_v8, %v5564_v50  ;;  %v3962_v37 = vadd.f32 %v3961_v4, %v3960_v28  ;;  %v4279_v40 = vadd.f32 %v5487_v29, %v2906_v48  ;;  %v3963_v46 = vpop.f32.mrb[142].mxu1  ;;  %v3220_v41 = vadd.f32 %v3188_v59, %v5610_v22 }
 0x21d   : > { %v4205_v42 = vpop.f32.mrb[46].mxu0  ;;  %v3189_v12 = vmul.f32 %v4694_v1, %v5567_v21  ;;  %v3006_v7 = vadd.f32 %v4276_v14, %v5513_v39  ;;  %v3964_v56 = vpop.f32.mrb[143].mxu1  ;;  %3254 = vst [vmem:[%s5625_s27 + $0x30] sm:$0xff] %v3222_v62  ;;  %v5693_v21 = vld [vmem:[%s5504_s17 + $0x78] sm:$0xff]  ;;  %v3161_v26 = vmul.f32 %v3129_v13, %v3097_v47  ;;  %v5712_v28 = vmul.f32 %v3134_v55, %v3102_v31  ;;  %v3138_v55 = vld [vmem:[%s5526_s22 + $0x90] sm:$0xff] }
 0x21e   : > { %v4282_v33 = vadd.f32 %v5519_v61, %v4205_v42  ;;  %v2909_v50 = vpop.f32.mrb[47].mxu0  ;;  %v3223_v29 = vadd.f32 %v3191_v17, %v5612_v3  ;;  %v4298_v58 = vadd.f32 %v3962_v37, %v5361_v36  ;;  %v3004_v22 = vadd.f32 %v4279_v40, %v5513_v39  ;;  %3252 = vst [vmem:[%s5625_s27 + $0x20] sm:$0xff] %v3220_v41  ;;  %v5701_v3 = vld [vmem:[%s5504_s17 + $0x68] sm:$0xff] }
 0x21f   : > { %v3965_v45 = vadd.f32 %v3964_v56, %v3963_v46  ;;  %v3221_v61 = vadd.f32 %v3189_v12, %v5614_v38  ;;  %4703 = vtanh.f32 %v3006_v7  ;;  %v4285_v63 = vadd.f32 %v5490_v57, %v2909_v50  ;;  %v3135_v12 = vld [vmem:[%s5526_s22 + $0x78] sm:$0xff]  ;;  %v3133_v50 = vld [vmem:[%s5526_s22 + $0x68] sm:$0xff] }
 0x220   : > { %v3007_v27 = vadd.f32 %v4282_v33, %v5513_v39  ;;  %3255 = vst [vmem:[%s5625_s27 + $0x38] sm:$0xff] %v3223_v29  ;;  %4705 = vtanh.f32 %v3004_v22  ;;  %v5709_v23 = vadd.f32 %v4298_v58, %v5444_v30  ;;  %v3103_v57 = vsub.f32 1.0, %v5693_v21  ;;  %v5721_v30 = vld [vmem:[%s5504_s17 + $0x80] sm:$0xff]  ;;  %v5748_v22 = vld [vmem:[%s5504_s17 + $0x98] sm:$0xff] }
 0x221   : > { %v4304_v36 = vadd.f32 %v3965_v45, %v5366_v44  ;;  %v4696_v38 = vpop.eup %4695  ;;  %3253 = vst [vmem:[%s5625_s27 + $0x28] sm:$0xff] %v3221_v61  ;;  %v3005_v11 = vadd.f32 %v4285_v63, %v5513_v39  ;;  %v5717_v59 = vmul.f32 %v3132_v16, %v3100_v18  ;;  %v3101_v44 = vsub.f32 1.0, %v5701_v3  ;;  %v3966_v14 = vpop.f32.mrb[144].mxu1  ;;  %v3136_v58 = vld [vmem:[%s5526_s22 + $0x80] sm:$0xff] }
 0x222   : > { %4707 = vtanh.f32 %v3007_v27  ;;  %v4698_v8 = vpop.eup %4697  ;;  %v3194_v47 = vmul.f32 %v4696_v38, %v5597_v5  ;;  %v4208_v4 = vpop.f32.mrb[48].mxu0  ;;  %v3106_v5 = vsub.f32 1.0, %v5706_v9 }
 0x223   : > { %v5724_v48 = vadd.f32 %v4304_v36, %v5447_v53  ;;  %v3192_v1 = vmul.f32 %v4698_v8, %v5602_v15  ;;  %4709 = vtanh.f32 %v3005_v11  ;;  %v4288_v62 = vadd.f32 %v5608_v43, %v4208_v4  ;;  %v3967_v18 = vpop.f32.mrb[145].mxu1  ;;  %v2922_v17 = vpop.f32.mrb[49].mxu0 }
 0x224   : > { %v4700_v31 = vpop.eup %4699  ;;  %v3226_v37 = vadd.f32 %v3194_v47, %v5655_v20  ;;  %v3968_v46 = vadd.f32 %v3967_v18, %v3966_v14  ;;  %v4291_v53 = vadd.f32 %v5555_v34, %v2922_v17  ;;  %v3969_v42 = vpop.f32.mrb[146].mxu1  ;;  %v3104_v20 = vsub.f32 1.0, %v5721_v30 }
 0x225   : > { %v3195_v40 = vmul.f32 %v4700_v31, %v5605_v35  ;;  %v4209_v41 = vpop.f32.mrb[50].mxu0  ;;  %v4702_v15 = vpop.eup %4701  ;;  %v3224_v43 = vadd.f32 %v3192_v1, %v5665_v25  ;;  %v3010_v13 = vadd.f32 %v4288_v62, %v5513_v39  ;;  %v3165_v27 = vmul.f32 %v3133_v50, %v3101_v44 }
 0x226   : > { %v4294_v35 = vadd.f32 %v5619_v0, %v4209_v41  ;;  %v3970_v7 = vpop.f32.mrb[147].mxu1  ;;  %v2925_v33 = vpop.f32.mrb[51].mxu0  ;;  %3258 = vst [vmem:[%s5625_s27 + $0x50] sm:$0xff] %v3226_v37  ;;  %v3193_v56 = vmul.f32 %v4702_v15, %v5649_v24  ;;  %v4313_v25 = vadd.f32 %v3968_v46, %v5371_v52  ;;  %v3008_v29 = vadd.f32 %v4291_v53, %v5513_v39  ;;  %v3137_v41 = vld [vmem:[%s5526_s22 + $0x88] sm:$0xff]  ;;  %v5897_v15 = vld [vmem:[#allocation2_spill] sm:$0xff] }
 0x227   : > { %v3227_v34 = vadd.f32 %v3195_v40, %v5667_v19  ;;  %3256 = vst [vmem:[%s5625_s27 + $0x40] sm:$0xff] %v3224_v43  ;;  %4711 = vtanh.f32 %v3010_v13  ;;  %v3971_v45 = vadd.f32 %v3970_v7, %v3969_v42  ;;  %v4297_v61 = vadd.f32 %v5570_v10, %v2925_v33  ;;  %v3139_v40 = vld [vmem:[%s5526_s22 + $0x98] sm:$0xff]  ;;  %v5790_v13 = vld [vmem:[%s5504_s17 + $0xa0] sm:$0xff] }
 0x228   : > { %v3011_v0 = vadd.f32 %v4294_v35, %v5513_v39  ;;  %v3225_v24 = vadd.f32 %v3193_v56, %v3161_v26  ;;  %v3167_v19 = vmul.f32 %v3135_v12, %v3103_v57  ;;  %4713 = vtanh.f32 %v3008_v29  ;;  %v5765_v57 = vld [vmem:[%s5504_s17 + $0x88] sm:$0xff]  ;;  %v5787_v12 = vld [vmem:[%s5504_s17 + $0xb0] sm:$0xff] }
 0x229   : > { %3259 = vst [vmem:[%s5625_s27 + $0x58] sm:$0xff] %v3227_v34  ;;  %v5753_v52 = vadd.f32 %v4313_v25, %v5456_v54  ;;  %v4704_v16 = vpop.eup %4703  ;;  %v4319_v63 = vadd.f32 %v3971_v45, %v5376_v60  ;;  %v3009_v36 = vadd.f32 %v4297_v61, %v5513_v39  ;;  %v5759_v10 = vmul.f32 %v3138_v55, %v3106_v5  ;;  %v3972_v54 = vpop.f32.mrb[148].mxu1  ;;  %v5898_v34 = vld [vmem:[#allocation8_spill] sm:$0xff]  ;;  %v5899_v29 = vld [vmem:[#allocation3_spill] sm:$0xff] }
 0x22a   : > { %4715 = vtanh.f32 %v3011_v0  ;;  %v4706_v38 = vpop.eup %4705  ;;  %3257 = vst [vmem:[%s5625_s27 + $0x48] sm:$0xff] %v3225_v24  ;;  %v3198_v11 = vmul.f32 %v4704_v16, %v5652_v49  ;;  %v5761_v8 = vmul.f32 %v3136_v58, %v3104_v20  ;;  %v3107_v26 = vsub.f32 1.0, %v5748_v22  ;;  %v4212_v47 = vpop.f32.mrb[52].mxu0  ;;  %v5794_v20 = vld [vmem:[%s5504_s17 + $0xb8] sm:$0xff] }
 0x22b   : > { %v3196_v60 = vmul.f32 %v4706_v38, %v5659_v6  ;;  %4717 = vtanh.f32 %v3009_v36  ;;  %v4300_v14 = vadd.f32 %v5709_v23, %v4212_v47  ;;  %v3973_v4 = vpop.f32.mrb[149].mxu1  ;;  %v2938_v31 = vpop.f32.mrb[53].mxu0  ;;  %v5770_v49 = vadd.f32 %v4319_v63, %v5459_v32 }
 0x22c   : > { %v4708_v44 = vpop.eup %4707  ;;  %v3230_v1 = vadd.f32 %v3198_v11, %v5712_v28  ;;  %v3974_v5 = vadd.f32 %v3973_v4, %v3972_v54  ;;  %v4303_v18 = vadd.f32 %v5662_v2, %v2938_v31  ;;  %v3975_v17 = vpop.f32.mrb[150].mxu1  ;;  %v3105_v32 = vsub.f32 1.0, %v5765_v57  ;;  %v5900_v54 = vld [vmem:[#allocation9_spill] sm:$0xff] }
 0x22d   : > { %v3199_v62 = vmul.f32 %v4708_v44, %v5693_v21  ;;  %v4213_v6 = vpop.f32.mrb[54].mxu0  ;;  %v4710_v37 = vpop.eup %4709  ;;  %v3228_v23 = vadd.f32 %v3196_v60, %v5717_v59  ;;  %v3014_v28 = vadd.f32 %v4300_v14, %v5513_v39  ;;  %v3171_v33 = vmul.f32 %v3139_v40, %v3107_v26 }
 0x22e   : > { %v4306_v21 = vadd.f32 %v5724_v48, %v4213_v6  ;;  %v3976_v46 = vpop.f32.mrb[151].mxu1  ;;  %v2941_v53 = vpop.f32.mrb[55].mxu0  ;;  %3262 = vst [vmem:[%s5625_s27 + $0x70] sm:$0xff] %v3230_v1  ;;  %v3197_v42 = vmul.f32 %v4710_v37, %v5701_v3  ;;  %v4310_v43 = vadd.f32 %v3974_v5, %v5897_v15  ;;  %v3012_v59 = vadd.f32 %v4303_v18, %v5513_v39  ;;  %v3140_v37 = vld [vmem:[%s5526_s22 + $0xa0] sm:$0xff] }
 0x22f   : > { %v3231_v2 = vadd.f32 %v3199_v62, %v3167_v19  ;;  %3260 = vst [vmem:[%s5625_s27 + $0x60] sm:$0xff] %v3228_v23  ;;  %4719 = vtanh.f32 %v3014_v28  ;;  %v3977_v35 = vadd.f32 %v3976_v46, %v3975_v17  ;;  %v4309_v7 = vadd.f32 %v5674_v51, %v2941_v53  ;;  %v5807_v19 = vld [vmem:[%s5504_s17 + $0xa8] sm:$0xff]  ;;  %v3142_v62 = vld [vmem:[%s5526_s22 + $0xb0] sm:$0xff] }
 0x230   : > { %v3015_v48 = vadd.f32 %v4306_v21, %v5513_v39  ;;  %v3229_v3 = vadd.f32 %v3197_v42, %v3165_v27  ;;  %4721 = vtanh.f32 %v3012_v59  ;;  %v4311_v56 = vadd.f32 %v4310_v43, %v5898_v34  ;;  %v5901_v23 = vld [vmem:[#allocation4_spill] sm:$0xff]  ;;  %v3141_v28 = vld [vmem:[%s5526_s22 + $0xa8] sm:$0xff] }
 0x231   : > { %3263 = vst [vmem:[%s5625_s27 + $0x78] sm:$0xff] %v3231_v2  ;;  %v4712_v50 = vpop.eup %4711  ;;  %v3169_v25 = vmul.f32 %v3137_v41, %v3105_v32  ;;  %v4316_v55 = vadd.f32 %v3977_v35, %v5899_v29  ;;  %v3013_v58 = vadd.f32 %v4309_v7, %v5513_v39  ;;  %v3110_v51 = vsub.f32 1.0, %v5787_v12  ;;  %v3978_v16 = vpop.f32.mrb[152].mxu1  ;;  %v3082_v42 = vld [vmem:[%s5504_s17 + $0xd0] sm:$0xff]  ;;  %v5902_v41 = vld [vmem:[#allocation10_spill] sm:$0xff] }
 0x232   : > { %4723 = vtanh.f32 %v3015_v48  ;;  %v4714_v0 = vpop.eup %4713  ;;  %3261 = vst [vmem:[%s5625_s27 + $0x68] sm:$0xff] %v3229_v3  ;;  %v3202_v45 = vmul.f32 %v4712_v50, %v5706_v9  ;;  %v3108_v61 = vsub.f32 1.0, %v5790_v13  ;;  %v3111_v24 = vsub.f32 1.0, %v5794_v20  ;;  %v4216_v27 = vpop.f32.mrb[56].mxu0  ;;  %v5903_v48 = vld [vmem:[#allocation5_spill] sm:$0xff] }
 0x233   : > { %v3200_v36 = vmul.f32 %v4714_v0, %v5721_v30  ;;  %4725 = vtanh.f32 %v3013_v58  ;;  %v4312_v38 = vadd.f32 %v4311_v56, %v4216_v27  ;;  %v3979_v11 = vpop.f32.mrb[153].mxu1  ;;  %v2954_v26 = vpop.f32.mrb[57].mxu0  ;;  %v4317_v9 = vadd.f32 %v4316_v55, %v5900_v54  ;;  %v3080_v56 = vld [vmem:[%s5504_s17 + $0xc0] sm:$0xff]  ;;  %v3083_v50 = vld [vmem:[%s5504_s17 + $0xd8] sm:$0xff] }
 0x234   : > { %v4716_v63 = vpop.eup %4715  ;;  %v3234_v47 = vadd.f32 %v3202_v45, %v5759_v10  ;;  %v3980_v60 = vadd.f32 %v3979_v11, %v3978_v16  ;;  %v4315_v14 = vadd.f32 %v5753_v52, %v2954_v26  ;;  %v3981_v4 = vpop.f32.mrb[154].mxu1  ;;  %v3109_v5 = vsub.f32 1.0, %v5807_v19 }
 0x235   : > { %v3203_v44 = vmul.f32 %v4716_v63, %v5748_v22  ;;  %v4217_v31 = vpop.f32.mrb[58].mxu0  ;;  %v4718_v30 = vpop.eup %4717  ;;  %v3232_v1 = vadd.f32 %v3200_v36, %v5761_v8  ;;  %v3018_v18 = vadd.f32 %v4312_v38, %v5513_v39  ;;  %v3143_v8 = vld [vmem:[%s5526_s22 + $0xb8] sm:$0xff]  ;;  %v3172_v59 = vmul.f32 %v3140_v37, %v3108_v61  ;;  %v5904_v61 = vld [vmem:[#allocation11_spill] sm:$0xff] }
 0x236   : > { %v4318_v10 = vadd.f32 %v4317_v9, %v4217_v31  ;;  %v3982_v22 = vpop.f32.mrb[155].mxu1  ;;  %v2957_v17 = vpop.f32.mrb[59].mxu0  ;;  %3266 = vst [vmem:[%s5625_s27 + $0x90] sm:$0xff] %v3234_v47  ;;  %v3201_v6 = vmul.f32 %v4718_v30, %v5765_v57  ;;  %v4325_v40 = vadd.f32 %v3980_v60, %v5901_v23  ;;  %v3016_v32 = vadd.f32 %v4315_v14, %v5513_v39  ;;  %v3081_v47 = vld [vmem:[%s5504_s17 + $0xc8] sm:$0xff]  ;;  %v5905_v31 = vld [vmem:[#allocation6_spill] sm:$0xff] }
 0x237   : > { %v3235_v52 = vadd.f32 %v3203_v44, %v3171_v33  ;;  %3264 = vst [vmem:[%s5625_s27 + $0x80] sm:$0xff] %v3232_v1  ;;  %4727 = vtanh.f32 %v3018_v18  ;;  %v3983_v46 = vadd.f32 %v3982_v22, %v3981_v4  ;;  %v4321_v53 = vadd.f32 %v5770_v49, %v2957_v17  ;;  %v3144_v4 = vld [vmem:[%s5526_s22 + $0xc0] sm:$0xff]  ;;  %v3145_v23 = vld [vmem:[%s5526_s22 + $0xc8] sm:$0xff] }
 0x238   : > { %v3019_v21 = vadd.f32 %v4318_v10, %v5513_v39  ;;  %v3233_v2 = vadd.f32 %v3201_v6, %v3169_v25  ;;  %v3174_v57 = vmul.f32 %v3142_v62, %v3110_v51  ;;  %4729 = vtanh.f32 %v3016_v32 }
 0x239   : > { %3267 = vst [vmem:[%s5625_s27 + $0x98] sm:$0xff] %v3235_v52  ;;  %v4326_v15 = vadd.f32 %v4325_v40, %v5902_v41  ;;  %v4720_v43 = vpop.eup %4719  ;;  %v4331_v35 = vadd.f32 %v3983_v46, %v5903_v48  ;;  %v3017_v7 = vadd.f32 %v4321_v53, %v5513_v39  ;;  %v3175_v33 = vmul.f32 %v3143_v8, %v3111_v24  ;;  %v3984_v25 = vpop.f32.mrb[156].mxu1  ;;  %v3146_v24 = vld [vmem:[%s5526_s22 + $0xd0] sm:$0xff]  ;;  %v5907_v40 = vld [vmem:[#allocation7_spill] sm:$0xff] }
 0x23a   : > { %4731 = vtanh.f32 %v3019_v21  ;;  %v4722_v3 = vpop.eup %4721  ;;  %3265 = vst [vmem:[%s5625_s27 + $0x88] sm:$0xff] %v3233_v2  ;;  %v3206_v49 = vmul.f32 %v4720_v43, %v5787_v12  ;;  %v3173_v34 = vmul.f32 %v3141_v28, %v3109_v5  ;;  %v4220_v29 = vpop.f32.mrb[60].mxu0  ;;  %v3114_v0 = vsub.f32 1.0, %v3082_v42  ;;  %v3147_v5 = vld [vmem:[%s5526_s22 + $0xd8] sm:$0xff]  ;;  %v5906_v52 = vld [vmem:[#allocation12_spill] sm:$0xff]  ;;  %v3084_v2 = vld [vmem:[%s5504_s17 + $0xe0] sm:$0xff] }
 0x23b   : > { %v3204_v58 = vmul.f32 %v4722_v3, %v5790_v13  ;;  %4733 = vtanh.f32 %v3017_v7  ;;  %v3985_v45 = vpop.f32.mrb[157].mxu1  ;;  %v2970_v51 = vpop.f32.mrb[61].mxu0  ;;  %v4332_v16 = vadd.f32 %v4331_v35, %v5904_v61  ;;  %v3112_v54 = vsub.f32 1.0, %v3080_v56 }
 0x23c   : > { %v4724_v55 = vpop.eup %4723  ;;  %v3238_v27 = vadd.f32 %v3206_v49, %v3174_v57  ;;  %v3986_v63 = vadd.f32 %v3985_v45, %v3984_v25  ;;  %v4327_v36 = vadd.f32 %v4326_v15, %v2970_v51  ;;  %v3987_v38 = vpop.f32.mrb[158].mxu1  ;;  %v3115_v9 = vsub.f32 1.0, %v3083_v50  ;;  %v5908_v15 = vld [vmem:[#allocation13_spill] sm:$0xff]  ;;  %v3149_v51 = vld [vmem:[%s5526_s22 + $0xe8] sm:$0xff] }
 0x23d   : > { %v3207_v12 = vmul.f32 %v4724_v55, %v5794_v20  ;;  %v4221_v11 = vpop.f32.mrb[62].mxu0  ;;  %v4726_v13 = vpop.eup %4725  ;;  %v3236_v26 = vadd.f32 %v3204_v58, %v3172_v59  ;;  %v3178_v62 = vmul.f32 %v3146_v24, %v3114_v0  ;;  %v3113_v17 = vsub.f32 1.0, %v3081_v47  ;;  %v3086_v58 = vld [vmem:[%s5504_s17 + $0xf0] sm:$0xff] }
 0x23e   : > { %v3988_v44 = vpop.f32.mrb[159].mxu1  ;;  %v2973_v60 = vpop.f32.mrb[63].mxu0  ;;  %3270 = vst [vmem:[%s5625_s27 + $0xb0] sm:$0xff] %v3238_v27  ;;  %v3205_v20 = vmul.f32 %v4726_v13, %v5807_v19  ;;  %v4322_v30 = vadd.f32 %v3986_v63, %v5905_v31  ;;  %v3020_v1 = vadd.f32 %v4327_v36, %v5513_v39  ;;  %v3176_v37 = vmul.f32 %v3144_v4, %v3112_v54  ;;  %v3150_v24 = vld [vmem:[%s5526_s22 + $0xf0] sm:$0xff] }
 0x23f   : > { %v3239_v14 = vadd.f32 %v3207_v12, %v3175_v33  ;;  %3268 = vst [vmem:[%s5625_s27 + $0xa0] sm:$0xff] %v3236_v26  ;;  %v3989_v18 = vadd.f32 %v3988_v44, %v3987_v38  ;;  %v4333_v10 = vadd.f32 %v4332_v16, %v2973_v60  ;;  %v3179_v46 = vmul.f32 %v3147_v5, %v3115_v9  ;;  %v3087_v12 = vld [vmem:[%s5504_s17 + $0xf8] sm:$0xff] }
 0x240   : > { %v3237_v22 = vadd.f32 %v3205_v20, %v3173_v34  ;;  %v4323_v6 = vadd.f32 %v4322_v30, %v5906_v52  ;;  %4735 = vtanh.f32 %v3020_v1  ;;  %v3177_v35 = vmul.f32 %v3145_v23, %v3113_v17  ;;  %v3085_v34 = vld [vmem:[%s5504_s17 + $0xe8] sm:$0xff]  ;;  %v3151_v26 = vld [vmem:[%s5526_s22 + $0xf8] sm:$0xff] }
 0x241   : > { %3271 = vst [vmem:[%s5625_s27 + $0xb8] sm:$0xff] %v3239_v14  ;;  %v4728_v19 = vpop.eup %4727  ;;  %v4328_v32 = vadd.f32 %v3989_v18, %v5907_v40  ;;  %v3021_v8 = vadd.f32 %v4333_v10, %v5513_v39  ;;  %v3116_v49 = vsub.f32 1.0, %v3084_v2  ;;  %v3117_v0 = vsub.f32 1.0, %v3085_v34 }
 0x242   : > { %v4730_v28 = vpop.eup %4729  ;;  %3269 = vst [vmem:[%s5625_s27 + $0xa8] sm:$0xff] %v3237_v22  ;;  %v3210_v21 = vmul.f32 %v4728_v19, %v3082_v42  ;;  %v4324_v53 = vadd.f32 %v4323_v6, %v4220_v29  ;;  %v3148_v29 = vld [vmem:[%s5526_s22 + $0xe0] sm:$0xff]  ;;  %v3118_v16 = vsub.f32 1.0, %v3086_v58  ;;  %v3119_v38 = vsub.f32 1.0, %v3087_v12 }
 0x243   : > { %v3208_v41 = vmul.f32 %v4730_v28, %v3080_v56  ;;  %v4329_v43 = vadd.f32 %v4328_v32, %v5908_v15  ;;  %4737 = vtanh.f32 %v3021_v8  ;;  %v3180_v45 = vmul.f32 %v3148_v29, %v3116_v49 }
 0x244   : > { %v4732_v57 = vpop.eup %4731  ;;  %v3242_v59 = vadd.f32 %v3210_v21, %v3178_v62  ;;  %v3022_v7 = vadd.f32 %v4324_v53, %v5513_v39  ;;  %v3181_v63 = vmul.f32 %v3149_v51, %v3117_v0  ;;  %v3182_v13 = vmul.f32 %v3150_v24, %v3118_v16 }
 0x245   : > { %v3211_v48 = vmul.f32 %v4732_v57, %v3083_v50  ;;  %v4734_v42 = vpop.eup %4733  ;;  %v3240_v3 = vadd.f32 %v3208_v41, %v3176_v37  ;;  %v4330_v33 = vadd.f32 %v4329_v43, %v4221_v11  ;;  %v3183_v44 = vmul.f32 %v3151_v26, %v3119_v38 }
 0x246   : > { %3274 = vst [vmem:[%s5625_s27 + $0xd0] sm:$0xff] %v3242_v59  ;;  %v3209_v25 = vmul.f32 %v4734_v42, %v3081_v47  ;;  %4739 = vtanh.f32 %v3022_v7 }
 0x247   : > { %v3243_v56 = vadd.f32 %v3211_v48, %v3179_v46  ;;  %3272 = vst [vmem:[%s5625_s27 + $0xc0] sm:$0xff] %v3240_v3  ;;  %v3023_v50 = vadd.f32 %v4330_v33, %v5513_v39 }
 0x248   : > { %v3241_v55 = vadd.f32 %v3209_v25, %v3177_v35 }
 0x249   : > { %3275 = vst [vmem:[%s5625_s27 + $0xd8] sm:$0xff] %v3243_v56  ;;  %4741 = vtanh.f32 %v3023_v50 }
 0x24a   : > { %v4736_v61 = vpop.eup %4735  ;;  %3273 = vst [vmem:[%s5625_s27 + $0xc8] sm:$0xff] %v3241_v55 }
 0x24b   : > { %v3212_v27 = vmul.f32 %v4736_v61, %v3084_v2 }
 0x24d   : > { %v4738_v36 = vpop.eup %4737  ;;  %v3244_v39 = vadd.f32 %v3212_v27, %v3180_v45 }
 0x24e   : > { %v3213_v11 = vmul.f32 %v4738_v36, %v3085_v34 }
 0x24f   : > { %3276 = vst [vmem:[%s5625_s27 + $0xe0] sm:$0xff] %v3244_v39 }
 0x250   : > { %v4740_v54 = vpop.eup %4739  ;;  %v3245_v9 = vadd.f32 %v3213_v11, %v3181_v63 }
 0x251   : > { %v3214_v47 = vmul.f32 %v4740_v54, %v3086_v58 }
 0x252   : > { %3277 = vst [vmem:[%s5625_s27 + $0xe8] sm:$0xff] %v3245_v9 }
 0x253   : > { %v4742_v60 = vpop.eup %4741  ;;  %v3246_v14 = vadd.f32 %v3214_v47, %v3182_v13 }
 0x254   : > { %v3215_v20 = vmul.f32 %v4742_v60, %v3087_v12 }
 0x255   : > { %3278 = vst [vmem:[%s5625_s27 + $0xf0] sm:$0xff] %v3246_v14 }
 0x256   : > { %v3247_v4 = vadd.f32 %v3215_v20, %v3183_v44 }
 0x258   : > { %3279 = vst [vmem:[%s5625_s27 + $0xf8] sm:$0xff] %v3247_v4 }
 0x259 PF: > { %s17_s24 = sadd.s32 1, %s4749_s24  }
 0x25a   : > { %p14_p4 = scmp.ge.s32.totalorder %s17_s24, 4  }
 0x25c   :  { %16 = sbr.rel (!%p14_p4) target bundleno = 1 (0x1), region = 87 }

// kernel: sepconvgru2_forward.16
= control target key start
LH: loop header
LB: loop body
LE: loop exit
PB: predicated region body
PF: predicated region fallthrough
CT: control target
= control target key end

     0   :  { %s3631_s12 = smov 0   ;;  %s4421_s0 = inlined_call_operand.vmem [shape: bf16[512,1152], index: 0, kind: input, shape index: {}]   ;;  %s4422_s1 = inlined_call_operand.vmem [shape: bf16[1152,128], index: 1, kind: input, shape index: {}]   ;;  %s4423_s2 = inlined_call_operand.vmem [shape: f32[1,128], index: 2, kind: input, shape index: {}]   ;;  %s4424_s3 = inlined_call_operand.vmem [shape: f32[512,128], index: 3, kind: output, shape index: {}]  }
   0x1 LB: > { %s2550_s13 = sadd.s32 4294967295, %s3609_s12   ;;  %p2554_p0 = scmp.ge.s32.totalorder %s3609_s12, 1  ;;  %s3609_s12 = sphi %s3631_s12, %s13_s12  }
   0x2   : > { %p139_p1 = scmp.lt.s32.totalorder %s3609_s12, 3 }
   0x4   : > { %p140_p2 = pnand %p2554_p0, %p139_p1 }
   0x5   : > { %v3323_v0 = vld [vmem:[%s4422_s1 + $0x40] sm:$0xff] (!%p140_p2)   ;;  %s2555_s16 = sshll.u32 (!%p140_p2), %s2550_s13, 5  ;;  %v3325_v2 = vld [vmem:[%s4422_s1 + $0x48] sm:$0xff] (!%p140_p2)   ;;  %v3327_v4 = vld [vmem:[%s4422_s1 + $0x50] sm:$0xff] (!%p140_p2)  }
   0x6   : > { %143 = sbr.rel (%p140_p2) target bundleno = 540 (0x21c), region = 32  ;;  %v3324_v1 = vld [vmem:[%s4422_s1] sm:$0xff] (!%p140_p2)   ;;  %2778 = vmatprep.subr.bf16.mxu0 (!%p140_p2), %v3323_v0  ;;  %3298 = vmatprep.subr.bf16.mxu1 (!%p140_p2), %v3323_v0  ;;  %p165_p3 = scmp.lt.s32.totalorder (!%p140_p2), %s2555_s16, 63  ;;  %v3326_v3 = vld [vmem:[%s4422_s1 + $0x8] sm:$0xff] (!%p140_p2)   ;;  %v3328_v5 = vld [vmem:[%s4422_s1 + $0x10] sm:$0xff] (!%p140_p2)  }
   0x7   : > { %2779 = vmatpush3.bf16.msra.mxu0 (!%p140_p2), %v3324_v1  ;;  %3306 = vmatpush3.bf16.msra.mxu1 (!%p140_p2), %v3324_v1  ;;  %v3329_v6 = vld [vmem:[%s4422_s1 + $0x58] sm:$0xff] (!%p140_p2)   ;;  %v3331_v8 = vld [vmem:[%s4422_s1 + $0x60] sm:$0xff] (!%p140_p2)   ;;  %v3333_v10 = vld [vmem:[%s4422_s1 + $0x68] sm:$0xff] (!%p140_p2)  }
   0x8   : > { %2780 = vmatprep.subr.bf16.mxu0 (!%p140_p2), %v3325_v2  ;;  %3299 = vmatprep.subr.bf16.mxu1 (!%p140_p2), %v3325_v2  ;;  %v3330_v7 = vld [vmem:[%s4422_s1 + $0x18] sm:$0xff] (!%p140_p2)   ;;  %v3332_v9 = vld [vmem:[%s4422_s1 + $0x20] sm:$0xff] (!%p140_p2)   ;;  %v3334_v13 = vld [vmem:[%s4422_s1 + $0x28] sm:$0xff] (!%p140_p2)  }
   0x9   : > { %v3335_v14 = vld [vmem:[%s4422_s1 + $0x70] sm:$0xff] (!%p140_p2)   ;;  %v3337_v16 = vld [vmem:[%s4422_s1 + $0x78] sm:$0xff] (!%p140_p2)   ;;  %v3345_v18 = vld [vmem:[%s4422_s1 + $0xc0] sm:$0xff] (!%p140_p2)  }
   0xa   : > { %v3336_v15 = vld [vmem:[%s4422_s1 + $0x30] sm:$0xff] (!%p140_p2)   ;;  %v3338_v17 = vld [vmem:[%s4422_s1 + $0x38] sm:$0xff] (!%p140_p2)   ;;  %v3348_v21 = vld [vmem:[%s4422_s1 + $0x140] sm:$0xff] (!%p140_p2)  }
   0xb   : > { %2781 = vmatpush3.bf16.msra.mxu0 (!%p140_p2), %v3326_v3  ;;  %3307 = vmatpush3.bf16.msra.mxu1 (!%p140_p2), %v3326_v3  ;;  %v3346_v22 = vld [vmem:[%s4422_s1 + $0x80] sm:$0xff] (!%p140_p2)   ;;  %v3347_v23 = vld [vmem:[%s4422_s1 + $0xc8] sm:$0xff] (!%p140_p2)   ;;  %v3357_v31 = vld [vmem:[%s4422_s1 + $0xd0] sm:$0xff] (!%p140_p2)  }
   0xc   : > { %2782 = vmatprep.subr.bf16.mxu0 (!%p140_p2), %v3327_v4  ;;  %3300 = vmatprep.subr.bf16.mxu1 (!%p140_p2), %v3327_v4  ;;  %v3350_v24 = vld [vmem:[%s4422_s1 + $0x100] sm:$0xff] (!%p140_p2)   ;;  %v3349_v27 = vld [vmem:[%s4422_s1 + $0x88] sm:$0xff] (!%p140_p2)   ;;  %v3358_v32 = vld [vmem:[%s4422_s1 + $0x90] sm:$0xff] (!%p140_p2)  }
   0xd   : > { %s4426_s16 = smov (!%p165_p3, %s2555_s16), 63  ;;  %v3368_v28 = vld [vmem:[%s4422_s1 + $0x148] sm:$0xff]   ;;  %v3359_v34 = vld [vmem:[%s4422_s1 + $0xd8] sm:$0xff]   ;;  %v3367_v40 = vld [vmem:[%s4422_s1 + $0xe0] sm:$0xff]  }
   0xe   : > { %s3314_s29 = smul.u32 36, %s4426_s16  ;;  %v3370_v33 = vld [vmem:[%s4422_s1 + $0x108] sm:$0xff]   ;;  %v3360_v37 = vld [vmem:[%s4422_s1 + $0x98] sm:$0xff]   ;;  %v3369_v41 = vld [vmem:[%s4422_s1 + $0xa0] sm:$0xff]  }
   0xf   : > { %2783 = vmatpush3.bf16.msra.mxu0 %v3328_v5  ;;  %3308 = vmatpush3.bf16.msra.mxu1 %v3328_v5  ;;  %v3371_v42 = vld [vmem:[%s4422_s1 + $0xe8] sm:$0xff]   ;;  %v3382_v43 = vld [vmem:[%s4422_s1 + $0x150] sm:$0xff]   ;;  %v3381_v52 = vld [vmem:[%s4422_s1 + $0xf8] sm:$0xff]  }
  0x10   : > { %2784 = vmatprep.subr.bf16.mxu0 %v3329_v6  ;;  %3301 = vmatprep.subr.bf16.mxu1 %v3329_v6  ;;  %s3672_s9 = scalar_lea.vmem %s4421_s0, %s3314_s29  ;;  %v3384_v46 = vld [vmem:[%s4422_s1 + $0x110] sm:$0xff]   ;;  %v3372_v47 = vld [vmem:[%s4422_s1 + $0xa8] sm:$0xff]   ;;  %v3399_v55 = vld [vmem:[%s4422_s1 + $0x158] sm:$0xff]  }
  0x11   : > { %v3341_v11 = vld [vmem:[%s3672_s9 + $0x4] ss:$36 sps:$4 sm:$0xff]   ;;  %v3351_v25 = vld [vmem:[%s3672_s9 + $0x4c] ss:$36 sps:$4 sm:$0xff]   ;;  %v3361_v35 = vld [vmem:[%s3672_s9 + $0x94] ss:$36 sps:$4 sm:$0xff]  }
  0x12   : > { %v3344_v12 = vld [vmem:[%s3672_s9 + $0x364] ss:$36 sps:$4 sm:$0xff]   ;;  %1689 = vmatprep.mubr.bf16.mxu0 %v3341_v11  ;;  %v3353_v26 = vld [vmem:[%s3672_s9 + $0x3ac] ss:$36 sps:$4 sm:$0xff]   ;;  %v3363_v36 = vld [vmem:[%s3672_s9 + $0x3f4] ss:$36 sps:$4 sm:$0xff]  }
  0x13   : > { %2785 = vmatpush3.bf16.msra.mxu0 %v3330_v7  ;;  %3309 = vmatpush3.bf16.msra.mxu1 %v3330_v7  ;;  %v3339_v19 = vld [vmem:[%s3672_s9] ss:$36 sps:$4 sm:$0xff]   ;;  %v3355_v29 = vld [vmem:[%s3672_s9 + $0x48] ss:$36 sps:$4 sm:$0xff]   ;;  %v3365_v38 = vld [vmem:[%s3672_s9 + $0x90] ss:$36 sps:$4 sm:$0xff]  }
  0x14   : > { %2786 = vmatprep.subr.bf16.mxu0 %v3331_v8  ;;  %3302 = vmatprep.subr.bf16.mxu1 %v3331_v8  ;;  %v3342_v20 = vld [vmem:[%s3672_s9 + $0x360] ss:$36 sps:$4 sm:$0xff]   ;;  %v3356_v30 = vld [vmem:[%s3672_s9 + $0x3a8] ss:$36 sps:$4 sm:$0xff]   ;;  %v3366_v39 = vld [vmem:[%s3672_s9 + $0x3f0] ss:$36 sps:$4 sm:$0xff]  }
  0x15   : > { %1785 = vmatprep.mubr.bf16.mxu1 %v3344_v12  ;;  %v3373_v44 = vld [vmem:[%s3672_s9 + $0xdc] ss:$36 sps:$4 sm:$0xff]   ;;  %v3379_v48 = vld [vmem:[%s4422_s1 + $0xf0] sm:$0xff]   ;;  %v3385_v53 = vld [vmem:[%s3672_s9 + $0x124] ss:$36 sps:$4 sm:$0xff]  }
  0x16   : > { %v3375_v45 = vld [vmem:[%s3672_s9 + $0x43c] ss:$36 sps:$4 sm:$0xff]   ;;  %v3380_v51 = vld [vmem:[%s4422_s1 + $0xb0] sm:$0xff]   ;;  %v3387_v58 = vld [vmem:[%s3672_s9 + $0x8] ss:$36 sps:$4 sm:$0xff]  }
  0x17   : > { %2787 = vmatpush3.bf16.msra.mxu0 %v3332_v9  ;;  %3310 = vmatpush3.bf16.msra.mxu1 %v3332_v9  ;;  %v3377_v49 = vld [vmem:[%s3672_s9 + $0xd8] ss:$36 sps:$4 sm:$0xff]   ;;  %v3389_v54 = vld [vmem:[%s3672_s9 + $0xc] ss:$36 sps:$4 sm:$0xff]   ;;  %v3390_v59 = vld [vmem:[%s3672_s9 + $0x120] ss:$36 sps:$4 sm:$0xff]  }
  0x18   : > { %2788 = vmatprep.subr.bf16.mxu0 %v3333_v10  ;;  %3303 = vmatprep.subr.bf16.mxu1 %v3333_v10  ;;  %v3378_v50 = vld [vmem:[%s3672_s9 + $0x438] ss:$36 sps:$4 sm:$0xff]   ;;  %v3391_v60 = vld [vmem:[%s4422_s1 + $0x1c0] sm:$0xff]   ;;  %v3393_v62 = vld [vmem:[%s3672_s9 + $0x16c] ss:$36 sps:$4 sm:$0xff]  }
  0x19   : > { %v3400_v56 = vld [vmem:[%s4422_s1 + $0x118] sm:$0xff]   ;;  %v3392_v61 = vld [vmem:[%s4422_s1 + $0x180] sm:$0xff]   ;;  %v3407_v1 = vld [vmem:[%s4422_s1 + $0x1c8] sm:$0xff]  }
  0x1a   : > { %v3383_v57 = vld [vmem:[%s4422_s1 + $0xb8] sm:$0xff]   ;;  %v3409_v0 = vld [vmem:[%s4422_s1 + $0x160] sm:$0xff]   ;;  %v3408_v3 = vld [vmem:[%s4422_s1 + $0x188] sm:$0xff]  }
  0x1b   : > { %2789 = vmatpush3.bf16.msra.mxu0 %v3334_v13  ;;  %3311 = vmatpush3.bf16.msra.mxu1 %v3334_v13  ;;  %v3395_v63 = vld [vmem:[%s3672_s9 + $0x54] ss:$36 sps:$4 sm:$0xff]   ;;  %v3410_v2 = vld [vmem:[%s4422_s1 + $0x120] sm:$0xff]   ;;  %v3397_v4 = vld [vmem:[%s3672_s9 + $0x168] ss:$36 sps:$4 sm:$0xff]  }
  0x1c   : > { %2790 = vmatprep.subr.bf16.mxu0 %v3335_v14  ;;  %3304 = vmatprep.subr.bf16.mxu1 %v3335_v14  ;;  %v3398_v5 = vld [vmem:[%s3672_s9 + $0x50] ss:$36 sps:$4 sm:$0xff]   ;;  %v3403_v7 = vld [vmem:[%s3672_s9 + $0x9c] ss:$36 sps:$4 sm:$0xff]   ;;  %v3423_v8 = vld [vmem:[%s4422_s1 + $0x168] sm:$0xff]  }
  0x1d   : > { %v3401_v6 = vld [vmem:[%s3672_s9 + $0x1b4] ss:$36 sps:$4 sm:$0xff]   ;;  %v3425_v10 = vld [vmem:[%s4422_s1 + $0x128] sm:$0xff]   ;;  %v3411_v14 = vld [vmem:[%s3672_s9 + $0x1fc] ss:$36 sps:$4 sm:$0xff]  }
  0x1e   : > { %v3424_v9 = vld [vmem:[%s4422_s1 + $0x1d0] sm:$0xff]   ;;  %v3406_v13 = vld [vmem:[%s3672_s9 + $0x98] ss:$36 sps:$4 sm:$0xff]  }
  0x1f   : > { %2791 = vmatpush3.bf16.msra.mxu0 %v3336_v15  ;;  %3312 = vmatpush3.bf16.msra.mxu1 %v3336_v15  ;;  %v3426_v11 = vld [vmem:[%s4422_s1 + $0x190] sm:$0xff]  }
  0x20   : > { %2792 = vmatprep.subr.bf16.mxu0 %v3337_v16  ;;  %3305 = vmatprep.subr.bf16.mxu1 %v3337_v16  ;;  %v3405_v12 = vld [vmem:[%s3672_s9 + $0x1b0] ss:$36 sps:$4 sm:$0xff]  }
  0x21   : > { %v3433_v15 = vld [vmem:[%s4422_s1 + $0x170] sm:$0xff]  }
  0x22   : > { %v3434_v16 = vld [vmem:[%s4422_s1 + $0x130] sm:$0xff]  }
  0x23   : > { %2793 = vmatpush3.bf16.msra.mxu0 %v3338_v17  ;;  %3313 = vmatpush3.bf16.msra.mxu1 %v3338_v17  ;;  %v3413_v17 = vld [vmem:[%s3672_s9 + $0xe4] ss:$36 sps:$4 sm:$0xff]  }
  0x24   : > { %2890 = vmatprep.subr.bf16.mxu1 %v3345_v18  ;;  %3002 = vmatprep.subr.bf16.mxu0 %v3348_v21  ;;  %v3441_v18 = vld [vmem:[%s4422_s1 + $0x1d8] sm:$0xff]   ;;  %v3416_v21 = vld [vmem:[%s3672_s9 + $0xe0] ss:$36 sps:$4 sm:$0xff]  }
  0x26   : > { %1690 = vmatmul.mubr.bf16.vlgmr.msra.gmra.mrb[0].mxu0 %v3339_v19  ;;  %1786 = vmatmul.mubr.bf16.vlgmr.msra.gmra.mrb[0].mxu1 %v3342_v20  ;;  %v3442_v19 = vld [vmem:[%s4422_s1 + $0x198] sm:$0xff]  }
  0x27   : > { %2891 = vmatpush3.bf16.msra.mxu1 %v3346_v22  ;;  %3003 = vmatpush3.bf16.msra.mxu0 %v3350_v24  ;;  %v3415_v20 = vld [vmem:[%s3672_s9 + $0x1f8] ss:$36 sps:$4 sm:$0xff]   ;;  %v3417_v22 = vld [vmem:[%s3672_s9 + $0x244] ss:$36 sps:$4 sm:$0xff]  }
  0x28   : > { %2892 = vmatprep.subr.bf16.mxu1 %v3347_v23  ;;  %1697 = vmatprep.mubr.bf16.mxu0 %v3351_v25  ;;  %v3419_v23 = vld [vmem:[%s3672_s9 + $0x12c] ss:$36 sps:$4 sm:$0xff]   ;;  %v3449_v24 = vld [vmem:[%s4422_s1 + $0x178] sm:$0xff]  }
  0x29   : > { %1793 = vmatprep.mubr.bf16.mxu1 %v3353_v26  ;;  %3004 = vmatprep.subr.bf16.mxu0 %v3368_v28  ;;  %v3450_v25 = vld [vmem:[%s4422_s1 + $0x138] sm:$0xff]   ;;  %v3457_v26 = vld [vmem:[%s4422_s1 + $0x1e0] sm:$0xff]  }
  0x2a   : > { %v3458_v28 = vld [vmem:[%s4422_s1 + $0x1a0] sm:$0xff]  }
  0x2b   : > { %2893 = vmatpush3.bf16.msra.mxu1 %v3349_v27  ;;  %3005 = vmatpush3.bf16.msra.mxu0 %v3370_v33  ;;  %v3421_v27 = vld [vmem:[%s3672_s9 + $0x240] ss:$36 sps:$4 sm:$0xff]   ;;  %v3472_v33 = vld [vmem:[%s4422_s1 + $0x1e8] sm:$0xff]  }
  0x2c   : > { %2894 = vmatprep.subr.bf16.mxu1 %v3357_v31  ;;  %3006 = vmatprep.subr.bf16.mxu0 %v3382_v43  ;;  %v3427_v31 = vld [vmem:[%s3672_s9 + $0x28c] ss:$36 sps:$4 sm:$0xff]   ;;  %v3443_v43 = vld [vmem:[%s3672_s9 + $0x31c] ss:$36 sps:$4 sm:$0xff]  }
  0x2e   : > { %1698 = vmatmul.mubr.bf16.gmra.mrb[4].mxu0 %v3355_v29  ;;  %1794 = vmatmul.mubr.bf16.gmra.mrb[4].mxu1 %v3356_v30  ;;  %v3459_v29 = vld [vmem:[%s4422_s1 + $0x200] sm:$0xff]   ;;  %v3422_v30 = vld [vmem:[%s3672_s9 + $0x128] ss:$36 sps:$4 sm:$0xff]  }
  0x2f   : > { %2895 = vmatpush3.bf16.msra.mxu1 %v3358_v32  ;;  %1705 = vmatprep.mubr.bf16.mxu0 %v3361_v35  ;;  %v3429_v32 = vld [vmem:[%s3672_s9 + $0x174] ss:$36 sps:$4 sm:$0xff]   ;;  %v3473_v35 = vld [vmem:[%s4422_s1 + $0x1a8] sm:$0xff]  }
  0x30   : > { %2896 = vmatprep.subr.bf16.mxu1 %v3359_v34  ;;  %1801 = vmatprep.mubr.bf16.mxu1 %v3363_v36  ;;  %v3431_v34 = vld [vmem:[%s3672_s9 + $0x288] ss:$36 sps:$4 sm:$0xff]   ;;  %v3432_v36 = vld [vmem:[%s3672_s9 + $0x170] ss:$36 sps:$4 sm:$0xff]  }
  0x31   : > { %3007 = vmatpush3.bf16.msra.mxu0 %v3384_v46  ;;  %v3448_v46 = vld [vmem:[%s3672_s9 + $0x200] ss:$36 sps:$4 sm:$0xff]  }
  0x32   : > { %3008 = vmatprep.subr.bf16.mxu0 %v3399_v55  ;;  %v3474_v55 = vld [vmem:[%s4422_s1 + $0x208] sm:$0xff]  }
  0x33   : > { %2897 = vmatpush3.bf16.msra.mxu1 %v3360_v37  ;;  %v3435_v37 = vld [vmem:[%s3672_s9 + $0x2d4] ss:$36 sps:$4 sm:$0xff]  }
  0x34   : > { %2898 = vmatprep.subr.bf16.mxu1 %v3367_v40  ;;  %v3440_v40 = vld [vmem:[%s3672_s9 + $0x1b8] ss:$36 sps:$4 sm:$0xff]  }
  0x35   : > { %3009 = vmatpush3.bf16.msra.mxu0 %v3400_v56  ;;  %v3489_v56 = vld [vmem:[%s4422_s1 + $0x210] sm:$0xff]  }
  0x36   : > { %1706 = vmatmul.mubr.bf16.gmra.mrb[8].mxu0 %v3365_v38  ;;  %1802 = vmatmul.mubr.bf16.gmra.mrb[8].mxu1 %v3366_v39  ;;  %v3437_v38 = vld [vmem:[%s3672_s9 + $0x1bc] ss:$36 sps:$4 sm:$0xff]   ;;  %v3439_v39 = vld [vmem:[%s3672_s9 + $0x2d0] ss:$36 sps:$4 sm:$0xff]  }
  0x37   : > { %2899 = vmatpush3.bf16.msra.mxu1 %v3369_v41  ;;  %1713 = vmatprep.mubr.bf16.mxu0 %v3373_v44  ;;  %v3487_v41 = vld [vmem:[%s4422_s1 + $0x1f0] sm:$0xff]   ;;  %v3445_v44 = vld [vmem:[%s3672_s9 + $0x204] ss:$36 sps:$4 sm:$0xff]  }
  0x38   : > { %2900 = vmatprep.subr.bf16.mxu1 %v3371_v42  ;;  %1809 = vmatprep.mubr.bf16.mxu1 %v3375_v45  ;;  %v3488_v42 = vld [vmem:[%s4422_s1 + $0x1b0] sm:$0xff]   ;;  %v3447_v45 = vld [vmem:[%s3672_s9 + $0x318] ss:$36 sps:$4 sm:$0xff]  }
  0x39   : > { %3010 = vmatprep.subr.bf16.mxu0 %v3409_v0  ;;  %v3471_v0 = vld [vmem:[%s3672_s9 + $0xa0] ss:$36 sps:$4 sm:$0xff]  }
  0x3a   : > { %3011 = vmatpush3.bf16.msra.mxu0 %v3410_v2  ;;  %v3477_v2 = vld [vmem:[%s3672_s9 + $0xec] ss:$36 sps:$4 sm:$0xff]  }
  0x3b   : > { %2901 = vmatpush3.bf16.msra.mxu1 %v3372_v47  ;;  %3012 = vmatprep.subr.bf16.mxu0 %v3423_v8  ;;  %v3502_v47 = vld [vmem:[%s4422_s1 + $0x1f8] sm:$0xff]  }
  0x3c   : > { %2902 = vmatprep.subr.bf16.mxu1 %v3379_v48  ;;  %v3503_v48 = vld [vmem:[%s4422_s1 + $0x1b8] sm:$0xff]  }
  0x3d   : > { %v3483_v8 = vld [vmem:[%s3672_s9 + $0x134] ss:$36 sps:$4 sm:$0xff]  }
  0x3e   : > { %1714 = vmatmul.mubr.bf16.gmra.mrb[12].mxu0 %v3377_v49  ;;  %1810 = vmatmul.mubr.bf16.gmra.mrb[12].mxu1 %v3378_v50  ;;  %v3451_v49 = vld [vmem:[%s3672_s9 + $0x24c] ss:$36 sps:$4 sm:$0xff]   ;;  %v3455_v50 = vld [vmem:[%s3672_s9 + $0x14] ss:$36 sps:$4 sm:$0xff]  }
  0x3f   : > { %2903 = vmatpush3.bf16.msra.mxu1 %v3380_v51  ;;  %1721 = vmatprep.mubr.bf16.mxu0 %v3385_v53  ;;  %v3453_v51 = vld [vmem:[%s3672_s9 + $0x10] ss:$36 sps:$4 sm:$0xff]  }
  0x40   : > { %2904 = vmatprep.subr.bf16.mxu1 %v3381_v52  ;;  %1850 = vmatprep.mubr.bf16.mxu1 %v3389_v54  ;;  %v3456_v52 = vld [vmem:[%s3672_s9 + $0x248] ss:$36 sps:$4 sm:$0xff]   ;;  %v3460_v53 = vld [vmem:[%s3672_s9 + $0x294] ss:$36 sps:$4 sm:$0xff]   ;;  %v3462_v54 = vld [vmem:[%s3672_s9 + $0x5c] ss:$36 sps:$4 sm:$0xff]  }
  0x41   : > { %3013 = vmatpush3.bf16.msra.mxu0 %v3425_v10  ;;  %v3485_v10 = vld [vmem:[%s3672_s9 + $0x368] ss:$36 sps:$4 sm:$0xff]  }
  0x42   : > { %3014 = vmatprep.subr.bf16.mxu0 %v3433_v15  ;;  %v3495_v15 = vld [vmem:[%s3672_s9 + $0x178] ss:$36 sps:$4 sm:$0xff]  }
  0x43   : > { %2905 = vmatpush3.bf16.msra.mxu1 %v3383_v57  ;;  %v3464_v57 = vld [vmem:[%s3672_s9 + $0x290] ss:$36 sps:$4 sm:$0xff]  }
  0x44   : > { %3114 = vmatprep.subr.bf16.mxu1 %v3391_v60  ;;  %v3468_v60 = vld [vmem:[%s3672_s9 + $0xa4] ss:$36 sps:$4 sm:$0xff]  }
  0x45   : > { %3015 = vmatpush3.bf16.msra.mxu0 %v3434_v16  ;;  %v3496_v16 = vld [vmem:[%s3672_s9 + $0x3fc] ss:$36 sps:$4 sm:$0xff]  }
  0x46   : > { %1722 = vmatmul.mubr.bf16.gmra.mrb[16].mxu0 %v3390_v59  ;;  %1851 = vmatmul.mubr.bf16.vlgmr.msra.gmra.mrb[16].mxu1 %v3387_v58  ;;  %v3465_v58 = vld [vmem:[%s3672_s9 + $0x58] ss:$36 sps:$4 sm:$0xff]  }
  0x47   : > { %3115 = vmatpush3.bf16.msra.mxu1 %v3392_v61  ;;  %1729 = vmatprep.mubr.bf16.mxu0 %v3393_v62  ;;  %v3466_v59 = vld [vmem:[%s3672_s9 + $0x2dc] ss:$36 sps:$4 sm:$0xff]  }
  0x48   : > { %1858 = vmatprep.mubr.bf16.mxu1 %v3395_v63  ;;  %3116 = vmatprep.subr.bf16.mxu1 %v3407_v1  ;;  %v3504_v61 = vld [vmem:[%s4422_s1 + $0x218] sm:$0xff]   ;;  %v3517_v62 = vld [vmem:[%s4422_s1 + $0x220] sm:$0xff]  }
  0x49   : > { %3016 = vmatprep.subr.bf16.mxu0 %v3449_v24  ;;  %v3470_v63 = vld [vmem:[%s3672_s9 + $0x2d8] ss:$36 sps:$4 sm:$0xff]   ;;  %v3475_v1 = vld [vmem:[%s3672_s9 + $0x324] ss:$36 sps:$4 sm:$0xff]  }
  0x4a   : > { %3017 = vmatpush3.bf16.msra.mxu0 %v3450_v25  ;;  %v3511_v24 = vld [vmem:[%s3672_s9 + $0x254] ss:$36 sps:$4 sm:$0xff]   ;;  %v3515_v25 = vld [vmem:[%s3672_s9 + $0x1c] ss:$36 sps:$4 sm:$0xff]  }
  0x4b   : > { %3117 = vmatpush3.bf16.msra.mxu1 %v3408_v3  ;;  %3250 = vmatprep.subr.bf16.mxu0 %v3459_v29  ;;  %v3530_v3 = vld [vmem:[%s4422_s1 + $0x228] sm:$0xff]  }
  0x4c   : > { %3118 = vmatprep.subr.bf16.mxu1 %v3424_v9  ;;  %v3556_v9 = vld [vmem:[%s4422_s1 + $0x238] sm:$0xff]  }
  0x4e   : > { %1730 = vmatmul.mubr.bf16.gmra.mrb[20].mxu0 %v3397_v4  ;;  %1859 = vmatmul.mubr.bf16.gmra.mrb[20].mxu1 %v3398_v5  ;;  %v3479_v4 = vld [vmem:[%s3672_s9 + $0x320] ss:$36 sps:$4 sm:$0xff]   ;;  %v3480_v5 = vld [vmem:[%s3672_s9 + $0xe8] ss:$36 sps:$4 sm:$0xff]  }
  0x4f   : > { %1737 = vmatprep.mubr.bf16.mxu0 %v3401_v6  ;;  %1866 = vmatprep.mubr.bf16.mxu1 %v3403_v7  ;;  %v3543_v6 = vld [vmem:[%s4422_s1 + $0x230] sm:$0xff]  }
  0x50   : > { %3119 = vmatpush3.bf16.msra.mxu1 %v3426_v11  ;;  %v3481_v7 = vld [vmem:[%s3672_s9 + $0x36c] ss:$36 sps:$4 sm:$0xff]  }
  0x51   : > { %3120 = vmatprep.subr.bf16.mxu1 %v3441_v18  ;;  %v3486_v11 = vld [vmem:[%s3672_s9 + $0x130] ss:$36 sps:$4 sm:$0xff]   ;;  %v3500_v18 = vld [vmem:[%s3672_s9 + $0x3f8] ss:$36 sps:$4 sm:$0xff]  }
  0x54   : > { %3121 = vmatpush3.bf16.msra.mxu1 %v3442_v19  ;;  %v3501_v19 = vld [vmem:[%s3672_s9 + $0x1c0] ss:$36 sps:$4 sm:$0xff]  }
  0x55   : > { %3122 = vmatprep.subr.bf16.mxu1 %v3457_v26  ;;  %v3513_v26 = vld [vmem:[%s3672_s9 + $0x18] ss:$36 sps:$4 sm:$0xff]  }
  0x56   : > { %1738 = vmatmul.mubr.bf16.gmra.mrb[24].mxu0 %v3405_v12  ;;  %1867 = vmatmul.mubr.bf16.gmra.mrb[24].mxu1 %v3406_v13  ;;  %v3490_v12 = vld [vmem:[%s3672_s9 + $0x3b4] ss:$36 sps:$4 sm:$0xff]   ;;  %v3492_v13 = vld [vmem:[%s3672_s9 + $0x17c] ss:$36 sps:$4 sm:$0xff]  }
  0x57   : > { %1745 = vmatprep.mubr.bf16.mxu0 %v3411_v14  ;;  %1874 = vmatprep.mubr.bf16.mxu1 %v3413_v17  ;;  %v3494_v14 = vld [vmem:[%s3672_s9 + $0x3b0] ss:$36 sps:$4 sm:$0xff]   ;;  %v3498_v17 = vld [vmem:[%s3672_s9 + $0x1c4] ss:$36 sps:$4 sm:$0xff]  }
  0x58   : > { %3123 = vmatpush3.bf16.msra.mxu1 %v3458_v28  ;;  %v3518_v28 = vld [vmem:[%s3672_s9 + $0x29c] ss:$36 sps:$4 sm:$0xff]  }
  0x59   : > { %3124 = vmatprep.subr.bf16.mxu1 %v3472_v33  ;;  %v3526_v33 = vld [vmem:[%s3672_s9 + $0xac] ss:$36 sps:$4 sm:$0xff]  }
  0x5c   : > { %3125 = vmatpush3.bf16.msra.mxu1 %v3473_v35  ;;  %v3529_v35 = vld [vmem:[%s3672_s9 + $0xa8] ss:$36 sps:$4 sm:$0xff]  }
  0x5d   : > { %3126 = vmatprep.subr.bf16.mxu1 %v3487_v41  ;;  %v3539_v41 = vld [vmem:[%s3672_s9 + $0x13c] ss:$36 sps:$4 sm:$0xff]  }
  0x5e   : > { %1746 = vmatmul.mubr.bf16.gmra.mrb[28].mxu0 %v3415_v20  ;;  %1875 = vmatmul.mubr.bf16.gmra.mrb[28].mxu1 %v3416_v21  ;;  %v3505_v20 = vld [vmem:[%s3672_s9 + $0x444] ss:$36 sps:$4 sm:$0xff]   ;;  %v3507_v21 = vld [vmem:[%s3672_s9 + $0x20c] ss:$36 sps:$4 sm:$0xff]  }
  0x5f   : > { %1753 = vmatprep.mubr.bf16.mxu0 %v3417_v22  ;;  %1882 = vmatprep.mubr.bf16.mxu1 %v3419_v23  ;;  %v3509_v22 = vld [vmem:[%s3672_s9 + $0x440] ss:$36 sps:$4 sm:$0xff]   ;;  %v3510_v23 = vld [vmem:[%s3672_s9 + $0x208] ss:$36 sps:$4 sm:$0xff]  }
  0x60   : > { %3127 = vmatpush3.bf16.msra.mxu1 %v3488_v42  ;;  %v3541_v42 = vld [vmem:[%s3672_s9 + $0x370] ss:$36 sps:$4 sm:$0xff]  }
  0x61   : > { %3128 = vmatprep.subr.bf16.mxu1 %v3502_v47  ;;  %v3549_v47 = vld [vmem:[%s3672_s9 + $0x180] ss:$36 sps:$4 sm:$0xff]  }
  0x64   : > { %3129 = vmatpush3.bf16.msra.mxu1 %v3503_v48  ;;  %v3550_v48 = vld [vmem:[%s3672_s9 + $0x404] ss:$36 sps:$4 sm:$0xff]  }
  0x66   : > { %1754 = vmatmul.mubr.bf16.gmra.mrb[32].mxu0 %v3421_v27  ;;  %1883 = vmatmul.mubr.bf16.gmra.mrb[32].mxu1 %v3422_v30  ;;  %v3516_v27 = vld [vmem:[%s3672_s9 + $0x250] ss:$36 sps:$4 sm:$0xff]   ;;  %v3522_v30 = vld [vmem:[%s3672_s9 + $0x298] ss:$36 sps:$4 sm:$0xff]  }
  0x67   : > { %1761 = vmatprep.mubr.bf16.mxu0 %v3427_v31  ;;  %1890 = vmatprep.mubr.bf16.mxu1 %v3429_v32  ;;  %v3523_v31 = vld [vmem:[%s3672_s9 + $0x60] ss:$36 sps:$4 sm:$0xff]  }
  0x68   : > { %v3524_v32 = vld [vmem:[%s3672_s9 + $0x2e4] ss:$36 sps:$4 sm:$0xff]  }
  0x6e   : > { %1762 = vmatmul.mubr.bf16.gmra.mrb[36].mxu0 %v3431_v34  ;;  %1891 = vmatmul.mubr.bf16.gmra.mrb[36].mxu1 %v3432_v36  ;;  %v3528_v34 = vld [vmem:[%s3672_s9 + $0x2e0] ss:$36 sps:$4 sm:$0xff]   ;;  %v3531_v36 = vld [vmem:[%s3672_s9 + $0x32c] ss:$36 sps:$4 sm:$0xff]  }
  0x6f   : > { %1769 = vmatprep.mubr.bf16.mxu0 %v3435_v37  ;;  %1898 = vmatprep.mubr.bf16.mxu1 %v3437_v38  ;;  %v3533_v37 = vld [vmem:[%s3672_s9 + $0xf4] ss:$36 sps:$4 sm:$0xff]   ;;  %v3535_v38 = vld [vmem:[%s3672_s9 + $0x328] ss:$36 sps:$4 sm:$0xff]  }
  0x76   : > { %1770 = vmatmul.mubr.bf16.gmra.mrb[40].mxu0 %v3439_v39  ;;  %1899 = vmatmul.mubr.bf16.gmra.mrb[40].mxu1 %v3440_v40  ;;  %v3536_v39 = vld [vmem:[%s3672_s9 + $0xf0] ss:$36 sps:$4 sm:$0xff]  }
  0x77   : > { %1777 = vmatprep.mubr.bf16.mxu0 %v3443_v43  ;;  %1906 = vmatprep.mubr.bf16.mxu1 %v3445_v44  ;;  %v3537_v40 = vld [vmem:[%s3672_s9 + $0x374] ss:$36 sps:$4 sm:$0xff]   ;;  %v3544_v44 = vld [vmem:[%s3672_s9 + $0x3bc] ss:$36 sps:$4 sm:$0xff]  }
  0x78   : > { %v3542_v43 = vld [vmem:[%s3672_s9 + $0x138] ss:$36 sps:$4 sm:$0xff]  }
  0x7e   : > { %1778 = vmatmul.mubr.bf16.gmra.mrb[44].mxu0 %v3447_v45  ;;  %1907 = vmatmul.mubr.bf16.gmra.mrb[44].mxu1 %v3448_v46  ;;  %v3546_v45 = vld [vmem:[%s3672_s9 + $0x184] ss:$36 sps:$4 sm:$0xff]   ;;  %v3548_v46 = vld [vmem:[%s3672_s9 + $0x3b8] ss:$36 sps:$4 sm:$0xff]  }
  0x7f   : > { %1914 = vmatprep.mubr.bf16.mxu1 %v3451_v49  ;;  %2011 = vmatprep.mubr.bf16.mxu0 %v3455_v50  ;;  %v3552_v49 = vld [vmem:[%s3672_s9 + $0x1cc] ss:$36 sps:$4 sm:$0xff]   ;;  %v3554_v50 = vld [vmem:[%s3672_s9 + $0x400] ss:$36 sps:$4 sm:$0xff]  }
  0x86   : > { %1915 = vmatmul.mubr.bf16.gmra.mrb[48].mxu1 %v3456_v52  ;;  %2012 = vmatmul.mubr.bf16.vlgmr.msra.gmra.mrb[48].mxu0 %v3453_v51  ;;  %v3555_v51 = vld [vmem:[%s3672_s9 + $0x1c8] ss:$36 sps:$4 sm:$0xff]  }
  0x87   : > { %3251 = vmatpush3.bf16.msra.mxu0 %v3459_v29  ;;  %1922 = vmatprep.mubr.bf16.mxu1 %v3460_v53  ;;  %v3520_v29 = vld [vmem:[%s3672_s9 + $0x64] ss:$36 sps:$4 sm:$0xff]   ;;  %v3557_v52 = vld [vmem:[%s3672_s9 + $0x44c] ss:$36 sps:$4 sm:$0xff]   ;;  %v3559_v53 = vld [vmem:[%s3672_s9 + $0x214] ss:$36 sps:$4 sm:$0xff]  }
  0x88   : > { %2019 = vmatprep.mubr.bf16.mxu0 %v3462_v54  ;;  %3252 = vmatprep.subr.bf16.mxu0 %v3474_v55 }
  0x8b   : > { %3253 = vmatpush3.bf16.msra.mxu0 %v3474_v55 }
  0x8c   : > { %3254 = vmatprep.subr.bf16.mxu0 %v3489_v56 }
  0x8e   : > { %1923 = vmatmul.mubr.bf16.gmra.mrb[52].mxu1 %v3464_v57  ;;  %2020 = vmatmul.mubr.bf16.gmra.mrb[52].mxu0 %v3465_v58  ;;  %v3561_v58 = vld [vmem:[%s3672_s9 + $0x448] ss:$36 sps:$4 sm:$0xff]  }
  0x8f   : > { %1930 = vmatprep.mubr.bf16.mxu1 %v3466_v59  ;;  %2027 = vmatprep.mubr.bf16.mxu0 %v3468_v60  ;;  %v3562_v59 = vld [vmem:[%s3672_s9 + $0x210] ss:$36 sps:$4 sm:$0xff]  }
  0x90   : > { %3255 = vmatpush3.bf16.msra.mxu0 %v3489_v56 }
  0x91   : > { %3256 = vmatprep.subr.bf16.mxu0 %v3504_v61 }
  0x94   : > { %3257 = vmatpush3.bf16.msra.mxu0 %v3504_v61 }
  0x95   : > { %3258 = vmatprep.subr.bf16.mxu0 %v3517_v62 }
  0x96   : > { %1931 = vmatmul.mubr.bf16.gmra.mrb[56].mxu1 %v3470_v63  ;;  %2028 = vmatmul.mubr.bf16.gmra.mrb[56].mxu0 %v3471_v0  ;;  %v3563_v0 = vld [vmem:[%s3672_s9 + $0x25c] ss:$36 sps:$4 sm:$0xff]  }
  0x97   : > { %1938 = vmatprep.mubr.bf16.mxu1 %v3475_v1  ;;  %2035 = vmatprep.mubr.bf16.mxu0 %v3477_v2  ;;  %v3565_v1 = vld [vmem:[%s3672_s9 + $0x20] ss:$36 sps:$4 sm:$0xff]  }
  0x98   : > { %3259 = vmatpush3.bf16.msra.mxu0 %v3517_v62 }
  0x99   : > { %3260 = vmatprep.subr.bf16.mxu0 %v3530_v3 }
  0x9c   : > { %3261 = vmatpush3.bf16.msra.mxu0 %v3530_v3 }
  0x9d   : > { %3262 = vmatprep.subr.bf16.mxu0 %v3543_v6 }
  0x9e   : > { %1939 = vmatmul.mubr.bf16.gmra.mrb[60].mxu1 %v3479_v4  ;;  %2036 = vmatmul.mubr.bf16.gmra.mrb[60].mxu0 %v3480_v5 }
  0x9f   : > { %1946 = vmatprep.mubr.bf16.mxu1 %v3481_v7  ;;  %2043 = vmatprep.mubr.bf16.mxu0 %v3483_v8 }
  0xa0   : > { %3263 = vmatpush3.bf16.msra.mxu0 %v3543_v6 }
  0xa1   : > { %3264 = vmatprep.subr.bf16.mxu0 %v3556_v9 }
  0xa4   : > { %3265 = vmatpush3.bf16.msra.mxu0 %v3556_v9 }
  0xa6   : > { %1947 = vmatmul.mubr.bf16.gmra.mrb[64].mxu1 %v3485_v10  ;;  %2044 = vmatmul.mubr.bf16.gmra.mrb[64].mxu0 %v3486_v11  ;;  %v3566_v10 = vld [vmem:[%s3672_s9 + $0x258] ss:$36 sps:$4 sm:$0xff]   ;;  %v3567_v11 = vld [vmem:[%s3672_s9 + $0x68] ss:$36 sps:$4 sm:$0xff]  }
  0xa7   : > { %1954 = vmatprep.mubr.bf16.mxu1 %v3490_v12  ;;  %2051 = vmatprep.mubr.bf16.mxu0 %v3492_v13 }
  0xae   : > { %1955 = vmatmul.mubr.bf16.gmra.mrb[68].mxu1 %v3494_v14  ;;  %2052 = vmatmul.mubr.bf16.gmra.mrb[68].mxu0 %v3495_v15 }
  0xaf   : > { %1962 = vmatprep.mubr.bf16.mxu1 %v3496_v16  ;;  %2059 = vmatprep.mubr.bf16.mxu0 %v3498_v17  ;;  %v3568_v16 = vld [vmem:[%s3672_s9 + $0x2a4] ss:$36 sps:$4 sm:$0xff]   ;;  %v3570_v17 = vld [vmem:[%s3672_s9 + $0xb0] ss:$36 sps:$4 sm:$0xff]  }
  0xb6   : > { %1963 = vmatmul.mubr.bf16.gmra.mrb[72].mxu1 %v3500_v18  ;;  %2060 = vmatmul.mubr.bf16.gmra.mrb[72].mxu0 %v3501_v19 }
  0xb7   : > { %1970 = vmatprep.mubr.bf16.mxu1 %v3505_v20  ;;  %2067 = vmatprep.mubr.bf16.mxu0 %v3507_v21 }
  0xbe   : > { %1971 = vmatmul.mubr.bf16.gmra.mrb[76].mxu1 %v3509_v22  ;;  %2068 = vmatmul.mubr.bf16.gmra.mrb[76].mxu0 %v3510_v23 }
  0xbf   : > { %2075 = vmatprep.mubr.bf16.mxu0 %v3511_v24  ;;  %2172 = vmatprep.mubr.bf16.mxu1 %v3515_v25 }
  0xc6   : > { %2076 = vmatmul.mubr.bf16.gmra.mrb[80].mxu0 %v3516_v27  ;;  %2173 = vmatmul.mubr.bf16.vlgmr.msra.gmra.mrb[80].mxu1 %v3513_v26  ;;  %v3571_v26 = vld [vmem:[%s3672_s9 + $0x2a0] ss:$36 sps:$4 sm:$0xff]   ;;  %v3572_v27 = vld [vmem:[%s3672_s9 + $0xf8] ss:$36 sps:$4 sm:$0xff]  }
  0xc7   : > { %2083 = vmatprep.mubr.bf16.mxu0 %v3518_v28  ;;  %2180 = vmatprep.mubr.bf16.mxu1 %v3520_v29 }
  0xce   : > { %2084 = vmatmul.mubr.bf16.gmra.mrb[84].mxu0 %v3522_v30  ;;  %2181 = vmatmul.mubr.bf16.gmra.mrb[84].mxu1 %v3523_v31 }
  0xcf   : > { %2091 = vmatprep.mubr.bf16.mxu0 %v3524_v32  ;;  %2188 = vmatprep.mubr.bf16.mxu1 %v3526_v33  ;;  %v3573_v32 = vld [vmem:[%s3672_s9 + $0x2ec] ss:$36 sps:$4 sm:$0xff]   ;;  %v3575_v33 = vld [vmem:[%s3672_s9 + $0x140] ss:$36 sps:$4 sm:$0xff]  }
  0xd6   : > { %2092 = vmatmul.mubr.bf16.gmra.mrb[88].mxu0 %v3528_v34  ;;  %2189 = vmatmul.mubr.bf16.gmra.mrb[88].mxu1 %v3529_v35 }
  0xd7   : > { %2099 = vmatprep.mubr.bf16.mxu0 %v3531_v36  ;;  %2196 = vmatprep.mubr.bf16.mxu1 %v3533_v37 }
  0xde   : > { %2100 = vmatmul.mubr.bf16.gmra.mrb[92].mxu0 %v3535_v38  ;;  %2197 = vmatmul.mubr.bf16.gmra.mrb[92].mxu1 %v3536_v39 }
  0xdf   : > { %2107 = vmatprep.mubr.bf16.mxu0 %v3537_v40  ;;  %2204 = vmatprep.mubr.bf16.mxu1 %v3539_v41 }
  0xe6   : > { %2108 = vmatmul.mubr.bf16.gmra.mrb[96].mxu0 %v3541_v42  ;;  %2205 = vmatmul.mubr.bf16.gmra.mrb[96].mxu1 %v3542_v43  ;;  %v3576_v42 = vld [vmem:[%s3672_s9 + $0x2e8] ss:$36 sps:$4 sm:$0xff]  }
  0xe7   : > { %2115 = vmatprep.mubr.bf16.mxu0 %v3544_v44  ;;  %2212 = vmatprep.mubr.bf16.mxu1 %v3546_v45  ;;  %v3577_v43 = vld [vmem:[%s3672_s9 + $0x188] ss:$36 sps:$4 sm:$0xff]  }
  0xee   : > { %2116 = vmatmul.mubr.bf16.gmra.mrb[100].mxu0 %v3548_v46  ;;  %2213 = vmatmul.mubr.bf16.gmra.mrb[100].mxu1 %v3549_v47 }
  0xef   : > { %2123 = vmatprep.mubr.bf16.mxu0 %v3550_v48  ;;  %2220 = vmatprep.mubr.bf16.mxu1 %v3552_v49  ;;  %v3578_v48 = vld [vmem:[%s3672_s9 + $0x334] ss:$36 sps:$4 sm:$0xff]  }
  0xf0   : > { %v3580_v49 = vld [vmem:[%s3672_s9 + $0x1d0] ss:$36 sps:$4 sm:$0xff]  }
  0xf6   : > { %2124 = vmatmul.mubr.bf16.gmra.mrb[104].mxu0 %v3554_v50  ;;  %2221 = vmatmul.mubr.bf16.gmra.mrb[104].mxu1 %v3555_v51 }
  0xf7   : > { %2131 = vmatprep.mubr.bf16.mxu0 %v3557_v52  ;;  %2228 = vmatprep.mubr.bf16.mxu1 %v3559_v53 }
  0xf9   : > { %v2866_v54 = vpop.f32.mrb[0].mxu1  ;;  %v2794_v55 = vpop.f32.mrb[0].mxu0 }
  0xfa   : > { %v2867_v56 = vpop.f32.mrb[1].mxu1  ;;  %v2795_v57 = vpop.f32.mrb[1].mxu0 }
  0xfb   : > { %v3975_v60 = vadd.f32 %v2867_v56, %v2866_v54  ;;  %v2869_v61 = vpop.f32.mrb[2].mxu1  ;;  %v3977_v62 = vadd.f32 %v2795_v57, %v2794_v55  ;;  %v2797_v63 = vpop.f32.mrb[2].mxu0  ;;  %v4024_v54 = vld [vmem:[%s4423_s2] ss:$0 sm:$0xff] }
  0xfc   : > { %v2870_v2 = vpop.f32.mrb[3].mxu1  ;;  %v2798_v3 = vpop.f32.mrb[3].mxu0 }
  0xfd   : > { %v3981_v4 = vadd.f32 %v2870_v2, %v2869_v61  ;;  %v3983_v5 = vadd.f32 %v2798_v3, %v2797_v63  ;;  %v3582_v61 = vld [vmem:[%s3672_s9 + $0x218] ss:$36 sps:$4 sm:$0xff]   ;;  %v1692_v63 = vadd.f32 %v3977_v62, %v4024_v54 }
  0xfe   : > { %2132 = vmatmul.mubr.bf16.gmra.mrb[108].mxu0 %v3561_v58  ;;  %2229 = vmatmul.mubr.bf16.gmra.mrb[108].mxu1 %v3562_v59  ;;  %v3581_v59 = vld [vmem:[%s3672_s9 + $0x330] ss:$36 sps:$4 sm:$0xff]  }
  0xff   : > { %2236 = vmatprep.mubr.bf16.mxu1 %v3563_v0  ;;  %3266 = vmatprep.mubr.bf16.mxu0 %v3565_v1 }
 0x101   : > { %v2872_v6 = vpop.f32.mrb[4].mxu1  ;;  %v2800_v7 = vpop.f32.mrb[4].mxu0 }
 0x102   : > { %v2873_v8 = vpop.f32.mrb[5].mxu1  ;;  %v2801_v9 = vpop.f32.mrb[5].mxu0 }
 0x103   : > { %v3987_v12 = vadd.f32 %v2873_v8, %v2872_v6  ;;  %v2875_v13 = vpop.f32.mrb[6].mxu1  ;;  %v3989_v14 = vadd.f32 %v2801_v9, %v2800_v7  ;;  %v2803_v15 = vpop.f32.mrb[6].mxu0  ;;  %v3583_v6 = vld [vmem:[%s3672_s9 + $0x37c] ss:$36 sps:$4 sm:$0xff]  }
 0x104   : > { %v2876_v18 = vpop.f32.mrb[7].mxu1  ;;  %v2804_v19 = vpop.f32.mrb[7].mxu0  ;;  %v3585_v7 = vld [vmem:[%s3672_s9 + $0x260] ss:$36 sps:$4 sm:$0xff]  }
 0x105   : > { %v3993_v20 = vadd.f32 %v2876_v18, %v2875_v13  ;;  %v3995_v21 = vadd.f32 %v2804_v19, %v2803_v15 }
 0x106   : > { %2237 = vmatmul.mubr.bf16.gmra.mrb[112].mxu1 %v3566_v10  ;;  %3267 = vmatmul.mubr.bf16.vlgmr.msra.gmra.mrb[112].mxu0 %v3567_v11  ;;  %v1695_v10 = vadd.f32 %v3983_v5, %v4024_v54  ;;  %v1700_v5 = vadd.f32 %v3989_v14, %v4024_v54 }
 0x107   : > { %2244 = vmatprep.mubr.bf16.mxu1 %v3568_v16  ;;  %3270 = vmatprep.mubr.bf16.mxu0 %v3570_v17 }
 0x109   : > { %v2878_v22 = vpop.f32.mrb[8].mxu1  ;;  %v2806_v23 = vpop.f32.mrb[8].mxu0 }
 0x10a   : > { %v2879_v24 = vpop.f32.mrb[9].mxu1  ;;  %v2807_v25 = vpop.f32.mrb[9].mxu0 }
 0x10b   : > { %v3999_v28 = vadd.f32 %v2879_v24, %v2878_v22  ;;  %v2881_v29 = vpop.f32.mrb[10].mxu1  ;;  %v4001_v30 = vadd.f32 %v2807_v25, %v2806_v23  ;;  %v2809_v31 = vpop.f32.mrb[10].mxu0  ;;  %v3586_v22 = vld [vmem:[%s3672_s9 + $0x378] ss:$36 sps:$4 sm:$0xff]   ;;  %v3587_v23 = vld [vmem:[%s3672_s9 + $0x2a8] ss:$36 sps:$4 sm:$0xff]  }
 0x10c   : > { %v2882_v34 = vpop.f32.mrb[11].mxu1  ;;  %v2810_v35 = vpop.f32.mrb[11].mxu0 }
 0x10d   : > { %v4005_v36 = vadd.f32 %v2882_v34, %v2881_v29  ;;  %v4007_v37 = vadd.f32 %v2810_v35, %v2809_v31  ;;  %v3588_v29 = vld [vmem:[%s3672_s9 + $0x3c4] ss:$36 sps:$4 sm:$0xff]   ;;  %v3590_v31 = vld [vmem:[%s3672_s9 + $0x2f0] ss:$36 sps:$4 sm:$0xff]   ;;  %v1703_v34 = vadd.f32 %v3995_v21, %v4024_v54  ;;  %v1708_v21 = vadd.f32 %v4001_v30, %v4024_v54 }
 0x10e   : > { %2245 = vmatmul.mubr.bf16.gmra.mrb[116].mxu1 %v3571_v26  ;;  %3271 = vmatmul.mubr.bf16.gmra.mrb[116].mxu0 %v3572_v27 }
 0x10f   : > { %2252 = vmatprep.mubr.bf16.mxu1 %v3573_v32  ;;  %3274 = vmatprep.mubr.bf16.mxu0 %v3575_v33 }
 0x111   : > { %v2884_v38 = vpop.f32.mrb[12].mxu1  ;;  %v2812_v39 = vpop.f32.mrb[12].mxu0 }
 0x112   : > { %v2885_v40 = vpop.f32.mrb[13].mxu1  ;;  %v2813_v41 = vpop.f32.mrb[13].mxu0 }
 0x113   : > { %v4011_v44 = vadd.f32 %v2885_v40, %v2884_v38  ;;  %v2887_v45 = vpop.f32.mrb[14].mxu1  ;;  %v4013_v46 = vadd.f32 %v2813_v41, %v2812_v39  ;;  %v2815_v47 = vpop.f32.mrb[14].mxu0 }
 0x114   : > { %v2888_v50 = vpop.f32.mrb[15].mxu1  ;;  %v2816_v51 = vpop.f32.mrb[15].mxu0 }
 0x115   : > { %v4017_v52 = vadd.f32 %v2888_v50, %v2887_v45  ;;  %v4019_v53 = vadd.f32 %v2816_v51, %v2815_v47  ;;  %v3591_v45 = vld [vmem:[%s3672_s9 + $0x3c0] ss:$36 sps:$4 sm:$0xff]   ;;  %v3592_v47 = vld [vmem:[%s3672_s9 + $0x338] ss:$36 sps:$4 sm:$0xff]  }
 0x116   : > { %2253 = vmatmul.mubr.bf16.gmra.mrb[120].mxu1 %v3576_v42  ;;  %3275 = vmatmul.mubr.bf16.gmra.mrb[120].mxu0 %v3577_v43 }
 0x117   : > { %2260 = vmatprep.mubr.bf16.mxu1 %v3578_v48  ;;  %3278 = vmatprep.mubr.bf16.mxu0 %v3580_v49 }
 0x119   : > { %v2906_v55 = vpop.f32.mrb[16].mxu1  ;;  %v2818_v56 = vpop.f32.mrb[16].mxu0 }
 0x11a   : > { %v2907_v57 = vpop.f32.mrb[17].mxu1  ;;  %v2819_v58 = vpop.f32.mrb[17].mxu0 }
 0x11b   : > { %v2908_v0 = vadd.f32 %v2907_v57, %v2906_v55  ;;  %v2909_v1 = vpop.f32.mrb[18].mxu1  ;;  %v4030_v2 = vadd.f32 %v2819_v58, %v2818_v56  ;;  %v2821_v3 = vpop.f32.mrb[18].mxu0  ;;  %v3593_v55 = vld [vmem:[%s3672_s9 + $0x40c] ss:$36 sps:$4 sm:$0xff]   ;;  %v3595_v56 = vld [vmem:[%s3672_s9 + $0x380] ss:$36 sps:$4 sm:$0xff]  }
 0x11c   : > { %v2910_v8 = vpop.f32.mrb[19].mxu1  ;;  %v2822_v9 = vpop.f32.mrb[19].mxu0 }
 0x11d   : > { %v4036_v11 = vadd.f32 %v2908_v0, %v1692_v63  ;;  %v2911_v13 = vadd.f32 %v2910_v8, %v2909_v1  ;;  %v4038_v15 = vadd.f32 %v2822_v9, %v2821_v3  ;;  %v3596_v8 = vld [vmem:[%s3672_s9 + $0x408] ss:$36 sps:$4 sm:$0xff]  }
 0x11e   : > { %2261 = vmatmul.mubr.bf16.gmra.mrb[124].mxu1 %v3581_v59  ;;  %3279 = vmatmul.mubr.bf16.gmra.mrb[124].mxu0 %v3582_v61  ;;  %v1711_v59 = vadd.f32 %v4007_v37, %v4024_v54  ;;  %v3597_v9 = vld [vmem:[%s3672_s9 + $0x3c8] ss:$36 sps:$4 sm:$0xff]   ;;  %v1716_v37 = vadd.f32 %v4013_v46, %v4024_v54 }
 0x11f   : > { %v4040_v62 = vadd.f32 %v2911_v13, %v1695_v10  ;;  %2268 = vmatprep.mubr.bf16.mxu1 %v3583_v6  ;;  %3282 = vmatprep.mubr.bf16.mxu0 %v3585_v7 }
 0x121   : > { %v2912_v16 = vpop.f32.mrb[20].mxu1  ;;  %v2824_v17 = vpop.f32.mrb[20].mxu0 }
 0x122   : > { %v2913_v18 = vpop.f32.mrb[21].mxu1  ;;  %v2825_v19 = vpop.f32.mrb[21].mxu0 }
 0x123   : > { %v2914_v24 = vadd.f32 %v2913_v18, %v2912_v16  ;;  %v2915_v25 = vpop.f32.mrb[22].mxu1  ;;  %v4046_v26 = vadd.f32 %v2825_v19, %v2824_v17  ;;  %v2827_v27 = vpop.f32.mrb[22].mxu0  ;;  %v3598_v18 = vld [vmem:[%s3672_s9 + $0x454] ss:$36 sps:$4 sm:$0xff]  }
 0x124   : > { %v2916_v32 = vpop.f32.mrb[23].mxu1  ;;  %v2828_v33 = vpop.f32.mrb[23].mxu0  ;;  %v3600_v19 = vld [vmem:[%s3672_s9 + $0x410] ss:$36 sps:$4 sm:$0xff]  }
 0x125   : > { %v4052_v35 = vadd.f32 %v2914_v24, %v1700_v5  ;;  %v2917_v38 = vadd.f32 %v2916_v32, %v2915_v25  ;;  %v4054_v39 = vadd.f32 %v2828_v33, %v2827_v27  ;;  %v1719_v5 = vadd.f32 %v4019_v53, %v4024_v54 }
 0x126   : > { %2269 = vmatmul.mubr.bf16.gmra.mrb[128].mxu1 %v3586_v22  ;;  %3283 = vmatmul.mubr.bf16.gmra.mrb[128].mxu0 %v3587_v23  ;;  %v1724_v53 = vadd.f32 %v4030_v2, %v4024_v54 }
 0x127   : > { %v4056_v14 = vadd.f32 %v2917_v38, %v1703_v34  ;;  %2276 = vmatprep.mubr.bf16.mxu1 %v3588_v29  ;;  %3286 = vmatprep.mubr.bf16.mxu0 %v3590_v31  ;;  %v3601_v34 = vld [vmem:[%s3672_s9 + $0x450] ss:$36 sps:$4 sm:$0xff]   ;;  %v3602_v38 = vld [vmem:[%s3672_s9 + $0x458] ss:$36 sps:$4 sm:$0xff]   ;;  %s2558_s9 = sshll.u32 %s4426_s16, 3 }
 0x128   : > { %s4346_s22 = scalar_lea.vmem %s4424_s3, %s2558_s9 }
 0x129   : > { %v2918_v40 = vpop.f32.mrb[24].mxu1  ;;  %v2830_v41 = vpop.f32.mrb[24].mxu0 }
 0x12a   : > { %v2919_v42 = vpop.f32.mrb[25].mxu1  ;;  %v2831_v43 = vpop.f32.mrb[25].mxu0 }
 0x12b   : > { %v2920_v48 = vadd.f32 %v2919_v42, %v2918_v40  ;;  %v2921_v49 = vpop.f32.mrb[26].mxu1  ;;  %v4062_v50 = vadd.f32 %v2831_v43, %v2830_v41  ;;  %v2833_v51 = vpop.f32.mrb[26].mxu0 }
 0x12c   : > { %v2922_v57 = vpop.f32.mrb[27].mxu1  ;;  %v2834_v58 = vpop.f32.mrb[27].mxu0 }
 0x12d   : > { %v4068_v61 = vadd.f32 %v2920_v48, %v1708_v21  ;;  %v2923_v63 = vadd.f32 %v2922_v57, %v2921_v49  ;;  %v4070_v0 = vadd.f32 %v2834_v58, %v2833_v51  ;;  %v1727_v21 = vadd.f32 %v4038_v15, %v4024_v54 }
 0x12e   : > { %2277 = vmatmul.mubr.bf16.gmra.mrb[132].mxu1 %v3591_v45  ;;  %3287 = vmatmul.mubr.bf16.gmra.mrb[132].mxu0 %v3592_v47 }
 0x12f   : > { %v4072_v30 = vadd.f32 %v2923_v63, %v1711_v59  ;;  %2284 = vmatprep.mubr.bf16.mxu1 %v3593_v55  ;;  %3290 = vmatprep.mubr.bf16.mxu0 %v3595_v56  ;;  %v1732_v59 = vadd.f32 %v4046_v26, %v4024_v54 }
 0x131   : > { %v2924_v1 = vpop.f32.mrb[28].mxu1  ;;  %v2836_v3 = vpop.f32.mrb[28].mxu0 }
 0x132   : > { %v2925_v6 = vpop.f32.mrb[29].mxu1  ;;  %v2837_v7 = vpop.f32.mrb[29].mxu0 }
 0x133   : > { %v2926_v10 = vadd.f32 %v2925_v6, %v2924_v1  ;;  %v2927_v13 = vpop.f32.mrb[30].mxu1  ;;  %v4078_v16 = vadd.f32 %v2837_v7, %v2836_v3  ;;  %v2839_v17 = vpop.f32.mrb[30].mxu0 }
 0x134   : > { %v2928_v22 = vpop.f32.mrb[31].mxu1  ;;  %v2840_v23 = vpop.f32.mrb[31].mxu0 }
 0x135   : > { %v4084_v24 = vadd.f32 %v2926_v10, %v1716_v37  ;;  %v2929_v25 = vadd.f32 %v2928_v22, %v2927_v13  ;;  %v4086_v27 = vadd.f32 %v2840_v23, %v2839_v17  ;;  %v1740_v22 = vadd.f32 %v4062_v50, %v4024_v54 }
 0x136   : > { %2285 = vmatmul.mubr.bf16.gmra.mrb[136].mxu1 %v3596_v8  ;;  %3291 = vmatmul.mubr.bf16.gmra.mrb[136].mxu0 %v3597_v9  ;;  %v1735_v8 = vadd.f32 %v4054_v39, %v4024_v54 }
 0x137   : > { %v4088_v46 = vadd.f32 %v2929_v25, %v1719_v5  ;;  %2292 = vmatprep.mubr.bf16.mxu1 %v3598_v18  ;;  %3294 = vmatprep.mubr.bf16.mxu0 %v3600_v19 }
 0x139   : > { %v2930_v29 = vpop.f32.mrb[32].mxu1  ;;  %v2842_v31 = vpop.f32.mrb[32].mxu0 }
 0x13a   : > { %v2931_v32 = vpop.f32.mrb[33].mxu1  ;;  %v2843_v33 = vpop.f32.mrb[33].mxu0 }
 0x13b   : > { %v2932_v40 = vadd.f32 %v2931_v32, %v2930_v29  ;;  %v2933_v41 = vpop.f32.mrb[34].mxu1  ;;  %v4094_v42 = vadd.f32 %v2843_v33, %v2842_v31  ;;  %v2845_v43 = vpop.f32.mrb[34].mxu0  ;;  %v1743_v32 = vadd.f32 %v4070_v0, %v4024_v54 }
 0x13c   : > { %v2934_v45 = vpop.f32.mrb[35].mxu1  ;;  %v2846_v47 = vpop.f32.mrb[35].mxu0 }
 0x13d   : > { %v4098_v48 = vadd.f32 %v2932_v40, %v1724_v53  ;;  %v2935_v49 = vadd.f32 %v2934_v45, %v2933_v41  ;;  %v2847_v51 = vadd.f32 %v2846_v47, %v2845_v43  ;;  %v1748_v45 = vadd.f32 %v4078_v16, %v4024_v54 }
 0x13e   : > { %2293 = vmatmul.mubr.bf16.gmra.mrb[140].mxu1 %v3601_v34  ;;  %3295 = vmatmul.mubr.bf16.gmra.mrb[140].mxu0 %v3602_v38 }
 0x13f   : > { %v4100_v55 = vadd.f32 %v2935_v49, %v1727_v21 }
 0x141   : > { %v2936_v56 = vpop.f32.mrb[36].mxu1  ;;  %v2848_v2 = vpop.f32.mrb[36].mxu0 }
 0x142   : > { %v2937_v57 = vpop.f32.mrb[37].mxu1  ;;  %v2849_v58 = vpop.f32.mrb[37].mxu0 }
 0x143   : > { %v2938_v63 = vadd.f32 %v2937_v57, %v2936_v56  ;;  %v2939_v1 = vpop.f32.mrb[38].mxu1  ;;  %v4104_v3 = vadd.f32 %v2849_v58, %v2848_v2  ;;  %v2851_v15 = vpop.f32.mrb[38].mxu0  ;;  %v1751_v57 = vadd.f32 %v4086_v27, %v4024_v54  ;;  %v1759_v27 = vadd.f32 %v2847_v51, %v4024_v54 }
 0x144   : > { %v2940_v6 = vpop.f32.mrb[39].mxu1  ;;  %v2852_v7 = vpop.f32.mrb[39].mxu0 }
 0x145   : > { %v4108_v9 = vadd.f32 %v2938_v63, %v1732_v59  ;;  %v2941_v37 = vadd.f32 %v2940_v6, %v2939_v1  ;;  %v2853_v10 = vadd.f32 %v2852_v7, %v2851_v15  ;;  %v1764_v51 = vadd.f32 %v4104_v3, %v4024_v54 }
 0x147   : > { %v4110_v13 = vadd.f32 %v2941_v37, %v1735_v8  ;;  %v1756_v8 = vadd.f32 %v4094_v42, %v4024_v54 }
 0x149   : > { %v2942_v17 = vpop.f32.mrb[40].mxu1  ;;  %v2854_v18 = vpop.f32.mrb[40].mxu0 }
 0x14a   : > { %v2943_v19 = vpop.f32.mrb[41].mxu1  ;;  %v2855_v26 = vpop.f32.mrb[41].mxu0 }
 0x14b   : > { %v2944_v23 = vadd.f32 %v2943_v19, %v2942_v17  ;;  %v2945_v5 = vpop.f32.mrb[42].mxu1  ;;  %v4114_v25 = vadd.f32 %v2855_v26, %v2854_v18  ;;  %v2857_v29 = vpop.f32.mrb[42].mxu0 }
 0x14c   : > { %v2946_v31 = vpop.f32.mrb[43].mxu1  ;;  %v2858_v39 = vpop.f32.mrb[43].mxu0 }
 0x14d   : > { %v4118_v33 = vadd.f32 %v2944_v23, %v1740_v22  ;;  %v2947_v34 = vadd.f32 %v2946_v31, %v2945_v5  ;;  %v4120_v38 = vadd.f32 %v2858_v39, %v2857_v29 }
 0x14f   : > { %v4122_v53 = vadd.f32 %v2947_v34, %v1743_v32 }
 0x151   : > { %v2948_v40 = vpop.f32.mrb[44].mxu1  ;;  %v2860_v41 = vpop.f32.mrb[44].mxu0 }
 0x152   : > { %v2949_v50 = vpop.f32.mrb[45].mxu1  ;;  %v2861_v43 = vpop.f32.mrb[45].mxu0 }
 0x153   : > { %v2950_v47 = vadd.f32 %v2949_v50, %v2948_v40  ;;  %v2951_v21 = vpop.f32.mrb[46].mxu1  ;;  %v4126_v49 = vadd.f32 %v2861_v43, %v2860_v41  ;;  %v2863_v56 = vpop.f32.mrb[46].mxu0 }
 0x154   : > { %v2952_v0 = vpop.f32.mrb[47].mxu1  ;;  %v2864_v2 = vpop.f32.mrb[47].mxu0 }
 0x155   : > { %v4130_v58 = vadd.f32 %v2950_v47, %v1748_v45  ;;  %v2953_v59 = vadd.f32 %v2952_v0, %v2951_v21  ;;  %v4132_v63 = vadd.f32 %v2864_v2, %v2863_v56 }
 0x157   : > { %v4134_v1 = vadd.f32 %v2953_v59, %v1751_v57 }
 0x159   : > { %v2954_v15 = vpop.f32.mrb[48].mxu1  ;;  %v3018_v6 = vpop.f32.mrb[48].mxu0 }
 0x15a   : > { %v2955_v16 = vpop.f32.mrb[49].mxu1  ;;  %v3019_v7 = vpop.f32.mrb[49].mxu0 }
 0x15b   : > { %v2956_v37 = vadd.f32 %v2955_v16, %v2954_v15  ;;  %v3020_v17 = vadd.f32 %v3019_v7, %v3018_v6  ;;  %v2957_v18 = vpop.f32.mrb[50].mxu1  ;;  %v3021_v19 = vpop.f32.mrb[50].mxu0 }
 0x15c   : > { %v2958_v26 = vpop.f32.mrb[51].mxu1  ;;  %v3022_v22 = vpop.f32.mrb[51].mxu0 }
 0x15d   : > { %v4139_v23 = vadd.f32 %v2956_v37, %v1756_v8  ;;  %v4142_v5 = vadd.f32 %v3020_v17, %v4036_v11  ;;  %v2959_v29 = vadd.f32 %v2958_v26, %v2957_v18  ;;  %v3023_v31 = vadd.f32 %v3022_v22, %v3021_v19 }
 0x15e   : > { %v1767_v11 = vadd.f32 %v2853_v10, %v4024_v54  ;;  %v1772_v10 = vadd.f32 %v4114_v25, %v4024_v54 }
 0x15f   : > { %v4144_v39 = vadd.f32 %v2959_v29, %v1759_v27  ;;  %v4147_v32 = vadd.f32 %v3023_v31, %v4040_v62 }
 0x161   : > { %v2960_v42 = vpop.f32.mrb[52].mxu1  ;;  %v3024_v34 = vpop.f32.mrb[52].mxu0 }
 0x162   : > { %v2961_v40 = vpop.f32.mrb[53].mxu1  ;;  %v3025_v41 = vpop.f32.mrb[53].mxu0 }
 0x163   : > { %v2962_v50 = vadd.f32 %v2961_v40, %v2960_v42  ;;  %v3026_v43 = vadd.f32 %v3025_v41, %v3024_v34  ;;  %v2963_v45 = vpop.f32.mrb[54].mxu1  ;;  %v3027_v47 = vpop.f32.mrb[54].mxu0 }
 0x164   : > { %v2964_v21 = vpop.f32.mrb[55].mxu1  ;;  %v3028_v56 = vpop.f32.mrb[55].mxu0 }
 0x165   : > { %v4152_v0 = vadd.f32 %v2962_v50, %v1764_v51  ;;  %v4155_v62 = vadd.f32 %v3026_v43, %v4052_v35  ;;  %v2965_v2 = vadd.f32 %v2964_v21, %v2963_v45  ;;  %v3029_v57 = vadd.f32 %v3028_v56, %v3027_v47 }
 0x166   : > { %v1775_v35 = vadd.f32 %v4120_v38, %v4024_v54  ;;  %v1780_v38 = vadd.f32 %v4126_v49, %v4024_v54 }
 0x167   : > { %v4157_v59 = vadd.f32 %v2965_v2, %v1767_v11  ;;  %v4160_v15 = vadd.f32 %v3029_v57, %v4056_v14 }
 0x169   : > { %v2966_v3 = vpop.f32.mrb[56].mxu1  ;;  %v3030_v6 = vpop.f32.mrb[56].mxu0 }
 0x16a   : > { %v2967_v16 = vpop.f32.mrb[57].mxu1  ;;  %v3031_v7 = vpop.f32.mrb[57].mxu0 }
 0x16b   : > { %v2968_v8 = vadd.f32 %v2967_v16, %v2966_v3  ;;  %v3032_v37 = vadd.f32 %v3031_v7, %v3030_v6  ;;  %v2969_v17 = vpop.f32.mrb[58].mxu1  ;;  %v3033_v18 = vpop.f32.mrb[58].mxu0 }
 0x16c   : > { %v2970_v19 = vpop.f32.mrb[59].mxu1  ;;  %v3034_v27 = vpop.f32.mrb[59].mxu0 }
 0x16d   : > { %v4166_v26 = vadd.f32 %v2968_v8, %v1772_v10  ;;  %v4169_v14 = vadd.f32 %v3032_v37, %v4068_v61  ;;  %v2971_v22 = vadd.f32 %v2970_v19, %v2969_v17  ;;  %v3035_v29 = vadd.f32 %v3034_v27, %v3033_v18 }
 0x16e   : > { %v1783_v61 = vadd.f32 %v4132_v63, %v4024_v54  ;;  %v1788_v63 = vadd.f32 %v3975_v60, %v4024_v54 }
 0x16f   : > { %v4171_v31 = vadd.f32 %v2971_v22, %v1775_v35  ;;  %v4174_v25 = vadd.f32 %v3035_v29, %v4072_v30 }
 0x171   : > { %v2972_v42 = vpop.f32.mrb[60].mxu1  ;;  %v3036_v34 = vpop.f32.mrb[60].mxu0 }
 0x172   : > { %v2973_v40 = vpop.f32.mrb[61].mxu1  ;;  %v3037_v41 = vpop.f32.mrb[61].mxu0 }
 0x173   : > { %v2974_v51 = vadd.f32 %v2973_v40, %v2972_v42  ;;  %v3038_v50 = vadd.f32 %v3037_v41, %v3036_v34  ;;  %v2975_v43 = vpop.f32.mrb[62].mxu1  ;;  %v3039_v45 = vpop.f32.mrb[62].mxu0 }
 0x174   : > { %v2976_v47 = vpop.f32.mrb[63].mxu1  ;;  %v3040_v11 = vpop.f32.mrb[63].mxu0 }
 0x175   : > { %v4180_v21 = vadd.f32 %v2974_v51, %v1780_v38  ;;  %v4183_v30 = vadd.f32 %v3038_v50, %v4084_v24  ;;  %v2977_v56 = vadd.f32 %v2976_v47, %v2975_v43  ;;  %v3041_v2 = vadd.f32 %v3040_v11, %v3039_v45 }
 0x176   : > { %v1791_v24 = vadd.f32 %v3981_v4, %v4024_v54  ;;  %v1796_v4 = vadd.f32 %v3987_v12, %v4024_v54 }
 0x177   : > { %v4185_v57 = vadd.f32 %v2977_v56, %v1783_v61  ;;  %v4188_v49 = vadd.f32 %v3041_v2, %v4088_v46 }
 0x179   : > { %v2978_v3 = vpop.f32.mrb[64].mxu1  ;;  %v3042_v6 = vpop.f32.mrb[64].mxu0 }
 0x17a   : > { %v2979_v16 = vpop.f32.mrb[65].mxu1  ;;  %v3043_v7 = vpop.f32.mrb[65].mxu0 }
 0x17b   : > { %v2980_v10 = vadd.f32 %v2979_v16, %v2978_v3  ;;  %v3044_v8 = vadd.f32 %v3043_v7, %v3042_v6  ;;  %v2981_v37 = vpop.f32.mrb[66].mxu1  ;;  %v3045_v17 = vpop.f32.mrb[66].mxu0 }
 0x17c   : > { %v2982_v18 = vpop.f32.mrb[67].mxu1  ;;  %v3046_v35 = vpop.f32.mrb[67].mxu0 }
 0x17d   : > { %v4194_v19 = vadd.f32 %v2980_v10, %v1788_v63  ;;  %v4197_v46 = vadd.f32 %v3044_v8, %v4098_v48  ;;  %v2983_v27 = vadd.f32 %v2982_v18, %v2981_v37  ;;  %v3047_v22 = vadd.f32 %v3046_v35, %v3045_v17 }
 0x17e   : > { %v1799_v48 = vadd.f32 %v3993_v20, %v4024_v54  ;;  %v1804_v20 = vadd.f32 %v3999_v28, %v4024_v54 }
 0x17f   : > { %v4199_v29 = vadd.f32 %v2983_v27, %v1791_v24  ;;  %v4202_v60 = vadd.f32 %v3047_v22, %v4100_v55 }
 0x181   : > { %v2984_v42 = vpop.f32.mrb[68].mxu1  ;;  %v3048_v34 = vpop.f32.mrb[68].mxu0 }
 0x182   : > { %v2985_v40 = vpop.f32.mrb[69].mxu1  ;;  %v3049_v41 = vpop.f32.mrb[69].mxu0 }
 0x183   : > { %v2986_v38 = vadd.f32 %v2985_v40, %v2984_v42  ;;  %v3050_v51 = vadd.f32 %v3049_v41, %v3048_v34  ;;  %v2987_v50 = vpop.f32.mrb[70].mxu1  ;;  %v3051_v43 = vpop.f32.mrb[70].mxu0 }
 0x184   : > { %v2988_v45 = vpop.f32.mrb[71].mxu1  ;;  %v3052_v61 = vpop.f32.mrb[71].mxu0 }
 0x185   : > { %v4208_v47 = vadd.f32 %v2986_v38, %v1796_v4  ;;  %v4211_v55 = vadd.f32 %v3050_v51, %v4108_v9  ;;  %v2989_v11 = vadd.f32 %v2988_v45, %v2987_v50  ;;  %v3053_v56 = vadd.f32 %v3052_v61, %v3051_v43 }
 0x186   : > { %v1807_v9 = vadd.f32 %v4005_v36, %v4024_v54  ;;  %v1812_v36 = vadd.f32 %v4011_v44, %v4024_v54 }
 0x187   : > { %v4213_v2 = vadd.f32 %v2989_v11, %v1799_v48  ;;  %v4216_v12 = vadd.f32 %v3053_v56, %v4110_v13 }
 0x189   : > { %v2990_v3 = vpop.f32.mrb[72].mxu1  ;;  %v3054_v6 = vpop.f32.mrb[72].mxu0 }
 0x18a   : > { %v2991_v16 = vpop.f32.mrb[73].mxu1  ;;  %v3055_v7 = vpop.f32.mrb[73].mxu0 }
 0x18b   : > { %v2992_v63 = vadd.f32 %v2991_v16, %v2990_v3  ;;  %v3056_v10 = vadd.f32 %v3055_v7, %v3054_v6  ;;  %v2993_v8 = vpop.f32.mrb[74].mxu1  ;;  %v3057_v37 = vpop.f32.mrb[74].mxu0 }
 0x18c   : > { %v2994_v17 = vpop.f32.mrb[75].mxu1  ;;  %v3058_v24 = vpop.f32.mrb[75].mxu0 }
 0x18d   : > { %v4222_v18 = vadd.f32 %v2992_v63, %v1804_v20  ;;  %v4225_v13 = vadd.f32 %v3056_v10, %v4118_v33  ;;  %v2995_v35 = vadd.f32 %v2994_v17, %v2993_v8  ;;  %v3059_v27 = vadd.f32 %v3058_v24, %v3057_v37 }
 0x18e   : > { %v1815_v33 = vadd.f32 %v4017_v52, %v4024_v54 }
 0x18f   : > { %v4227_v22 = vadd.f32 %v2995_v35, %v1807_v9  ;;  %v4230_v28 = vadd.f32 %v3059_v27, %v4122_v53 }
 0x191   : > { %v2996_v42 = vpop.f32.mrb[76].mxu1  ;;  %v3060_v34 = vpop.f32.mrb[76].mxu0 }
 0x192   : > { %v2997_v40 = vpop.f32.mrb[77].mxu1  ;;  %v3061_v41 = vpop.f32.mrb[77].mxu0 }
 0x193   : > { %v2998_v4 = vadd.f32 %v2997_v40, %v2996_v42  ;;  %v3062_v38 = vadd.f32 %v3061_v41, %v3060_v34  ;;  %v2999_v51 = vpop.f32.mrb[78].mxu1  ;;  %v3063_v50 = vpop.f32.mrb[78].mxu0 }
 0x194   : > { %v3000_v43 = vpop.f32.mrb[79].mxu1  ;;  %v3064_v48 = vpop.f32.mrb[79].mxu0 }
 0x195   : > { %v4236_v45 = vadd.f32 %v2998_v4, %v1812_v36  ;;  %v4239_v53 = vadd.f32 %v3062_v38, %v4130_v58  ;;  %v3001_v61 = vadd.f32 %v3000_v43, %v2999_v51  ;;  %v3065_v11 = vadd.f32 %v3064_v48, %v3063_v50 }
 0x197   : > { %v4241_v56 = vadd.f32 %v3001_v61, %v1815_v33  ;;  %v4244_v44 = vadd.f32 %v3065_v11, %v4134_v1 }
 0x199   : > { %v3066_v3 = vpop.f32.mrb[80].mxu0  ;;  %v3130_v6 = vpop.f32.mrb[80].mxu1 }
 0x19a   : > { %v3067_v16 = vpop.f32.mrb[81].mxu0  ;;  %v3131_v7 = vpop.f32.mrb[81].mxu1 }
 0x19b   : > { %v3068_v20 = vadd.f32 %v3067_v16, %v3066_v3  ;;  %v3132_v52 = vadd.f32 %v3131_v7, %v3130_v6  ;;  %v3069_v54 = vpop.f32.mrb[82].mxu0  ;;  %v3133_v63 = vpop.f32.mrb[82].mxu1 }
 0x19c   : > { %v3070_v10 = vpop.f32.mrb[83].mxu0  ;;  %v3134_v8 = vpop.f32.mrb[83].mxu1 }
 0x19d   : > { %v4247_v58 = vadd.f32 %v3068_v20, %v4139_v23  ;;  %v3071_v37 = vadd.f32 %v3070_v10, %v3069_v54  ;;  %v3135_v9 = vadd.f32 %v3134_v8, %v3133_v63  ;;  %v4250_v17 = vadd.f32 %v3132_v52, %v4142_v5 }
 0x19f   : > { %v4253_v1 = vadd.f32 %v3071_v37, %v4144_v39  ;;  %v4256_v24 = vadd.f32 %v3135_v9, %v4147_v32 }
 0x1a1   : > { %v3072_v35 = vpop.f32.mrb[84].mxu0  ;;  %v3136_v27 = vpop.f32.mrb[84].mxu1 }
 0x1a2   : > { %v3073_v42 = vpop.f32.mrb[85].mxu0  ;;  %v3137_v34 = vpop.f32.mrb[85].mxu1 }
 0x1a3   : > { %v3074_v40 = vadd.f32 %v3073_v42, %v3072_v35  ;;  %v3138_v41 = vadd.f32 %v3137_v34, %v3136_v27  ;;  %v3075_v36 = vpop.f32.mrb[86].mxu0  ;;  %v3139_v23 = vpop.f32.mrb[86].mxu1 }
 0x1a4   : > { %v3076_v4 = vpop.f32.mrb[87].mxu0  ;;  %v3140_v38 = vpop.f32.mrb[87].mxu1 }
 0x1a5   : > { %v4259_v51 = vadd.f32 %v3074_v40, %v4152_v0  ;;  %v3077_v5 = vadd.f32 %v3076_v4, %v3075_v36  ;;  %v3141_v50 = vadd.f32 %v3140_v38, %v3139_v23  ;;  %v4262_v39 = vadd.f32 %v3138_v41, %v4155_v62 }
 0x1a7   : > { %v4265_v32 = vadd.f32 %v3077_v5, %v4157_v59  ;;  %v4268_v33 = vadd.f32 %v3141_v50, %v4160_v15 }
 0x1a9   : > { %v3078_v43 = vpop.f32.mrb[88].mxu0  ;;  %v3142_v48 = vpop.f32.mrb[88].mxu1 }
 0x1aa   : > { %v3079_v61 = vpop.f32.mrb[89].mxu0  ;;  %v3143_v11 = vpop.f32.mrb[89].mxu1 }
 0x1ab   : > { %v3080_v3 = vadd.f32 %v3079_v61, %v3078_v43  ;;  %v3144_v6 = vadd.f32 %v3143_v11, %v3142_v48  ;;  %v3081_v16 = vpop.f32.mrb[90].mxu0  ;;  %v3145_v0 = vpop.f32.mrb[90].mxu1 }
 0x1ac   : > { %v3082_v7 = vpop.f32.mrb[91].mxu0  ;;  %v3146_v20 = vpop.f32.mrb[91].mxu1 }
 0x1ad   : > { %v4271_v52 = vadd.f32 %v3080_v3, %v4166_v26  ;;  %v3083_v62 = vadd.f32 %v3082_v7, %v3081_v16  ;;  %v3147_v54 = vadd.f32 %v3146_v20, %v3145_v0  ;;  %v4274_v59 = vadd.f32 %v3144_v6, %v4169_v14 }
 0x1af   : > { %v4277_v15 = vadd.f32 %v3083_v62, %v4171_v31  ;;  %v4280_v63 = vadd.f32 %v3147_v54, %v4174_v25 }
 0x1b1   : > { %v3084_v10 = vpop.f32.mrb[92].mxu0  ;;  %v3148_v8 = vpop.f32.mrb[92].mxu1 }
 0x1b2   : > { %v3085_v37 = vpop.f32.mrb[93].mxu0  ;;  %v3149_v9 = vpop.f32.mrb[93].mxu1 }
 0x1b3   : > { %v3086_v35 = vadd.f32 %v3085_v37, %v3084_v10  ;;  %v3150_v27 = vadd.f32 %v3149_v9, %v3148_v8  ;;  %v3087_v42 = vpop.f32.mrb[94].mxu0  ;;  %v3151_v26 = vpop.f32.mrb[94].mxu1 }
 0x1b4   : > { %v3088_v34 = vpop.f32.mrb[95].mxu0  ;;  %v3152_v40 = vpop.f32.mrb[95].mxu1 }
 0x1b5   : > { %v4283_v41 = vadd.f32 %v3086_v35, %v4180_v21  ;;  %v3089_v14 = vadd.f32 %v3088_v34, %v3087_v42  ;;  %v3153_v36 = vadd.f32 %v3152_v40, %v3151_v26  ;;  %v4286_v31 = vadd.f32 %v3150_v27, %v4183_v30 }
 0x1b7   : > { %v4289_v25 = vadd.f32 %v3089_v14, %v4185_v57  ;;  %v4292_v23 = vadd.f32 %v3153_v36, %v4188_v49 }
 0x1b9   : > { %v3090_v4 = vpop.f32.mrb[96].mxu0  ;;  %v3154_v38 = vpop.f32.mrb[96].mxu1 }
 0x1ba   : > { %v3091_v5 = vpop.f32.mrb[97].mxu0  ;;  %v3155_v50 = vpop.f32.mrb[97].mxu1 }
 0x1bb   : > { %v3092_v43 = vadd.f32 %v3091_v5, %v3090_v4  ;;  %v3156_v48 = vadd.f32 %v3155_v50, %v3154_v38  ;;  %v3093_v61 = vpop.f32.mrb[98].mxu0  ;;  %v3157_v21 = vpop.f32.mrb[98].mxu1 }
 0x1bc   : > { %v3094_v11 = vpop.f32.mrb[99].mxu0  ;;  %v3158_v3 = vpop.f32.mrb[99].mxu1 }
 0x1bd   : > { %v4295_v6 = vadd.f32 %v3092_v43, %v4194_v19  ;;  %v3095_v30 = vadd.f32 %v3094_v11, %v3093_v61  ;;  %v3159_v16 = vadd.f32 %v3158_v3, %v3157_v21  ;;  %v4298_v57 = vadd.f32 %v3156_v48, %v4197_v46 }
 0x1bf   : > { %v4301_v49 = vadd.f32 %v3095_v30, %v4199_v29  ;;  %v4304_v0 = vadd.f32 %v3159_v16, %v4202_v60 }
 0x1c1   : > { %v3096_v7 = vpop.f32.mrb[100].mxu0  ;;  %v3160_v20 = vpop.f32.mrb[100].mxu1 }
 0x1c2   : > { %v3097_v62 = vpop.f32.mrb[101].mxu0  ;;  %v3161_v54 = vpop.f32.mrb[101].mxu1 }
 0x1c3   : > { %v3098_v10 = vadd.f32 %v3097_v62, %v3096_v7  ;;  %v3162_v8 = vadd.f32 %v3161_v54, %v3160_v20  ;;  %v3099_v37 = vpop.f32.mrb[102].mxu0  ;;  %v3163_v19 = vpop.f32.mrb[102].mxu1 }
 0x1c4   : > { %v3100_v9 = vpop.f32.mrb[103].mxu0  ;;  %v3164_v35 = vpop.f32.mrb[103].mxu1 }
 0x1c5   : > { %v4307_v27 = vadd.f32 %v3098_v10, %v4208_v47  ;;  %v3101_v46 = vadd.f32 %v3100_v9, %v3099_v37  ;;  %v3165_v42 = vadd.f32 %v3164_v35, %v3163_v19  ;;  %v4310_v29 = vadd.f32 %v3162_v8, %v4211_v55 }
 0x1c7   : > { %v4313_v60 = vadd.f32 %v3101_v46, %v4213_v2  ;;  %v4316_v26 = vadd.f32 %v3165_v42, %v4216_v12 }
 0x1c9   : > { %v3102_v34 = vpop.f32.mrb[104].mxu0  ;;  %v3166_v40 = vpop.f32.mrb[104].mxu1 }
 0x1ca   : > { %v3103_v14 = vpop.f32.mrb[105].mxu0  ;;  %v3167_v36 = vpop.f32.mrb[105].mxu1 }
 0x1cb   : > { %v3104_v4 = vadd.f32 %v3103_v14, %v3102_v34  ;;  %v3168_v38 = vadd.f32 %v3167_v36, %v3166_v40  ;;  %v3105_v5 = vpop.f32.mrb[106].mxu0  ;;  %v3169_v47 = vpop.f32.mrb[106].mxu1 }
 0x1cc   : > { %v3106_v50 = vpop.f32.mrb[107].mxu0  ;;  %v3170_v43 = vpop.f32.mrb[107].mxu1 }
 0x1cd   : > { %v4319_v48 = vadd.f32 %v3104_v4, %v4222_v18  ;;  %v3107_v55 = vadd.f32 %v3106_v50, %v3105_v5  ;;  %v3171_v61 = vadd.f32 %v3170_v43, %v3169_v47  ;;  %v4322_v2 = vadd.f32 %v3168_v38, %v4225_v13 }
 0x1cf   : > { %v4325_v12 = vadd.f32 %v3107_v55, %v4227_v22  ;;  %v4328_v21 = vadd.f32 %v3171_v61, %v4230_v28 }
 0x1d1   : > { %v3108_v11 = vpop.f32.mrb[108].mxu0  ;;  %v3172_v3 = vpop.f32.mrb[108].mxu1 }
 0x1d2   : > { %v3109_v30 = vpop.f32.mrb[109].mxu0  ;;  %v3173_v16 = vpop.f32.mrb[109].mxu1 }
 0x1d3   : > { %v3110_v7 = vadd.f32 %v3109_v30, %v3108_v11  ;;  %v3174_v20 = vadd.f32 %v3173_v16, %v3172_v3  ;;  %v3111_v18 = vpop.f32.mrb[110].mxu0  ;;  %v3175_v62 = vpop.f32.mrb[110].mxu1 }
 0x1d4   : > { %v3112_v54 = vpop.f32.mrb[111].mxu0  ;;  %v3176_v10 = vpop.f32.mrb[111].mxu1 }
 0x1d5   : > { %v4331_v13 = vadd.f32 %v3110_v7, %v4236_v45  ;;  %v3113_v8 = vadd.f32 %v3112_v54, %v3111_v18  ;;  %v3177_v22 = vadd.f32 %v3176_v10, %v3175_v62  ;;  %v4334_v37 = vadd.f32 %v3174_v20, %v4239_v53 }
 0x1d7   : > { %v4338_v28 = vadd.f32 %v3113_v8, %v4241_v56  ;;  %v4341_v19 = vadd.f32 %v3177_v22, %v4244_v44 }
 0x1d9   : > { %v3178_v9 = vpop.f32.mrb[112].mxu1  ;;  %v3268_v45 = vpop.f32.mrb[112].mxu0 }
 0x1da   : > { %v2344_v53 = vadd.f32 %v3268_v45, %v4262_v39  ;;  %v3179_v35 = vpop.f32.mrb[113].mxu1  ;;  %v2335_v46 = vpop.f32.mrb[113].mxu0 }
 0x1db   : > { %v3180_v56 = vadd.f32 %v3179_v35, %v3178_v9  ;;  %v2336_v42 = vadd.f32 %v2335_v46, %v4250_v17  ;;  %v3181_v44 = vpop.f32.mrb[114].mxu1  ;;  %v3269_v34 = vpop.f32.mrb[114].mxu0 }
 0x1dc   : > { %2464 = vst [vmem:[%s4346_s22 + $0x10] sm:$0xff] %v2344_v53  ;;  %v2347_v40 = vadd.f32 %v3269_v34, %v4268_v33  ;;  %v3182_v14 = vpop.f32.mrb[115].mxu1  ;;  %v2338_v36 = vpop.f32.mrb[115].mxu0 }
 0x1dd   : > { %2462 = vst [vmem:[%s4346_s22] sm:$0xff] %v2336_v42  ;;  %v3183_v4 = vadd.f32 %v3182_v14, %v3181_v44  ;;  %v2339_v38 = vadd.f32 %v2338_v36, %v4256_v24  ;;  %v4355_v39 = vadd.f32 %v3180_v56, %v4247_v58 }
 0x1de   : > { %2465 = vst [vmem:[%s4346_s22 + $0x18] sm:$0xff] %v2347_v40 }
 0x1df   : > { %2463 = vst [vmem:[%s4346_s22 + $0x8] sm:$0xff] %v2339_v38  ;;  %v4360_v17 = vadd.f32 %v3183_v4, %v4253_v1 }
 0x1e1   : > { %v3184_v5 = vpop.f32.mrb[116].mxu1  ;;  %v3272_v47 = vpop.f32.mrb[116].mxu0 }
 0x1e2   : > { %v2360_v33 = vadd.f32 %v3272_v47, %v4286_v31  ;;  %v3185_v50 = vpop.f32.mrb[117].mxu1  ;;  %v2351_v43 = vpop.f32.mrb[117].mxu0 }
 0x1e3   : > { %v3186_v55 = vadd.f32 %v3185_v50, %v3184_v5  ;;  %v2352_v24 = vadd.f32 %v2351_v43, %v4274_v59  ;;  %v3187_v61 = vpop.f32.mrb[118].mxu1  ;;  %v3273_v58 = vpop.f32.mrb[118].mxu0 }
 0x1e4   : > { %2468 = vst [vmem:[%s4346_s22 + $0x30] sm:$0xff] %v2360_v33  ;;  %v2363_v11 = vadd.f32 %v3273_v58, %v4292_v23  ;;  %v3188_v3 = vpop.f32.mrb[119].mxu1  ;;  %v2354_v30 = vpop.f32.mrb[119].mxu0 }
 0x1e5   : > { %2466 = vst [vmem:[%s4346_s22 + $0x20] sm:$0xff] %v2352_v24  ;;  %v3189_v1 = vadd.f32 %v3188_v3, %v3187_v61  ;;  %v2355_v16 = vadd.f32 %v2354_v30, %v4280_v63  ;;  %v2247_v31 = vadd.f32 %v3186_v55, %v4259_v51 }
 0x1e6   : > { %2469 = vst [vmem:[%s4346_s22 + $0x38] sm:$0xff] %v2363_v11 }
 0x1e7   : > { %2467 = vst [vmem:[%s4346_s22 + $0x28] sm:$0xff] %v2355_v16  ;;  %v2250_v7 = vadd.f32 %v3189_v1, %v4265_v32 }
 0x1e9   : > { %v3190_v59 = vpop.f32.mrb[120].mxu1  ;;  %v3276_v20 = vpop.f32.mrb[120].mxu0 }
 0x1ea   : > { %v2376_v18 = vadd.f32 %v3276_v20, %v4310_v29  ;;  %v3191_v23 = vpop.f32.mrb[121].mxu1  ;;  %v2367_v62 = vpop.f32.mrb[121].mxu0 }
 0x1eb   : > { %v3192_v54 = vadd.f32 %v3191_v23, %v3190_v59  ;;  %v2368_v10 = vadd.f32 %v2367_v62, %v4298_v57  ;;  %v3193_v8 = vpop.f32.mrb[122].mxu1  ;;  %v3277_v63 = vpop.f32.mrb[122].mxu0 }
 0x1ec   : > { %2472 = vst [vmem:[%s4346_s22 + $0x50] sm:$0xff] %v2376_v18  ;;  %v2379_v51 = vadd.f32 %v3277_v63, %v4316_v26  ;;  %v3194_v22 = vpop.f32.mrb[123].mxu1  ;;  %v2370_v9 = vpop.f32.mrb[123].mxu0 }
 0x1ed   : > { %2470 = vst [vmem:[%s4346_s22 + $0x40] sm:$0xff] %v2368_v10  ;;  %v3195_v32 = vadd.f32 %v3194_v22, %v3193_v8  ;;  %v2371_v45 = vadd.f32 %v2370_v9, %v4304_v0  ;;  %v2255_v29 = vadd.f32 %v3192_v54, %v4271_v52 }
 0x1ee   : > { %2473 = vst [vmem:[%s4346_s22 + $0x58] sm:$0xff] %v2379_v51 }
 0x1ef   : > { %2471 = vst [vmem:[%s4346_s22 + $0x48] sm:$0xff] %v2371_v45  ;;  %v2258_v53 = vadd.f32 %v3195_v32, %v4277_v15 }
 0x1f1   : > { %v3196_v57 = vpop.f32.mrb[124].mxu1  ;;  %v3280_v35 = vpop.f32.mrb[124].mxu0 }
 0x1f2   : > { %v2392_v46 = vadd.f32 %v3280_v35, %v4334_v37  ;;  %v3197_v26 = vpop.f32.mrb[125].mxu1  ;;  %v2383_v56 = vpop.f32.mrb[125].mxu0 }
 0x1f3   : > { %v3198_v42 = vadd.f32 %v3197_v26, %v3196_v57  ;;  %v2384_v44 = vadd.f32 %v2383_v56, %v4322_v2  ;;  %v3199_v34 = vpop.f32.mrb[126].mxu1  ;;  %v3281_v0 = vpop.f32.mrb[126].mxu0 }
 0x1f4   : > { %2476 = vst [vmem:[%s4346_s22 + $0x70] sm:$0xff] %v2392_v46  ;;  %v2395_v52 = vadd.f32 %v3281_v0, %v4341_v19  ;;  %v3200_v40 = vpop.f32.mrb[127].mxu1  ;;  %v2386_v14 = vpop.f32.mrb[127].mxu0 }
 0x1f5   : > { %2474 = vst [vmem:[%s4346_s22 + $0x60] sm:$0xff] %v2384_v44  ;;  %v3201_v15 = vadd.f32 %v3200_v40, %v3199_v34  ;;  %v2387_v36 = vadd.f32 %v2386_v14, %v4328_v21  ;;  %v2263_v37 = vadd.f32 %v3198_v42, %v4283_v41 }
 0x1f6   : > { %2477 = vst [vmem:[%s4346_s22 + $0x78] sm:$0xff] %v2395_v52 }
 0x1f7   : > { %2475 = vst [vmem:[%s4346_s22 + $0x68] sm:$0xff] %v2387_v36  ;;  %v2266_v4 = vadd.f32 %v3201_v15, %v4289_v25 }
 0x1f9   : > { %v3202_v2 = vpop.f32.mrb[128].mxu1  ;;  %v3284_v38 = vpop.f32.mrb[128].mxu0 }
 0x1fa   : > { %v2408_v5 = vadd.f32 %v3284_v38, %v2247_v31  ;;  %v3203_v19 = vpop.f32.mrb[129].mxu1  ;;  %v2399_v47 = vpop.f32.mrb[129].mxu0 }
 0x1fb   : > { %v3204_v33 = vadd.f32 %v3203_v19, %v3202_v2  ;;  %v2400_v50 = vadd.f32 %v2399_v47, %v4355_v39  ;;  %v3205_v43 = vpop.f32.mrb[130].mxu1  ;;  %v3285_v55 = vpop.f32.mrb[130].mxu0 }
 0x1fc   : > { %2480 = vst [vmem:[%s4346_s22 + $0x90] sm:$0xff] %v2408_v5  ;;  %v2411_v21 = vadd.f32 %v3285_v55, %v2250_v7  ;;  %v3206_v41 = vpop.f32.mrb[131].mxu1  ;;  %v2402_v24 = vpop.f32.mrb[131].mxu0 }
 0x1fd   : > { %2478 = vst [vmem:[%s4346_s22 + $0x80] sm:$0xff] %v2400_v50  ;;  %v3207_v61 = vadd.f32 %v3206_v41, %v3205_v43  ;;  %v2403_v25 = vadd.f32 %v2402_v24, %v4360_v17  ;;  %v2271_v58 = vadd.f32 %v3204_v33, %v4295_v6 }
 0x1fe   : > { %2481 = vst [vmem:[%s4346_s22 + $0x98] sm:$0xff] %v2411_v21 }
 0x1ff   : > { %2479 = vst [vmem:[%s4346_s22 + $0x88] sm:$0xff] %v2403_v25  ;;  %v2274_v11 = vadd.f32 %v3207_v61, %v4301_v49 }
 0x201   : > { %v3208_v3 = vpop.f32.mrb[132].mxu1  ;;  %v3288_v39 = vpop.f32.mrb[132].mxu0 }
 0x202   : > { %v2424_v30 = vadd.f32 %v3288_v39, %v2263_v37  ;;  %v3209_v1 = vpop.f32.mrb[133].mxu1  ;;  %v2415_v16 = vpop.f32.mrb[133].mxu0 }
 0x203   : > { %v3210_v31 = vadd.f32 %v3209_v1, %v3208_v3  ;;  %v2416_v7 = vadd.f32 %v2415_v16, %v2255_v29  ;;  %v3211_v59 = vpop.f32.mrb[134].mxu1  ;;  %v3289_v20 = vpop.f32.mrb[134].mxu0 }
 0x204   : > { %2484 = vst [vmem:[%s4346_s22 + $0xb0] sm:$0xff] %v2424_v30  ;;  %v2427_v17 = vadd.f32 %v3289_v20, %v2266_v4  ;;  %v3212_v18 = vpop.f32.mrb[135].mxu1  ;;  %v2418_v6 = vpop.f32.mrb[135].mxu0 }
 0x205   : > { %2482 = vst [vmem:[%s4346_s22 + $0xa0] sm:$0xff] %v2416_v7  ;;  %v3213_v23 = vadd.f32 %v3212_v18, %v3211_v59  ;;  %v2419_v62 = vadd.f32 %v2418_v6, %v2258_v53  ;;  %v2279_v49 = vadd.f32 %v3210_v31, %v4307_v27 }
 0x206   : > { %2485 = vst [vmem:[%s4346_s22 + $0xb8] sm:$0xff] %v2427_v17 }
 0x207   : > { %2483 = vst [vmem:[%s4346_s22 + $0xa8] sm:$0xff] %v2419_v62  ;;  %v2282_v54 = vadd.f32 %v3213_v23, %v4313_v60 }
 0x209   : > { %v3214_v10 = vpop.f32.mrb[136].mxu1  ;;  %v3292_v8 = vpop.f32.mrb[136].mxu0 }
 0x20a   : > { %v2440_v63 = vadd.f32 %v3292_v8, %v2279_v49  ;;  %v3215_v51 = vpop.f32.mrb[137].mxu1  ;;  %v2431_v22 = vpop.f32.mrb[137].mxu0 }
 0x20b   : > { %v3216_v9 = vadd.f32 %v3215_v51, %v3214_v10  ;;  %v2432_v32 = vadd.f32 %v2431_v22, %v2271_v58  ;;  %v3217_v45 = vpop.f32.mrb[138].mxu1  ;;  %v3293_v29 = vpop.f32.mrb[138].mxu0 }
 0x20c   : > { %2488 = vst [vmem:[%s4346_s22 + $0xd0] sm:$0xff] %v2440_v63  ;;  %v2443_v53 = vadd.f32 %v3293_v29, %v2282_v54  ;;  %v3218_v57 = vpop.f32.mrb[139].mxu1  ;;  %v2434_v27 = vpop.f32.mrb[139].mxu0 }
 0x20d   : > { %2486 = vst [vmem:[%s4346_s22 + $0xc0] sm:$0xff] %v2432_v32  ;;  %v3219_v35 = vadd.f32 %v3218_v57, %v3217_v45  ;;  %v2435_v46 = vadd.f32 %v2434_v27, %v2274_v11  ;;  %v2287_v60 = vadd.f32 %v3216_v9, %v4319_v48 }
 0x20e   : > { %2489 = vst [vmem:[%s4346_s22 + $0xd8] sm:$0xff] %v2443_v53 }
 0x20f   : > { %2487 = vst [vmem:[%s4346_s22 + $0xc8] sm:$0xff] %v2435_v46  ;;  %v2290_v26 = vadd.f32 %v3219_v35, %v4325_v12 }
 0x211   : > { %v3220_v56 = vpop.f32.mrb[140].mxu1  ;;  %v3296_v42 = vpop.f32.mrb[140].mxu0 }
 0x212   : > { %v3221_v44 = vpop.f32.mrb[141].mxu1  ;;  %v2447_v34 = vpop.f32.mrb[141].mxu0 }
 0x213   : > { %v3222_v0 = vadd.f32 %v3221_v44, %v3220_v56  ;;  %v2448_v52 = vadd.f32 %v2447_v34, %v2287_v60  ;;  %v3223_v40 = vpop.f32.mrb[142].mxu1  ;;  %v3297_v14 = vpop.f32.mrb[142].mxu0 }
 0x214   : > { %v3224_v15 = vpop.f32.mrb[143].mxu1  ;;  %v2450_v36 = vpop.f32.mrb[143].mxu0 }
 0x215   : > { %v2295_v37 = vadd.f32 %v3222_v0, %v4331_v13  ;;  %2490 = vst [vmem:[%s4346_s22 + $0xe0] sm:$0xff] %v2448_v52  ;;  %v3225_v48 = vadd.f32 %v3224_v15, %v3223_v40  ;;  %v2451_v4 = vadd.f32 %v2450_v36, %v2290_v26 }
 0x217   : > { %v2456_v2 = vadd.f32 %v3296_v42, %v2295_v37  ;;  %v2298_v12 = vadd.f32 %v3225_v48, %v4338_v28  ;;  %2491 = vst [vmem:[%s4346_s22 + $0xe8] sm:$0xff] %v2451_v4 }
 0x219   : > { %2492 = vst [vmem:[%s4346_s22 + $0xf0] sm:$0xff] %v2456_v2  ;;  %v2459_v38 = vadd.f32 %v3297_v14, %v2298_v12 }
 0x21b   : > { %2493 = vst [vmem:[%s4346_s22 + $0xf8] sm:$0xff] %v2459_v38 }
 0x21c PF: > { %s13_s12 = sadd.s32 1, %s3609_s12  }
 0x21d   : > { %p10_p4 = scmp.ge.s32.totalorder %s13_s12, 4  }
 0x21f   :  { %12 = sbr.rel (!%p10_p4) target bundleno = 1 (0x1), region = 62 }

// kernel: sepconvgru2_forward.17
= control target key start
LH: loop header
LB: loop body
LE: loop exit
PB: predicated region body
PF: predicated region fallthrough
CT: control target
= control target key end

     0   :  { %s2183_s21 = smov 0   ;;  %s3081_s0 = inlined_call_operand.vmem [shape: f32[2,256,128], index: 0, kind: input, shape index: {}]   ;;  %s3082_s1 = inlined_call_operand.vmem [shape: f32[1,128], index: 1, kind: input, shape index: {}]   ;;  %s3083_s2 = inlined_call_operand.vmem [shape: f32[1,128], index: 2, kind: input, shape index: {}]   ;;  %s3084_s3 = inlined_call_operand.vmem [shape: f32[128,16], index: 3, kind: input, shape index: {}]   ;;  %s3085_s4 = inlined_call_operand.vmem [shape: f32[16,128], index: 4, kind: input, shape index: {}]   ;;  %s3086_s5 = inlined_call_operand.vmem [shape: f32[4,64,256], index: 5, kind: input, shape index: {}]   ;;  %s3087_s6 = inlined_call_operand.vmem [shape: bf16[2,64,128], index: 6, kind: output, shape index: {}]  }
   0x1 LB: > { %s1490_s22 = sadd.s32 4294967295, %s2143_s21   ;;  %p1494_p0 = scmp.ge.s32.totalorder %s2143_s21, 1  ;;  %s2143_s21 = sphi %s2183_s21, %s16_s21  }
   0x2   : > { %p212_p1 = scmp.lt.s32.totalorder %s2143_s21, 3 }
   0x4   : > { %p213_p2 = pnand %p1494_p0, %p212_p1 }
   0x5   : > { %v284_v0 = vld [vmem:[%s3084_s3] sm:$0xff] (!%p213_p2)  ;;  %v285_v1 = vld [vmem:[%s3084_s3 + $0x8] sm:$0xff] (!%p213_p2)  ;;  %v286_v2 = vld [vmem:[%s3084_s3 + $0x10] sm:$0xff] (!%p213_p2)  ;;  %v2145_v3 = vmov (!%p213_p2), 0.0|0.0   ;;  %p242_p3 = scmp.lt.s32.totalorder (!%p213_p2), %s1490_s22, 1  ;;  %vm2146_vm0 = vmmov (!%p213_p2), 0  }
   0x6   : > { %216 = sbr.rel (%p213_p2) target bundleno = 869 (0x365), region = 44  ;;  %1942 = vmatprep.subr.bf16.mxu0 (!%p213_p2), %v2145_v3  ;;  %v1943_v4 = vpack.c.bf16 (!%p213_p2), %v285_v1, %v284_v0  ;;  %1966 = vmatprep.subr.bf16.mxu1 (!%p213_p2), %v2145_v3  ;;  %v287_v5 = vld [vmem:[%s3084_s3 + $0x18] sm:$0xff] (!%p213_p2)  ;;  %v2147_v6 = vmov (!%p213_p2), 0.0   ;;  %v288_v8 = vld [vmem:[%s3084_s3 + $0x20] sm:$0xff] (!%p213_p2)  ;;  %v289_v9 = vld [vmem:[%s3084_s3 + $0x28] sm:$0xff] (!%p213_p2)  ;;  %vm554_vm1 = vcmask (!%p213_p2), 130048  }
   0x7   : > { %1890 = vmatprep.mubr.msk.f32.mxu0 (!%p213_p2), %vm2146_vm0, %v2147_v6  ;;  %1925 = vmatprep.mubr.msk.f32.mxu1 (!%p213_p2), %vm2146_vm0, %v2147_v6  ;;  %v1946_v7 = vpack.c.bf16 (!%p213_p2), %v287_v5, %v286_v2  ;;  %v1949_v10 = vpack.c.bf16 (!%p213_p2), %v289_v9, %v288_v8  ;;  %v290_v14 = vld [vmem:[%s3084_s3 + $0x30] sm:$0xff] (!%p213_p2)  ;;  %v291_v15 = vld [vmem:[%s3084_s3 + $0x38] sm:$0xff] (!%p213_p2)  ;;  %v292_v21 = vld [vmem:[%s3084_s3 + $0x40] sm:$0xff] (!%p213_p2) }
   0x8   : > { %1944 = vmatpush3.bf16.msra.mxu0 (!%p213_p2), %v1943_v4  ;;  %1968 = vmatpush3.bf16.msra.mxu1 (!%p213_p2), %v1943_v4  ;;  %v1952_v19 = vpack.c.bf16 (!%p213_p2), %v291_v15, %v290_v14  ;;  %v293_v22 = vld [vmem:[%s3084_s3 + $0x48] sm:$0xff] (!%p213_p2)  ;;  %v294_v30 = vld [vmem:[%s3084_s3 + $0x50] sm:$0xff] (!%p213_p2)  ;;  %v295_v31 = vld [vmem:[%s3084_s3 + $0x58] sm:$0xff] (!%p213_p2) }
   0x9   : > { %1945 = vmatprep.subr.bf16.mxu0 (!%p213_p2), %v2145_v3  ;;  %1969 = vmatprep.subr.bf16.mxu1 (!%p213_p2), %v2145_v3  ;;  %v1955_v28 = vpack.c.bf16 (!%p213_p2), %v293_v22, %v292_v21  ;;  %v1958_v38 = vpack.c.bf16 (!%p213_p2), %v295_v31, %v294_v30  ;;  %v296_v40 = vld [vmem:[%s3084_s3 + $0x60] sm:$0xff] (!%p213_p2)  ;;  %v297_v41 = vld [vmem:[%s3084_s3 + $0x68] sm:$0xff] (!%p213_p2)  ;;  %v298_v51 = vld [vmem:[%s3084_s3 + $0x70] sm:$0xff] (!%p213_p2) }
   0xa   : > { %v1961_v49 = vpack.c.bf16 (!%p213_p2), %v297_v41, %v296_v40  ;;  %v299_v52 = vld [vmem:[%s3084_s3 + $0x78] sm:$0xff] (!%p213_p2) }
   0xb   : > { %v1964_v60 = vpack.c.bf16 (!%p213_p2), %v299_v52, %v298_v51 }
   0xc   : > { %1947 = vmatpush3.bf16.msra.mxu0 (!%p213_p2), %v1946_v7  ;;  %1971 = vmatpush3.bf16.msra.mxu1 (!%p213_p2), %v1946_v7 }
   0xd   : > { %s3098_s22 = smov (!%p242_p3, %s1490_s22), 1  ;;  %1948 = vmatprep.subr.bf16.mxu0 %v2145_v3  ;;  %1972 = vmatprep.subr.bf16.mxu1 %v2145_v3 }
   0xe   : > { %s1561_s11 = sshll.u32 %s3098_s22, 8  ;;  %s1562_s17 = sshll.u32 %s3098_s22, 5 }
   0xf   : > { %s2223_s14 = scalar_lea.vmem %s3081_s0, %s1561_s11  ;;  %s3054_s20 = scalar_lea.vmem %s3087_s6, %s1562_s17 }
  0x10   : > { %v2226_v11 = vld [vmem:[%s2223_s14] sm:$0xff]  ;;  %v2229_v12 = vld [vmem:[%s2223_s14 + $0x8] sm:$0xff]  ;;  %v2232_v13 = vld [vmem:[%s2223_s14 + $0x10] sm:$0xff]  ;;  %1950 = vmatpush3.bf16.msra.mxu0 %v1949_v10  ;;  %1974 = vmatpush3.bf16.msra.mxu1 %v1949_v10 }
  0x11   : > { %v302_v16 = vadd.f32 %v2229_v12, %v2226_v11  ;;  %v2245_v17 = vld [vmem:[%s2223_s14 + $0x18] sm:$0xff]  ;;  %v2249_v20 = vld [vmem:[%s2223_s14 + $0x20] sm:$0xff]  ;;  %1951 = vmatprep.subr.bf16.mxu0 %v2145_v3  ;;  %1975 = vmatprep.subr.bf16.mxu1 %v2145_v3  ;;  %v2261_v24 = vld [vmem:[%s2223_s14 + $0x28] sm:$0xff]  ;;  %v339_v26 = vmul.f32 %v2226_v11, %v2226_v11  ;;  %v340_v27 = vmul.f32 %v2229_v12, %v2229_v12 }
  0x12   : > { %v2269_v29 = vld [vmem:[%s2223_s14 + $0x30] sm:$0xff]  ;;  %v341_v33 = vmul.f32 %v2232_v13, %v2232_v13  ;;  %v2283_v34 = vld [vmem:[%s2223_s14 + $0x38] sm:$0xff]  ;;  %v342_v36 = vmul.f32 %v2245_v17, %v2245_v17  ;;  %v2289_v39 = vld [vmem:[%s2223_s14 + $0x40] sm:$0xff]  ;;  %v343_v43 = vmul.f32 %v2249_v20, %v2249_v20  ;;  %v344_v47 = vmul.f32 %v2261_v24, %v2261_v24 }
  0x13   : > { %v303_v18 = vadd.f32 %v302_v16, %v2232_v13  ;;  %v371_v37 = vadd.f32 %v340_v27, %v339_v26  ;;  %v2303_v45 = vld [vmem:[%s2223_s14 + $0x48] sm:$0xff]  ;;  %v2309_v50 = vld [vmem:[%s2223_s14 + $0x50] sm:$0xff]  ;;  %v345_v54 = vmul.f32 %v2269_v29, %v2269_v29  ;;  %v2323_v56 = vld [vmem:[%s2223_s14 + $0x58] sm:$0xff]  ;;  %v346_v58 = vmul.f32 %v2283_v34, %v2283_v34 }
  0x14   : > { %1953 = vmatpush3.bf16.msra.mxu0 %v1952_v19  ;;  %1977 = vmatpush3.bf16.msra.mxu1 %v1952_v19  ;;  %v2329_v61 = vld [vmem:[%s2223_s14 + $0x60] sm:$0xff]  ;;  %v347_v63 = vmul.f32 %v2289_v39, %v2289_v39  ;;  %v2337_v1 = vld [vmem:[%s2223_s14 + $0x68] sm:$0xff]  ;;  %v348_v4 = vmul.f32 %v2303_v45, %v2303_v45  ;;  %v2343_v7 = vld [vmem:[%s2223_s14 + $0x70] sm:$0xff]  ;;  %v349_v9 = vmul.f32 %v2309_v50, %v2309_v50 }
  0x15   : > { %v304_v23 = vadd.f32 %v303_v18, %v2245_v17  ;;  %1954 = vmatprep.subr.bf16.mxu0 %v2145_v3  ;;  %1978 = vmatprep.subr.bf16.mxu1 %v2145_v3  ;;  %v372_v44 = vadd.f32 %v371_v37, %v341_v33  ;;  %v2351_v14 = vld [vmem:[%s2223_s14 + $0x78] sm:$0xff]  ;;  %v350_v16 = vmul.f32 %v2323_v56, %v2323_v56  ;;  %v2357_v19 = vld [vmem:[%s2223_s14 + $0x80] sm:$0xff] }
  0x16   : > { %v351_v22 = vmul.f32 %v2329_v61, %v2329_v61  ;;  %v352_v26 = vmul.f32 %v2337_v1, %v2337_v1  ;;  %v353_v31 = vmul.f32 %v2343_v7, %v2343_v7  ;;  %v2375_v33 = vld [vmem:[%s2223_s14 + $0x98] sm:$0xff]  ;;  %v355_v41 = vmul.f32 %v2357_v19, %v2357_v19 }
  0x17   : > { %v305_v25 = vadd.f32 %v304_v23, %v2249_v20  ;;  %v373_v48 = vadd.f32 %v372_v44, %v342_v36  ;;  %v354_v36 = vmul.f32 %v2351_v14, %v2351_v14 }
  0x18   : > { %1956 = vmatpush3.bf16.msra.mxu0 %v1955_v28  ;;  %1980 = vmatpush3.bf16.msra.mxu1 %v1955_v28  ;;  %v2369_v28 = vld [vmem:[%s2223_s14 + $0x90] sm:$0xff] }
  0x19   : > { %v306_v32 = vadd.f32 %v305_v25, %v2261_v24  ;;  %1957 = vmatprep.subr.bf16.mxu0 %v2145_v3  ;;  %1981 = vmatprep.subr.bf16.mxu1 %v2145_v3  ;;  %v374_v55 = vadd.f32 %v373_v48, %v343_v43  ;;  %v2363_v25 = vld [vmem:[%s2223_s14 + $0x88] sm:$0xff]  ;;  %v2393_v48 = vld [vmem:[%s2223_s14 + $0xb0] sm:$0xff]  ;;  %v357_v51 = vmul.f32 %v2369_v28, %v2369_v28 }
  0x1a   : > { %v2387_v43 = vld [vmem:[%s2223_s14 + $0xa8] sm:$0xff] }
  0x1b   : > { %v307_v35 = vadd.f32 %v306_v32, %v2269_v29  ;;  %v375_v59 = vadd.f32 %v374_v55, %v344_v47  ;;  %v358_v55 = vmul.f32 %v2375_v33, %v2375_v33 }
  0x1c   : > { %1959 = vmatpush3.bf16.msra.mxu0 %v1958_v38  ;;  %1983 = vmatpush3.bf16.msra.mxu1 %v1958_v38  ;;  %v2381_v38 = vld [vmem:[%s2223_s14 + $0xa0] sm:$0xff] }
  0x1d   : > { %v308_v42 = vadd.f32 %v307_v35, %v2283_v34  ;;  %1960 = vmatprep.subr.bf16.mxu0 %v2145_v3  ;;  %1984 = vmatprep.subr.bf16.mxu1 %v2145_v3  ;;  %v376_v0 = vadd.f32 %v375_v59, %v345_v54 }
  0x1f   : > { %v309_v46 = vadd.f32 %v308_v42, %v2289_v39  ;;  %v377_v5 = vadd.f32 %v376_v0, %v346_v58  ;;  %v2405_v58 = vld [vmem:[%s2223_s14 + $0xc0] sm:$0xff] }
  0x20   : > { %1962 = vmatpush3.bf16.msra.mxu0 %v1961_v49  ;;  %1986 = vmatpush3.bf16.msra.mxu1 %v1961_v49 }
  0x21   : > { %v310_v53 = vadd.f32 %v309_v46, %v2303_v45  ;;  %1963 = vmatprep.subr.bf16.mxu0 %v2145_v3  ;;  %1987 = vmatprep.subr.bf16.mxu1 %v2145_v3  ;;  %v378_v10 = vadd.f32 %v377_v5, %v347_v63  ;;  %v356_v46 = vmul.f32 %v2363_v25, %v2363_v25  ;;  %v2411_v63 = vld [vmem:[%s2223_s14 + $0xc8] sm:$0xff]  ;;  %v2417_v5 = vld [vmem:[%s2223_s14 + $0xd0] sm:$0xff] }
  0x23   : > { %v311_v57 = vadd.f32 %v310_v53, %v2309_v50  ;;  %v379_v18 = vadd.f32 %v378_v10, %v348_v4  ;;  %v2399_v53 = vld [vmem:[%s2223_s14 + $0xb8] sm:$0xff] }
  0x24   : > { %1965 = vmatpush3.bf16.msra.mxu0 %v1964_v60  ;;  %1989 = vmatpush3.bf16.msra.mxu1 %v1964_v60  ;;  %v359_v60 = vmul.f32 %v2381_v38, %v2381_v38 }
  0x25   : > { %v312_v62 = vadd.f32 %v311_v57, %v2323_v56  ;;  %1990 = vmatprep.subr.bf16.mxu0 %v2145_v3  ;;  %1993 = vmatprep.subr.bf16.mxu1 %v2145_v3  ;;  %v380_v23 = vadd.f32 %v379_v18, %v349_v9  ;;  %v361_v9 = vmul.f32 %v2393_v48, %v2393_v48 }
  0x26   : > { %v362_v18 = vmul.f32 %v2399_v53, %v2399_v53 }
  0x27   : > { %v313_v2 = vadd.f32 %v312_v62, %v2329_v61  ;;  %v381_v27 = vadd.f32 %v380_v23, %v350_v16 }
  0x29   : > { %v314_v8 = vadd.f32 %v313_v2, %v2337_v1  ;;  %v382_v32 = vadd.f32 %v381_v27, %v351_v22  ;;  %v360_v2 = vmul.f32 %v2387_v43, %v2387_v43  ;;  %v2429_v22 = vld [vmem:[%s2223_s14 + $0xe0] sm:$0xff]  ;;  %v2435_v27 = vld [vmem:[%s2223_s14 + $0xe8] sm:$0xff] }
  0x2b   : > { %v315_v15 = vadd.f32 %v314_v8, %v2343_v7  ;;  %v383_v37 = vadd.f32 %v382_v32, %v352_v26 }
  0x2d   : > { %v316_v21 = vadd.f32 %v315_v15, %v2351_v14  ;;  %v384_v42 = vadd.f32 %v383_v37, %v353_v31  ;;  %v2423_v15 = vld [vmem:[%s2223_s14 + $0xd8] sm:$0xff]  ;;  %v364_v31 = vmul.f32 %v2411_v63, %v2411_v63  ;;  %v365_v37 = vmul.f32 %v2417_v5, %v2417_v5 }
  0x2f   : > { %v317_v3 = vadd.f32 %v316_v21, %v2357_v19  ;;  %v385_v47 = vadd.f32 %v384_v42, %v354_v36 }
  0x31   : > { %v318_v30 = vadd.f32 %v317_v3, %v2363_v25  ;;  %v386_v52 = vadd.f32 %v385_v47, %v355_v41  ;;  %v363_v3 = vmul.f32 %v2405_v58, %v2405_v58  ;;  %v2447_v41 = vld [vmem:[%s2223_s14 + $0xf8] sm:$0xff] }
  0x33   : > { %v319_v35 = vadd.f32 %v318_v30, %v2369_v28  ;;  %v387_v57 = vadd.f32 %v386_v52, %v356_v46 }
  0x35   : > { %v320_v40 = vadd.f32 %v319_v35, %v2375_v33  ;;  %v388_v62 = vadd.f32 %v387_v57, %v357_v51  ;;  %v2441_v35 = vld [vmem:[%s2223_s14 + $0xf0] sm:$0xff] }
  0x37   : > { %v321_v44 = vadd.f32 %v320_v40, %v2381_v38  ;;  %v389_v4 = vadd.f32 %v388_v62, %v358_v55 }
  0x39   : > { %v322_v49 = vadd.f32 %v321_v44, %v2387_v43  ;;  %v390_v10 = vadd.f32 %v389_v4, %v359_v60  ;;  %v366_v44 = vmul.f32 %v2423_v15, %v2423_v15 }
  0x3b   : > { %v323_v54 = vadd.f32 %v322_v49, %v2393_v48  ;;  %v391_v21 = vadd.f32 %v390_v10, %v360_v2  ;;  %v367_v49 = vmul.f32 %v2429_v22, %v2429_v22 }
  0x3d   : > { %v324_v59 = vadd.f32 %v323_v54, %v2399_v53  ;;  %v392_v26 = vadd.f32 %v391_v21, %v361_v9  ;;  %v368_v54 = vmul.f32 %v2435_v27, %v2435_v27 }
  0x3f   : > { %v325_v0 = vadd.f32 %v324_v59, %v2405_v58  ;;  %v393_v32 = vadd.f32 %v392_v26, %v362_v18  ;;  %v369_v59 = vmul.f32 %v2441_v35, %v2441_v35 }
  0x41   : > { %v326_v8 = vadd.f32 %v325_v0, %v2411_v63  ;;  %v394_v40 = vadd.f32 %v393_v32, %v363_v3  ;;  %v370_v0 = vmul.f32 %v2447_v41, %v2447_v41  ;;  %v301_v32 = vld [vmem:[%s3085_s4 + $0x8] sm:$0xff] }
  0x43   : > { %v327_v16 = vadd.f32 %v326_v8, %v2417_v5  ;;  %v395_v46 = vadd.f32 %v394_v40, %v364_v31  ;;  %v300_v31 = vld [vmem:[%s3085_s4] sm:$0xff] }
  0x45   : > { %v328_v23 = vadd.f32 %v327_v16, %v2423_v15  ;;  %v396_v51 = vadd.f32 %v395_v46, %v365_v37 }
  0x47   : > { %v329_v30 = vadd.f32 %v328_v23, %v2429_v22  ;;  %v397_v55 = vadd.f32 %v396_v51, %v366_v44 }
  0x49   : > { %v330_v36 = vadd.f32 %v329_v30, %v2435_v27  ;;  %v398_v60 = vadd.f32 %v397_v55, %v367_v49 }
  0x4b   : > { %v331_v42 = vadd.f32 %v330_v36, %v2441_v35  ;;  %v399_v2 = vadd.f32 %v398_v60, %v368_v54  ;;  %v1991_v36 = vpack.c.bf16 %v301_v32, %v300_v31  ;;  %v1504_v54 = vld [vmem:[%s3086_s5 + $0x88] sm:$0xff] }
  0x4d   : > { %v332_v47 = vadd.f32 %v331_v42, %v2447_v41  ;;  %v400_v8 = vadd.f32 %v399_v2, %v369_v59  ;;  %v702_v59 = vlaneseq }
  0x4f   : > { %v333_v52 = vrot.slane %v332_v47, 4  ;;  %v401_v10 = vadd.f32 %v400_v8, %v370_v0  ;;  %v703_v60 = vshrl.u32 %v702_v59, 7 }
  0x51   : > { %v334_v57 = vadd.f32 %v333_v52, %v332_v47  ;;  %v402_v18 = vrot.slane %v401_v10, 4  ;;  %v885_v52 = vld [vmem:[%s3086_s5 + $0x8] sm:$0xff] }
  0x53   : > { %v335_v62 = vrot.slane %v334_v57, 2  ;;  %v403_v21 = vadd.f32 %v402_v18, %v401_v10 }
  0x55   : > { %v336_v4 = vadd.f32 %v335_v62, %v334_v57  ;;  %v404_v23 = vrot.slane %v403_v21, 2  ;;  %v704_v62 = vsub.s32 0, %v703_v60 }
  0x57   : > { %v337_v9 = vrot.slane %v336_v4, 1  ;;  %v405_v3 = vadd.f32 %v404_v23, %v403_v21 }
  0x59   : > { %v338_v16 = vadd.f32 %v337_v9, %v336_v4  ;;  %v406_v26 = vrot.slane %v405_v3, 1 }
  0x5b   : > { %1891 = vmatmul.mubr.f32.vlgmr.msra.gmra.mrb[0].mxu0 %v338_v16  ;;  %v407_v30 = vadd.f32 %v406_v26, %v405_v3 }
  0x5c   : > { %1932 = vmatprep.mubr.msk.f32.mxu0 %vm2146_vm0, %v2147_v6  ;;  %1992 = vmatpush3.bf16.msra.mxu0 %v1991_v36 }
  0x5d   : > { %1926 = vmatmul.mubr.f32.vlgmr.msra.gmra.mrb[0].mxu1 %v407_v30 }
  0x5e   : > { %1939 = vmatprep.mubr.msk.f32.mxu1 %vm2146_vm0, %v2147_v6  ;;  %1995 = vmatpush3.bf16.msra.mxu1 %v1991_v36 }
 0x12e   : > { %v474_v37 = vpop.f32.mrb[0].mxu0 }
 0x12f   : > { %v549_v40 = vmul.f32 0.00048828125, %v474_v37  ;;  %v1892_v42 = vpop.f32.mrb[1].mxu0 }
 0x130   : > { %v544_v46 = vpop.f32.mrb[0].mxu1 }
 0x131   : > { %1933 = vmatmul.mubr.msk.f32.vlgmr.msra.gmra.mrb[2].mxu0 %vm554_vm1, %v549_v40  ;;  %v551_v44 = vmul.f32 %v549_v40, %v549_v40  ;;  %v550_v47 = vmul.f32 0.00048828125, %v544_v46  ;;  %v1927_v6 = vpop.f32.mrb[1].mxu1 }
 0x132   : > { %964 = vmatprep.mubr.f32.mxu0 %v885_v52 }
 0x133   : > { %v552_v49 = vsub.f32 %v550_v47, %v551_v44 }
 0x135   : > { %v553_v51 = vmax.f32 %v552_v49, 0.0 }
 0x137   : > { %1940 = vmatmul.mubr.msk.f32.vlgmr.msra.gmra.mrb[2].mxu1 %vm554_vm1, %v553_v51  ;;  %v2540_v51 = vld [vmem:[%s3082_s1] ss:$0 sm:$0xff] }
 0x138   : > { %1086 = vmatprep.mubr.f32.mxu1 %v1504_v54 }
 0x204   : > { %v624_v55 = vpop.f32.mrb[2].mxu0 }
 0x205   : > { %v1934_v57 = vpop.f32.mrb[3].mxu0  ;;  %v2477_v8 = vrot.slane %v624_v55, %v704_v62 }
 0x207   : > { %v722_v10 = vsub.f32 %v2357_v19, %v2477_v8  ;;  %v723_v16 = vsub.f32 %v2363_v25, %v2477_v8  ;;  %v706_v18 = vsub.f32 %v2226_v11, %v2477_v8  ;;  %v707_v21 = vsub.f32 %v2229_v12, %v2477_v8 }
 0x208   : > { %v724_v23 = vsub.f32 %v2369_v28, %v2477_v8  ;;  %v725_v3 = vsub.f32 %v2375_v33, %v2477_v8  ;;  %v708_v26 = vsub.f32 %v2232_v13, %v2477_v8  ;;  %v709_v19 = vsub.f32 %v2245_v17, %v2477_v8 }
 0x209   : > { %v726_v25 = vsub.f32 %v2381_v38, %v2477_v8  ;;  %v727_v11 = vsub.f32 %v2387_v43, %v2477_v8  ;;  %v710_v12 = vsub.f32 %v2249_v20, %v2477_v8  ;;  %v711_v28 = vsub.f32 %v2261_v24, %v2477_v8 }
 0x20a   : > { %v697_v0 = vpop.f32.mrb[2].mxu1  ;;  %v728_v33 = vsub.f32 %v2393_v48, %v2477_v8  ;;  %v729_v13 = vsub.f32 %v2399_v53, %v2477_v8  ;;  %v712_v17 = vsub.f32 %v2269_v29, %v2477_v8  ;;  %v713_v38 = vsub.f32 %v2283_v34, %v2477_v8 }
 0x20b   : > { %v698_v2 = vadd.f32 1e-05, %v697_v0  ;;  %v1941_v4 = vpop.f32.mrb[3].mxu1  ;;  %v730_v43 = vsub.f32 %v2405_v58, %v2477_v8  ;;  %v731_v30 = vsub.f32 %v2411_v63, %v2477_v8  ;;  %v714_v31 = vsub.f32 %v2289_v39, %v2477_v8 }
 0x20c   : > { %v715_v32 = vsub.f32 %v2303_v45, %v2477_v8  ;;  %v732_v37 = vsub.f32 %v2417_v5, %v2477_v8  ;;  %v733_v40 = vsub.f32 %v2423_v15, %v2477_v8  ;;  %v716_v42 = vsub.f32 %v2309_v50, %v2477_v8 }
 0x20d   : > { %2135 = vrsqrt.f32 %v698_v2  ;;  %v2557_v2 = vld [vmem:[%s3083_s2] ss:$0 sm:$0xff] }
 0x217   : > { %v2136_v36 = vpop.eup %2135 }
 0x218   : > { %v2529_v46 = vrot.slane %v2136_v36, %v704_v62 }
 0x21a   : > { %v758_v59 = vmul.f32 %v2529_v46, %v722_v10  ;;  %v759_v60 = vmul.f32 %v2529_v46, %v723_v16  ;;  %v742_v62 = vmul.f32 %v2529_v46, %v706_v18  ;;  %v743_v0 = vmul.f32 %v2529_v46, %v707_v21 }
 0x21b   : > { %v760_v4 = vmul.f32 %v2529_v46, %v724_v23  ;;  %v761_v36 = vmul.f32 %v2529_v46, %v725_v3  ;;  %v744_v55 = vmul.f32 %v2529_v46, %v708_v26  ;;  %v745_v57 = vmul.f32 %v2529_v46, %v709_v19 }
 0x21c   : > { %v797_v10 = vmul.f32 %v2540_v51, %v758_v59  ;;  %v798_v16 = vmul.f32 %v2540_v51, %v759_v60  ;;  %v781_v18 = vmul.f32 %v2540_v51, %v742_v62  ;;  %v782_v21 = vmul.f32 %v2540_v51, %v743_v0 }
 0x21d   : > { %v799_v9 = vmul.f32 %v2540_v51, %v760_v4  ;;  %v800_v54 = vmul.f32 %v2540_v51, %v761_v36  ;;  %v783_v23 = vmul.f32 %v2540_v51, %v744_v55  ;;  %v784_v3 = vmul.f32 %v2540_v51, %v745_v57 }
 0x21e   : > { %v836_v26 = vadd.f32 %v2557_v2, %v797_v10  ;;  %v837_v19 = vadd.f32 %v2557_v2, %v798_v16  ;;  %v820_v59 = vadd.f32 %v2557_v2, %v781_v18  ;;  %v821_v60 = vadd.f32 %v2557_v2, %v782_v21 }
 0x21f   : > { %v838_v62 = vadd.f32 %v2557_v2, %v799_v9  ;;  %v839_v0 = vadd.f32 %v2557_v2, %v800_v54  ;;  %v822_v4 = vadd.f32 %v2557_v2, %v783_v23  ;;  %v823_v36 = vadd.f32 %v2557_v2, %v784_v3 }
 0x220   : > { %v868_v52 = vmax.f32 %v836_v26, 0.0  ;;  %v869_v55 = vmax.f32 %v837_v19, 0.0  ;;  %v852_v49 = vmax.f32 %v820_v59, 0.0  ;;  %v853_v57 = vmax.f32 %v821_v60, 0.0 }
 0x221   : > { %v870_v6 = vmax.f32 %v838_v62, 0.0  ;;  %v871_v10 = vmax.f32 %v839_v0, 0.0  ;;  %v854_v47 = vmax.f32 %v822_v4, 0.0  ;;  %v855_v16 = vmax.f32 %v823_v36, 0.0 }
 0x222   : > { %v2579_v44 = vpack.c.bf16 %v869_v55, %v868_v52  ;;  %v2581_v18 = vpack.c.bf16 %v853_v57, %v852_v49  ;;  %v762_v9 = vmul.f32 %v2529_v46, %v726_v25  ;;  %v763_v54 = vmul.f32 %v2529_v46, %v727_v11 }
 0x223   : > { %v2585_v21 = vpack.c.bf16 %v871_v10, %v870_v6  ;;  %v2587_v23 = vpack.c.bf16 %v855_v16, %v854_v47  ;;  %v746_v3 = vmul.f32 %v2529_v46, %v710_v12  ;;  %v747_v52 = vmul.f32 %v2529_v46, %v711_v28 }
 0x224   : > { %1997 = vmatprep.subr.bf16.mxu0 %v2579_v44  ;;  %2029 = vmatprep.subr.bf16.mxu1 %v2579_v44  ;;  %v801_v25 = vmul.f32 %v2540_v51, %v762_v9  ;;  %v802_v11 = vmul.f32 %v2540_v51, %v763_v54  ;;  %v764_v20 = vmul.f32 %v2529_v46, %v728_v33 }
 0x225   : > { %1999 = vmatpush3.bf16.msra.mxu0 %v2581_v18  ;;  %2031 = vmatpush3.bf16.msra.mxu1 %v2581_v18  ;;  %v785_v24 = vmul.f32 %v2540_v51, %v746_v3  ;;  %v786_v12 = vmul.f32 %v2540_v51, %v747_v52  ;;  %v765_v28 = vmul.f32 %v2529_v46, %v729_v13 }
 0x226   : > { %2001 = vmatprep.subr.bf16.mxu0 %v2585_v21  ;;  %2033 = vmatprep.subr.bf16.mxu1 %v2585_v21  ;;  %v840_v48 = vadd.f32 %v2557_v2, %v801_v25  ;;  %v841_v33 = vadd.f32 %v2557_v2, %v802_v11  ;;  %v803_v47 = vmul.f32 %v2540_v51, %v764_v20 }
 0x227   : > { %v824_v6 = vadd.f32 %v2557_v2, %v785_v24  ;;  %v825_v49 = vadd.f32 %v2557_v2, %v786_v12  ;;  %v804_v26 = vmul.f32 %v2540_v51, %v765_v28  ;;  %v748_v53 = vmul.f32 %v2529_v46, %v712_v17 }
 0x228   : > { %v872_v13 = vmax.f32 %v840_v48, 0.0  ;;  %v873_v19 = vmax.f32 %v841_v33, 0.0  ;;  %v842_v59 = vadd.f32 %v2557_v2, %v803_v47  ;;  %v749_v60 = vmul.f32 %v2529_v46, %v713_v38 }
 0x229   : > { %2003 = vmatpush3.bf16.msra.mxu0 %v2587_v23  ;;  %2035 = vmatpush3.bf16.msra.mxu1 %v2587_v23  ;;  %v856_v62 = vmax.f32 %v824_v6, 0.0  ;;  %v857_v0 = vmax.f32 %v825_v49, 0.0  ;;  %v843_v4 = vadd.f32 %v2557_v2, %v804_v26  ;;  %v787_v29 = vmul.f32 %v2540_v51, %v748_v53 }
 0x22a   : > { %v2634_v17 = vpack.c.bf16 %v873_v19, %v872_v13  ;;  %v874_v36 = vmax.f32 %v842_v59, 0.0  ;;  %v788_v55 = vmul.f32 %v2540_v51, %v749_v60  ;;  %v766_v34 = vmul.f32 %v2529_v46, %v730_v43 }
 0x22b   : > { %v2641_v38 = vpack.c.bf16 %v857_v0, %v856_v62  ;;  %v875_v57 = vmax.f32 %v843_v4, 0.0  ;;  %v826_v10 = vadd.f32 %v2557_v2, %v787_v29  ;;  %v767_v16 = vmul.f32 %v2529_v46, %v731_v30 }
 0x22c   : > { %2005 = vmatprep.subr.bf16.mxu0 %v2634_v17  ;;  %2037 = vmatprep.subr.bf16.mxu1 %v2634_v17  ;;  %v827_v9 = vadd.f32 %v2557_v2, %v788_v55  ;;  %v805_v58 = vmul.f32 %v2540_v51, %v766_v34  ;;  %v750_v43 = vmul.f32 %v2529_v46, %v714_v31 }
 0x22d   : > { %2007 = vmatpush3.bf16.msra.mxu0 %v2641_v38  ;;  %2039 = vmatpush3.bf16.msra.mxu1 %v2641_v38  ;;  %v2658_v63 = vpack.c.bf16 %v875_v57, %v874_v36  ;;  %v858_v30 = vmax.f32 %v826_v10, 0.0  ;;  %v806_v54 = vmul.f32 %v2540_v51, %v767_v16  ;;  %v751_v3 = vmul.f32 %v2529_v46, %v715_v32 }
 0x22e   : > { %v859_v52 = vmax.f32 %v827_v9, 0.0  ;;  %v844_v25 = vadd.f32 %v2557_v2, %v805_v58  ;;  %v789_v39 = vmul.f32 %v2540_v51, %v750_v43  ;;  %v768_v31 = vmul.f32 %v2529_v46, %v732_v37 }
 0x22f   : > { %2009 = vmatprep.subr.bf16.mxu0 %v2658_v63  ;;  %2041 = vmatprep.subr.bf16.mxu1 %v2658_v63  ;;  %v845_v11 = vadd.f32 %v2557_v2, %v806_v54  ;;  %v790_v45 = vmul.f32 %v2540_v51, %v751_v3  ;;  %v769_v32 = vmul.f32 %v2529_v46, %v733_v40 }
 0x230   : > { %v2679_v20 = vpack.c.bf16 %v859_v52, %v858_v30  ;;  %v876_v24 = vmax.f32 %v844_v25, 0.0  ;;  %v828_v5 = vadd.f32 %v2557_v2, %v789_v39  ;;  %v807_v37 = vmul.f32 %v2540_v51, %v768_v31 }
 0x231   : > { %v877_v12 = vmax.f32 %v845_v11, 0.0  ;;  %v829_v28 = vadd.f32 %v2557_v2, %v790_v45  ;;  %v808_v48 = vmul.f32 %v2540_v51, %v769_v32  ;;  %v752_v33 = vmul.f32 %v2529_v46, %v716_v42 }
 0x232   : > { %2011 = vmatpush3.bf16.msra.mxu0 %v2679_v20  ;;  %2043 = vmatpush3.bf16.msra.mxu1 %v2679_v20  ;;  %v860_v15 = vmax.f32 %v828_v5, 0.0  ;;  %v846_v40 = vadd.f32 %v2557_v2, %v807_v37  ;;  %v3088_v47 = vsub.f32 %v2323_v56, %v2477_v8  ;;  %v3089_v49 = vsub.f32 %v2429_v22, %v2477_v8 }
 0x233   : > { %v2700_v50 = vpack.c.bf16 %v877_v12, %v876_v24  ;;  %v861_v42 = vmax.f32 %v829_v28, 0.0  ;;  %v847_v53 = vadd.f32 %v2557_v2, %v808_v48  ;;  %v791_v13 = vmul.f32 %v2540_v51, %v752_v33 }
 0x234   : > { %v753_v6 = vmul.f32 %v2529_v46, %v3088_v47  ;;  %v770_v26 = vmul.f32 %v2529_v46, %v3089_v49  ;;  %v878_v19 = vmax.f32 %v846_v40, 0.0  ;;  %v3090_v56 = vsub.f32 %v2435_v27, %v2477_v8 }
 0x235   : > { %2013 = vmatprep.subr.bf16.mxu0 %v2700_v50  ;;  %2045 = vmatprep.subr.bf16.mxu1 %v2700_v50  ;;  %v2712_v22 = vpack.c.bf16 %v861_v42, %v860_v15  ;;  %v879_v0 = vmax.f32 %v847_v53, 0.0  ;;  %v830_v4 = vadd.f32 %v2557_v2, %v791_v13  ;;  %v3091_v29 = vsub.f32 %v2329_v61, %v2477_v8  ;;  %v1503_v53 = vld [vmem:[%s3086_s5 + $0x80] sm:$0xff]  ;;  %v887_v13 = vld [vmem:[%s3086_s5 + $0x18] sm:$0xff] }
 0x236   : > { %v792_v59 = vmul.f32 %v2540_v51, %v753_v6  ;;  %v771_v60 = vmul.f32 %v2529_v46, %v3090_v56  ;;  %v809_v62 = vmul.f32 %v2540_v51, %v770_v26  ;;  %v3092_v57 = vsub.f32 %v2337_v1, %v2477_v8  ;;  %v1508_v56 = vld [vmem:[%s3086_s5 + $0xa8] sm:$0xff] }
 0x237   : > { %v754_v36 = vmul.f32 %v2529_v46, %v3091_v29  ;;  %2015 = vmatpush3.bf16.msra.mxu0 %v2712_v22  ;;  %2047 = vmatpush3.bf16.msra.mxu1 %v2712_v22  ;;  %v2728_v16 = vpack.c.bf16 %v879_v0, %v878_v19  ;;  %v862_v61 = vmax.f32 %v830_v4, 0.0  ;;  %v3093_v58 = vsub.f32 %v2441_v35, %v2477_v8  ;;  %v1506_v19 = vld [vmem:[%s3086_s5 + $0x98] sm:$0xff]  ;;  %v1509_v0 = vld [vmem:[%s3086_s5 + $0xb0] sm:$0xff]  ;;  %v1512_v4 = vld [vmem:[%s3086_s5 + $0xc8] sm:$0xff] }
 0x238   : > { %v831_v27 = vadd.f32 %v2557_v2, %v792_v59  ;;  %v810_v55 = vmul.f32 %v2540_v51, %v771_v60  ;;  %v848_v34 = vadd.f32 %v2557_v2, %v809_v62  ;;  %v755_v10 = vmul.f32 %v2529_v46, %v3092_v57  ;;  %v886_v59 = vld [vmem:[%s3086_s5 + $0x10] sm:$0xff]  ;;  %v1507_v60 = vld [vmem:[%s3086_s5 + $0xa0] sm:$0xff]  ;;  %v1510_v62 = vld [vmem:[%s3086_s5 + $0xb8] sm:$0xff] }
 0x239   : > { %v793_v9 = vmul.f32 %v2540_v51, %v754_v36  ;;  %v772_v43 = vmul.f32 %v2529_v46, %v3093_v58  ;;  %2017 = vmatprep.subr.bf16.mxu0 %v2728_v16  ;;  %2049 = vmatprep.subr.bf16.mxu1 %v2728_v16  ;;  %v3094_v25 = vsub.f32 %v2447_v41, %v2477_v8  ;;  %v1511_v29 = vld [vmem:[%s3086_s5 + $0xc0] sm:$0xff]  ;;  %v1514_v36 = vld [vmem:[%s3086_s5 + $0xd8] sm:$0xff]  ;;  %v1520_v58 = vld [vmem:[%s3086_s5 + $0x108] sm:$0xff] }
 0x23a   : > { %v863_v30 = vmax.f32 %v831_v27, 0.0  ;;  %v849_v54 = vadd.f32 %v2557_v2, %v810_v55  ;;  %v880_v1 = vmax.f32 %v848_v34, 0.0  ;;  %v794_v3 = vmul.f32 %v2540_v51, %v755_v10  ;;  %v1513_v27 = vld [vmem:[%s3086_s5 + $0xd0] sm:$0xff]  ;;  %v1516_v55 = vld [vmem:[%s3086_s5 + $0xe8] sm:$0xff]  ;;  %v896_v34 = vld [vmem:[%s3086_s5 + $0x60] sm:$0xff] }
 0x23b   : > { %v832_v52 = vadd.f32 %v2557_v2, %v793_v9  ;;  %v773_v39 = vmul.f32 %v2529_v46, %v3094_v25  ;;  %v811_v35 = vmul.f32 %v2540_v51, %v772_v43  ;;  %v3095_v32 = vsub.f32 %v2343_v7, %v2477_v8  ;;  %v1515_v57 = vld [vmem:[%s3086_s5 + $0xe0] sm:$0xff]  ;;  %v899_v10 = vld [vmem:[%s3086_s5 + $0x78] sm:$0xff]  ;;  %v1517_v9 = vld [vmem:[%s3086_s5 + $0xf0] sm:$0xff] }
 0x23c   : > { %v2745_v31 = vpack.c.bf16 %v863_v30, %v862_v61  ;;  %v881_v11 = vmax.f32 %v849_v54, 0.0  ;;  %v833_v45 = vadd.f32 %v2557_v2, %v794_v3  ;;  %v3096_v41 = vsub.f32 %v2351_v14, %v2477_v8  ;;  %v898_v61 = vld [vmem:[%s3086_s5 + $0x70] sm:$0xff]  ;;  %v1536_v43 = vld [vmem:[%s3086_s5 + $0x188] sm:$0xff]  ;;  %v1519_v30 = vld [vmem:[%s3086_s5 + $0x100] sm:$0xff] }
 0x23d   : > { %v756_v24 = vmul.f32 %v2529_v46, %v3095_v32  ;;  %v864_v5 = vmax.f32 %v832_v52, 0.0  ;;  %v812_v37 = vmul.f32 %v2540_v51, %v773_v39  ;;  %v850_v12 = vadd.f32 %v2557_v2, %v811_v35  ;;  %v1535_v54 = vld [vmem:[%s3086_s5 + $0x180] sm:$0xff]  ;;  %v1538_v3 = vld [vmem:[%s3086_s5 + $0x198] sm:$0xff]  ;;  %v1521_v52 = vld [vmem:[%s3086_s5 + $0x110] sm:$0xff] }
 0x23e   : > { %v757_v28 = vmul.f32 %v2529_v46, %v3096_v41  ;;  %2019 = vmatpush3.bf16.msra.mxu0 %v2745_v31  ;;  %2051 = vmatpush3.bf16.msra.mxu1 %v2745_v31  ;;  %v2760_v48 = vpack.c.bf16 %v881_v11, %v880_v1  ;;  %v865_v33 = vmax.f32 %v833_v45, 0.0  ;;  %v1522_v1 = vld [vmem:[%s3086_s5 + $0x118] sm:$0xff]  ;;  %v1537_v25 = vld [vmem:[%s3086_s5 + $0x190] sm:$0xff]  ;;  %v1524_v39 = vld [vmem:[%s3086_s5 + $0x128] sm:$0xff] }
 0x23f   : > { %v795_v7 = vmul.f32 %v2540_v51, %v756_v24  ;;  %v851_v15 = vadd.f32 %v2557_v2, %v812_v37  ;;  %v882_v40 = vmax.f32 %v850_v12, 0.0  ;;  %v1540_v35 = vld [vmem:[%s3086_s5 + $0x1a8] sm:$0xff]  ;;  %v1539_v11 = vld [vmem:[%s3086_s5 + $0x1a0] sm:$0xff]  ;;  %v1526_v45 = vld [vmem:[%s3086_s5 + $0x138] sm:$0xff] }
 0x240   : > { %v796_v47 = vmul.f32 %v2540_v51, %v757_v28  ;;  %2021 = vmatprep.subr.bf16.mxu0 %v2760_v48  ;;  %2053 = vmatprep.subr.bf16.mxu1 %v2760_v48  ;;  %v2767_v14 = vpack.c.bf16 %v865_v33, %v864_v5  ;;  %v1542_v32 = vld [vmem:[%s3086_s5 + $0x1b8] sm:$0xff]  ;;  %v1525_v24 = vld [vmem:[%s3086_s5 + $0x130] sm:$0xff]  ;;  %v1528_v37 = vld [vmem:[%s3086_s5 + $0x148] sm:$0xff] }
 0x241   : > { %v834_v8 = vadd.f32 %v2557_v2, %v795_v7  ;;  %v883_v46 = vmax.f32 %v851_v15, 0.0  ;;  %v1541_v5 = vld [vmem:[%s3086_s5 + $0x1b0] sm:$0xff]  ;;  %v1544_v12 = vld [vmem:[%s3086_s5 + $0x1c8] sm:$0xff]  ;;  %v1527_v41 = vld [vmem:[%s3086_s5 + $0x140] sm:$0xff] }
 0x242   : > { %v835_v6 = vadd.f32 %v2557_v2, %v796_v47  ;;  %2023 = vmatpush3.bf16.msra.mxu0 %v2767_v14  ;;  %2055 = vmatpush3.bf16.msra.mxu1 %v2767_v14  ;;  %v884_v2 = vld [vmem:[%s3086_s5] sm:$0xff]  ;;  %v1546_v33 = vld [vmem:[%s3086_s5 + $0x1d8] sm:$0xff]  ;;  %v1529_v7 = vld [vmem:[%s3086_s5 + $0x150] sm:$0xff] }
 0x243   : > { %v866_v49 = vmax.f32 %v834_v8, 0.0  ;;  %v2773_v26 = vpack.c.bf16 %v883_v46, %v882_v40  ;;  %v1543_v28 = vld [vmem:[%s3086_s5 + $0x1c0] sm:$0xff]  ;;  %v1545_v15 = vld [vmem:[%s3086_s5 + $0x1d0] sm:$0xff]  ;;  %v1532_v40 = vld [vmem:[%s3086_s5 + $0x168] sm:$0xff] }
 0x244   : > { %v867_v42 = vmax.f32 %v835_v6, 0.0  ;;  %v1548_v47 = vld [vmem:[%s3086_s5 + $0x1e8] sm:$0xff]  ;;  %v1547_v8 = vld [vmem:[%s3086_s5 + $0x1e0] sm:$0xff]  ;;  %v1534_v46 = vld [vmem:[%s3086_s5 + $0x178] sm:$0xff] }
 0x245   : > { %2025 = vmatprep.subr.bf16.mxu0 %v2773_v26  ;;  %2057 = vmatprep.subr.bf16.mxu1 %v2773_v26  ;;  %v1550_v6 = vld [vmem:[%s3086_s5 + $0x1f8] sm:$0xff] }
 0x246   : > { %v2777_v51 = vpack.c.bf16 %v867_v42, %v866_v49  ;;  %v1533_v49 = vld [vmem:[%s3086_s5 + $0x170] sm:$0xff] }
 0x248   : > { %2027 = vmatpush3.bf16.msra.mxu0 %v2777_v51  ;;  %2059 = vmatpush3.bf16.msra.mxu1 %v2777_v51 }
 0x249   : > { %2061 = vmatprep.subr.bf16.mxu0 %v2579_v44  ;;  %2093 = vmatprep.subr.bf16.mxu1 %v2579_v44  ;;  %v1505_v44 = vld [vmem:[%s3086_s5 + $0x90] sm:$0xff] }
 0x24b   : > { %965 = vmatmul.mubr.f32.vlgmr.msra.gmra.mrb[4].mxu0 %v884_v2  ;;  %1087 = vmatmul.mubr.f32.vlgmr.msra.gmra.mrb[4].mxu1 %v1503_v53 }
 0x24c   : > { %2063 = vmatpush3.bf16.msra.mxu0 %v2581_v18  ;;  %2095 = vmatpush3.bf16.msra.mxu1 %v2581_v18  ;;  %v889_v18 = vld [vmem:[%s3086_s5 + $0x28] sm:$0xff] }
 0x24d   : > { %2065 = vmatprep.subr.bf16.mxu0 %v2585_v21  ;;  %2097 = vmatprep.subr.bf16.mxu1 %v2585_v21  ;;  %v888_v21 = vld [vmem:[%s3086_s5 + $0x20] sm:$0xff] }
 0x24e   : > { %969 = vmatprep.mubr.f32.mxu0 %v887_v13  ;;  %1091 = vmatprep.mubr.f32.mxu1 %v1506_v19 }
 0x24f   : > { %970 = vmatmul.mubr.f32.gmra.mrb[6].mxu0 %v886_v59  ;;  %1092 = vmatmul.mubr.f32.gmra.mrb[6].mxu1 %v1505_v44 }
 0x250   : > { %2067 = vmatpush3.bf16.msra.mxu0 %v2587_v23  ;;  %2099 = vmatpush3.bf16.msra.mxu1 %v2587_v23  ;;  %v891_v23 = vld [vmem:[%s3086_s5 + $0x38] sm:$0xff] }
 0x251   : > { %2069 = vmatprep.subr.bf16.mxu0 %v2634_v17  ;;  %2101 = vmatprep.subr.bf16.mxu1 %v2634_v17  ;;  %v890_v17 = vld [vmem:[%s3086_s5 + $0x30] sm:$0xff] }
 0x252   : > { %974 = vmatprep.mubr.f32.mxu0 %v889_v18  ;;  %1096 = vmatprep.mubr.f32.mxu1 %v1508_v56 }
 0x253   : > { %975 = vmatmul.mubr.f32.gmra.mrb[8].mxu0 %v888_v21  ;;  %1097 = vmatmul.mubr.f32.gmra.mrb[8].mxu1 %v1507_v60 }
 0x254   : > { %2071 = vmatpush3.bf16.msra.mxu0 %v2641_v38  ;;  %2103 = vmatpush3.bf16.msra.mxu1 %v2641_v38  ;;  %v893_v38 = vld [vmem:[%s3086_s5 + $0x48] sm:$0xff] }
 0x255   : > { %2073 = vmatprep.subr.bf16.mxu0 %v2658_v63  ;;  %2105 = vmatprep.subr.bf16.mxu1 %v2658_v63  ;;  %v892_v63 = vld [vmem:[%s3086_s5 + $0x40] sm:$0xff] }
 0x256   : > { %979 = vmatprep.mubr.f32.mxu0 %v891_v23  ;;  %1101 = vmatprep.mubr.f32.mxu1 %v1510_v62 }
 0x257   : > { %980 = vmatmul.mubr.f32.gmra.mrb[10].mxu0 %v890_v17  ;;  %1102 = vmatmul.mubr.f32.gmra.mrb[10].mxu1 %v1509_v0 }
 0x258   : > { %2075 = vmatpush3.bf16.msra.mxu0 %v2679_v20  ;;  %2107 = vmatpush3.bf16.msra.mxu1 %v2679_v20  ;;  %v895_v20 = vld [vmem:[%s3086_s5 + $0x58] sm:$0xff] }
 0x259   : > { %2077 = vmatprep.subr.bf16.mxu0 %v2700_v50  ;;  %2109 = vmatprep.subr.bf16.mxu1 %v2700_v50  ;;  %v894_v50 = vld [vmem:[%s3086_s5 + $0x50] sm:$0xff] }
 0x25a   : > { %984 = vmatprep.mubr.f32.mxu0 %v893_v38  ;;  %1106 = vmatprep.mubr.f32.mxu1 %v1512_v4 }
 0x25b   : > { %985 = vmatmul.mubr.f32.gmra.mrb[12].mxu0 %v892_v63  ;;  %1107 = vmatmul.mubr.f32.gmra.mrb[12].mxu1 %v1511_v29 }
 0x25c   : > { %2079 = vmatpush3.bf16.msra.mxu0 %v2712_v22  ;;  %2111 = vmatpush3.bf16.msra.mxu1 %v2712_v22  ;;  %v897_v22 = vld [vmem:[%s3086_s5 + $0x68] sm:$0xff] }
 0x25d   : > { %2081 = vmatprep.subr.bf16.mxu0 %v2728_v16  ;;  %2113 = vmatprep.subr.bf16.mxu1 %v2728_v16  ;;  %v1518_v16 = vld [vmem:[%s3086_s5 + $0xf8] sm:$0xff] }
 0x25e   : > { %989 = vmatprep.mubr.f32.mxu0 %v895_v20  ;;  %1111 = vmatprep.mubr.f32.mxu1 %v1514_v36 }
 0x25f   : > { %990 = vmatmul.mubr.f32.gmra.mrb[14].mxu0 %v894_v50  ;;  %1112 = vmatmul.mubr.f32.gmra.mrb[14].mxu1 %v1513_v27 }
 0x260   : > { %2083 = vmatpush3.bf16.msra.mxu0 %v2745_v31  ;;  %2115 = vmatpush3.bf16.msra.mxu1 %v2745_v31  ;;  %v1523_v31 = vld [vmem:[%s3086_s5 + $0x120] sm:$0xff] }
 0x261   : > { %2085 = vmatprep.subr.bf16.mxu0 %v2760_v48  ;;  %2117 = vmatprep.subr.bf16.mxu1 %v2760_v48  ;;  %v1530_v48 = vld [vmem:[%s3086_s5 + $0x158] sm:$0xff] }
 0x262   : > { %994 = vmatprep.mubr.f32.mxu0 %v897_v22  ;;  %1116 = vmatprep.mubr.f32.mxu1 %v1516_v55 }
 0x263   : > { %995 = vmatmul.mubr.f32.gmra.mrb[16].mxu0 %v896_v34  ;;  %1117 = vmatmul.mubr.f32.gmra.mrb[16].mxu1 %v1515_v57 }
 0x264   : > { %2087 = vmatpush3.bf16.msra.mxu0 %v2767_v14  ;;  %2119 = vmatpush3.bf16.msra.mxu1 %v2767_v14  ;;  %v1531_v14 = vld [vmem:[%s3086_s5 + $0x160] sm:$0xff] }
 0x265   : > { %2089 = vmatprep.subr.bf16.mxu0 %v2773_v26  ;;  %2121 = vmatprep.subr.bf16.mxu1 %v2773_v26  ;;  %v1549_v26 = vld [vmem:[%s3086_s5 + $0x1f0] sm:$0xff] }
 0x266   : > { %999 = vmatprep.mubr.f32.mxu0 %v899_v10  ;;  %1121 = vmatprep.mubr.f32.mxu1 %v1518_v16 }
 0x267   : > { %1000 = vmatmul.mubr.f32.gmra.mrb[18].mxu0 %v898_v61  ;;  %1122 = vmatmul.mubr.f32.gmra.mrb[18].mxu1 %v1517_v9 }
 0x268   : > { %2091 = vmatpush3.bf16.msra.mxu0 %v2777_v51  ;;  %2123 = vmatpush3.bf16.msra.mxu1 %v2777_v51 }
 0x269   : > { %1208 = vmatprep.mubr.f32.mxu0 %v1520_v58  ;;  %1330 = vmatprep.mubr.f32.mxu1 %v1536_v43 }
 0x26b   : > { %1209 = vmatmul.mubr.f32.vlgmr.msra.gmra.mrb[20].mxu0 %v1519_v30  ;;  %1331 = vmatmul.mubr.f32.vlgmr.msra.gmra.mrb[20].mxu1 %v1535_v54 }
 0x26c   : > { %1213 = vmatprep.mubr.f32.mxu0 %v1522_v1  ;;  %1335 = vmatprep.mubr.f32.mxu1 %v1538_v3 }
 0x26f   : > { %1214 = vmatmul.mubr.f32.gmra.mrb[22].mxu0 %v1521_v52  ;;  %1336 = vmatmul.mubr.f32.gmra.mrb[22].mxu1 %v1537_v25 }
 0x270   : > { %1218 = vmatprep.mubr.f32.mxu0 %v1524_v39  ;;  %1340 = vmatprep.mubr.f32.mxu1 %v1540_v35 }
 0x273   : > { %1219 = vmatmul.mubr.f32.gmra.mrb[24].mxu0 %v1523_v31  ;;  %1341 = vmatmul.mubr.f32.gmra.mrb[24].mxu1 %v1539_v11 }
 0x274   : > { %1223 = vmatprep.mubr.f32.mxu0 %v1526_v45  ;;  %1345 = vmatprep.mubr.f32.mxu1 %v1542_v32 }
 0x277   : > { %1224 = vmatmul.mubr.f32.gmra.mrb[26].mxu0 %v1525_v24  ;;  %1346 = vmatmul.mubr.f32.gmra.mrb[26].mxu1 %v1541_v5 }
 0x278   : > { %1228 = vmatprep.mubr.f32.mxu0 %v1528_v37  ;;  %1350 = vmatprep.mubr.f32.mxu1 %v1544_v12 }
 0x27b   : > { %1229 = vmatmul.mubr.f32.gmra.mrb[28].mxu0 %v1527_v41  ;;  %1351 = vmatmul.mubr.f32.gmra.mrb[28].mxu1 %v1543_v28 }
 0x27c   : > { %1233 = vmatprep.mubr.f32.mxu0 %v1530_v48  ;;  %1355 = vmatprep.mubr.f32.mxu1 %v1546_v33 }
 0x27f   : > { %1234 = vmatmul.mubr.f32.gmra.mrb[30].mxu0 %v1529_v7  ;;  %1356 = vmatmul.mubr.f32.gmra.mrb[30].mxu1 %v1545_v15 }
 0x280   : > { %1238 = vmatprep.mubr.f32.mxu0 %v1532_v40  ;;  %1360 = vmatprep.mubr.f32.mxu1 %v1548_v47 }
 0x283   : > { %1239 = vmatmul.mubr.f32.gmra.mrb[32].mxu0 %v1531_v14  ;;  %1361 = vmatmul.mubr.f32.gmra.mrb[32].mxu1 %v1547_v8 }
 0x284   : > { %1243 = vmatprep.mubr.f32.mxu0 %v1534_v46  ;;  %1365 = vmatprep.mubr.f32.mxu1 %v1550_v6 }
 0x287   : > { %1244 = vmatmul.mubr.f32.gmra.mrb[34].mxu0 %v1533_v49  ;;  %1366 = vmatmul.mubr.f32.gmra.mrb[34].mxu1 %v1549_v26 }
 0x31e   : > { %v1666_v42 = vpop.f32.mrb[4].mxu0  ;;  %v1722_v51 = vpop.f32.mrb[4].mxu1 }
 0x31f   : > { %v1667_v2 = vpop.f32.mrb[5].mxu0  ;;  %v1723_v53 = vpop.f32.mrb[5].mxu1 }
 0x320   : > { %v2999_v13 = vadd.f32 %v1667_v2, %v1666_v42  ;;  %v3001_v19 = vadd.f32 %v1723_v53, %v1722_v51 }
 0x322   : > { %v1371_v59 = vmax.f32 %v2999_v13, %v3001_v19  ;;  %v1669_v44 = vpop.f32.mrb[6].mxu0  ;;  %v1725_v18 = vpop.f32.mrb[6].mxu1 }
 0x323   : > { %v1670_v56 = vpop.f32.mrb[7].mxu0  ;;  %v1726_v21 = vpop.f32.mrb[7].mxu1 }
 0x324   : > { %v3005_v60 = vadd.f32 %v1670_v56, %v1669_v44  ;;  %v3007_v23 = vadd.f32 %v1726_v21, %v1725_v18 }
 0x326   : > { %v1372_v62 = vmax.f32 %v3005_v60, %v3007_v23  ;;  %v1672_v17 = vpop.f32.mrb[8].mxu0  ;;  %v1728_v0 = vpop.f32.mrb[8].mxu1 }
 0x327   : > { %v1673_v38 = vpop.f32.mrb[9].mxu0  ;;  %v1729_v4 = vpop.f32.mrb[9].mxu1 }
 0x328   : > { %v3011_v63 = vadd.f32 %v1673_v38, %v1672_v17  ;;  %v3013_v29 = vadd.f32 %v1729_v4, %v1728_v0 }
 0x32a   : > { %v1373_v20 = vmax.f32 %v3011_v63, %v3013_v29  ;;  %v1675_v36 = vpop.f32.mrb[10].mxu0  ;;  %v1731_v50 = vpop.f32.mrb[10].mxu1 }
 0x32b   : > { %v1676_v27 = vpop.f32.mrb[11].mxu0  ;;  %v1732_v22 = vpop.f32.mrb[11].mxu1 }
 0x32c   : > { %v3017_v55 = vadd.f32 %v1676_v27, %v1675_v36  ;;  %v3019_v34 = vadd.f32 %v1732_v22, %v1731_v50 }
 0x32e   : > { %v1374_v57 = vmax.f32 %v3017_v55, %v3019_v34  ;;  %v1678_v10 = vpop.f32.mrb[12].mxu0  ;;  %v1734_v16 = vpop.f32.mrb[12].mxu1 }
 0x32f   : > { %v1679_v61 = vpop.f32.mrb[13].mxu0  ;;  %v1735_v9 = vpop.f32.mrb[13].mxu1 }
 0x330   : > { %v3023_v58 = vadd.f32 %v1679_v61, %v1678_v10  ;;  %v3025_v43 = vadd.f32 %v1735_v9, %v1734_v16 }
 0x332   : > { %v1375_v30 = vmax.f32 %v3023_v58, %v3025_v43  ;;  %v1681_v54 = vpop.f32.mrb[14].mxu0  ;;  %v1737_v1 = vpop.f32.mrb[14].mxu1 }
 0x333   : > { %v1682_v3 = vpop.f32.mrb[15].mxu0  ;;  %v1738_v52 = vpop.f32.mrb[15].mxu1 }
 0x334   : > { %v3029_v25 = vadd.f32 %v1682_v3, %v1681_v54  ;;  %v3031_v39 = vadd.f32 %v1738_v52, %v1737_v1 }
 0x336   : > { %v1376_v35 = vmax.f32 %v3029_v25, %v3031_v39  ;;  %v1684_v31 = vpop.f32.mrb[16].mxu0  ;;  %v1740_v11 = vpop.f32.mrb[16].mxu1 }
 0x337   : > { %v1685_v45 = vpop.f32.mrb[17].mxu0  ;;  %v1741_v32 = vpop.f32.mrb[17].mxu1 }
 0x338   : > { %v3035_v24 = vadd.f32 %v1685_v45, %v1684_v31  ;;  %v3037_v5 = vadd.f32 %v1741_v32, %v1740_v11 }
 0x33a   : > { %v1377_v37 = vmax.f32 %v3035_v24, %v3037_v5  ;;  %v1687_v12 = vpop.f32.mrb[18].mxu0  ;;  %v1743_v41 = vpop.f32.mrb[18].mxu1 }
 0x33b   : > { %v1688_v28 = vpop.f32.mrb[19].mxu0  ;;  %v1744_v48 = vpop.f32.mrb[19].mxu1 }
 0x33c   : > { %v3041_v33 = vadd.f32 %v1688_v28, %v1687_v12  ;;  %v3043_v7 = vadd.f32 %v1744_v48, %v1743_v41 }
 0x33e   : > { %v1378_v15 = vmax.f32 %v3041_v33, %v3043_v7  ;;  %v1778_v40 = vpop.f32.mrb[20].mxu0  ;;  %v1834_v47 = vpop.f32.mrb[20].mxu1 }
 0x33f   : > { %v1779_v14 = vpop.f32.mrb[21].mxu0  ;;  %v1835_v8 = vpop.f32.mrb[21].mxu1 }
 0x340   : > { %v1780_v46 = vadd.f32 %v1779_v14, %v1778_v40  ;;  %v1836_v6 = vadd.f32 %v1835_v8, %v1834_v47 }
 0x342   : > { %v1379_v49 = vmax.f32 %v1780_v46, %v1836_v6  ;;  %v1781_v26 = vpop.f32.mrb[22].mxu0  ;;  %v1837_v42 = vpop.f32.mrb[22].mxu1 }
 0x343   : > { %v1782_v51 = vpop.f32.mrb[23].mxu0  ;;  %v1838_v2 = vpop.f32.mrb[23].mxu1 }
 0x344   : > { %v1387_v53 = vmax.f32 %v1371_v59, %v1379_v49  ;;  %v1783_v13 = vadd.f32 %v1782_v51, %v1781_v26  ;;  %v1839_v19 = vadd.f32 %v1838_v2, %v1837_v42 }
 0x346   : > { %v1380_v44 = vmax.f32 %v1783_v13, %v1839_v19  ;;  %v1784_v18 = vpop.f32.mrb[24].mxu0  ;;  %v1840_v56 = vpop.f32.mrb[24].mxu1 }
 0x347   : > { %v1785_v21 = vpop.f32.mrb[25].mxu0  ;;  %v1841_v17 = vpop.f32.mrb[25].mxu1 }
 0x348   : > { %v1388_v0 = vmax.f32 %v1372_v62, %v1380_v44  ;;  %v1786_v38 = vadd.f32 %v1785_v21, %v1784_v18  ;;  %v1842_v4 = vadd.f32 %v1841_v17, %v1840_v56 }
 0x34a   : > { %v1574_v59 = vpack.c.bf16 %v1388_v0, %v1387_v53  ;;  %v1381_v36 = vmax.f32 %v1786_v38, %v1842_v4  ;;  %v1787_v50 = vpop.f32.mrb[26].mxu0  ;;  %v1843_v27 = vpop.f32.mrb[26].mxu1 }
 0x34b   : > { %v1788_v22 = vpop.f32.mrb[27].mxu0  ;;  %v1844_v10 = vpop.f32.mrb[27].mxu1 }
 0x34c   : > { %1575 = vst [vmem:[%s3054_s20] sm:$0xff] %v1574_v59   ;;  %v1389_v60 = vmax.f32 %v1373_v20, %v1381_v36  ;;  %v1789_v23 = vadd.f32 %v1788_v22, %v1787_v50  ;;  %v1845_v62 = vadd.f32 %v1844_v10, %v1843_v27 }
 0x34e   : > { %v1382_v16 = vmax.f32 %v1789_v23, %v1845_v62  ;;  %v1790_v61 = vpop.f32.mrb[28].mxu0  ;;  %v1846_v9 = vpop.f32.mrb[28].mxu1 }
 0x34f   : > { %v1791_v54 = vpop.f32.mrb[29].mxu0  ;;  %v1847_v1 = vpop.f32.mrb[29].mxu1 }
 0x350   : > { %v1390_v3 = vmax.f32 %v1374_v57, %v1382_v16  ;;  %v1792_v52 = vadd.f32 %v1791_v54, %v1790_v61  ;;  %v1848_v31 = vadd.f32 %v1847_v1, %v1846_v9 }
 0x352   : > { %v1579_v11 = vpack.c.bf16 %v1390_v3, %v1389_v60  ;;  %v1383_v45 = vmax.f32 %v1792_v52, %v1848_v31  ;;  %v1793_v32 = vpop.f32.mrb[30].mxu0  ;;  %v1849_v12 = vpop.f32.mrb[30].mxu1 }
 0x353   : > { %v1794_v63 = vpop.f32.mrb[31].mxu0  ;;  %v1850_v29 = vpop.f32.mrb[31].mxu1 }
 0x354   : > { %1591 = vst [vmem:[%s3054_s20 + $0x8] sm:$0xff] %v1579_v11   ;;  %v1391_v20 = vmax.f32 %v1375_v30, %v1383_v45  ;;  %v1795_v41 = vadd.f32 %v1794_v63, %v1793_v32  ;;  %v1851_v28 = vadd.f32 %v1850_v29, %v1849_v12 }
 0x356   : > { %v1384_v48 = vmax.f32 %v1795_v41, %v1851_v28  ;;  %v1796_v40 = vpop.f32.mrb[32].mxu0  ;;  %v1852_v55 = vpop.f32.mrb[32].mxu1 }
 0x357   : > { %v1797_v34 = vpop.f32.mrb[33].mxu0  ;;  %v1853_v57 = vpop.f32.mrb[33].mxu1 }
 0x358   : > { %v1392_v47 = vmax.f32 %v1376_v35, %v1384_v48  ;;  %v1798_v14 = vadd.f32 %v1797_v34, %v1796_v40  ;;  %v1854_v8 = vadd.f32 %v1853_v57, %v1852_v55 }
 0x35a   : > { %v1584_v46 = vpack.c.bf16 %v1392_v47, %v1391_v20  ;;  %v1385_v6 = vmax.f32 %v1798_v14, %v1854_v8  ;;  %v1799_v49 = vpop.f32.mrb[34].mxu0  ;;  %v1855_v58 = vpop.f32.mrb[34].mxu1 }
 0x35b   : > { %v1800_v43 = vpop.f32.mrb[35].mxu0  ;;  %v1856_v30 = vpop.f32.mrb[35].mxu1 }
 0x35c   : > { %1592 = vst [vmem:[%s3054_s20 + $0x10] sm:$0xff] %v1584_v46   ;;  %v1393_v26 = vmax.f32 %v1377_v37, %v1385_v6  ;;  %v1801_v42 = vadd.f32 %v1800_v43, %v1799_v49  ;;  %v1857_v51 = vadd.f32 %v1856_v30, %v1855_v58 }
 0x35e   : > { %v1386_v2 = vmax.f32 %v1801_v42, %v1857_v51 }
 0x360   : > { %v1394_v25 = vmax.f32 %v1378_v15, %v1386_v2 }
 0x362   : > { %v1589_v39 = vpack.c.bf16 %v1394_v25, %v1393_v26 }
 0x364   : > { %1593 = vst [vmem:[%s3054_s20 + $0x18] sm:$0xff] %v1589_v39  }
 0x365 PF: > { %s16_s21 = sadd.s32 1, %s2143_s21  }
 0x366   : > { %p13_p4 = scmp.ge.s32.totalorder %s16_s21, 4  }
 0x368   :  { %15 = sbr.rel (!%p13_p4) target bundleno = 1 (0x1), region = 77 }

// kernel: sepconvgru2_forward.19
= control target key start
LH: loop header
LB: loop body
LE: loop exit
PB: predicated region body
PF: predicated region fallthrough
CT: control target
= control target key end

     0   :  { %s1524_s21 = smov 0   ;;  %s1721_s0 = inlined_call_operand.vmem [shape: f32[2,64,128], index: 0, kind: input, shape index: {}]   ;;  %s1722_s1 = inlined_call_operand.vmem [shape: f32[1,128], index: 1, kind: input, shape index: {}]   ;;  %s1723_s2 = inlined_call_operand.vmem [shape: f32[1,128], index: 2, kind: input, shape index: {}]   ;;  %s1724_s3 = inlined_call_operand.vmem [shape: f32[128,16], index: 3, kind: input, shape index: {}]   ;;  %s1725_s4 = inlined_call_operand.vmem [shape: f32[16,128], index: 4, kind: input, shape index: {}]   ;;  %s1726_s5 = inlined_call_operand.vmem [shape: f32[4,16,64], index: 5, kind: input, shape index: {}]   ;;  %s1727_s6 = inlined_call_operand.vmem [shape: bf16[2,16,128], index: 6, kind: output, shape index: {}]  }
   0x1 LB: > { %s1067_s22 = sadd.s32 4294967295, %s1484_s21   ;;  %p1071_p0 = scmp.ge.s32.totalorder %s1484_s21, 1  ;;  %s1484_s21 = sphi %s1524_s21, %s16_s21  }
   0x2   : > { %p212_p1 = scmp.lt.s32.totalorder %s1484_s21, 3 }
   0x4   : > { %p213_p2 = pnand %p1071_p0, %p212_p1 }
   0x5   : > { %v260_v0 = vld [vmem:[%s1724_s3] sm:$0xff] (!%p213_p2)  ;;  %v261_v1 = vld [vmem:[%s1724_s3 + $0x8] sm:$0xff] (!%p213_p2)  ;;  %v262_v2 = vld [vmem:[%s1724_s3 + $0x10] sm:$0xff] (!%p213_p2)  ;;  %v1486_v3 = vmov (!%p213_p2), 0.0|0.0   ;;  %p242_p3 = scmp.lt.s32.totalorder (!%p213_p2), %s1067_s22, 1  ;;  %vm1487_vm0 = vmmov (!%p213_p2), 0  }
   0x6   : > { %216 = sbr.rel (%p213_p2) target bundleno = 750 (0x2ee), region = 44  ;;  %1347 = vmatprep.subr.bf16.mxu0 (!%p213_p2), %v1486_v3  ;;  %v1348_v4 = vpack.c.bf16 (!%p213_p2), %v261_v1, %v260_v0  ;;  %1371 = vmatprep.subr.bf16.mxu1 (!%p213_p2), %v1486_v3  ;;  %v263_v5 = vld [vmem:[%s1724_s3 + $0x18] sm:$0xff] (!%p213_p2)  ;;  %v1488_v6 = vmov (!%p213_p2), 0.0   ;;  %v264_v8 = vld [vmem:[%s1724_s3 + $0x20] sm:$0xff] (!%p213_p2)  ;;  %v265_v9 = vld [vmem:[%s1724_s3 + $0x28] sm:$0xff] (!%p213_p2)  ;;  %vm458_vm1 = vcmask (!%p213_p2), 130048  }
   0x7   : > { %1219 = vmatprep.mubr.msk.f32.mxu0 (!%p213_p2), %vm1487_vm0, %v1488_v6  ;;  %1254 = vmatprep.mubr.msk.f32.mxu1 (!%p213_p2), %vm1487_vm0, %v1488_v6  ;;  %v1351_v7 = vpack.c.bf16 (!%p213_p2), %v263_v5, %v262_v2  ;;  %v1354_v10 = vpack.c.bf16 (!%p213_p2), %v265_v9, %v264_v8  ;;  %v266_v14 = vld [vmem:[%s1724_s3 + $0x30] sm:$0xff] (!%p213_p2)  ;;  %v267_v15 = vld [vmem:[%s1724_s3 + $0x38] sm:$0xff] (!%p213_p2)  ;;  %v268_v27 = vld [vmem:[%s1724_s3 + $0x40] sm:$0xff] (!%p213_p2)  ;;  %vm662_vm2 = vcmask (!%p213_p2), 523264  }
   0x8   : > { %1349 = vmatpush3.bf16.msra.mxu0 (!%p213_p2), %v1348_v4  ;;  %1373 = vmatpush3.bf16.msra.mxu1 (!%p213_p2), %v1348_v4  ;;  %v1357_v25 = vpack.c.bf16 (!%p213_p2), %v267_v15, %v266_v14  ;;  %v269_v28 = vld [vmem:[%s1724_s3 + $0x48] sm:$0xff] (!%p213_p2)  ;;  %v270_v38 = vld [vmem:[%s1724_s3 + $0x50] sm:$0xff] (!%p213_p2)  ;;  %v271_v39 = vld [vmem:[%s1724_s3 + $0x58] sm:$0xff] (!%p213_p2) }
   0x9   : > { %1350 = vmatprep.subr.bf16.mxu0 (!%p213_p2), %v1486_v3  ;;  %1374 = vmatprep.subr.bf16.mxu1 (!%p213_p2), %v1486_v3  ;;  %v1360_v36 = vpack.c.bf16 (!%p213_p2), %v269_v28, %v268_v27  ;;  %v1363_v46 = vpack.c.bf16 (!%p213_p2), %v271_v39, %v270_v38  ;;  %v272_v47 = vld [vmem:[%s1724_s3 + $0x60] sm:$0xff] (!%p213_p2)  ;;  %v273_v48 = vld [vmem:[%s1724_s3 + $0x68] sm:$0xff] (!%p213_p2)  ;;  %v274_v54 = vld [vmem:[%s1724_s3 + $0x70] sm:$0xff] (!%p213_p2) }
   0xa   : > { %v1366_v53 = vpack.c.bf16 (!%p213_p2), %v273_v48, %v272_v47  ;;  %v275_v55 = vld [vmem:[%s1724_s3 + $0x78] sm:$0xff] (!%p213_p2)  ;;  %v276_v5 = vld [vmem:[%s1725_s4] sm:$0xff] (!%p213_p2) }
   0xb   : > { %v1369_v60 = vpack.c.bf16 (!%p213_p2), %v275_v55, %v274_v54 }
   0xc   : > { %1352 = vmatpush3.bf16.msra.mxu0 (!%p213_p2), %v1351_v7  ;;  %1376 = vmatpush3.bf16.msra.mxu1 (!%p213_p2), %v1351_v7  ;;  %v277_v7 = vld [vmem:[%s1725_s4 + $0x8] sm:$0xff] (!%p213_p2) }
   0xd   : > { %s1729_s22 = smov (!%p242_p3, %s1067_s22), 1  ;;  %1353 = vmatprep.subr.bf16.mxu0 %v1486_v3  ;;  %1377 = vmatprep.subr.bf16.mxu1 %v1486_v3  ;;  %v1396_v8 = vpack.c.bf16 %v277_v7, %v276_v5  ;;  %v1083_v5 = vld [vmem:[%s1726_s5 + $0x18] sm:$0xff]  ;;  %v1086_v7 = vld [vmem:[%s1726_s5 + $0x20] sm:$0xff] }
   0xe   : > { %s1098_s11 = sshll.u32 %s1729_s22, 6  ;;  %s1099_s15 = sshll.u32 %s1729_s22, 3 }
   0xf   : > { %s1564_s14 = scalar_lea.vmem %s1721_s0, %s1098_s11  ;;  %s251_s18 = scalar_lea.vmem %s1727_s6, %s1099_s15 }
  0x10   : > { %v1567_v11 = vld [vmem:[%s1564_s14] sm:$0xff]  ;;  %v1570_v12 = vld [vmem:[%s1564_s14 + $0x8] sm:$0xff]  ;;  %v1573_v13 = vld [vmem:[%s1564_s14 + $0x10] sm:$0xff]  ;;  %1355 = vmatpush3.bf16.msra.mxu0 %v1354_v10  ;;  %1379 = vmatpush3.bf16.msra.mxu1 %v1354_v10 }
  0x11   : > { %v1584_v16 = vld [vmem:[%s1564_s14 + $0x18] sm:$0xff]  ;;  %v278_v17 = vadd.f32 %v1570_v12, %v1567_v11  ;;  %v291_v18 = vmul.f32 %v1567_v11, %v1567_v11  ;;  %v292_v19 = vmul.f32 %v1570_v12, %v1570_v12  ;;  %v1593_v20 = vld [vmem:[%s1564_s14 + $0x20] sm:$0xff]  ;;  %v293_v21 = vmul.f32 %v1573_v13, %v1573_v13  ;;  %v1601_v26 = vld [vmem:[%s1564_s14 + $0x28] sm:$0xff]  ;;  %1356 = vmatprep.subr.bf16.mxu0 %v1486_v3 }
  0x12   : > { %v294_v23 = vmul.f32 %v1584_v16, %v1584_v16  ;;  %1380 = vmatprep.subr.bf16.mxu1 %v1486_v3  ;;  %v295_v30 = vmul.f32 %v1593_v20, %v1593_v20  ;;  %v1615_v32 = vld [vmem:[%s1564_s14 + $0x30] sm:$0xff]  ;;  %v296_v34 = vmul.f32 %v1601_v26, %v1601_v26  ;;  %v1621_v37 = vld [vmem:[%s1564_s14 + $0x38] sm:$0xff] }
  0x13   : > { %v279_v22 = vadd.f32 %v278_v17, %v1573_v13  ;;  %v299_v24 = vadd.f32 %v292_v19, %v291_v18  ;;  %v297_v41 = vmul.f32 %v1615_v32, %v1615_v32  ;;  %v298_v44 = vmul.f32 %v1621_v37, %v1621_v37 }
  0x14   : > { %1358 = vmatpush3.bf16.msra.mxu0 %v1357_v25  ;;  %1382 = vmatpush3.bf16.msra.mxu1 %v1357_v25  ;;  %v606_v25 = vlaneseq }
  0x15   : > { %v280_v29 = vadd.f32 %v279_v22, %v1584_v16  ;;  %v300_v31 = vadd.f32 %v299_v24, %v293_v21  ;;  %1359 = vmatprep.subr.bf16.mxu0 %v1486_v3  ;;  %1383 = vmatprep.subr.bf16.mxu1 %v1486_v3  ;;  %v660_v21 = vld [vmem:[%s1726_s5] sm:$0xff]  ;;  %v1082_v22 = vld [vmem:[%s1726_s5 + $0x10] sm:$0xff] }
  0x16   : > { %v607_v28 = vshrl.u32 %v606_v25, 7 }
  0x17   : > { %v281_v33 = vadd.f32 %v280_v29, %v1593_v20  ;;  %v301_v35 = vadd.f32 %v300_v31, %v294_v23 }
  0x18   : > { %1361 = vmatpush3.bf16.msra.mxu0 %v1360_v36  ;;  %1385 = vmatpush3.bf16.msra.mxu1 %v1360_v36  ;;  %v608_v31 = vsub.s32 0, %v607_v28 }
  0x19   : > { %v282_v40 = vadd.f32 %v281_v33, %v1601_v26  ;;  %v302_v42 = vadd.f32 %v301_v35, %v295_v30  ;;  %1362 = vmatprep.subr.bf16.mxu0 %v1486_v3  ;;  %1386 = vmatprep.subr.bf16.mxu1 %v1486_v3 }
  0x1b   : > { %v283_v43 = vadd.f32 %v282_v40, %v1615_v32  ;;  %v303_v45 = vadd.f32 %v302_v42, %v296_v34 }
  0x1c   : > { %1364 = vmatpush3.bf16.msra.mxu0 %v1363_v46  ;;  %1388 = vmatpush3.bf16.msra.mxu1 %v1363_v46 }
  0x1d   : > { %v284_v49 = vadd.f32 %v283_v43, %v1621_v37  ;;  %v304_v50 = vadd.f32 %v303_v45, %v297_v41  ;;  %1365 = vmatprep.subr.bf16.mxu0 %v1486_v3  ;;  %1389 = vmatprep.subr.bf16.mxu1 %v1486_v3  ;;  %v1078_v45 = vld [vmem:[%s1722_s1] ss:$0 sm:$0xff] }
  0x1f   : > { %v285_v51 = vrot.slane %v284_v49, 4  ;;  %v305_v52 = vadd.f32 %v304_v50, %v298_v44 }
  0x20   : > { %1367 = vmatpush3.bf16.msra.mxu0 %v1366_v53  ;;  %1391 = vmatpush3.bf16.msra.mxu1 %v1366_v53 }
  0x21   : > { %v286_v56 = vadd.f32 %v285_v51, %v284_v49  ;;  %v306_v57 = vrot.slane %v305_v52, 4  ;;  %1368 = vmatprep.subr.bf16.mxu0 %v1486_v3  ;;  %1392 = vmatprep.subr.bf16.mxu1 %v1486_v3 }
  0x23   : > { %v287_v58 = vrot.slane %v286_v56, 2  ;;  %v307_v59 = vadd.f32 %v306_v57, %v305_v52 }
  0x24   : > { %1370 = vmatpush3.bf16.msra.mxu0 %v1369_v60  ;;  %1394 = vmatpush3.bf16.msra.mxu1 %v1369_v60 }
  0x25   : > { %v288_v61 = vadd.f32 %v287_v58, %v286_v56  ;;  %v308_v62 = vrot.slane %v307_v59, 2  ;;  %1395 = vmatprep.subr.bf16.mxu0 %v1486_v3  ;;  %1398 = vmatprep.subr.bf16.mxu1 %v1486_v3 }
  0x27   : > { %v289_v63 = vrot.slane %v288_v61, 1  ;;  %v309_v0 = vadd.f32 %v308_v62, %v307_v59 }
  0x29   : > { %v290_v1 = vadd.f32 %v289_v63, %v288_v61  ;;  %v310_v2 = vrot.slane %v309_v0, 1 }
  0x2b   : > { %1220 = vmatmul.mubr.f32.vlgmr.msra.gmra.mrb[0].mxu0 %v290_v1  ;;  %v311_v4 = vadd.f32 %v310_v2, %v309_v0 }
  0x2c   : > { %1261 = vmatprep.mubr.msk.f32.mxu0 %vm1487_vm0, %v1488_v6  ;;  %1397 = vmatpush3.bf16.msra.mxu0 %v1396_v8 }
  0x2d   : > { %1255 = vmatmul.mubr.f32.vlgmr.msra.gmra.mrb[0].mxu1 %v311_v4  ;;  %v661_v4 = vld [vmem:[%s1726_s5 + $0x8] sm:$0xff] }
  0x2e   : > { %1268 = vmatprep.mubr.msk.f32.mxu1 %vm1487_vm0, %v1488_v6  ;;  %1400 = vmatpush3.bf16.msra.mxu1 %v1396_v8  ;;  %v1090_v8 = vld [vmem:[%s1726_s5 + $0x30] sm:$0xff] }
  0xfe   : > { %v378_v3 = vpop.f32.mrb[0].mxu0 }
  0xff   : > { %v453_v9 = vmul.f32 0.001953125, %v378_v3  ;;  %v1221_v10 = vpop.f32.mrb[1].mxu0  ;;  %v1087_v3 = vld [vmem:[%s1726_s5 + $0x28] sm:$0xff] }
 0x100   : > { %v448_v14 = vpop.f32.mrb[0].mxu1 }
 0x101   : > { %v455_v15 = vmul.f32 %v453_v9, %v453_v9  ;;  %v454_v17 = vmul.f32 0.001953125, %v448_v14  ;;  %v1256_v18 = vpop.f32.mrb[1].mxu1  ;;  %1262 = vmatmul.mubr.msk.f32.vlgmr.msra.gmra.mrb[2].mxu0 %vm458_vm1, %v453_v9  ;;  %v1091_v9 = vld [vmem:[%s1726_s5 + $0x38] sm:$0xff] }
 0x102   : > { %1287 = vmatprep.mubr.msk.f32.mxu0 %vm662_vm2, %v660_v21 }
 0x103   : > { %v456_v6 = vsub.f32 %v454_v17, %v455_v15 }
 0x105   : > { %v457_v19 = vmax.f32 %v456_v6, 0.0 }
 0x107   : > { %1269 = vmatmul.mubr.msk.f32.vlgmr.msra.gmra.mrb[2].mxu1 %vm458_vm1, %v457_v19 }
 0x108   : > { %1306 = vmatprep.mubr.msk.f32.mxu1 %vm662_vm2, %v1082_v22 }
 0x1d4   : > { %v528_v23 = vpop.f32.mrb[2].mxu0 }
 0x1d5   : > { %v1263_v24 = vpop.f32.mrb[3].mxu0  ;;  %v609_v33 = vrot.slane %v528_v23, %v608_v31 }
 0x1d7   : > { %v610_v35 = vsub.f32 %v1567_v11, %v609_v33  ;;  %v611_v36 = vsub.f32 %v1570_v12, %v609_v33  ;;  %v612_v38 = vsub.f32 %v1573_v13, %v609_v33  ;;  %v613_v39 = vsub.f32 %v1584_v16, %v609_v33  ;;  %v1079_v13 = vld [vmem:[%s1723_s2] ss:$0 sm:$0xff] }
 0x1d8   : > { %v614_v41 = vsub.f32 %v1593_v20, %v609_v33  ;;  %v615_v42 = vsub.f32 %v1601_v26, %v609_v33  ;;  %v616_v43 = vsub.f32 %v1615_v32, %v609_v33  ;;  %v617_v44 = vsub.f32 %v1621_v37, %v609_v33 }
 0x1da   : > { %v601_v27 = vpop.f32.mrb[2].mxu1 }
 0x1db   : > { %v602_v29 = vadd.f32 1e-05, %v601_v27  ;;  %v1270_v30 = vpop.f32.mrb[3].mxu1 }
 0x1dd   : > { %1476 = vrsqrt.f32 %v602_v29 }
 0x1e7   : > { %v1477_v34 = vpop.eup %1476 }
 0x1e8   : > { %v621_v40 = vrot.slane %v1477_v34, %v608_v31 }
 0x1ea   : > { %v622_v11 = vmul.f32 %v621_v40, %v610_v35  ;;  %v623_v46 = vmul.f32 %v621_v40, %v611_v36  ;;  %v624_v12 = vmul.f32 %v621_v40, %v612_v38  ;;  %v625_v47 = vmul.f32 %v621_v40, %v613_v39 }
 0x1eb   : > { %v626_v16 = vmul.f32 %v621_v40, %v614_v41  ;;  %v627_v20 = vmul.f32 %v621_v40, %v615_v42  ;;  %v628_v48 = vmul.f32 %v621_v40, %v616_v43  ;;  %v629_v26 = vmul.f32 %v621_v40, %v617_v44 }
 0x1ec   : > { %v637_v49 = vmul.f32 %v1078_v45, %v622_v11  ;;  %v638_v32 = vmul.f32 %v1078_v45, %v623_v46  ;;  %v639_v50 = vmul.f32 %v1078_v45, %v624_v12  ;;  %v640_v37 = vmul.f32 %v1078_v45, %v625_v47 }
 0x1ed   : > { %v641_v51 = vmul.f32 %v1078_v45, %v626_v16  ;;  %v642_v52 = vmul.f32 %v1078_v45, %v627_v20  ;;  %v643_v53 = vmul.f32 %v1078_v45, %v628_v48  ;;  %v644_v54 = vmul.f32 %v1078_v45, %v629_v26 }
 0x1ee   : > { %v652_v55 = vadd.f32 %v1079_v13, %v637_v49  ;;  %v653_v56 = vadd.f32 %v1079_v13, %v638_v32  ;;  %v654_v57 = vadd.f32 %v1079_v13, %v639_v50  ;;  %v655_v58 = vadd.f32 %v1079_v13, %v640_v37 }
 0x1ef   : > { %v656_v59 = vadd.f32 %v1079_v13, %v641_v51  ;;  %v657_v60 = vadd.f32 %v1079_v13, %v642_v52  ;;  %v658_v61 = vadd.f32 %v1079_v13, %v643_v53  ;;  %v659_v62 = vadd.f32 %v1079_v13, %v644_v54 }
 0x1f0   : > { %v1401_v63 = vpack.c.bf16 %v653_v56, %v652_v55  ;;  %v1405_v0 = vpack.c.bf16 %v655_v58, %v654_v57 }
 0x1f1   : > { %v1409_v1 = vpack.c.bf16 %v657_v60, %v656_v59  ;;  %v1413_v2 = vpack.c.bf16 %v659_v62, %v658_v61 }
 0x1f2   : > { %1402 = vmatprep.subr.bf16.mxu0 %v1401_v63  ;;  %1418 = vmatprep.subr.bf16.mxu1 %v1401_v63 }
 0x1f3   : > { %1404 = vmatpush3.bf16.msra.mxu0 %v1401_v63  ;;  %1420 = vmatpush3.bf16.msra.mxu1 %v1401_v63 }
 0x1f4   : > { %1406 = vmatprep.subr.bf16.mxu0 %v1405_v0  ;;  %1422 = vmatprep.subr.bf16.mxu1 %v1405_v0 }
 0x1f7   : > { %1408 = vmatpush3.bf16.msra.mxu0 %v1405_v0  ;;  %1424 = vmatpush3.bf16.msra.mxu1 %v1405_v0 }
 0x1f8   : > { %1410 = vmatprep.subr.bf16.mxu0 %v1409_v1  ;;  %1426 = vmatprep.subr.bf16.mxu1 %v1409_v1 }
 0x1fb   : > { %1412 = vmatpush3.bf16.msra.mxu0 %v1409_v1  ;;  %1428 = vmatpush3.bf16.msra.mxu1 %v1409_v1 }
 0x1fc   : > { %1414 = vmatprep.subr.bf16.mxu0 %v1413_v2  ;;  %1430 = vmatprep.subr.bf16.mxu1 %v1413_v2 }
 0x1ff   : > { %1416 = vmatpush3.bf16.msra.mxu0 %v1413_v2  ;;  %1432 = vmatpush3.bf16.msra.mxu1 %v1413_v2 }
 0x200   : > { %1434 = vmatprep.subr.bf16.mxu0 %v1401_v63  ;;  %1450 = vmatprep.subr.bf16.mxu1 %v1401_v63 }
 0x202   : > { %1288 = vmatmul.mubr.msk.f32.vlgmr.msra.gmra.mrb[4].mxu0 %vm662_vm2, %v661_v4  ;;  %1307 = vmatmul.mubr.msk.f32.vlgmr.msra.gmra.mrb[4].mxu1 %vm662_vm2, %v1083_v5 }
 0x203   : > { %1436 = vmatpush3.bf16.msra.mxu0 %v1401_v63  ;;  %1452 = vmatpush3.bf16.msra.mxu1 %v1401_v63 }
 0x204   : > { %1438 = vmatprep.subr.bf16.mxu0 %v1405_v0  ;;  %1454 = vmatprep.subr.bf16.mxu1 %v1405_v0 }
 0x205   : > { %1325 = vmatprep.mubr.msk.f32.mxu0 %vm662_vm2, %v1086_v7  ;;  %1344 = vmatprep.mubr.msk.f32.mxu1 %vm662_vm2, %v1090_v8 }
 0x207   : > { %1440 = vmatpush3.bf16.msra.mxu0 %v1405_v0  ;;  %1456 = vmatpush3.bf16.msra.mxu1 %v1405_v0 }
 0x208   : > { %1442 = vmatprep.subr.bf16.mxu0 %v1409_v1  ;;  %1458 = vmatprep.subr.bf16.mxu1 %v1409_v1 }
 0x20b   : > { %1444 = vmatpush3.bf16.msra.mxu0 %v1409_v1  ;;  %1460 = vmatpush3.bf16.msra.mxu1 %v1409_v1 }
 0x20c   : > { %1446 = vmatprep.subr.bf16.mxu0 %v1413_v2  ;;  %1462 = vmatprep.subr.bf16.mxu1 %v1413_v2 }
 0x20f   : > { %1448 = vmatpush3.bf16.msra.mxu0 %v1413_v2  ;;  %1464 = vmatpush3.bf16.msra.mxu1 %v1413_v2 }
 0x212   : > { %1326 = vmatmul.mubr.msk.f32.vlgmr.msra.gmra.mrb[6].mxu0 %vm662_vm2, %v1087_v3  ;;  %1345 = vmatmul.mubr.msk.f32.vlgmr.msra.gmra.mrb[6].mxu1 %vm662_vm2, %v1091_v9 }
 0x2d5   : > { %v1289_v10 = vpop.f32.mrb[4].mxu0  ;;  %v1308_v14 = vpop.f32.mrb[4].mxu1 }
 0x2d6   : > { %v997_v15 = vmax.f32 %v1289_v10, %v1308_v14  ;;  %v735_v17 = vpop.f32.mrb[5].mxu0  ;;  %v819_v18 = vpop.f32.mrb[5].mxu1 }
 0x2d7   : > { %v996_v6 = vmax.f32 %v735_v17, %v819_v18 }
 0x2e5   : > { %v1327_v19 = vpop.f32.mrb[6].mxu0  ;;  %v1346_v21 = vpop.f32.mrb[6].mxu1 }
 0x2e6   : > { %v999_v22 = vmax.f32 %v1327_v19, %v1346_v21  ;;  %v903_v23 = vpop.f32.mrb[7].mxu0  ;;  %v987_v24 = vpop.f32.mrb[7].mxu1 }
 0x2e7   : > { %v998_v25 = vmax.f32 %v903_v23, %v987_v24 }
 0x2e8   : > { %v1001_v27 = vmax.f32 %v997_v15, %v999_v22 }
 0x2e9   : > { %v1000_v28 = vmax.f32 %v996_v6, %v998_v25 }
 0x2eb   : > { %v1105_v29 = vpack.c.bf16 %v1001_v27, %v1000_v28 }
 0x2ed   : > { %1106 = vst [vmem:[%s251_s18] sm:$0xff] %v1105_v29  }
 0x2ee PF: > { %s16_s21 = sadd.s32 1, %s1484_s21  }
 0x2ef   : > { %p13_p4 = scmp.ge.s32.totalorder %s16_s21, 4  }
 0x2f1   :  { %15 = sbr.rel (!%p13_p4) target bundleno = 1 (0x1), region = 77 }

// kernel: sepconvgru2_forward.18
= control target key start
LH: loop header
LB: loop body
LE: loop exit
PB: predicated region body
PF: predicated region fallthrough
CT: control target
= control target key end

     0   :  { %s1867_s12 = smov 0   ;;  %s2150_s0 = inlined_call_operand.vmem [shape: bf16[128,1152], index: 0, kind: input, shape index: {}]   ;;  %s2151_s1 = inlined_call_operand.vmem [shape: bf16[1152,128], index: 1, kind: input, shape index: {}]   ;;  %s2152_s2 = inlined_call_operand.vmem [shape: f32[1,128], index: 2, kind: input, shape index: {}]   ;;  %s2153_s3 = inlined_call_operand.vmem [shape: f32[128,128], index: 3, kind: output, shape index: {}]  }
   0x1 LB: > { %s1374_s13 = sadd.s32 4294967295, %s1845_s12   ;;  %p1378_p0 = scmp.ge.s32.totalorder %s1845_s12, 1  ;;  %s1845_s12 = sphi %s1867_s12, %s13_s12  }
   0x2   : > { %p139_p1 = scmp.lt.s32.totalorder %s1845_s12, 3 }
   0x4   : > { %p140_p2 = pnand %p1378_p0, %p139_p1 }
   0x5   : > { %v1715_v0 = vld [vmem:[%s2151_s1 + $0x40] sm:$0xff] (!%p140_p2)   ;;  %v1719_v4 = vld [vmem:[%s2151_s1 + $0x48] sm:$0xff] (!%p140_p2)   ;;  %v1723_v8 = vld [vmem:[%s2151_s1 + $0x50] sm:$0xff] (!%p140_p2)   ;;  %s1379_s19 = sshll.u32 (!%p140_p2), %s1374_s13, 3 }
   0x6   : > { %143 = sbr.rel (%p140_p2) target bundleno = 323 (0x143), region = 32  ;;  %v1716_v1 = vld [vmem:[%s2151_s1 + $0xc0] sm:$0xff] (!%p140_p2)   ;;  %1494 = vmatprep.subr.bf16.mxu0 (!%p140_p2), %v1715_v0  ;;  %v1720_v5 = vld [vmem:[%s2151_s1 + $0xc8] sm:$0xff] (!%p140_p2)   ;;  %v1724_v9 = vld [vmem:[%s2151_s1 + $0xd0] sm:$0xff] (!%p140_p2)   ;;  %p165_p3 = scmp.lt.s32.totalorder (!%p140_p2), %s1379_s19, 15 }
   0x7   : > { %v1717_v2 = vld [vmem:[%s2151_s1] sm:$0xff] (!%p140_p2)   ;;  %1534 = vmatprep.subr.bf16.mxu1 (!%p140_p2), %v1716_v1  ;;  %v1721_v6 = vld [vmem:[%s2151_s1 + $0x8] sm:$0xff] (!%p140_p2)   ;;  %v1725_v10 = vld [vmem:[%s2151_s1 + $0x10] sm:$0xff] (!%p140_p2)  }
   0x8   : > { %v1718_v3 = vld [vmem:[%s2151_s1 + $0x80] sm:$0xff] (!%p140_p2)   ;;  %1495 = vmatpush3.bf16.msra.mxu0 (!%p140_p2), %v1717_v2  ;;  %v1722_v7 = vld [vmem:[%s2151_s1 + $0x88] sm:$0xff] (!%p140_p2)   ;;  %v1726_v11 = vld [vmem:[%s2151_s1 + $0x90] sm:$0xff] (!%p140_p2)  }
   0x9   : > { %1535 = vmatpush3.bf16.msra.mxu1 (!%p140_p2), %v1718_v3  ;;  %1496 = vmatprep.subr.bf16.mxu0 (!%p140_p2), %v1719_v4  ;;  %v1727_v12 = vld [vmem:[%s2151_s1 + $0x58] sm:$0xff] (!%p140_p2)   ;;  %v1731_v16 = vld [vmem:[%s2151_s1 + $0x60] sm:$0xff] (!%p140_p2)   ;;  %v1735_v20 = vld [vmem:[%s2151_s1 + $0x68] sm:$0xff] (!%p140_p2)  }
   0xa   : > { %1536 = vmatprep.subr.bf16.mxu1 (!%p140_p2), %v1720_v5  ;;  %v1728_v13 = vld [vmem:[%s2151_s1 + $0xd8] sm:$0xff] (!%p140_p2)   ;;  %v1732_v17 = vld [vmem:[%s2151_s1 + $0xe0] sm:$0xff] (!%p140_p2)   ;;  %v1736_v21 = vld [vmem:[%s2151_s1 + $0xe8] sm:$0xff] (!%p140_p2)  }
   0xb   : > { %v1729_v14 = vld [vmem:[%s2151_s1 + $0x18] sm:$0xff] (!%p140_p2)   ;;  %v1733_v18 = vld [vmem:[%s2151_s1 + $0x20] sm:$0xff] (!%p140_p2)   ;;  %v1737_v22 = vld [vmem:[%s2151_s1 + $0x28] sm:$0xff] (!%p140_p2)  }
   0xc   : > { %1497 = vmatpush3.bf16.msra.mxu0 (!%p140_p2), %v1721_v6  ;;  %v1730_v15 = vld [vmem:[%s2151_s1 + $0x98] sm:$0xff] (!%p140_p2)   ;;  %v1734_v19 = vld [vmem:[%s2151_s1 + $0xa0] sm:$0xff] (!%p140_p2)   ;;  %v1738_v23 = vld [vmem:[%s2151_s1 + $0xa8] sm:$0xff] (!%p140_p2)  }
   0xd   : > { %1537 = vmatpush3.bf16.msra.mxu1 %v1722_v7  ;;  %1498 = vmatprep.subr.bf16.mxu0 %v1723_v8  ;;  %s2155_s19 = smov (!%p165_p3, %s1379_s19), 15  ;;  %v1739_v24 = vld [vmem:[%s2151_s1 + $0x70] sm:$0xff]   ;;  %v1743_v28 = vld [vmem:[%s2151_s1 + $0x78] sm:$0xff]   ;;  %v1753_v36 = vld [vmem:[%s2151_s1 + $0x140] sm:$0xff]  }
   0xe   : > { %1538 = vmatprep.subr.bf16.mxu1 %v1724_v9  ;;  %v1740_v25 = vld [vmem:[%s2151_s1 + $0xf0] sm:$0xff]   ;;  %s1706_s16 = smul.u32 36, %s2155_s19  ;;  %v1744_v29 = vld [vmem:[%s2151_s1 + $0xf8] sm:$0xff]   ;;  %v1754_v37 = vld [vmem:[%s2151_s1 + $0x1c0] sm:$0xff]  }
   0xf   : > { %v1741_v26 = vld [vmem:[%s2151_s1 + $0x30] sm:$0xff]   ;;  %v1745_v30 = vld [vmem:[%s2151_s1 + $0x38] sm:$0xff]   ;;  %v1755_v38 = vld [vmem:[%s2151_s1 + $0x100] sm:$0xff]  }
  0x10   : > { %1499 = vmatpush3.bf16.msra.mxu0 %v1725_v10  ;;  %v1742_v27 = vld [vmem:[%s2151_s1 + $0xb0] sm:$0xff]   ;;  %s1973_s13 = scalar_lea.vmem %s2150_s0, %s1706_s16  ;;  %v1746_v31 = vld [vmem:[%s2151_s1 + $0xb8] sm:$0xff]   ;;  %v1756_v39 = vld [vmem:[%s2151_s1 + $0x180] sm:$0xff]  }
  0x11   : > { %1539 = vmatpush3.bf16.msra.mxu1 %v1726_v11  ;;  %1500 = vmatprep.subr.bf16.mxu0 %v1727_v12  ;;  %v1747_v32 = vld [vmem:[%s1973_s13] ss:$36 sps:$4 sm:$0xff]   ;;  %v1750_v34 = vld [vmem:[%s1973_s13 + $0x8] ss:$36 sps:$4 sm:$0xff]   ;;  %v1763_v45 = vld [vmem:[%s1973_s13 + $0x54] ss:$36 sps:$4 sm:$0xff]  }
  0x12   : > { %1540 = vmatprep.subr.bf16.mxu1 %v1728_v13  ;;  %v1749_v33 = vld [vmem:[%s1973_s13 + $0x4] ss:$36 sps:$4 sm:$0xff]   ;;  %v1752_v35 = vld [vmem:[%s1973_s13 + $0xc] ss:$36 sps:$4 sm:$0xff]   ;;  %v1771_v52 = vld [vmem:[%s2151_s1 + $0x158] sm:$0xff]  }
  0x13   : > { %1017 = vmatprep.mubr.bf16.mxu0 %v1749_v33  ;;  %1082 = vmatprep.mubr.bf16.mxu1 %v1752_v35  ;;  %v1757_v40 = vld [vmem:[%s2151_s1 + $0x148] sm:$0xff]   ;;  %v1766_v47 = vld [vmem:[%s1973_s13 + $0x50] ss:$36 sps:$4 sm:$0xff]   ;;  %v1772_v53 = vld [vmem:[%s2151_s1 + $0x1d8] sm:$0xff]  }
  0x14   : > { %1501 = vmatpush3.bf16.msra.mxu0 %v1729_v14  ;;  %v1758_v41 = vld [vmem:[%s2151_s1 + $0x1c8] sm:$0xff]   ;;  %v1767_v48 = vld [vmem:[%s2151_s1 + $0x150] sm:$0xff]   ;;  %v1773_v54 = vld [vmem:[%s2151_s1 + $0x118] sm:$0xff]  }
  0x15   : > { %1541 = vmatpush3.bf16.msra.mxu1 %v1730_v15  ;;  %1502 = vmatprep.subr.bf16.mxu0 %v1731_v16  ;;  %v1759_v42 = vld [vmem:[%s2151_s1 + $0x108] sm:$0xff]   ;;  %v1768_v49 = vld [vmem:[%s2151_s1 + $0x1d0] sm:$0xff]   ;;  %v1774_v55 = vld [vmem:[%s2151_s1 + $0x198] sm:$0xff]  }
  0x16   : > { %1542 = vmatprep.subr.bf16.mxu1 %v1732_v17  ;;  %v1760_v43 = vld [vmem:[%s2151_s1 + $0x188] sm:$0xff]   ;;  %v1769_v50 = vld [vmem:[%s2151_s1 + $0x110] sm:$0xff]   ;;  %v1777_v57 = vld [vmem:[%s1973_s13 + $0x9c] ss:$36 sps:$4 sm:$0xff]  }
  0x17   : > { %v1761_v44 = vld [vmem:[%s1973_s13 + $0x4c] ss:$36 sps:$4 sm:$0xff]   ;;  %v1775_v56 = vld [vmem:[%s1973_s13 + $0x94] ss:$36 sps:$4 sm:$0xff]   ;;  %v1781_v60 = vld [vmem:[%s2151_s1 + $0x160] sm:$0xff]  }
  0x18   : > { %1503 = vmatpush3.bf16.msra.mxu0 %v1733_v18  ;;  %v1765_v46 = vld [vmem:[%s1973_s13 + $0x48] ss:$36 sps:$4 sm:$0xff]   ;;  %v1770_v51 = vld [vmem:[%s2151_s1 + $0x190] sm:$0xff]   ;;  %v1780_v59 = vld [vmem:[%s1973_s13 + $0x98] ss:$36 sps:$4 sm:$0xff]  }
  0x19   : > { %1543 = vmatpush3.bf16.msra.mxu1 %v1734_v19  ;;  %1504 = vmatprep.subr.bf16.mxu0 %v1735_v20  ;;  %v1779_v58 = vld [vmem:[%s1973_s13 + $0x90] ss:$36 sps:$4 sm:$0xff]   ;;  %v1782_v61 = vld [vmem:[%s2151_s1 + $0x1e0] sm:$0xff]   ;;  %v1785_v0 = vld [vmem:[%s2151_s1 + $0x168] sm:$0xff]  }
  0x1a   : > { %1544 = vmatprep.subr.bf16.mxu1 %v1736_v21  ;;  %v1783_v62 = vld [vmem:[%s2151_s1 + $0x120] sm:$0xff]   ;;  %v1786_v1 = vld [vmem:[%s2151_s1 + $0x1e8] sm:$0xff]   ;;  %v1793_v6 = vld [vmem:[%s1973_s13 + $0xd8] ss:$36 sps:$4 sm:$0xff]  }
  0x1b   : > { %v1784_v63 = vld [vmem:[%s2151_s1 + $0x1a0] sm:$0xff]   ;;  %v1787_v2 = vld [vmem:[%s2151_s1 + $0x128] sm:$0xff]   ;;  %v1795_v8 = vld [vmem:[%s2151_s1 + $0x170] sm:$0xff]  }
  0x1c   : > { %1505 = vmatpush3.bf16.msra.mxu0 %v1737_v22  ;;  %v1788_v3 = vld [vmem:[%s2151_s1 + $0x1a8] sm:$0xff]   ;;  %v1789_v4 = vld [vmem:[%s1973_s13 + $0xdc] ss:$36 sps:$4 sm:$0xff]   ;;  %v1796_v9 = vld [vmem:[%s2151_s1 + $0x1f0] sm:$0xff]  }
  0x1d   : > { %1545 = vmatpush3.bf16.msra.mxu1 %v1738_v23  ;;  %1506 = vmatprep.subr.bf16.mxu0 %v1739_v24  ;;  %v1791_v5 = vld [vmem:[%s1973_s13 + $0xe4] ss:$36 sps:$4 sm:$0xff]   ;;  %v1797_v10 = vld [vmem:[%s2151_s1 + $0x130] sm:$0xff]   ;;  %v1799_v12 = vld [vmem:[%s2151_s1 + $0x178] sm:$0xff]  }
  0x1e   : > { %1546 = vmatprep.subr.bf16.mxu1 %v1740_v25  ;;  %v1794_v7 = vld [vmem:[%s1973_s13 + $0xe0] ss:$36 sps:$4 sm:$0xff]   ;;  %v1798_v11 = vld [vmem:[%s2151_s1 + $0x1b0] sm:$0xff]   ;;  %v1800_v13 = vld [vmem:[%s2151_s1 + $0x1f8] sm:$0xff]  }
  0x1f   : > { %v1801_v14 = vld [vmem:[%s2151_s1 + $0x138] sm:$0xff]   ;;  %v1803_v16 = vld [vmem:[%s1973_s13 + $0x10] ss:$36 sps:$4 sm:$0xff]   ;;  %v1809_v20 = vld [vmem:[%s2151_s1 + $0x200] sm:$0xff]  }
  0x20   : > { %1507 = vmatpush3.bf16.msra.mxu0 %v1741_v26  ;;  %v1802_v15 = vld [vmem:[%s2151_s1 + $0x1b8] sm:$0xff]   ;;  %v1810_v21 = vld [vmem:[%s2151_s1 + $0x208] sm:$0xff]   ;;  %v1816_v25 = vld [vmem:[%s1973_s13 + $0x60] ss:$36 sps:$4 sm:$0xff]  }
  0x21   : > { %1547 = vmatpush3.bf16.msra.mxu1 %v1742_v27  ;;  %1508 = vmatprep.subr.bf16.mxu0 %v1743_v28  ;;  %v1805_v17 = vld [vmem:[%s1973_s13 + $0x14] ss:$36 sps:$4 sm:$0xff]   ;;  %v1808_v19 = vld [vmem:[%s1973_s13 + $0x1c] ss:$36 sps:$4 sm:$0xff]   ;;  %v1813_v23 = vld [vmem:[%s1973_s13 + $0x64] ss:$36 sps:$4 sm:$0xff]  }
  0x22   : > { %1548 = vmatprep.subr.bf16.mxu1 %v1744_v29  ;;  %v1806_v18 = vld [vmem:[%s1973_s13 + $0x18] ss:$36 sps:$4 sm:$0xff]   ;;  %v1817_v26 = vld [vmem:[%s2151_s1 + $0x210] sm:$0xff]   ;;  %v1819_v27 = vld [vmem:[%s1973_s13 + $0xa4] ss:$36 sps:$4 sm:$0xff]  }
  0x23   : > { %v1811_v22 = vld [vmem:[%s1973_s13 + $0x5c] ss:$36 sps:$4 sm:$0xff]   ;;  %v1821_v28 = vld [vmem:[%s1973_s13 + $0xac] ss:$36 sps:$4 sm:$0xff]  }
  0x24   : > { %1509 = vmatpush3.bf16.msra.mxu0 %v1745_v30  ;;  %v1815_v24 = vld [vmem:[%s1973_s13 + $0x58] ss:$36 sps:$4 sm:$0xff]   ;;  %v1823_v30 = vld [vmem:[%s1973_s13 + $0xa0] ss:$36 sps:$4 sm:$0xff]   ;;  %v1827_v33 = vld [vmem:[%s1973_s13 + $0xec] ss:$36 sps:$4 sm:$0xff]  }
  0x25   : > { %1549 = vmatpush3.bf16.msra.mxu1 %v1746_v31  ;;  %1574 = vmatprep.subr.bf16.mxu0 %v1753_v36  ;;  %v1818_v29 = vld [vmem:[%s2151_s1 + $0x218] sm:$0xff]   ;;  %v1824_v31 = vld [vmem:[%s1973_s13 + $0xa8] ss:$36 sps:$4 sm:$0xff]  }
  0x26   : > { %1614 = vmatprep.subr.bf16.mxu1 %v1754_v37  ;;  %v1826_v35 = vld [vmem:[%s2151_s1 + $0x228] sm:$0xff]   ;;  %v1833_v37 = vld [vmem:[%s2151_s1 + $0x230] sm:$0xff]  }
  0x27   : > { %1018 = vmatmul.mubr.bf16.vlgmr.msra.gmra.mrb[0].mxu0 %v1747_v32  ;;  %v1825_v32 = vld [vmem:[%s2151_s1 + $0x220] sm:$0xff]   ;;  %v1831_v36 = vld [vmem:[%s1973_s13 + $0xe8] ss:$36 sps:$4 sm:$0xff]  }
  0x28   : > { %1083 = vmatmul.mubr.bf16.vlgmr.msra.gmra.mrb[0].mxu1 %v1750_v34  ;;  %1575 = vmatpush3.bf16.msra.mxu0 %v1755_v38  ;;  %v1829_v34 = vld [vmem:[%s1973_s13 + $0xf4] ss:$36 sps:$4 sm:$0xff]  }
  0x29   : > { %1615 = vmatpush3.bf16.msra.mxu1 %v1756_v39  ;;  %1576 = vmatprep.subr.bf16.mxu0 %v1757_v40  ;;  %v1832_v38 = vld [vmem:[%s1973_s13 + $0xf0] ss:$36 sps:$4 sm:$0xff]   ;;  %v1835_v39 = vld [vmem:[%s1973_s13 + $0x20] ss:$36 sps:$4 sm:$0xff]  }
  0x2a   : > { %1616 = vmatprep.subr.bf16.mxu1 %v1758_v41  ;;  %1025 = vmatprep.mubr.bf16.mxu0 %v1761_v44  ;;  %v1836_v40 = vld [vmem:[%s1973_s13 + $0xb0] ss:$36 sps:$4 sm:$0xff]   ;;  %v1834_v41 = vld [vmem:[%s2151_s1 + $0x238] sm:$0xff]  }
  0x2b   : > { %1090 = vmatprep.mubr.bf16.mxu1 %v1763_v45 }
  0x2c   : > { %1577 = vmatpush3.bf16.msra.mxu0 %v1759_v42  ;;  %v1837_v42 = vld [vmem:[%s1973_s13 + $0x68] ss:$36 sps:$4 sm:$0xff]  }
  0x2d   : > { %1617 = vmatpush3.bf16.msra.mxu1 %v1760_v43  ;;  %1578 = vmatprep.subr.bf16.mxu0 %v1767_v48  ;;  %v1838_v43 = vld [vmem:[%s1973_s13 + $0xf8] ss:$36 sps:$4 sm:$0xff]   ;;  %s1382_s13 = sshll.u32 %s2155_s19, 3 }
  0x2e   : > { %1618 = vmatprep.subr.bf16.mxu1 %v1768_v49  ;;  %s175_s20 = scalar_lea.vmem %s2153_s3, %s1382_s13 }
  0x2f   : > { %1026 = vmatmul.mubr.bf16.gmra.mrb[4].mxu0 %v1765_v46  ;;  %v1383_v46 = vld [vmem:[%s2152_s2] ss:$0 sm:$0xff] }
  0x30   : > { %1091 = vmatmul.mubr.bf16.gmra.mrb[4].mxu1 %v1766_v47  ;;  %1579 = vmatpush3.bf16.msra.mxu0 %v1769_v50 }
  0x31   : > { %1619 = vmatpush3.bf16.msra.mxu1 %v1770_v51  ;;  %1580 = vmatprep.subr.bf16.mxu0 %v1771_v52 }
  0x32   : > { %1620 = vmatprep.subr.bf16.mxu1 %v1772_v53  ;;  %1033 = vmatprep.mubr.bf16.mxu0 %v1775_v56 }
  0x33   : > { %1098 = vmatprep.mubr.bf16.mxu1 %v1777_v57 }
  0x34   : > { %1581 = vmatpush3.bf16.msra.mxu0 %v1773_v54 }
  0x35   : > { %1621 = vmatpush3.bf16.msra.mxu1 %v1774_v55  ;;  %1582 = vmatprep.subr.bf16.mxu0 %v1781_v60 }
  0x36   : > { %1622 = vmatprep.subr.bf16.mxu1 %v1782_v61 }
  0x37   : > { %1034 = vmatmul.mubr.bf16.gmra.mrb[8].mxu0 %v1779_v58 }
  0x38   : > { %1099 = vmatmul.mubr.bf16.gmra.mrb[8].mxu1 %v1780_v59  ;;  %1583 = vmatpush3.bf16.msra.mxu0 %v1783_v62 }
  0x39   : > { %1623 = vmatpush3.bf16.msra.mxu1 %v1784_v63  ;;  %1584 = vmatprep.subr.bf16.mxu0 %v1785_v0 }
  0x3a   : > { %1624 = vmatprep.subr.bf16.mxu1 %v1786_v1  ;;  %1041 = vmatprep.mubr.bf16.mxu0 %v1789_v4 }
  0x3b   : > { %1106 = vmatprep.mubr.bf16.mxu1 %v1791_v5 }
  0x3c   : > { %1585 = vmatpush3.bf16.msra.mxu0 %v1787_v2 }
  0x3d   : > { %1625 = vmatpush3.bf16.msra.mxu1 %v1788_v3  ;;  %1586 = vmatprep.subr.bf16.mxu0 %v1795_v8 }
  0x3e   : > { %1626 = vmatprep.subr.bf16.mxu1 %v1796_v9 }
  0x3f   : > { %1042 = vmatmul.mubr.bf16.gmra.mrb[12].mxu0 %v1793_v6 }
  0x40   : > { %1107 = vmatmul.mubr.bf16.gmra.mrb[12].mxu1 %v1794_v7  ;;  %1587 = vmatpush3.bf16.msra.mxu0 %v1797_v10 }
  0x41   : > { %1627 = vmatpush3.bf16.msra.mxu1 %v1798_v11  ;;  %1588 = vmatprep.subr.bf16.mxu0 %v1799_v12 }
  0x42   : > { %1628 = vmatprep.subr.bf16.mxu1 %v1800_v13  ;;  %1147 = vmatprep.mubr.bf16.mxu0 %v1805_v17 }
  0x43   : > { %1212 = vmatprep.mubr.bf16.mxu1 %v1808_v19 }
  0x44   : > { %1589 = vmatpush3.bf16.msra.mxu0 %v1801_v14 }
  0x45   : > { %1629 = vmatpush3.bf16.msra.mxu1 %v1802_v15  ;;  %1666 = vmatprep.subr.bf16.mxu0 %v1809_v20 }
  0x46   : > { %1690 = vmatprep.subr.bf16.mxu1 %v1809_v20 }
  0x47   : > { %1148 = vmatmul.mubr.bf16.vlgmr.msra.gmra.mrb[16].mxu0 %v1803_v16 }
  0x48   : > { %1213 = vmatmul.mubr.bf16.vlgmr.msra.gmra.mrb[16].mxu1 %v1806_v18  ;;  %1667 = vmatpush3.bf16.msra.mxu0 %v1809_v20 }
  0x49   : > { %1698 = vmatpush3.bf16.msra.mxu1 %v1809_v20  ;;  %1668 = vmatprep.subr.bf16.mxu0 %v1810_v21 }
  0x4a   : > { %1691 = vmatprep.subr.bf16.mxu1 %v1810_v21  ;;  %1155 = vmatprep.mubr.bf16.mxu0 %v1811_v22 }
  0x4b   : > { %1220 = vmatprep.mubr.bf16.mxu1 %v1813_v23 }
  0x4c   : > { %1669 = vmatpush3.bf16.msra.mxu0 %v1810_v21 }
  0x4d   : > { %1699 = vmatpush3.bf16.msra.mxu1 %v1810_v21  ;;  %1670 = vmatprep.subr.bf16.mxu0 %v1817_v26 }
  0x4e   : > { %1692 = vmatprep.subr.bf16.mxu1 %v1817_v26 }
  0x4f   : > { %1156 = vmatmul.mubr.bf16.gmra.mrb[20].mxu0 %v1815_v24 }
  0x50   : > { %1221 = vmatmul.mubr.bf16.gmra.mrb[20].mxu1 %v1816_v25  ;;  %1163 = vmatprep.mubr.bf16.mxu0 %v1819_v27 }
  0x51   : > { %1671 = vmatpush3.bf16.msra.mxu0 %v1817_v26  ;;  %1228 = vmatprep.mubr.bf16.mxu1 %v1821_v28 }
  0x52   : > { %1700 = vmatpush3.bf16.msra.mxu1 %v1817_v26  ;;  %1672 = vmatprep.subr.bf16.mxu0 %v1818_v29 }
  0x53   : > { %1693 = vmatprep.subr.bf16.mxu1 %v1818_v29 }
  0x55   : > { %1673 = vmatpush3.bf16.msra.mxu0 %v1818_v29 }
  0x56   : > { %1701 = vmatpush3.bf16.msra.mxu1 %v1818_v29  ;;  %1674 = vmatprep.subr.bf16.mxu0 %v1825_v32 }
  0x57   : > { %1164 = vmatmul.mubr.bf16.gmra.mrb[24].mxu0 %v1823_v30  ;;  %1694 = vmatprep.subr.bf16.mxu1 %v1825_v32 }
  0x58   : > { %1229 = vmatmul.mubr.bf16.gmra.mrb[24].mxu1 %v1824_v31  ;;  %1171 = vmatprep.mubr.bf16.mxu0 %v1827_v33 }
  0x59   : > { %1675 = vmatpush3.bf16.msra.mxu0 %v1825_v32  ;;  %1236 = vmatprep.mubr.bf16.mxu1 %v1829_v34 }
  0x5a   : > { %1702 = vmatpush3.bf16.msra.mxu1 %v1825_v32  ;;  %1676 = vmatprep.subr.bf16.mxu0 %v1826_v35 }
  0x5b   : > { %1695 = vmatprep.subr.bf16.mxu1 %v1826_v35 }
  0x5d   : > { %1677 = vmatpush3.bf16.msra.mxu0 %v1826_v35 }
  0x5e   : > { %1703 = vmatpush3.bf16.msra.mxu1 %v1826_v35  ;;  %1678 = vmatprep.subr.bf16.mxu0 %v1833_v37 }
  0x5f   : > { %1172 = vmatmul.mubr.bf16.gmra.mrb[28].mxu0 %v1831_v36  ;;  %1696 = vmatprep.subr.bf16.mxu1 %v1833_v37 }
  0x60   : > { %1237 = vmatmul.mubr.bf16.gmra.mrb[28].mxu1 %v1832_v38  ;;  %1682 = vmatprep.mubr.bf16.mxu0 %v1835_v39 }
  0x61   : > { %1679 = vmatpush3.bf16.msra.mxu0 %v1833_v37  ;;  %1686 = vmatprep.mubr.bf16.mxu1 %v1836_v40 }
  0x62   : > { %1704 = vmatpush3.bf16.msra.mxu1 %v1833_v37  ;;  %1680 = vmatprep.subr.bf16.mxu0 %v1834_v41 }
  0x63   : > { %1697 = vmatprep.subr.bf16.mxu1 %v1834_v41 }
  0x65   : > { %1681 = vmatpush3.bf16.msra.mxu0 %v1834_v41 }
  0x66   : > { %1705 = vmatpush3.bf16.msra.mxu1 %v1834_v41 }
  0x68   : > { %1683 = vmatmul.mubr.bf16.vlgmr.msra.gmra.mrb[32].mxu0 %v1837_v42 }
  0x69   : > { %1687 = vmatmul.mubr.bf16.vlgmr.msra.gmra.mrb[32].mxu1 %v1838_v43 }
  0xfa   : > { %v1510_v44 = vpop.f32.mrb[0].mxu0 }
  0xfb   : > { %v1550_v45 = vpop.f32.mrb[0].mxu1  ;;  %v1511_v47 = vpop.f32.mrb[1].mxu0 }
  0xfc   : > { %v1512_v48 = vadd.f32 %v1511_v47, %v1510_v44  ;;  %v1551_v49 = vpop.f32.mrb[1].mxu1  ;;  %v1513_v50 = vpop.f32.mrb[2].mxu0 }
  0xfd   : > { %v1552_v51 = vadd.f32 %v1551_v49, %v1550_v45  ;;  %v1553_v52 = vpop.f32.mrb[2].mxu1  ;;  %v1514_v53 = vpop.f32.mrb[3].mxu0 }
  0xfe   : > { %v1020_v54 = vadd.f32 %v1512_v48, %v1383_v46  ;;  %v1515_v55 = vadd.f32 %v1514_v53, %v1513_v50  ;;  %v1554_v56 = vpop.f32.mrb[3].mxu1 }
  0xff   : > { %v1555_v57 = vadd.f32 %v1554_v56, %v1553_v52 }
 0x100   : > { %v1085_v58 = vadd.f32 %v1552_v51, %v1020_v54  ;;  %v1023_v59 = vadd.f32 %v1515_v55, %v1383_v46 }
 0x102   : > { %v1088_v60 = vadd.f32 %v1555_v57, %v1023_v59  ;;  %v1516_v61 = vpop.f32.mrb[4].mxu0 }
 0x103   : > { %v1556_v62 = vpop.f32.mrb[4].mxu1  ;;  %v1517_v63 = vpop.f32.mrb[5].mxu0 }
 0x104   : > { %v1518_v0 = vadd.f32 %v1517_v63, %v1516_v61  ;;  %v1557_v1 = vpop.f32.mrb[5].mxu1  ;;  %v1519_v2 = vpop.f32.mrb[6].mxu0 }
 0x105   : > { %v1558_v3 = vadd.f32 %v1557_v1, %v1556_v62  ;;  %v1559_v4 = vpop.f32.mrb[6].mxu1  ;;  %v1520_v5 = vpop.f32.mrb[7].mxu0 }
 0x106   : > { %v1028_v6 = vadd.f32 %v1518_v0, %v1383_v46  ;;  %v1521_v7 = vadd.f32 %v1520_v5, %v1519_v2  ;;  %v1560_v8 = vpop.f32.mrb[7].mxu1 }
 0x107   : > { %v1561_v9 = vadd.f32 %v1560_v8, %v1559_v4 }
 0x108   : > { %v1093_v10 = vadd.f32 %v1558_v3, %v1028_v6  ;;  %v1031_v11 = vadd.f32 %v1521_v7, %v1383_v46 }
 0x10a   : > { %v1096_v12 = vadd.f32 %v1561_v9, %v1031_v11  ;;  %v1522_v13 = vpop.f32.mrb[8].mxu0 }
 0x10b   : > { %v1562_v14 = vpop.f32.mrb[8].mxu1  ;;  %v1523_v15 = vpop.f32.mrb[9].mxu0 }
 0x10c   : > { %v1524_v16 = vadd.f32 %v1523_v15, %v1522_v13  ;;  %v1563_v17 = vpop.f32.mrb[9].mxu1  ;;  %v1525_v18 = vpop.f32.mrb[10].mxu0 }
 0x10d   : > { %v1564_v19 = vadd.f32 %v1563_v17, %v1562_v14  ;;  %v1565_v20 = vpop.f32.mrb[10].mxu1  ;;  %v1526_v21 = vpop.f32.mrb[11].mxu0 }
 0x10e   : > { %v1036_v22 = vadd.f32 %v1524_v16, %v1383_v46  ;;  %v1527_v23 = vadd.f32 %v1526_v21, %v1525_v18  ;;  %v1566_v24 = vpop.f32.mrb[11].mxu1 }
 0x10f   : > { %v1567_v25 = vadd.f32 %v1566_v24, %v1565_v20 }
 0x110   : > { %v1101_v26 = vadd.f32 %v1564_v19, %v1036_v22  ;;  %v1039_v27 = vadd.f32 %v1527_v23, %v1383_v46 }
 0x112   : > { %v1104_v28 = vadd.f32 %v1567_v25, %v1039_v27  ;;  %v1528_v29 = vpop.f32.mrb[12].mxu0 }
 0x113   : > { %v1568_v30 = vpop.f32.mrb[12].mxu1  ;;  %v1529_v31 = vpop.f32.mrb[13].mxu0 }
 0x114   : > { %v1569_v32 = vpop.f32.mrb[13].mxu1  ;;  %v1530_v33 = vadd.f32 %v1529_v31, %v1528_v29  ;;  %v1531_v35 = vpop.f32.mrb[14].mxu0 }
 0x115   : > { %v1570_v34 = vadd.f32 %v1569_v32, %v1568_v30  ;;  %v1571_v36 = vpop.f32.mrb[14].mxu1  ;;  %v1532_v37 = vpop.f32.mrb[15].mxu0 }
 0x116   : > { %v1572_v38 = vpop.f32.mrb[15].mxu1  ;;  %v1044_v39 = vadd.f32 %v1530_v33, %v1383_v46  ;;  %v1533_v40 = vadd.f32 %v1532_v37, %v1531_v35 }
 0x117   : > { %v1573_v41 = vadd.f32 %v1572_v38, %v1571_v36 }
 0x118   : > { %v1109_v42 = vadd.f32 %v1570_v34, %v1044_v39  ;;  %v1047_v43 = vadd.f32 %v1533_v40, %v1383_v46 }
 0x11a   : > { %v1112_v44 = vadd.f32 %v1573_v41, %v1047_v43  ;;  %v1590_v45 = vpop.f32.mrb[16].mxu0 }
 0x11b   : > { %v1591_v47 = vpop.f32.mrb[17].mxu0  ;;  %v1630_v48 = vpop.f32.mrb[16].mxu1 }
 0x11c   : > { %v1592_v49 = vadd.f32 %v1591_v47, %v1590_v45  ;;  %v1593_v50 = vpop.f32.mrb[18].mxu0  ;;  %v1631_v51 = vpop.f32.mrb[17].mxu1 }
 0x11d   : > { %v1594_v52 = vpop.f32.mrb[19].mxu0  ;;  %v1632_v54 = vadd.f32 %v1631_v51, %v1630_v48  ;;  %v1633_v55 = vpop.f32.mrb[18].mxu1 }
 0x11e   : > { %v1150_v53 = vadd.f32 %v1592_v49, %v1085_v58  ;;  %v1595_v56 = vadd.f32 %v1594_v52, %v1593_v50  ;;  %v1634_v57 = vpop.f32.mrb[19].mxu1 }
 0x11f   : > { %v1635_v61 = vadd.f32 %v1634_v57, %v1633_v55 }
 0x120   : > { %v1153_v59 = vadd.f32 %v1595_v56, %v1088_v60  ;;  %v1215_v62 = vadd.f32 %v1632_v54, %v1150_v53 }
 0x122   : > { %v1596_v63 = vpop.f32.mrb[20].mxu0  ;;  %v2140_v0 = vadd.f32 %v1635_v61, %v1153_v59 }
 0x123   : > { %v1597_v46 = vpop.f32.mrb[21].mxu0  ;;  %v1636_v1 = vpop.f32.mrb[20].mxu1 }
 0x124   : > { %v1598_v2 = vadd.f32 %v1597_v46, %v1596_v63  ;;  %v1599_v3 = vpop.f32.mrb[22].mxu0  ;;  %v1637_v4 = vpop.f32.mrb[21].mxu1 }
 0x125   : > { %v1600_v5 = vpop.f32.mrb[23].mxu0  ;;  %v1638_v7 = vadd.f32 %v1637_v4, %v1636_v1  ;;  %v1639_v8 = vpop.f32.mrb[22].mxu1 }
 0x126   : > { %v1158_v6 = vadd.f32 %v1598_v2, %v1093_v10  ;;  %v1601_v58 = vadd.f32 %v1600_v5, %v1599_v3  ;;  %v1640_v9 = vpop.f32.mrb[23].mxu1 }
 0x127   : > { %v1641_v13 = vadd.f32 %v1640_v9, %v1639_v8 }
 0x128   : > { %v1161_v11 = vadd.f32 %v1601_v58, %v1096_v12  ;;  %v1223_v14 = vadd.f32 %v1638_v7, %v1158_v6 }
 0x12a   : > { %v1602_v60 = vpop.f32.mrb[24].mxu0  ;;  %v1226_v15 = vadd.f32 %v1641_v13, %v1161_v11 }
 0x12b   : > { %v1603_v16 = vpop.f32.mrb[25].mxu0  ;;  %v1642_v17 = vpop.f32.mrb[24].mxu1 }
 0x12c   : > { %v1604_v18 = vadd.f32 %v1603_v16, %v1602_v60  ;;  %v1605_v19 = vpop.f32.mrb[26].mxu0  ;;  %v1643_v20 = vpop.f32.mrb[25].mxu1 }
 0x12d   : > { %v1606_v21 = vpop.f32.mrb[27].mxu0  ;;  %v1644_v23 = vadd.f32 %v1643_v20, %v1642_v17  ;;  %v1645_v24 = vpop.f32.mrb[26].mxu1 }
 0x12e   : > { %v1166_v22 = vadd.f32 %v1604_v18, %v1101_v26  ;;  %v1607_v25 = vadd.f32 %v1606_v21, %v1605_v19  ;;  %v1646_v10 = vpop.f32.mrb[27].mxu1 }
 0x12f   : > { %v1647_v29 = vadd.f32 %v1646_v10, %v1645_v24 }
 0x130   : > { %v1169_v27 = vadd.f32 %v1607_v25, %v1104_v28  ;;  %v1231_v30 = vadd.f32 %v1644_v23, %v1166_v22 }
 0x132   : > { %v1608_v31 = vpop.f32.mrb[28].mxu0  ;;  %v1234_v12 = vadd.f32 %v1647_v29, %v1169_v27 }
 0x133   : > { %v1609_v32 = vpop.f32.mrb[29].mxu0  ;;  %v1648_v33 = vpop.f32.mrb[28].mxu1 }
 0x134   : > { %v1610_v34 = vadd.f32 %v1609_v32, %v1608_v31  ;;  %v1611_v35 = vpop.f32.mrb[30].mxu0  ;;  %v1649_v36 = vpop.f32.mrb[29].mxu1 }
 0x135   : > { %v1612_v37 = vpop.f32.mrb[31].mxu0  ;;  %v1650_v39 = vadd.f32 %v1649_v36, %v1648_v33  ;;  %v1651_v40 = vpop.f32.mrb[30].mxu1 }
 0x136   : > { %v1174_v38 = vadd.f32 %v1610_v34, %v1109_v42  ;;  %v1613_v26 = vadd.f32 %v1612_v37, %v1611_v35  ;;  %v1652_v41 = vpop.f32.mrb[31].mxu1 }
 0x137   : > { %v1653_v45 = vadd.f32 %v1652_v41, %v1651_v40 }
 0x138   : > { %v1177_v43 = vadd.f32 %v1613_v26, %v1112_v44  ;;  %v1239_v47 = vadd.f32 %v1650_v39, %v1174_v38 }
 0x13a   : > { %v1242_v28 = vadd.f32 %v1653_v45, %v1177_v43 }
 0x13b   : > { %v1684_v48 = vpop.f32.mrb[32].mxu0 }
 0x13c   : > { %v1288_v49 = vadd.f32 %v1684_v48, %v1223_v14  ;;  %v1688_v50 = vpop.f32.mrb[32].mxu1  ;;  %v1279_v51 = vpop.f32.mrb[33].mxu0 }
 0x13d   : > { %v1304_v52 = vadd.f32 %v1688_v50, %v1239_v47  ;;  %v1280_v53 = vadd.f32 %v1279_v51, %v1215_v62  ;;  %v1295_v42 = vpop.f32.mrb[33].mxu1  ;;  %v1685_v54 = vpop.f32.mrb[34].mxu0 }
 0x13e   : > { %1312 = vst [vmem:[%s175_s20 + $0x10] sm:$0xff] %v1288_v49  ;;  %v1296_v55 = vadd.f32 %v1295_v42, %v1231_v30  ;;  %v1291_v56 = vadd.f32 %v1685_v54, %v1226_v15  ;;  %v1689_v44 = vpop.f32.mrb[34].mxu1  ;;  %v1282_v57 = vpop.f32.mrb[35].mxu0 }
 0x13f   : > { %1316 = vst [vmem:[%s175_s20 + $0x30] sm:$0xff] %v1304_v52  ;;  %1310 = vst [vmem:[%s175_s20] sm:$0xff] %v1280_v53  ;;  %v1307_v59 = vadd.f32 %v1689_v44, %v1242_v28  ;;  %v1283_v61 = vadd.f32 %v1282_v57, %v2140_v0  ;;  %v1298_v63 = vpop.f32.mrb[35].mxu1 }
 0x140   : > { %1314 = vst [vmem:[%s175_s20 + $0x20] sm:$0xff] %v1296_v55  ;;  %1313 = vst [vmem:[%s175_s20 + $0x18] sm:$0xff] %v1291_v56  ;;  %v1299_v46 = vadd.f32 %v1298_v63, %v1234_v12 }
 0x141   : > { %1317 = vst [vmem:[%s175_s20 + $0x38] sm:$0xff] %v1307_v59  ;;  %1311 = vst [vmem:[%s175_s20 + $0x8] sm:$0xff] %v1283_v61 }
 0x142   : > { %1315 = vst [vmem:[%s175_s20 + $0x28] sm:$0xff] %v1299_v46 }
 0x143 PF: > { %s13_s12 = sadd.s32 1, %s1845_s12  }
 0x144   : > { %p10_p4 = scmp.ge.s32.totalorder %s13_s12, 4  }
 0x146   :  { %12 = sbr.rel (!%p10_p4) target bundleno = 1 (0x1), region = 62 }

// kernel: sepconvgru2_forward.21
= control target key start
LH: loop header
LB: loop body
LE: loop exit
PB: predicated region body
PF: predicated region fallthrough
CT: control target
= control target key end

     0   :  { %s1278_s21 = smov 0   ;;  %s1427_s0 = inlined_call_operand.vmem [shape: f32[2,16,128], index: 0, kind: input, shape index: {}]   ;;  %s1428_s1 = inlined_call_operand.vmem [shape: f32[1,128], index: 1, kind: input, shape index: {}]   ;;  %s1429_s2 = inlined_call_operand.vmem [shape: f32[1,128], index: 2, kind: input, shape index: {}]   ;;  %s1430_s3 = inlined_call_operand.vmem [shape: f32[128,16], index: 3, kind: input, shape index: {}]   ;;  %s1431_s4 = inlined_call_operand.vmem [shape: f32[16,128], index: 4, kind: input, shape index: {}]   ;;  %s1432_s5 = inlined_call_operand.vmem [shape: f32[4,4,16], index: 5, kind: input, shape index: {}]   ;;  %s1433_s6 = inlined_call_operand.vmem [shape: bf16[2,4,128], index: 6, kind: output, shape index: {}]  }
   0x1 LB: > { %s967_s22 = sadd.s32 4294967295, %s1238_s21   ;;  %p971_p0 = scmp.ge.s32.totalorder %s1238_s21, 1  ;;  %s1238_s21 = sphi %s1278_s21, %s16_s21  }
   0x2   : > { %p212_p1 = scmp.lt.s32.totalorder %s1238_s21, 3 }
   0x4   : > { %p213_p2 = pnand %p971_p0, %p212_p1 }
   0x5   : > { %v252_v0 = vld [vmem:[%s1430_s3] sm:$0xff] (!%p213_p2)  ;;  %v253_v1 = vld [vmem:[%s1430_s3 + $0x8] sm:$0xff] (!%p213_p2)  ;;  %v254_v2 = vld [vmem:[%s1430_s3 + $0x10] sm:$0xff] (!%p213_p2)  ;;  %v1240_v3 = vmov (!%p213_p2), 0.0|0.0   ;;  %p241_p3 = scmp.lt.s32.totalorder (!%p213_p2), %s967_s22, 1  ;;  %vm1241_vm0 = vmmov (!%p213_p2), 0   ;;  %v580_v58 = vlaneseq (!%p213_p2) }
   0x6   : > { %216 = sbr.rel (%p213_p2) target bundleno = 720 (0x2d0), region = 44  ;;  %1153 = vmatprep.subr.bf16.mxu0 (!%p213_p2), %v1240_v3  ;;  %v1154_v4 = vpack.c.bf16 (!%p213_p2), %v253_v1, %v252_v0  ;;  %1177 = vmatprep.subr.bf16.mxu1 (!%p213_p2), %v1240_v3  ;;  %v255_v5 = vld [vmem:[%s1430_s3 + $0x18] sm:$0xff] (!%p213_p2)  ;;  %v1242_v6 = vmov (!%p213_p2), 0.0   ;;  %v256_v8 = vld [vmem:[%s1430_s3 + $0x20] sm:$0xff] (!%p213_p2)  ;;  %v257_v9 = vld [vmem:[%s1430_s3 + $0x28] sm:$0xff] (!%p213_p2)  ;;  %vm432_vm1 = vcmask (!%p213_p2), 130048  }
   0x7   : > { %1073 = vmatprep.mubr.msk.f32.mxu0 (!%p213_p2), %vm1241_vm0, %v1242_v6  ;;  %1108 = vmatprep.mubr.msk.f32.mxu1 (!%p213_p2), %vm1241_vm0, %v1242_v6  ;;  %v1157_v7 = vpack.c.bf16 (!%p213_p2), %v255_v5, %v254_v2  ;;  %v1160_v10 = vpack.c.bf16 (!%p213_p2), %v257_v9, %v256_v8  ;;  %v258_v13 = vld [vmem:[%s1430_s3 + $0x30] sm:$0xff] (!%p213_p2)  ;;  %v259_v14 = vld [vmem:[%s1430_s3 + $0x38] sm:$0xff] (!%p213_p2)  ;;  %v260_v21 = vld [vmem:[%s1430_s3 + $0x40] sm:$0xff] (!%p213_p2)  ;;  %v581_v62 = vshrl.u32 (!%p213_p2), %v580_v58, 7 }
   0x8   : > { %1155 = vmatpush3.bf16.msra.mxu0 (!%p213_p2), %v1154_v4  ;;  %1179 = vmatpush3.bf16.msra.mxu1 (!%p213_p2), %v1154_v4  ;;  %v1163_v20 = vpack.c.bf16 (!%p213_p2), %v259_v14, %v258_v13  ;;  %v261_v22 = vld [vmem:[%s1430_s3 + $0x48] sm:$0xff] (!%p213_p2)  ;;  %v262_v27 = vld [vmem:[%s1430_s3 + $0x50] sm:$0xff] (!%p213_p2)  ;;  %v263_v28 = vld [vmem:[%s1430_s3 + $0x58] sm:$0xff] (!%p213_p2) }
   0x9   : > { %1156 = vmatprep.subr.bf16.mxu0 (!%p213_p2), %v1240_v3  ;;  %1180 = vmatprep.subr.bf16.mxu1 (!%p213_p2), %v1240_v3  ;;  %v1166_v26 = vpack.c.bf16 (!%p213_p2), %v261_v22, %v260_v21  ;;  %v1169_v31 = vpack.c.bf16 (!%p213_p2), %v263_v28, %v262_v27  ;;  %v264_v32 = vld [vmem:[%s1430_s3 + $0x60] sm:$0xff] (!%p213_p2)  ;;  %v265_v33 = vld [vmem:[%s1430_s3 + $0x68] sm:$0xff] (!%p213_p2)  ;;  %v266_v37 = vld [vmem:[%s1430_s3 + $0x70] sm:$0xff] (!%p213_p2)  ;;  %v582_v63 = vsub.s32 (!%p213_p2), 0, %v581_v62 }
   0xa   : > { %v1172_v36 = vpack.c.bf16 (!%p213_p2), %v265_v33, %v264_v32  ;;  %v267_v38 = vld [vmem:[%s1430_s3 + $0x78] sm:$0xff] (!%p213_p2)  ;;  %v268_v44 = vld [vmem:[%s1431_s4] sm:$0xff] (!%p213_p2)  ;;  %v269_v45 = vld [vmem:[%s1431_s4 + $0x8] sm:$0xff] (!%p213_p2) }
   0xb   : > { %v1175_v41 = vpack.c.bf16 (!%p213_p2), %v267_v38, %v266_v37  ;;  %v1202_v46 = vpack.c.bf16 (!%p213_p2), %v269_v45, %v268_v44 }
   0xc   : > { %1158 = vmatpush3.bf16.msra.mxu0 (!%p213_p2), %v1157_v7  ;;  %1182 = vmatpush3.bf16.msra.mxu1 (!%p213_p2), %v1157_v7  ;;  %v977_v7 = vld [vmem:[%s1428_s1] ss:$0 sm:$0xff] (!%p213_p2) }
   0xd   : > { %s1435_s22 = smov (!%p241_p3, %s967_s22), 1  ;;  %1159 = vmatprep.subr.bf16.mxu0 %v1240_v3  ;;  %1183 = vmatprep.subr.bf16.mxu1 %v1240_v3 }
   0xe   : > { %s988_s11 = sshll.u32 %s1435_s22, 4  ;;  %s974_s7 = sshll.u32 %s1435_s22, 1 }
   0xf   : > { %s245_s14 = scalar_lea.vmem %s1427_s0, %s988_s11  ;;  %s249_s10 = scalar_lea.vmem %s1433_s6, %s974_s7 }
  0x10   : > { %v1318_v11 = vld [vmem:[%s245_s14] sm:$0xff]  ;;  %v1320_v12 = vld [vmem:[%s245_s14 + $0x8] sm:$0xff]  ;;  %1161 = vmatpush3.bf16.msra.mxu0 %v1160_v10  ;;  %1185 = vmatpush3.bf16.msra.mxu1 %v1160_v10 }
  0x11   : > { %v270_v15 = vadd.f32 %v1320_v12, %v1318_v11  ;;  %v277_v16 = vmul.f32 %v1318_v11, %v1318_v11  ;;  %v278_v17 = vmul.f32 %v1320_v12, %v1320_v12  ;;  %1162 = vmatprep.subr.bf16.mxu0 %v1240_v3  ;;  %1186 = vmatprep.subr.bf16.mxu1 %v1240_v3  ;;  %v978_v10 = vld [vmem:[%s1429_s2] ss:$0 sm:$0xff] }
  0x13   : > { %v271_v18 = vrot.slane %v270_v15, 4  ;;  %v279_v19 = vadd.f32 %v278_v17, %v277_v16 }
  0x14   : > { %1164 = vmatpush3.bf16.msra.mxu0 %v1163_v20  ;;  %1188 = vmatpush3.bf16.msra.mxu1 %v1163_v20 }
  0x15   : > { %v280_v23 = vrot.slane %v279_v19, 4  ;;  %v272_v24 = vadd.f32 %v271_v18, %v270_v15  ;;  %1165 = vmatprep.subr.bf16.mxu0 %v1240_v3  ;;  %1189 = vmatprep.subr.bf16.mxu1 %v1240_v3  ;;  %v982_v18 = vld [vmem:[%s1432_s5 + $0x8] sm:$0xf] }
  0x17   : > { %v281_v25 = vadd.f32 %v280_v23, %v279_v19  ;;  %v273_v29 = vrot.slane %v272_v24, 2  ;;  %v984_v19 = vld [vmem:[%s1432_s5 + $0xc] sm:$0xf] }
  0x18   : > { %1167 = vmatpush3.bf16.msra.mxu0 %v1166_v26  ;;  %1191 = vmatpush3.bf16.msra.mxu1 %v1166_v26 }
  0x19   : > { %v282_v30 = vrot.slane %v281_v25, 2  ;;  %1168 = vmatprep.subr.bf16.mxu0 %v1240_v3  ;;  %1192 = vmatprep.subr.bf16.mxu1 %v1240_v3  ;;  %v274_v34 = vadd.f32 %v273_v29, %v272_v24 }
  0x1b   : > { %v283_v35 = vadd.f32 %v282_v30, %v281_v25  ;;  %v275_v39 = vrot.slane %v274_v34, 1 }
  0x1c   : > { %1170 = vmatpush3.bf16.msra.mxu0 %v1169_v31  ;;  %1194 = vmatpush3.bf16.msra.mxu1 %v1169_v31 }
  0x1d   : > { %1171 = vmatprep.subr.bf16.mxu0 %v1240_v3  ;;  %1195 = vmatprep.subr.bf16.mxu1 %v1240_v3  ;;  %v284_v40 = vrot.slane %v283_v35, 1  ;;  %v276_v42 = vadd.f32 %v275_v39, %v274_v34 }
  0x1f   : > { %v285_v43 = vadd.f32 %v284_v40, %v283_v35 }
  0x20   : > { %1173 = vmatpush3.bf16.msra.mxu0 %v1172_v36  ;;  %1197 = vmatpush3.bf16.msra.mxu1 %v1172_v36 }
  0x21   : > { %1174 = vmatprep.subr.bf16.mxu0 %v1240_v3  ;;  %1198 = vmatprep.subr.bf16.mxu1 %v1240_v3 }
  0x24   : > { %1176 = vmatpush3.bf16.msra.mxu0 %v1175_v41  ;;  %1200 = vmatpush3.bf16.msra.mxu1 %v1175_v41 }
  0x25   : > { %1201 = vmatprep.subr.bf16.mxu0 %v1240_v3  ;;  %1204 = vmatprep.subr.bf16.mxu1 %v1240_v3 }
  0x27   : > { %1074 = vmatmul.mubr.f32.vlgmr.msra.gmra.mrb[0].mxu0 %v276_v42  ;;  %1109 = vmatmul.mubr.f32.vlgmr.msra.gmra.mrb[0].mxu1 %v285_v43 }
  0x28   : > { %1115 = vmatprep.mubr.msk.f32.mxu0 %vm1241_vm0, %v1242_v6  ;;  %1122 = vmatprep.mubr.msk.f32.mxu1 %vm1241_vm0, %v1242_v6 }
  0x29   : > { %1203 = vmatpush3.bf16.msra.mxu0 %v1202_v46  ;;  %1206 = vmatpush3.bf16.msra.mxu1 %v1202_v46 }
  0x2a   : > { %1207 = vmatprep.subr.bf16.mxu0 %v1240_v3  ;;  %1210 = vmatprep.subr.bf16.mxu1 %v1240_v3 }
  0xfa   : > { %v352_v47 = vpop.f32.mrb[0].mxu0  ;;  %v422_v48 = vpop.f32.mrb[0].mxu1 }
  0xfb   : > { %v427_v49 = vmul.f32 0.0078125, %v352_v47  ;;  %v1075_v50 = vpop.f32.mrb[1].mxu0  ;;  %v428_v51 = vmul.f32 0.0078125, %v422_v48  ;;  %v1110_v52 = vpop.f32.mrb[1].mxu1 }
  0xfd   : > { %v429_v53 = vmul.f32 %v427_v49, %v427_v49  ;;  %1116 = vmatmul.mubr.msk.f32.vlgmr.msra.gmra.mrb[2].mxu0 %vm432_vm1, %v427_v49 }
  0xfe   : > { %1129 = vmatprep.mubr.msk.f32.mxu0 %vm1241_vm0, %v1242_v6 }
  0xff   : > { %v430_v54 = vsub.f32 %v428_v51, %v429_v53 }
 0x101   : > { %v431_v55 = vmax.f32 %v430_v54, 0.0 }
 0x103   : > { %1123 = vmatmul.mubr.msk.f32.vlgmr.msra.gmra.mrb[2].mxu1 %vm432_vm1, %v431_v55 }
 0x104   : > { %1136 = vmatprep.mubr.msk.f32.mxu1 %vm1241_vm0, %v1242_v6 }
 0x1d0   : > { %v502_v56 = vpop.f32.mrb[2].mxu0 }
 0x1d1   : > { %v1117_v57 = vpop.f32.mrb[3].mxu0  ;;  %v583_v0 = vrot.slane %v502_v56, %v582_v63 }
 0x1d3   : > { %v584_v2 = vsub.f32 %v1318_v11, %v583_v0  ;;  %v585_v4 = vsub.f32 %v1320_v12, %v583_v0  ;;  %v610_v11 = vld [vmem:[%s1432_s5] sm:$0xf]  ;;  %v980_v12 = vld [vmem:[%s1432_s5 + $0x4] sm:$0xf] }
 0x1d6   : > { %v575_v59 = vpop.f32.mrb[2].mxu1 }
 0x1d7   : > { %v576_v60 = vadd.f32 1e-05, %v575_v59  ;;  %v1124_v61 = vpop.f32.mrb[3].mxu1 }
 0x1d9   : > { %1230 = vrsqrt.f32 %v576_v60 }
 0x1e3   : > { %v1231_v1 = vpop.eup %1230 }
 0x1e4   : > { %v589_v5 = vrot.slane %v1231_v1, %v582_v63 }
 0x1e6   : > { %v590_v8 = vmul.f32 %v589_v5, %v584_v2  ;;  %v591_v9 = vmul.f32 %v589_v5, %v585_v4 }
 0x1e8   : > { %v599_v13 = vmul.f32 %v977_v7, %v590_v8  ;;  %v600_v14 = vmul.f32 %v977_v7, %v591_v9 }
 0x1ea   : > { %v608_v15 = vadd.f32 %v978_v10, %v599_v13  ;;  %v609_v16 = vadd.f32 %v978_v10, %v600_v14 }
 0x1ec   : > { %v1208_v17 = vpack.c.bf16 %v609_v16, %v608_v15 }
 0x1ee   : > { %1209 = vmatpush3.bf16.msra.mxu0 %v1208_v17  ;;  %1212 = vmatpush3.bf16.msra.mxu1 %v1208_v17 }
 0x1ef   : > { %1213 = vmatprep.subr.bf16.mxu0 %v1240_v3  ;;  %1216 = vmatprep.subr.bf16.mxu1 %v1240_v3 }
 0x1f1   : > { %1130 = vmatmul.mubr.msk.f32.vlgmr.msra.gmra.mrb[4].mxu0 %vm432_vm1, %v610_v11  ;;  %1137 = vmatmul.mubr.msk.f32.vlgmr.msra.gmra.mrb[4].mxu1 %vm432_vm1, %v980_v12 }
 0x1f2   : > { %1215 = vmatpush3.bf16.msra.mxu0 %v1208_v17  ;;  %1218 = vmatpush3.bf16.msra.mxu1 %v1208_v17 }
 0x1f3   : > { %1143 = vmatprep.mubr.msk.f32.mxu0 %vm1241_vm0, %v1242_v6  ;;  %1150 = vmatprep.mubr.msk.f32.mxu1 %vm1241_vm0, %v1242_v6 }
 0x1f5   : > { %1144 = vmatmul.mubr.msk.f32.vlgmr.msra.gmra.mrb[6].mxu0 %vm432_vm1, %v982_v18  ;;  %1151 = vmatmul.mubr.msk.f32.vlgmr.msra.gmra.mrb[6].mxu1 %vm432_vm1, %v984_v19 }
 0x2c4   : > { %v680_v3 = vpop.f32.mrb[4].mxu0  ;;  %v755_v20 = vpop.f32.mrb[4].mxu1 }
 0x2c5   : > { %v909_v21 = vmax.f32 %v680_v3, %v755_v20  ;;  %v1131_v22 = vpop.f32.mrb[5].mxu0  ;;  %v1138_v23 = vpop.f32.mrb[5].mxu1 }
 0x2c8   : > { %v830_v24 = vpop.f32.mrb[6].mxu0  ;;  %v905_v25 = vpop.f32.mrb[6].mxu1 }
 0x2c9   : > { %v910_v26 = vmax.f32 %v830_v24, %v905_v25  ;;  %v1145_v27 = vpop.f32.mrb[7].mxu0  ;;  %v1152_v28 = vpop.f32.mrb[7].mxu1 }
 0x2cb   : > { %v911_v29 = vmax.f32 %v909_v21, %v910_v26 }
 0x2cd   : > { %v912_v6 = vpack.c.bf16 %v911_v29, %v911_v29 }
 0x2cf   : > { %913 = vst [vmem:[%s249_s10] sm:$0x3] %v912_v6 }
 0x2d0 PF: > { %s16_s21 = sadd.s32 1, %s1238_s21  }
 0x2d1   : > { %p13_p4 = scmp.ge.s32.totalorder %s16_s21, 4  }
 0x2d3   :  { %15 = sbr.rel (!%p13_p4) target bundleno = 1 (0x1), region = 77 }

// kernel: sepconvgru2_forward.20
= control target key start
LH: loop header
LB: loop body
LE: loop exit
PB: predicated region body
PF: predicated region fallthrough
CT: control target
= control target key end

     0   :  { %s1416_s12 = smov 0   ;;  %s1669_s0 = inlined_call_operand.vmem [shape: bf16[32,1152], index: 0, kind: input, shape index: {}]   ;;  %s1670_s1 = inlined_call_operand.vmem [shape: bf16[1152,128], index: 1, kind: input, shape index: {}]   ;;  %s1671_s2 = inlined_call_operand.vmem [shape: f32[1,128], index: 2, kind: input, shape index: {}]   ;;  %s1672_s3 = inlined_call_operand.vmem [shape: f32[32,128], index: 3, kind: output, shape index: {}]  }
   0x1 LB: > { %s1080_s13 = sadd.s32 4294967295, %s1392_s12   ;;  %p1084_p0 = scmp.ge.s32.totalorder %s1392_s12, 1  ;;  %s1392_s12 = sphi %s1416_s12, %s13_s12  }
   0x2   : > { %p139_p1 = scmp.lt.s32.totalorder %s1392_s12, 3 }
   0x4   : > { %p140_p2 = pnand %p1084_p0, %p139_p1 }
   0x5   : > { %v1301_v0 = vld [vmem:[%s1670_s1 + $0x40] sm:$0xff] (!%p140_p2)   ;;  %v1305_v4 = vld [vmem:[%s1670_s1 + $0x48] sm:$0xff] (!%p140_p2)   ;;  %v1309_v8 = vld [vmem:[%s1670_s1 + $0x50] sm:$0xff] (!%p140_p2)   ;;  %s1085_s17 = sshll.u32 (!%p140_p2), %s1080_s13, 1  ;;  %vm1395_vm0 = vmmov (!%p140_p2), 0  }
   0x6   : > { %143 = sbr.rel (%p140_p2) target bundleno = 319 (0x13f), region = 32  ;;  %v1302_v1 = vld [vmem:[%s1670_s1] sm:$0xff] (!%p140_p2)   ;;  %1173 = vmatprep.subr.bf16.mxu0 (!%p140_p2), %v1301_v0  ;;  %v1306_v5 = vld [vmem:[%s1670_s1 + $0x8] sm:$0xff] (!%p140_p2)   ;;  %v1310_v9 = vld [vmem:[%s1670_s1 + $0x10] sm:$0xff] (!%p140_p2)   ;;  %p165_p3 = scmp.lt.s32.totalorder (!%p140_p2), %s1085_s17, 3 }
   0x7   : > { %v1303_v2 = vld [vmem:[%s1670_s1 + $0xc0] sm:$0xff] (!%p140_p2)   ;;  %1174 = vmatpush3.bf16.msra.mxu0 (!%p140_p2), %v1302_v1  ;;  %v1307_v6 = vld [vmem:[%s1670_s1 + $0xc8] sm:$0xff] (!%p140_p2)   ;;  %v1311_v10 = vld [vmem:[%s1670_s1 + $0xd0] sm:$0xff] (!%p140_p2)  }
   0x8   : > { %v1304_v3 = vld [vmem:[%s1670_s1 + $0x80] sm:$0xff] (!%p140_p2)   ;;  %1195 = vmatprep.subr.bf16.mxu1 (!%p140_p2), %v1303_v2  ;;  %1175 = vmatprep.subr.bf16.mxu0 (!%p140_p2), %v1305_v4  ;;  %v1308_v7 = vld [vmem:[%s1670_s1 + $0x88] sm:$0xff] (!%p140_p2)   ;;  %v1312_v11 = vld [vmem:[%s1670_s1 + $0x90] sm:$0xff] (!%p140_p2)  }
   0x9   : > { %1196 = vmatpush3.bf16.msra.mxu1 (!%p140_p2), %v1304_v3  ;;  %v1313_v12 = vld [vmem:[%s1670_s1 + $0x58] sm:$0xff] (!%p140_p2)   ;;  %v1317_v16 = vld [vmem:[%s1670_s1 + $0x60] sm:$0xff] (!%p140_p2)   ;;  %v1321_v20 = vld [vmem:[%s1670_s1 + $0x68] sm:$0xff] (!%p140_p2)  }
   0xa   : > { %1197 = vmatprep.subr.bf16.mxu1 (!%p140_p2), %v1307_v6  ;;  %v1314_v13 = vld [vmem:[%s1670_s1 + $0x18] sm:$0xff] (!%p140_p2)   ;;  %v1318_v17 = vld [vmem:[%s1670_s1 + $0x20] sm:$0xff] (!%p140_p2)   ;;  %v1322_v21 = vld [vmem:[%s1670_s1 + $0x28] sm:$0xff] (!%p140_p2)   ;;  %v1394_v6 = vmov (!%p140_p2), 0.0  }
   0xb   : > { %1176 = vmatpush3.bf16.msra.mxu0 (!%p140_p2), %v1306_v5  ;;  %v1315_v14 = vld [vmem:[%s1670_s1 + $0xd8] sm:$0xff] (!%p140_p2)   ;;  %v1319_v18 = vld [vmem:[%s1670_s1 + $0xe0] sm:$0xff] (!%p140_p2)   ;;  %v1323_v22 = vld [vmem:[%s1670_s1 + $0xe8] sm:$0xff] (!%p140_p2)  }
   0xc   : > { %1177 = vmatprep.subr.bf16.mxu0 (!%p140_p2), %v1309_v8  ;;  %v1316_v15 = vld [vmem:[%s1670_s1 + $0x98] sm:$0xff] (!%p140_p2)   ;;  %v1320_v19 = vld [vmem:[%s1670_s1 + $0xa0] sm:$0xff] (!%p140_p2)   ;;  %v1324_v23 = vld [vmem:[%s1670_s1 + $0xa8] sm:$0xff] (!%p140_p2)  }
   0xd   : > { %1198 = vmatpush3.bf16.msra.mxu1 %v1308_v7  ;;  %s1674_s17 = smov (!%p165_p3, %s1085_s17), 3  ;;  %v1325_v24 = vld [vmem:[%s1670_s1 + $0x70] sm:$0xff]   ;;  %v1329_v28 = vld [vmem:[%s1670_s1 + $0x78] sm:$0xff]   ;;  %v1336_v34 = vld [vmem:[%s1670_s1 + $0x140] sm:$0xff]  }
   0xe   : > { %1199 = vmatprep.subr.bf16.mxu1 %v1311_v10  ;;  %s1290_s14 = smul.u32 36, %s1674_s17  ;;  %v1326_v25 = vld [vmem:[%s1670_s1 + $0x30] sm:$0xff]   ;;  %v1330_v29 = vld [vmem:[%s1670_s1 + $0x38] sm:$0xff]   ;;  %v1340_v37 = vld [vmem:[%s1670_s1 + $0x100] sm:$0xff]  }
   0xf   : > { %1178 = vmatpush3.bf16.msra.mxu0 %v1310_v9  ;;  %v1327_v26 = vld [vmem:[%s1670_s1 + $0xf0] sm:$0xff]   ;;  %v1331_v30 = vld [vmem:[%s1670_s1 + $0xf8] sm:$0xff]   ;;  %v1341_v38 = vld [vmem:[%s1670_s1 + $0x1c0] sm:$0xff]  }
  0x10   : > { %1179 = vmatprep.subr.bf16.mxu0 %v1313_v12  ;;  %v1328_v27 = vld [vmem:[%s1670_s1 + $0xb0] sm:$0xff]   ;;  %s1519_s13 = scalar_lea.vmem %s1669_s0, %s1290_s14  ;;  %v1335_v33 = vld [vmem:[%s1670_s1 + $0xb8] sm:$0xff]   ;;  %v1342_v39 = vld [vmem:[%s1670_s1 + $0x180] sm:$0xff]  }
  0x11   : > { %1200 = vmatpush3.bf16.msra.mxu1 %v1312_v11  ;;  %v1332_v31 = vld [vmem:[%s1519_s13] ss:$36 sps:$4 sm:$0xff]   ;;  %v1337_v35 = vld [vmem:[%s1519_s13 + $0x8] ss:$36 sps:$4 sm:$0xff]   ;;  %v1347_v44 = vld [vmem:[%s1670_s1 + $0x150] sm:$0xff]  }
  0x12   : > { %1201 = vmatprep.subr.bf16.mxu1 %v1315_v14  ;;  %v1334_v32 = vld [vmem:[%s1519_s13 + $0x4] ss:$36 sps:$4 sm:$0xff]   ;;  %v1339_v36 = vld [vmem:[%s1519_s13 + $0xc] ss:$36 sps:$4 sm:$0xff]   ;;  %v1351_v48 = vld [vmem:[%s1670_s1 + $0x158] sm:$0xff]  }
  0x13   : > { %1180 = vmatpush3.bf16.msra.mxu0 %v1314_v13  ;;  %849 = vmatprep.mubr.bf16.mxu0 %v1334_v32  ;;  %v1343_v40 = vld [vmem:[%s1670_s1 + $0x148] sm:$0xff]   ;;  %v1348_v45 = vld [vmem:[%s1670_s1 + $0x110] sm:$0xff]   ;;  %v1352_v49 = vld [vmem:[%s1670_s1 + $0x118] sm:$0xff]  }
  0x14   : > { %1181 = vmatprep.subr.bf16.mxu0 %v1317_v16  ;;  %890 = vmatprep.mubr.bf16.mxu1 %v1339_v36  ;;  %v1344_v41 = vld [vmem:[%s1670_s1 + $0x108] sm:$0xff]   ;;  %v1349_v46 = vld [vmem:[%s1670_s1 + $0x1d0] sm:$0xff]   ;;  %v1353_v50 = vld [vmem:[%s1670_s1 + $0x1d8] sm:$0xff]  }
  0x15   : > { %1202 = vmatpush3.bf16.msra.mxu1 %v1316_v15  ;;  %v1345_v42 = vld [vmem:[%s1670_s1 + $0x1c8] sm:$0xff]   ;;  %v1350_v47 = vld [vmem:[%s1670_s1 + $0x190] sm:$0xff]   ;;  %v1354_v51 = vld [vmem:[%s1670_s1 + $0x198] sm:$0xff]  }
  0x16   : > { %1203 = vmatprep.subr.bf16.mxu1 %v1319_v18  ;;  %v1346_v43 = vld [vmem:[%s1670_s1 + $0x188] sm:$0xff]   ;;  %v1355_v52 = vld [vmem:[%s1670_s1 + $0x160] sm:$0xff]   ;;  %v1363_v60 = vld [vmem:[%s1670_s1 + $0x170] sm:$0xff]  }
  0x17   : > { %1182 = vmatpush3.bf16.msra.mxu0 %v1318_v17  ;;  %v1356_v53 = vld [vmem:[%s1670_s1 + $0x120] sm:$0xff]   ;;  %v1359_v56 = vld [vmem:[%s1670_s1 + $0x168] sm:$0xff]   ;;  %v1364_v61 = vld [vmem:[%s1670_s1 + $0x130] sm:$0xff]  }
  0x18   : > { %1183 = vmatprep.subr.bf16.mxu0 %v1321_v20  ;;  %v1357_v54 = vld [vmem:[%s1670_s1 + $0x1e0] sm:$0xff]   ;;  %v1360_v57 = vld [vmem:[%s1670_s1 + $0x128] sm:$0xff]   ;;  %v1365_v62 = vld [vmem:[%s1670_s1 + $0x1f0] sm:$0xff]  }
  0x19   : > { %1204 = vmatpush3.bf16.msra.mxu1 %v1320_v19  ;;  %v1358_v55 = vld [vmem:[%s1670_s1 + $0x1a0] sm:$0xff]   ;;  %v1361_v58 = vld [vmem:[%s1670_s1 + $0x1e8] sm:$0xff]   ;;  %v1366_v63 = vld [vmem:[%s1670_s1 + $0x1b0] sm:$0xff]  }
  0x1a   : > { %1205 = vmatprep.subr.bf16.mxu1 %v1323_v22  ;;  %v1362_v59 = vld [vmem:[%s1670_s1 + $0x1a8] sm:$0xff]   ;;  %v1367_v0 = vld [vmem:[%s1670_s1 + $0x178] sm:$0xff]   ;;  %v1370_v3 = vld [vmem:[%s1519_s13 + $0x10] ss:$36 sps:$4 sm:$0xff]  }
  0x1b   : > { %1184 = vmatpush3.bf16.msra.mxu0 %v1322_v21  ;;  %v1368_v1 = vld [vmem:[%s1670_s1 + $0x138] sm:$0xff]   ;;  %v1377_v9 = vld [vmem:[%s1670_s1 + $0x200] sm:$0xff]   ;;  %v1378_v10 = vld [vmem:[%s1670_s1 + $0x208] sm:$0xff]  }
  0x1c   : > { %1185 = vmatprep.subr.bf16.mxu0 %v1325_v24  ;;  %v1369_v2 = vld [vmem:[%s1670_s1 + $0x1f8] sm:$0xff]   ;;  %v1379_v11 = vld [vmem:[%s1670_s1 + $0x210] sm:$0xff]   ;;  %v1381_v13 = vld [vmem:[%s1670_s1 + $0x220] sm:$0xff]  }
  0x1d   : > { %1206 = vmatpush3.bf16.msra.mxu1 %v1324_v23  ;;  %v1372_v4 = vld [vmem:[%s1519_s13 + $0x14] ss:$36 sps:$4 sm:$0xff]   ;;  %v1376_v8 = vld [vmem:[%s1519_s13 + $0x1c] ss:$36 sps:$4 sm:$0xff]   ;;  %v1382_v14 = vld [vmem:[%s1670_s1 + $0x228] sm:$0xff]  }
  0x1e   : > { %1207 = vmatprep.subr.bf16.mxu1 %v1327_v26  ;;  %v1373_v5 = vld [vmem:[%s1670_s1 + $0x1b8] sm:$0xff]   ;;  %v1383_v15 = vld [vmem:[%s1670_s1 + $0x230] sm:$0xff]   ;;  %v1385_v17 = vld [vmem:[%s1519_s13 + $0x20] ss:$36 sps:$4 sm:$0xff]  }
  0x1f   : > { %1186 = vmatpush3.bf16.msra.mxu0 %v1326_v25  ;;  %v1374_v7 = vld [vmem:[%s1519_s13 + $0x18] ss:$36 sps:$4 sm:$0xff]   ;;  %v1089_v19 = vld [vmem:[%s1671_s2] ss:$0 sm:$0xff]  ;;  %s1088_s13 = sshll.u32 %s1674_s17, 3 }
  0x20   : > { %1187 = vmatprep.subr.bf16.mxu0 %v1329_v28  ;;  %v1380_v12 = vld [vmem:[%s1670_s1 + $0x218] sm:$0xff]   ;;  %s175_s20 = scalar_lea.vmem %s1672_s3, %s1088_s13 }
  0x21   : > { %1208 = vmatpush3.bf16.msra.mxu1 %v1328_v27  ;;  %v1384_v16 = vld [vmem:[%s1670_s1 + $0x238] sm:$0xff]  }
  0x22   : > { %1209 = vmatprep.subr.bf16.mxu1 %v1331_v30 }
  0x23   : > { %1188 = vmatpush3.bf16.msra.mxu0 %v1330_v29 }
  0x24   : > { %1217 = vmatprep.subr.bf16.mxu0 %v1336_v34 }
  0x25   : > { %1210 = vmatpush3.bf16.msra.mxu1 %v1335_v33 }
  0x26   : > { %850 = vmatmul.mubr.bf16.vlgmr.msra.gmra.mrb[0].mxu0 %v1332_v31  ;;  %1239 = vmatprep.subr.bf16.mxu1 %v1341_v38 }
  0x27   : > { %1218 = vmatpush3.bf16.msra.mxu0 %v1340_v37  ;;  %931 = vmatprep.mubr.bf16.mxu0 %v1372_v4 }
  0x28   : > { %891 = vmatmul.mubr.bf16.vlgmr.msra.gmra.mrb[0].mxu1 %v1337_v35  ;;  %1219 = vmatprep.subr.bf16.mxu0 %v1343_v40 }
  0x29   : > { %1240 = vmatpush3.bf16.msra.mxu1 %v1342_v39  ;;  %972 = vmatprep.mubr.bf16.mxu1 %v1376_v8 }
  0x2a   : > { %1241 = vmatprep.subr.bf16.mxu1 %v1345_v42 }
  0x2b   : > { %1220 = vmatpush3.bf16.msra.mxu0 %v1344_v41 }
  0x2c   : > { %1221 = vmatprep.subr.bf16.mxu0 %v1347_v44 }
  0x2d   : > { %1242 = vmatpush3.bf16.msra.mxu1 %v1346_v43 }
  0x2e   : > { %1243 = vmatprep.subr.bf16.mxu1 %v1349_v46 }
  0x2f   : > { %1222 = vmatpush3.bf16.msra.mxu0 %v1348_v45 }
  0x30   : > { %1223 = vmatprep.subr.bf16.mxu0 %v1351_v48 }
  0x31   : > { %1244 = vmatpush3.bf16.msra.mxu1 %v1350_v47 }
  0x32   : > { %1245 = vmatprep.subr.bf16.mxu1 %v1353_v50 }
  0x33   : > { %1224 = vmatpush3.bf16.msra.mxu0 %v1352_v49 }
  0x34   : > { %1225 = vmatprep.subr.bf16.mxu0 %v1355_v52 }
  0x35   : > { %1246 = vmatpush3.bf16.msra.mxu1 %v1354_v51 }
  0x36   : > { %1247 = vmatprep.subr.bf16.mxu1 %v1357_v54 }
  0x37   : > { %1226 = vmatpush3.bf16.msra.mxu0 %v1356_v53 }
  0x38   : > { %1227 = vmatprep.subr.bf16.mxu0 %v1359_v56 }
  0x39   : > { %1248 = vmatpush3.bf16.msra.mxu1 %v1358_v55 }
  0x3a   : > { %1249 = vmatprep.subr.bf16.mxu1 %v1361_v58 }
  0x3b   : > { %1228 = vmatpush3.bf16.msra.mxu0 %v1360_v57 }
  0x3c   : > { %1229 = vmatprep.subr.bf16.mxu0 %v1363_v60 }
  0x3d   : > { %1250 = vmatpush3.bf16.msra.mxu1 %v1362_v59 }
  0x3e   : > { %1251 = vmatprep.subr.bf16.mxu1 %v1365_v62 }
  0x3f   : > { %1230 = vmatpush3.bf16.msra.mxu0 %v1364_v61 }
  0x40   : > { %1231 = vmatprep.subr.bf16.mxu0 %v1367_v0 }
  0x41   : > { %1252 = vmatpush3.bf16.msra.mxu1 %v1366_v63 }
  0x42   : > { %1253 = vmatprep.subr.bf16.mxu1 %v1369_v2 }
  0x43   : > { %1232 = vmatpush3.bf16.msra.mxu0 %v1368_v1 }
  0x44   : > { %1270 = vmatprep.subr.bf16.mxu0 %v1394_v6 }
  0x45   : > { %1254 = vmatpush3.bf16.msra.mxu1 %v1373_v5 }
  0x46   : > { %932 = vmatmul.mubr.bf16.vlgmr.msra.gmra.mrb[4].mxu0 %v1370_v3 }
  0x47   : > { %1286 = vmatprep.mubr.msk.bf16.mxu0 %vm1395_vm0, %v1394_v6  ;;  %1271 = vmatpush3.bf16.msra.mxu0 %v1377_v9 }
  0x48   : > { %973 = vmatmul.mubr.bf16.vlgmr.msra.gmra.mrb[4].mxu1 %v1374_v7  ;;  %1272 = vmatprep.subr.bf16.mxu0 %v1394_v6 }
  0x4b   : > { %1273 = vmatpush3.bf16.msra.mxu0 %v1378_v10 }
  0x4c   : > { %1274 = vmatprep.subr.bf16.mxu0 %v1394_v6 }
  0x4f   : > { %1275 = vmatpush3.bf16.msra.mxu0 %v1379_v11 }
  0x50   : > { %1276 = vmatprep.subr.bf16.mxu0 %v1394_v6 }
  0x53   : > { %1277 = vmatpush3.bf16.msra.mxu0 %v1380_v12 }
  0x54   : > { %1278 = vmatprep.subr.bf16.mxu0 %v1394_v6 }
  0x57   : > { %1279 = vmatpush3.bf16.msra.mxu0 %v1381_v13 }
  0x58   : > { %1280 = vmatprep.subr.bf16.mxu0 %v1394_v6 }
  0x5b   : > { %1281 = vmatpush3.bf16.msra.mxu0 %v1382_v14 }
  0x5c   : > { %1282 = vmatprep.subr.bf16.mxu0 %v1394_v6 }
  0x5f   : > { %1283 = vmatpush3.bf16.msra.mxu0 %v1383_v15 }
  0x60   : > { %1284 = vmatprep.subr.bf16.mxu0 %v1394_v6 }
  0x63   : > { %1285 = vmatpush3.bf16.msra.mxu0 %v1384_v16 }
  0x66   : > { %1287 = vmatmul.mubr.bf16.vlgmr.msra.gmra.mrb[8].mxu0 %v1385_v17 }
  0xf9   : > { %v1189_v18 = vpop.f32.mrb[0].mxu0 }
  0xfa   : > { %v1190_v20 = vpop.f32.mrb[1].mxu0 }
  0xfb   : > { %v1191_v21 = vadd.f32 %v1190_v20, %v1189_v18  ;;  %v1192_v22 = vpop.f32.mrb[2].mxu0  ;;  %v1211_v23 = vpop.f32.mrb[0].mxu1 }
  0xfc   : > { %v1193_v24 = vpop.f32.mrb[3].mxu0  ;;  %v1212_v27 = vpop.f32.mrb[1].mxu1 }
  0xfd   : > { %v852_v25 = vadd.f32 %v1191_v21, %v1089_v19  ;;  %v1194_v26 = vadd.f32 %v1193_v24, %v1192_v22  ;;  %v1213_v28 = vadd.f32 %v1212_v27, %v1211_v23  ;;  %v1214_v29 = vpop.f32.mrb[2].mxu1 }
  0xfe   : > { %v1215_v31 = vpop.f32.mrb[3].mxu1 }
  0xff   : > { %v855_v30 = vadd.f32 %v1194_v26, %v1089_v19  ;;  %v893_v32 = vadd.f32 %v1213_v28, %v852_v25  ;;  %v1216_v33 = vadd.f32 %v1215_v31, %v1214_v29 }
 0x101   : > { %v896_v34 = vadd.f32 %v1216_v33, %v855_v30 }
 0x119   : > { %v1233_v35 = vpop.f32.mrb[4].mxu0 }
 0x11a   : > { %v1234_v36 = vpop.f32.mrb[5].mxu0 }
 0x11b   : > { %v1235_v37 = vadd.f32 %v1234_v36, %v1233_v35  ;;  %v1236_v38 = vpop.f32.mrb[6].mxu0  ;;  %v1255_v39 = vpop.f32.mrb[4].mxu1 }
 0x11c   : > { %v1237_v40 = vpop.f32.mrb[7].mxu0  ;;  %v1256_v43 = vpop.f32.mrb[5].mxu1 }
 0x11d   : > { %v934_v41 = vadd.f32 %v1235_v37, %v893_v32  ;;  %v1238_v42 = vadd.f32 %v1237_v40, %v1236_v38  ;;  %v1257_v44 = vadd.f32 %v1256_v43, %v1255_v39  ;;  %v1258_v45 = vpop.f32.mrb[6].mxu1 }
 0x11e   : > { %v1259_v47 = vpop.f32.mrb[7].mxu1 }
 0x11f   : > { %v937_v46 = vadd.f32 %v1238_v42, %v896_v34  ;;  %v1260_v48 = vadd.f32 %v1259_v47, %v1258_v45  ;;  %v975_v49 = vadd.f32 %v1257_v44, %v934_v41 }
 0x121   : > { %v978_v50 = vadd.f32 %v1260_v48, %v937_v46 }
 0x139   : > { %v1015_v51 = vpop.f32.mrb[8].mxu0 }
 0x13a   : > { %v1016_v52 = vadd.f32 %v1015_v51, %v975_v49  ;;  %v1288_v53 = vpop.f32.mrb[9].mxu0 }
 0x13b   : > { %v1018_v54 = vpop.f32.mrb[10].mxu0 }
 0x13c   : > { %1022 = vst [vmem:[%s175_s20] sm:$0xff] %v1016_v52  ;;  %v1019_v55 = vadd.f32 %v1018_v54, %v978_v50  ;;  %v1289_v56 = vpop.f32.mrb[11].mxu0 }
 0x13e   : > { %1023 = vst [vmem:[%s175_s20 + $0x8] sm:$0xff] %v1019_v55 }
 0x13f PF: > { %s13_s12 = sadd.s32 1, %s1392_s12  }
 0x140   : > { %p10_p4 = scmp.ge.s32.totalorder %s13_s12, 4  }
 0x142   :  { %12 = sbr.rel (!%p10_p4) target bundleno = 1 (0x1), region = 62 }

// kernel: sepconvgru2_forward.22
= control target key start
LH: loop header
LB: loop body
LE: loop exit
PB: predicated region body
PF: predicated region fallthrough
CT: control target
= control target key end

     0   :  { %vm1123_vm0 = vmmov 0   ;;  %s1381_s1 = inlined_call_operand.vmem [shape: bf16[1152,128], index: 1, kind: input, shape index: {}]   ;;  %s1382_s0 = inlined_call_operand.vmem [shape: bf16[8,1152], index: 0, kind: input, shape index: {}]   ;;  %s1383_s2 = inlined_call_operand.vmem [shape: f32[1,128], index: 2, kind: input, shape index: {}]   ;;  %s1384_s3 = inlined_call_operand.vmem [shape: f32[8,128], index: 3, kind: output, shape index: {}]  }
   0x1   :  { %v1041_v0 = vld [vmem:[%s1381_s1 + $0x40] sm:$0xff]   ;;  %v1045_v4 = vld [vmem:[%s1381_s1 + $0x48] sm:$0xff]   ;;  %v1049_v8 = vld [vmem:[%s1381_s1 + $0x50] sm:$0xff]  }
   0x2   :  { %v1042_v1 = vld [vmem:[%s1381_s1] sm:$0xff]   ;;  %922 = vmatprep.subr.bf16.mxu0 %v1041_v0  ;;  %v1046_v5 = vld [vmem:[%s1381_s1 + $0x8] sm:$0xff]   ;;  %v1050_v9 = vld [vmem:[%s1381_s1 + $0x10] sm:$0xff]  }
   0x3   :  { %v1043_v2 = vld [vmem:[%s1381_s1 + $0xc0] sm:$0xff]   ;;  %923 = vmatpush3.bf16.msra.mxu0 %v1042_v1  ;;  %v1047_v6 = vld [vmem:[%s1381_s1 + $0xc8] sm:$0xff]   ;;  %v1051_v10 = vld [vmem:[%s1381_s1 + $0xd0] sm:$0xff]  }
   0x4   :  { %v1044_v3 = vld [vmem:[%s1381_s1 + $0x80] sm:$0xff]   ;;  %944 = vmatprep.subr.bf16.mxu1 %v1043_v2  ;;  %924 = vmatprep.subr.bf16.mxu0 %v1045_v4  ;;  %v1048_v7 = vld [vmem:[%s1381_s1 + $0x88] sm:$0xff]   ;;  %v1052_v11 = vld [vmem:[%s1381_s1 + $0x90] sm:$0xff]  }
   0x5   :  { %945 = vmatpush3.bf16.msra.mxu1 %v1044_v3  ;;  %v1053_v12 = vld [vmem:[%s1381_s1 + $0x58] sm:$0xff]   ;;  %v1057_v16 = vld [vmem:[%s1381_s1 + $0x60] sm:$0xff]   ;;  %v1061_v20 = vld [vmem:[%s1381_s1 + $0x68] sm:$0xff]  }
   0x6   :  { %946 = vmatprep.subr.bf16.mxu1 %v1047_v6  ;;  %v1054_v13 = vld [vmem:[%s1381_s1 + $0x18] sm:$0xff]   ;;  %v1058_v17 = vld [vmem:[%s1381_s1 + $0x20] sm:$0xff]   ;;  %v1062_v21 = vld [vmem:[%s1381_s1 + $0x28] sm:$0xff]  }
   0x7   :  { %925 = vmatpush3.bf16.msra.mxu0 %v1046_v5  ;;  %v1055_v14 = vld [vmem:[%s1381_s1 + $0xd8] sm:$0xff]   ;;  %v1059_v18 = vld [vmem:[%s1381_s1 + $0xe0] sm:$0xff]   ;;  %v1063_v22 = vld [vmem:[%s1381_s1 + $0xe8] sm:$0xff]  }
   0x8   :  { %926 = vmatprep.subr.bf16.mxu0 %v1049_v8  ;;  %v1056_v15 = vld [vmem:[%s1381_s1 + $0x98] sm:$0xff]   ;;  %v1060_v19 = vld [vmem:[%s1381_s1 + $0xa0] sm:$0xff]   ;;  %v1064_v23 = vld [vmem:[%s1381_s1 + $0xa8] sm:$0xff]  }
   0x9   :  { %947 = vmatpush3.bf16.msra.mxu1 %v1048_v7  ;;  %v1065_v24 = vld [vmem:[%s1381_s1 + $0x70] sm:$0xff]   ;;  %v1069_v28 = vld [vmem:[%s1381_s1 + $0x78] sm:$0xff]   ;;  %v15_v31 = vld [vmem:[%s1382_s0] sm:$0xff] }
   0xa   :  { %948 = vmatprep.subr.bf16.mxu1 %v1051_v10  ;;  %v1066_v25 = vld [vmem:[%s1381_s1 + $0x30] sm:$0xff]   ;;  %v1070_v29 = vld [vmem:[%s1381_s1 + $0x38] sm:$0xff]   ;;  %v841_v32 = vcombine.low %v15_v31, %v15_v31  ;;  %v842_v33 = vcombine.high %v15_v31, %v15_v31  ;;  %v1075_v35 = vld [vmem:[%s1381_s1 + $0x140] sm:$0xff]  }
   0xb   :  { %927 = vmatpush3.bf16.msra.mxu0 %v1050_v9  ;;  %v1067_v26 = vld [vmem:[%s1381_s1 + $0xf0] sm:$0xff]   ;;  %v1071_v30 = vld [vmem:[%s1381_s1 + $0xf8] sm:$0xff]   ;;  %v16_v36 = vld [vmem:[%s1382_s0 + $0x8] sm:$0xff]  ;;  %v1122_v9 = vmov 0.0  }
   0xc   :  { %928 = vmatprep.subr.bf16.mxu0 %v1053_v12  ;;  %v1068_v27 = vld [vmem:[%s1381_s1 + $0xb0] sm:$0xff]   ;;  %v1074_v34 = vld [vmem:[%s1381_s1 + $0xb8] sm:$0xff]   ;;  %667 = vmatprep.mubr.bf16.mxu0 %v842_v33  ;;  %v843_v37 = vcombine.low %v16_v36, %v16_v36  ;;  %v844_v38 = vcombine.high %v16_v36, %v16_v36  ;;  %v1078_v39 = vld [vmem:[%s1381_s1 + $0x100] sm:$0xff]  }
   0xd   :  { %949 = vmatpush3.bf16.msra.mxu1 %v1052_v11  ;;  %v1079_v40 = vld [vmem:[%s1381_s1 + $0x1c0] sm:$0xff]   ;;  %v1081_v42 = vld [vmem:[%s1381_s1 + $0x148] sm:$0xff]   ;;  %v1085_v46 = vld [vmem:[%s1381_s1 + $0x150] sm:$0xff]  }
   0xe   :  { %950 = vmatprep.subr.bf16.mxu1 %v1055_v14  ;;  %707 = vmatprep.mubr.bf16.mxu1 %v844_v38  ;;  %v1080_v41 = vld [vmem:[%s1381_s1 + $0x180] sm:$0xff]   ;;  %v1082_v43 = vld [vmem:[%s1381_s1 + $0x108] sm:$0xff]   ;;  %v1086_v47 = vld [vmem:[%s1381_s1 + $0x110] sm:$0xff]  }
   0xf   :  { %929 = vmatpush3.bf16.msra.mxu0 %v1054_v13  ;;  %v1083_v44 = vld [vmem:[%s1381_s1 + $0x1c8] sm:$0xff]   ;;  %v1087_v48 = vld [vmem:[%s1381_s1 + $0x1d0] sm:$0xff]   ;;  %v1089_v50 = vld [vmem:[%s1381_s1 + $0x158] sm:$0xff]  }
  0x10   :  { %930 = vmatprep.subr.bf16.mxu0 %v1057_v16  ;;  %v1084_v45 = vld [vmem:[%s1381_s1 + $0x188] sm:$0xff]   ;;  %v1088_v49 = vld [vmem:[%s1381_s1 + $0x190] sm:$0xff]   ;;  %v1090_v51 = vld [vmem:[%s1381_s1 + $0x118] sm:$0xff]  }
  0x11   :  { %951 = vmatpush3.bf16.msra.mxu1 %v1056_v15  ;;  %v1091_v52 = vld [vmem:[%s1381_s1 + $0x1d8] sm:$0xff]   ;;  %v1093_v54 = vld [vmem:[%s1381_s1 + $0x160] sm:$0xff]   ;;  %v1097_v58 = vld [vmem:[%s1381_s1 + $0x168] sm:$0xff]  }
  0x12   :  { %952 = vmatprep.subr.bf16.mxu1 %v1059_v18  ;;  %v1092_v53 = vld [vmem:[%s1381_s1 + $0x198] sm:$0xff]   ;;  %v1094_v55 = vld [vmem:[%s1381_s1 + $0x120] sm:$0xff]   ;;  %v1098_v59 = vld [vmem:[%s1381_s1 + $0x128] sm:$0xff]  }
  0x13   :  { %931 = vmatpush3.bf16.msra.mxu0 %v1058_v17  ;;  %v1095_v56 = vld [vmem:[%s1381_s1 + $0x1e0] sm:$0xff]   ;;  %v1099_v60 = vld [vmem:[%s1381_s1 + $0x1e8] sm:$0xff]   ;;  %v1101_v62 = vld [vmem:[%s1381_s1 + $0x170] sm:$0xff]  }
  0x14   :  { %932 = vmatprep.subr.bf16.mxu0 %v1061_v20  ;;  %v1096_v57 = vld [vmem:[%s1381_s1 + $0x1a0] sm:$0xff]   ;;  %v1100_v61 = vld [vmem:[%s1381_s1 + $0x1a8] sm:$0xff]   ;;  %v1102_v63 = vld [vmem:[%s1381_s1 + $0x130] sm:$0xff]  }
  0x15   :  { %953 = vmatpush3.bf16.msra.mxu1 %v1060_v19  ;;  %v1103_v0 = vld [vmem:[%s1381_s1 + $0x1f0] sm:$0xff]   ;;  %v1105_v2 = vld [vmem:[%s1381_s1 + $0x178] sm:$0xff]   ;;  %v1113_v13 = vld [vmem:[%s1381_s1 + $0x200] sm:$0xff]  }
  0x16   :  { %954 = vmatprep.subr.bf16.mxu1 %v1063_v22  ;;  %v1104_v1 = vld [vmem:[%s1381_s1 + $0x1b0] sm:$0xff]   ;;  %v1106_v3 = vld [vmem:[%s1381_s1 + $0x138] sm:$0xff]   ;;  %v1114_v14 = vld [vmem:[%s1381_s1 + $0x208] sm:$0xff]  }
  0x17   :  { %933 = vmatpush3.bf16.msra.mxu0 %v1062_v21  ;;  %v1107_v4 = vld [vmem:[%s1381_s1 + $0x1f8] sm:$0xff]   ;;  %v17_v5 = vld [vmem:[%s1382_s0 + $0x10] sm:$0xff]  ;;  %v1117_v17 = vld [vmem:[%s1381_s1 + $0x220] sm:$0xff]  }
  0x18   :  { %934 = vmatprep.subr.bf16.mxu0 %v1065_v24  ;;  %v845_v6 = vcombine.low %v17_v5, %v17_v5  ;;  %v846_v7 = vcombine.high %v17_v5, %v17_v5  ;;  %v1110_v8 = vld [vmem:[%s1381_s1 + $0x1b8] sm:$0xff]   ;;  %v1115_v15 = vld [vmem:[%s1381_s1 + $0x210] sm:$0xff]   ;;  %v1118_v18 = vld [vmem:[%s1381_s1 + $0x228] sm:$0xff]  }
  0x19   :  { %955 = vmatpush3.bf16.msra.mxu1 %v1064_v23  ;;  %v18_v10 = vld [vmem:[%s1382_s0 + $0x18] sm:$0xff]  ;;  %v1119_v19 = vld [vmem:[%s1381_s1 + $0x230] sm:$0xff]   ;;  %v1121_v21 = vld [vmem:[%s1382_s0 + $0x20] ss:$0 sps:$4 sm:$0xff]  }
  0x1a   :  { %956 = vmatprep.subr.bf16.mxu1 %v1067_v26  ;;  %v847_v11 = vcombine.low %v18_v10, %v18_v10  ;;  %v848_v12 = vcombine.high %v18_v10, %v18_v10  ;;  %v1116_v16 = vld [vmem:[%s1381_s1 + $0x218] sm:$0xff]   ;;  %v840_v23 = vld [vmem:[%s1383_s2] ss:$0 sm:$0xff] }
  0x1b   :  { %935 = vmatpush3.bf16.msra.mxu0 %v1066_v25  ;;  %v1120_v20 = vld [vmem:[%s1381_s1 + $0x238] sm:$0xff]  }
  0x1c   :  { %936 = vmatprep.subr.bf16.mxu0 %v1069_v28 }
  0x1d   :  { %957 = vmatpush3.bf16.msra.mxu1 %v1068_v27 }
  0x1e   :  { %958 = vmatprep.subr.bf16.mxu1 %v1071_v30 }
  0x1f   :  { %937 = vmatpush3.bf16.msra.mxu0 %v1070_v29 }
  0x20   :  { %966 = vmatprep.subr.bf16.mxu0 %v1075_v35 }
  0x21   :  { %959 = vmatpush3.bf16.msra.mxu1 %v1074_v34 }
  0x22   :  { %668 = vmatmul.mubr.bf16.vlgmr.msra.gmra.mrb[0].mxu0 %v841_v32  ;;  %988 = vmatprep.subr.bf16.mxu1 %v1079_v40 }
  0x23   :  { %967 = vmatpush3.bf16.msra.mxu0 %v1078_v39  ;;  %747 = vmatprep.mubr.bf16.mxu0 %v846_v7 }
  0x24   :  { %708 = vmatmul.mubr.bf16.vlgmr.msra.gmra.mrb[0].mxu1 %v843_v37  ;;  %968 = vmatprep.subr.bf16.mxu0 %v1081_v42 }
  0x25   :  { %989 = vmatpush3.bf16.msra.mxu1 %v1080_v41  ;;  %787 = vmatprep.mubr.bf16.mxu1 %v848_v12 }
  0x26   :  { %990 = vmatprep.subr.bf16.mxu1 %v1083_v44 }
  0x27   :  { %969 = vmatpush3.bf16.msra.mxu0 %v1082_v43 }
  0x28   :  { %970 = vmatprep.subr.bf16.mxu0 %v1085_v46 }
  0x29   :  { %991 = vmatpush3.bf16.msra.mxu1 %v1084_v45 }
  0x2a   :  { %992 = vmatprep.subr.bf16.mxu1 %v1087_v48 }
  0x2b   :  { %971 = vmatpush3.bf16.msra.mxu0 %v1086_v47 }
  0x2c   :  { %972 = vmatprep.subr.bf16.mxu0 %v1089_v50 }
  0x2d   :  { %993 = vmatpush3.bf16.msra.mxu1 %v1088_v49 }
  0x2e   :  { %994 = vmatprep.subr.bf16.mxu1 %v1091_v52 }
  0x2f   :  { %973 = vmatpush3.bf16.msra.mxu0 %v1090_v51 }
  0x30   :  { %974 = vmatprep.subr.bf16.mxu0 %v1093_v54 }
  0x31   :  { %995 = vmatpush3.bf16.msra.mxu1 %v1092_v53 }
  0x32   :  { %996 = vmatprep.subr.bf16.mxu1 %v1095_v56 }
  0x33   :  { %975 = vmatpush3.bf16.msra.mxu0 %v1094_v55 }
  0x34   :  { %976 = vmatprep.subr.bf16.mxu0 %v1097_v58 }
  0x35   :  { %997 = vmatpush3.bf16.msra.mxu1 %v1096_v57 }
  0x36   :  { %998 = vmatprep.subr.bf16.mxu1 %v1099_v60 }
  0x37   :  { %977 = vmatpush3.bf16.msra.mxu0 %v1098_v59 }
  0x38   :  { %978 = vmatprep.subr.bf16.mxu0 %v1101_v62 }
  0x39   :  { %999 = vmatpush3.bf16.msra.mxu1 %v1100_v61 }
  0x3a   :  { %1000 = vmatprep.subr.bf16.mxu1 %v1103_v0 }
  0x3b   :  { %979 = vmatpush3.bf16.msra.mxu0 %v1102_v63 }
  0x3c   :  { %980 = vmatprep.subr.bf16.mxu0 %v1105_v2 }
  0x3d   :  { %1001 = vmatpush3.bf16.msra.mxu1 %v1104_v1 }
  0x3e   :  { %1002 = vmatprep.subr.bf16.mxu1 %v1107_v4 }
  0x3f   :  { %981 = vmatpush3.bf16.msra.mxu0 %v1106_v3 }
  0x40   :  { %1019 = vmatprep.subr.bf16.mxu0 %v1122_v9 }
  0x41   :  { %1003 = vmatpush3.bf16.msra.mxu1 %v1110_v8 }
  0x42   :  { %748 = vmatmul.mubr.bf16.vlgmr.msra.gmra.mrb[4].mxu0 %v845_v6 }
  0x43   :  { %1020 = vmatpush3.bf16.msra.mxu0 %v1113_v13  ;;  %1035 = vmatprep.mubr.msk.bf16.mxu0 %vm1123_vm0, %v1122_v9 }
  0x44   :  { %788 = vmatmul.mubr.bf16.vlgmr.msra.gmra.mrb[4].mxu1 %v847_v11  ;;  %1021 = vmatprep.subr.bf16.mxu0 %v1122_v9 }
  0x47   :  { %1022 = vmatpush3.bf16.msra.mxu0 %v1114_v14 }
  0x48   :  { %1023 = vmatprep.subr.bf16.mxu0 %v1122_v9 }
  0x4b   :  { %1024 = vmatpush3.bf16.msra.mxu0 %v1115_v15 }
  0x4c   :  { %1025 = vmatprep.subr.bf16.mxu0 %v1122_v9 }
  0x4f   :  { %1026 = vmatpush3.bf16.msra.mxu0 %v1116_v16 }
  0x50   :  { %1027 = vmatprep.subr.bf16.mxu0 %v1122_v9 }
  0x53   :  { %1028 = vmatpush3.bf16.msra.mxu0 %v1117_v17 }
  0x54   :  { %1029 = vmatprep.subr.bf16.mxu0 %v1122_v9 }
  0x57   :  { %1030 = vmatpush3.bf16.msra.mxu0 %v1118_v18 }
  0x58   :  { %1031 = vmatprep.subr.bf16.mxu0 %v1122_v9 }
  0x5b   :  { %1032 = vmatpush3.bf16.msra.mxu0 %v1119_v19 }
  0x5c   :  { %1033 = vmatprep.subr.bf16.mxu0 %v1122_v9 }
  0x5f   :  { %1034 = vmatpush3.bf16.msra.mxu0 %v1120_v20 }
  0x62   :  { %1036 = vmatmul.mubr.bf16.vlgmr.msra.gmra.mrb[8].mxu0 %v1121_v21 }
  0xf5   :  { %v938_v22 = vpop.f32.mrb[0].mxu0 }
  0xf6   :  { %v939_v24 = vpop.f32.mrb[1].mxu0 }
  0xf7   :  { %v940_v25 = vadd.f32 %v939_v24, %v938_v22  ;;  %v941_v26 = vpop.f32.mrb[2].mxu0  ;;  %v960_v27 = vpop.f32.mrb[0].mxu1 }
  0xf8   :  { %v942_v28 = vpop.f32.mrb[3].mxu0  ;;  %v961_v29 = vpop.f32.mrb[1].mxu1 }
  0xf9   :  { %v670_v30 = vadd.f32 %v940_v25, %v840_v23  ;;  %v962_v31 = vadd.f32 %v961_v29, %v960_v27  ;;  %v963_v32 = vpop.f32.mrb[2].mxu1 }
  0xfa   :  { %v964_v33 = vpop.f32.mrb[3].mxu1 }
  0xfb   :  { %v710_v34 = vadd.f32 %v962_v31, %v670_v30 }
 0x115   :  { %v982_v35 = vpop.f32.mrb[4].mxu0 }
 0x116   :  { %v983_v36 = vpop.f32.mrb[5].mxu0 }
 0x117   :  { %v984_v37 = vadd.f32 %v983_v36, %v982_v35  ;;  %v985_v38 = vpop.f32.mrb[6].mxu0  ;;  %v1004_v39 = vpop.f32.mrb[4].mxu1 }
 0x118   :  { %v986_v40 = vpop.f32.mrb[7].mxu0  ;;  %v1005_v41 = vpop.f32.mrb[5].mxu1 }
 0x119   :  { %v750_v42 = vadd.f32 %v984_v37, %v710_v34  ;;  %v1006_v43 = vadd.f32 %v1005_v41, %v1004_v39  ;;  %v1007_v44 = vpop.f32.mrb[6].mxu1 }
 0x11a   :  { %v1008_v45 = vpop.f32.mrb[7].mxu1 }
 0x11b   :  { %v790_v46 = vadd.f32 %v1006_v43, %v750_v42 }
 0x135   :  { %v829_v47 = vpop.f32.mrb[8].mxu0 }
 0x136   :  { %v830_v48 = vadd.f32 %v829_v47, %v790_v46  ;;  %v1037_v49 = vpop.f32.mrb[9].mxu0 }
 0x137   :  { %v832_v50 = vpop.f32.mrb[10].mxu0 }
 0x138   :  { %835 = vst [vmem:[%s1384_s3] sm:$0xff] %v830_v48  ;;  %v1038_v51 = vpop.f32.mrb[11].mxu0 }

// kernel: sepconvgru2_forward.23
= control target key start
LH: loop header
LB: loop body
LE: loop exit
PB: predicated region body
PF: predicated region fallthrough
CT: control target
= control target key end

     0   :  { %s1248_s21 = smov 0   ;;  %s1391_s0 = inlined_call_operand.vmem [shape: f32[2,4,128], index: 0, kind: input, shape index: {}]   ;;  %s1392_s1 = inlined_call_operand.vmem [shape: f32[1,128], index: 1, kind: input, shape index: {}]   ;;  %s1393_s2 = inlined_call_operand.vmem [shape: f32[1,128], index: 2, kind: input, shape index: {}]   ;;  %s1394_s3 = inlined_call_operand.vmem [shape: f32[128,16], index: 3, kind: input, shape index: {}]   ;;  %s1395_s4 = inlined_call_operand.vmem [shape: f32[16,128], index: 4, kind: input, shape index: {}]   ;;  %s1396_s5 = inlined_call_operand.vmem [shape: f32[4,1,4], index: 5, kind: input, shape index: {}]   ;;  %s1397_s6 = inlined_call_operand.vmem [shape: bf16[2,1,128], index: 6, kind: output, shape index: {}]  }
   0x1 LB: > { %s960_s22 = sadd.s32 4294967295, %s1208_s21   ;;  %p964_p0 = scmp.ge.s32.totalorder %s1208_s21, 1  ;;  %s1208_s21 = sphi %s1248_s21, %s16_s21  }
   0x2   : > { %p211_p1 = scmp.lt.s32.totalorder %s1208_s21, 3 }
   0x4   : > { %p212_p2 = pnand %p964_p0, %p211_p1 }
   0x5   : > { %v246_v0 = vld [vmem:[%s1394_s3] sm:$0xff] (!%p212_p2)  ;;  %v247_v1 = vld [vmem:[%s1394_s3 + $0x8] sm:$0xff] (!%p212_p2)  ;;  %v248_v2 = vld [vmem:[%s1394_s3 + $0x10] sm:$0xff] (!%p212_p2)  ;;  %v1210_v3 = vmov (!%p212_p2), 0.0|0.0   ;;  %p238_p3 = scmp.lt.s32.totalorder (!%p212_p2), %s960_s22, 1  ;;  %vm1211_vm0 = vmmov (!%p212_p2), 0   ;;  %v574_v56 = vlaneseq (!%p212_p2) }
   0x6   : > { %215 = sbr.rel (%p212_p2) target bundleno = 717 (0x2cd), region = 44  ;;  %1135 = vmatprep.subr.bf16.mxu0 (!%p212_p2), %v1210_v3  ;;  %v1136_v4 = vpack.c.bf16 (!%p212_p2), %v247_v1, %v246_v0  ;;  %1159 = vmatprep.subr.bf16.mxu1 (!%p212_p2), %v1210_v3  ;;  %v249_v5 = vld [vmem:[%s1394_s3 + $0x18] sm:$0xff] (!%p212_p2)  ;;  %v1212_v6 = vmov (!%p212_p2), 0.0   ;;  %v250_v8 = vld [vmem:[%s1394_s3 + $0x20] sm:$0xff] (!%p212_p2)  ;;  %v251_v9 = vld [vmem:[%s1394_s3 + $0x28] sm:$0xff] (!%p212_p2)  ;;  %vm264_vm1 = vcmask (!%p212_p2), 1043456  }
   0x7   : > { %1063 = vmatprep.mubr.msk.f32.mxu0 (!%p212_p2), %vm1211_vm0, %v1212_v6  ;;  %1098 = vmatprep.mubr.msk.f32.mxu1 (!%p212_p2), %vm1211_vm0, %v1212_v6  ;;  %v1139_v7 = vpack.c.bf16 (!%p212_p2), %v249_v5, %v248_v2  ;;  %v1142_v10 = vpack.c.bf16 (!%p212_p2), %v251_v9, %v250_v8  ;;  %v252_v12 = vld [vmem:[%s1394_s3 + $0x30] sm:$0xff] (!%p212_p2)  ;;  %v253_v13 = vld [vmem:[%s1394_s3 + $0x38] sm:$0xff] (!%p212_p2)  ;;  %v254_v20 = vld [vmem:[%s1394_s3 + $0x40] sm:$0xff] (!%p212_p2)  ;;  %vm426_vm2 = vcmask (!%p212_p2), 130048   ;;  %v575_v60 = vshrl.u32 (!%p212_p2), %v574_v56, 7 }
   0x8   : > { %1137 = vmatpush3.bf16.msra.mxu0 (!%p212_p2), %v1136_v4  ;;  %1161 = vmatpush3.bf16.msra.mxu1 (!%p212_p2), %v1136_v4  ;;  %v1145_v18 = vpack.c.bf16 (!%p212_p2), %v253_v13, %v252_v12  ;;  %v255_v21 = vld [vmem:[%s1394_s3 + $0x48] sm:$0xff] (!%p212_p2)  ;;  %v256_v25 = vld [vmem:[%s1394_s3 + $0x50] sm:$0xff] (!%p212_p2)  ;;  %v257_v26 = vld [vmem:[%s1394_s3 + $0x58] sm:$0xff] (!%p212_p2)  ;;  %vm601_vm3 = vcmask (!%p212_p2), 31744   ;;  %vm907_vm4 = vcmask (!%p212_p2), 1040384  }
   0x9   : > { %1138 = vmatprep.subr.bf16.mxu0 (!%p212_p2), %v1210_v3  ;;  %1162 = vmatprep.subr.bf16.mxu1 (!%p212_p2), %v1210_v3  ;;  %v1148_v24 = vpack.c.bf16 (!%p212_p2), %v255_v21, %v254_v20  ;;  %v1151_v29 = vpack.c.bf16 (!%p212_p2), %v257_v26, %v256_v25  ;;  %v258_v30 = vld [vmem:[%s1394_s3 + $0x60] sm:$0xff] (!%p212_p2)  ;;  %v259_v31 = vld [vmem:[%s1394_s3 + $0x68] sm:$0xff] (!%p212_p2)  ;;  %v260_v35 = vld [vmem:[%s1394_s3 + $0x70] sm:$0xff] (!%p212_p2)  ;;  %v576_v61 = vsub.s32 (!%p212_p2), 0, %v575_v60  ;;  %vm908_vm5 = vsmask.f32 (!%p212_p2), 256 }
   0xa   : > { %v1154_v34 = vpack.c.bf16 (!%p212_p2), %v259_v31, %v258_v30  ;;  %v261_v36 = vld [vmem:[%s1394_s3 + $0x78] sm:$0xff] (!%p212_p2)  ;;  %v262_v42 = vld [vmem:[%s1395_s4] sm:$0xff] (!%p212_p2)  ;;  %v263_v43 = vld [vmem:[%s1395_s4 + $0x8] sm:$0xff] (!%p212_p2) }
   0xb   : > { %v1157_v39 = vpack.c.bf16 (!%p212_p2), %v261_v36, %v260_v35  ;;  %v1184_v44 = vpack.c.bf16 (!%p212_p2), %v263_v43, %v262_v42  ;;  %v968_v2 = vld [vmem:[%s1392_s1] ss:$0 sm:$0xff] (!%p212_p2)  ;;  %v972_v9 = vld [vmem:[%s1396_s5 + $0x1] sm:$0x1] (!%p212_p2)  ;;  %vm909_vm6 = vmand (!%p212_p2), %vm907_vm4, %vm908_vm5 }
   0xc   : > { %1140 = vmatpush3.bf16.msra.mxu0 (!%p212_p2), %v1139_v7  ;;  %1164 = vmatpush3.bf16.msra.mxu1 (!%p212_p2), %v1139_v7  ;;  %v969_v4 = vld [vmem:[%s1393_s2] ss:$0 sm:$0xff] (!%p212_p2) }
   0xd   : > { %s1399_s22 = smov (!%p238_p3, %s960_s22), 1  ;;  %1141 = vmatprep.subr.bf16.mxu0 %v1210_v3  ;;  %1165 = vmatprep.subr.bf16.mxu1 %v1210_v3  ;;  %v600_v8 = vld [vmem:[%s1396_s5] sm:$0x1] }
   0xe   : > { %s965_s11 = sshll.u32 %s1399_s22, 2  ;;  %s244_s9 = scalar_lea.vmem %s1397_s6, %s1399_s22 }
   0xf   : > { %s241_s14 = scalar_lea.vmem %s1391_s0, %s965_s11 }
  0x10   : > { %v1288_v11 = vld [vmem:[%s241_s14] sm:$0xf]  ;;  %1143 = vmatpush3.bf16.msra.mxu0 %v1142_v10  ;;  %1167 = vmatpush3.bf16.msra.mxu1 %v1142_v10 }
  0x11   : > { %v265_v14 = vsel %vm264_vm1, %v1288_v11, 0.0  ;;  %v272_v15 = vmul.f32 %v1288_v11, %v1288_v11  ;;  %1144 = vmatprep.subr.bf16.mxu0 %v1210_v3  ;;  %1168 = vmatprep.subr.bf16.mxu1 %v1210_v3  ;;  %v975_v10 = vld [vmem:[%s1396_s5 + $0x2] sm:$0x1] }
  0x12   : > { %v266_v16 = vrot.slane %v265_v14, 4 }
  0x13   : > { %v273_v17 = vsel %vm264_vm1, %v272_v15, 0.0 }
  0x14   : > { %v274_v19 = vrot.slane %v273_v17, 4  ;;  %v267_v22 = vadd.f32 %v266_v16, %v265_v14  ;;  %1146 = vmatpush3.bf16.msra.mxu0 %v1145_v18  ;;  %1170 = vmatpush3.bf16.msra.mxu1 %v1145_v18 }
  0x15   : > { %1147 = vmatprep.subr.bf16.mxu0 %v1210_v3  ;;  %1171 = vmatprep.subr.bf16.mxu1 %v1210_v3 }
  0x16   : > { %v275_v23 = vadd.f32 %v274_v19, %v273_v17  ;;  %v268_v27 = vrot.slane %v267_v22, 2 }
  0x18   : > { %v276_v28 = vrot.slane %v275_v23, 2  ;;  %1149 = vmatpush3.bf16.msra.mxu0 %v1148_v24  ;;  %1173 = vmatpush3.bf16.msra.mxu1 %v1148_v24  ;;  %v269_v32 = vadd.f32 %v268_v27, %v267_v22 }
  0x19   : > { %1150 = vmatprep.subr.bf16.mxu0 %v1210_v3  ;;  %1174 = vmatprep.subr.bf16.mxu1 %v1210_v3 }
  0x1a   : > { %v277_v33 = vadd.f32 %v276_v28, %v275_v23  ;;  %v270_v37 = vrot.slane %v269_v32, 1 }
  0x1c   : > { %1152 = vmatpush3.bf16.msra.mxu0 %v1151_v29  ;;  %1176 = vmatpush3.bf16.msra.mxu1 %v1151_v29  ;;  %v278_v38 = vrot.slane %v277_v33, 1  ;;  %v271_v40 = vadd.f32 %v270_v37, %v269_v32 }
  0x1d   : > { %1153 = vmatprep.subr.bf16.mxu0 %v1210_v3  ;;  %1177 = vmatprep.subr.bf16.mxu1 %v1210_v3 }
  0x1e   : > { %v279_v41 = vadd.f32 %v278_v38, %v277_v33 }
  0x20   : > { %1155 = vmatpush3.bf16.msra.mxu0 %v1154_v34  ;;  %1179 = vmatpush3.bf16.msra.mxu1 %v1154_v34 }
  0x21   : > { %1156 = vmatprep.subr.bf16.mxu0 %v1210_v3  ;;  %1180 = vmatprep.subr.bf16.mxu1 %v1210_v3 }
  0x24   : > { %1158 = vmatpush3.bf16.msra.mxu0 %v1157_v39  ;;  %1182 = vmatpush3.bf16.msra.mxu1 %v1157_v39 }
  0x25   : > { %1183 = vmatprep.subr.bf16.mxu0 %v1210_v3  ;;  %1186 = vmatprep.subr.bf16.mxu1 %v1210_v3 }
  0x27   : > { %1064 = vmatmul.mubr.f32.vlgmr.msra.gmra.mrb[0].mxu0 %v271_v40  ;;  %1099 = vmatmul.mubr.f32.vlgmr.msra.gmra.mrb[0].mxu1 %v279_v41 }
  0x28   : > { %1105 = vmatprep.mubr.msk.f32.mxu0 %vm1211_vm0, %v1212_v6  ;;  %1112 = vmatprep.mubr.msk.f32.mxu1 %vm1211_vm0, %v1212_v6 }
  0x29   : > { %1185 = vmatpush3.bf16.msra.mxu0 %v1184_v44  ;;  %1188 = vmatpush3.bf16.msra.mxu1 %v1184_v44 }
  0x2a   : > { %1115 = vmatprep.subr.mxu0 %v1212_v6  ;;  %1120 = vmatprep.subr.mxu1 %v1212_v6 }
  0xfa   : > { %v346_v45 = vpop.f32.mrb[0].mxu0  ;;  %v416_v46 = vpop.f32.mrb[0].mxu1 }
  0xfb   : > { %v421_v47 = vmul.f32 0.03125, %v346_v45  ;;  %v1065_v48 = vpop.f32.mrb[1].mxu0  ;;  %v422_v49 = vmul.f32 0.03125, %v416_v46  ;;  %v1100_v50 = vpop.f32.mrb[1].mxu1 }
  0xfd   : > { %v423_v51 = vmul.f32 %v421_v47, %v421_v47  ;;  %1106 = vmatmul.mubr.msk.f32.vlgmr.msra.gmra.mrb[2].mxu0 %vm426_vm2, %v421_v47 }
  0xfe   : > { %1117 = vmatprep.mubr.msk.f32.mxu0 %vm1211_vm0, %v1212_v6 }
  0xff   : > { %v424_v52 = vsub.f32 %v422_v49, %v423_v51 }
 0x101   : > { %v425_v53 = vmax.f32 %v424_v52, 0.0 }
 0x103   : > { %1113 = vmatmul.mubr.msk.f32.vlgmr.msra.gmra.mrb[2].mxu1 %vm426_vm2, %v425_v53 }
 0x104   : > { %1122 = vmatprep.mubr.msk.f32.mxu1 %vm1211_vm0, %v1212_v6 }
 0x1d0   : > { %v496_v54 = vpop.f32.mrb[2].mxu0 }
 0x1d1   : > { %v1107_v55 = vpop.f32.mrb[3].mxu0  ;;  %v577_v62 = vrot.slane %v496_v54, %v576_v61 }
 0x1d3   : > { %v578_v0 = vsub.f32 %v1288_v11, %v577_v62  ;;  %v978_v11 = vld [vmem:[%s1396_s5 + $0x3] sm:$0x1] }
 0x1d6   : > { %v569_v57 = vpop.f32.mrb[2].mxu1 }
 0x1d7   : > { %v570_v58 = vadd.f32 1e-05, %v569_v57  ;;  %v1114_v59 = vpop.f32.mrb[3].mxu1 }
 0x1d9   : > { %1200 = vrsqrt.f32 %v570_v58 }
 0x1e3   : > { %v1201_v63 = vpop.eup %1200 }
 0x1e4   : > { %v582_v1 = vrot.slane %v1201_v63, %v576_v61 }
 0x1e6   : > { %v583_v3 = vmul.f32 %v582_v1, %v578_v0 }
 0x1e8   : > { %v591_v5 = vmul.f32 %v968_v2, %v583_v3 }
 0x1ea   : > { %v599_v7 = vadd.f32 %v969_v4, %v591_v5 }
 0x1ec   : > { %1116 = vmatpush3.msk.msra.mxu0 %vm264_vm1, %v599_v7  ;;  %1121 = vmatpush3.msk.msra.mxu1 %vm264_vm1, %v599_v7 }
 0x1ed   : > { %1118 = vmatmul.mubr.msk.f32.vlgmr.msra.gmra.mrb[4].mxu0 %vm601_vm3, %v600_v8  ;;  %1123 = vmatmul.mubr.msk.f32.vlgmr.msra.gmra.mrb[4].mxu1 %vm601_vm3, %v972_v9 }
 0x1ee   : > { %1125 = vmatprep.subr.mxu0 %v1212_v6  ;;  %1130 = vmatprep.subr.mxu1 %v1212_v6 }
 0x1ef   : > { %1126 = vmatpush3.msk.msra.mxu0 %vm264_vm1, %v599_v7  ;;  %1131 = vmatpush3.msk.msra.mxu1 %vm264_vm1, %v599_v7 }
 0x1f0   : > { %1127 = vmatprep.mubr.msk.f32.mxu0 %vm1211_vm0, %v1212_v6  ;;  %1132 = vmatprep.mubr.msk.f32.mxu1 %vm1211_vm0, %v1212_v6  ;;  %v910_v6 = vld [vmem:[%s244_s9] sm:$0x1] }
 0x1f1   : > { %1128 = vmatmul.mubr.msk.f32.vlgmr.msra.gmra.mrb[6].mxu0 %vm601_vm3, %v975_v10  ;;  %1133 = vmatmul.mubr.msk.f32.vlgmr.msra.gmra.mrb[6].mxu1 %vm601_vm3, %v978_v11 }
 0x2c0   : > { %v674_v12 = vpop.f32.mrb[4].mxu0  ;;  %v749_v13 = vpop.f32.mrb[4].mxu1 }
 0x2c1   : > { %v903_v14 = vmax.f32 %v674_v12, %v749_v13  ;;  %v1119_v15 = vpop.f32.mrb[5].mxu0  ;;  %v1124_v16 = vpop.f32.mrb[5].mxu1 }
 0x2c4   : > { %v824_v17 = vpop.f32.mrb[6].mxu0  ;;  %v899_v18 = vpop.f32.mrb[6].mxu1 }
 0x2c5   : > { %v904_v19 = vmax.f32 %v824_v17, %v899_v18  ;;  %v1129_v20 = vpop.f32.mrb[7].mxu0  ;;  %v1134_v21 = vpop.f32.mrb[7].mxu1 }
 0x2c7   : > { %v905_v22 = vmax.f32 %v903_v14, %v904_v19 }
 0x2c9   : > { %v906_v23 = vpack.c.bf16 %v905_v22, %v905_v22 }
 0x2cb   : > { %v911_v24 = vsel %vm909_vm6, %v906_v23, %v910_v6 }
 0x2cc   : > { %912 = vst [vmem:[%s244_s9] sm:$0x1] %v911_v24 }
 0x2cd PF: > { %s16_s21 = sadd.s32 1, %s1208_s21  }
 0x2ce   : > { %p13_p4 = scmp.ge.s32.totalorder %s16_s21, 4  }
 0x2d0   :  { %15 = sbr.rel (!%p13_p4) target bundleno = 1 (0x1), region = 77 }

</bundles_post_ra>
